<compile_context>
chip_gen: v7x
topology: tpu7x:2x2x1
jax: 0.10.0
libtpu: 0.0.40
codegen_flags: <defaults>
</compile_context>

<pallas_src>
import functools

import jax
import jax.numpy as jnp
import numpy as np
from jax.experimental import pallas as pl
from jax.experimental.pallas import tpu as pltpu


# ----------------------------------------------------------------------------
# Fused DoubleConv kernel: (Conv3d 3x3x3 s1 p1 + folded BN + ReLU) x 2
# ----------------------------------------------------------------------------
def _double_conv_kernel(x_ref, w1_ref, b1_ref, w2_ref, b2_ref, o_ref,
                        acc1_ref, acc2_ref, mid_ref,
                        *, DT, H, W, Cin, Cmid, Cout):
    # x_ref  : (1, D+4, H+2, W*Cin)   bf16, zero-padded 2-deep in D, 1-deep in H
    # w1_ref : (3, 3*W*Cin, W*Cmid)   bf16 banded taps (kd major, kh folded on K)
    # b1_ref : (1, W*Cmid)            f32 folded conv bias + BN shift
    # w2_ref : (3, 3*W*Cmid, W*Cout)  bf16
    # b2_ref : (1, W*Cout)            f32
    # o_ref  : (1, 1, DT*H, W*Cout)
    # acc1   : ((DT+2)*H, W*Cmid) f32 ; acc2: (DT*H, W*Cout) f32
    # mid    : (DT+2, H, W*Cmid) bf16  conv1 output incl. 1-deep D halo
    t = pl.program_id(1)
    d0 = pl.multiple_of(t * DT, DT)
    WCi, WCm = W * Cin, W * Cmid

    # ---- conv1 + BN1 + ReLU over DT+2 depth slices (D halo for conv2) --------
    acc1_ref[...] = jnp.zeros_like(acc1_ref)
    for kd in range(3):
        slab = x_ref[0, pl.ds(d0 + kd, DT + 2)]               # (DT+2, H+2, W*Cin)
        patch = jnp.concatenate(                               # kh taps onto K
            [slab[:, 0:H], slab[:, 1:H + 1], slab[:, 2:H + 2]], axis=-1)
        acc1_ref[...] += jnp.dot(patch.reshape((DT + 2) * H, 3 * WCi),
                                 w1_ref[kd],
                                 preferred_element_type=jnp.float32)
    y1 = jnp.maximum(acc1_ref[...] + b1_ref[...], 0.0)        # bias + ReLU only
    mid_ref[...] = y1.reshape(DT + 2, H, WCm).astype(mid_ref.dtype)

    # conv2's zero D-padding at the volume boundaries.
    @pl.when(t == 0)
    def _():
        mid_ref[0] = jnp.zeros((H, WCm), mid_ref.dtype)

    @pl.when(t == pl.num_programs(1) - 1)
    def _():
        mid_ref[DT + 1] = jnp.zeros((H, WCm), mid_ref.dtype)

    # ---- conv2 + BN2 + ReLU on the VMEM-resident bf16 intermediate -----------
    acc2_ref[...] = jnp.zeros_like(acc2_ref)
    zrow = jnp.zeros((DT, 1, WCm), mid_ref.dtype)              # H zero padding
    for kd in range(3):
        slab = mid_ref[kd:kd + DT]                             # (DT, H, W*Cmid)
        up = jnp.concatenate([zrow, slab[:, :H - 1]], axis=1)     # kh = 0
        dn = jnp.concatenate([slab[:, 1:], zrow], axis=1)         # kh = 2
        patch = jnp.concatenate([up, slab, dn], axis=-1)
        acc2_ref[...] += jnp.dot(patch.reshape(DT * H, 3 * WCm),
                                 w2_ref[kd],
                                 preferred_element_type=jnp.float32)
    y2 = jnp.maximum(acc2_ref[...] + b2_ref[...], 0.0)
    o_ref[0, 0] = y2.astype(o_ref.dtype)


# ----------------------------------------------------------------------------
# Host-side weight prep
# ----------------------------------------------------------------------------
def _band_weights(w, W):
    """w: (3,3,3,Cin,Cout) -> (3, 3*W*Cin, W*Cout) banded taps.

    band[kd][(kh, wi, ci), (wo, co)] = w[kd, kh, wi-wo+1, ci, co] if |wi-wo|<=1
    else 0.  This realizes the kw taps, the W zero padding and the kh->K folding
    inside a single matmul per kd.
    TODO(synk): for large-C layers (3*Cin >= 128) the band's zero blocks waste
                MXU MACs (notably on v5e); fall back to narrower W sub-bands.
    """
    Cin, Cout = w.shape[3], w.shape[4]
    wi = jnp.arange(W)[:, None]
    wo = jnp.arange(W)[None, :]
    kw = wi - wo + 1
    valid = (kw >= 0) & (kw <= 2)
    kw_c = jnp.clip(kw, 0, 2)
    wg = w[:, :, kw_c, :, :]                                  # (3,3,W,W,Cin,Cout)
    wg = jnp.where(valid[None, None, :, :, None, None], wg, 0.0)
    wg = jnp.transpose(wg, (0, 1, 2, 4, 3, 5))                # (kd,kh,wi,ci,wo,co)
    return wg.reshape(3, 3 * W * Cin, W * Cout)


def _pick_d_tile(D, H):
    """Largest divisor of D with DT*H ~ 512 (cap 32) for good MXU M-fill.

    (~256 would suffice on v5e; 512 targets the 256-wide v6e/v7x MXUs.)
    TODO(synk): pad D for prime/awkward depths instead of falling back to DT=1.
    """
    target = max(1, 512 // max(H, 1))
    cap = max(1, min(target, 32, D))
    best = 1
    for dt in range(1, D + 1):
        if D % dt == 0 and dt <= cap:
            best = dt
    return best


def _vmem_limit_bytes(D, H, W, Cin, Cmid, Cout, DT, out_itemsize):
    blk_x = (D + 4) * (H + 2) * W * Cin * 2
    blk_w = 3 * (3 * W * Cin * W * Cmid + 3 * W * Cmid * W * Cout) * 2
    blk_b = (W * Cmid + W * Cout) * 4
    blk_o = DT * H * W * Cout * out_itemsize
    scratch = ((DT + 2) * H * W * Cmid * 4 + DT * H * W * Cout * 4
               + (DT + 2) * H * W * Cmid * 2)
    temps = (DT + 2) * H * 3 * W * Cin * 2 + DT * H * 3 * W * Cmid * 2
    need = 2 * (blk_x + blk_w + blk_b + blk_o) + scratch + temps
    # TODO(synk): on v7x (64 MiB VMEM/TC) large decoder levels need Buffered(1)
    #             on the resident-input spec or a manual (DT+4)-deep halo DMA
    #             (memory_space=pl.ANY) instead of the whole-depth block.
    return int(min(max(need + (4 << 20), 32 << 20), 96 << 20))


def double_conv(xp, w1, s1, b1, w2, s2, b2, *, D, H, W, out_dtype=jnp.float32):
    """Fused DoubleConv on a pre-padded, (W,C)-lane-merged bf16 input.

    xp: (N, D+4, H+2, W*Cin) bf16, zero-padded 2-deep in D and 1-deep in H.
    """
    N = xp.shape[0]
    Cin = xp.shape[-1] // W
    Cmid = w1.shape[-1]
    Cout = w2.shape[-1]
    DT = _pick_d_tile(D, H)
    T = D // DT

    # Fold BN scale into the bf16 weights (epilogue = bias + ReLU only).
    w1b = _band_weights(w1.astype(jnp.float32) * s1.astype(jnp.float32),
                        W).astype(jnp.bfloat16)
    w2b = _band_weights(w2.astype(jnp.float32) * s2.astype(jnp.float32),
                        W).astype(jnp.bfloat16)
    b1w = jnp.tile(b1.astype(jnp.float32), W).reshape(1, W * Cmid)
    b2w = jnp.tile(b2.astype(jnp.float32), W).reshape(1, W * Cout)

    kernel = functools.partial(_double_conv_kernel, DT=DT, H=H, W=W,
                               Cin=Cin, Cmid=Cmid, Cout=Cout)
    out = pl.pallas_call(
        kernel,
        out_shape=jax.ShapeDtypeStruct((N, T, DT * H, W * Cout), out_dtype),
        grid_spec=pltpu.PrefetchScalarGridSpec(
            num_scalar_prefetch=0,
            grid=(N, T),   # >= 2 programs so both v7x TensorCores stay busy
            in_specs=[
                pl.BlockSpec((1, D + 4, H + 2, W * Cin),
                             lambda n, t: (n, 0, 0, 0)),
                pl.BlockSpec((3, 3 * W * Cin, W * Cmid), lambda n, t: (0, 0, 0)),
                pl.BlockSpec((1, W * Cmid), lambda n, t: (0, 0)),
                pl.BlockSpec((3, 3 * W * Cmid, W * Cout), lambda n, t: (0, 0, 0)),
                pl.BlockSpec((1, W * Cout), lambda n, t: (0, 0)),
            ],
            out_specs=pl.BlockSpec((1, 1, DT * H, W * Cout),
                                   lambda n, t: (n, t, 0, 0)),
            scratch_shapes=[
                pltpu.VMEM(((DT + 2) * H, W * Cmid), jnp.float32),   # acc1
                pltpu.VMEM((DT * H, W * Cout), jnp.float32),         # acc2
                pltpu.VMEM((DT + 2, H, W * Cmid), jnp.bfloat16),     # conv1 out
            ],
        ),
        compiler_params=pltpu.CompilerParams(
            dimension_semantics=("parallel", "parallel"),
            vmem_limit_bytes=_vmem_limit_bytes(
                D, H, W, Cin, Cmid, Cout, DT, np.dtype(out_dtype).itemsize)),
    )(xp, w1b, b1w, w2b, b2w)

    return out.reshape(N, T, DT, H, W, Cout).reshape(N, D, H, W, Cout)


# ----------------------------------------------------------------------------
# Glue: trilinear x2 upsample (align_corners=True), pad, concat  (bf16 JAX)
# ----------------------------------------------------------------------------
def _interp_matrix(in_size, out_size):
    """(out_size, in_size) 1-D linear interpolation matrix, align_corners=True."""
    if in_size == 1:
        return jnp.ones((out_size, 1), jnp.float32)
    pos = jnp.arange(out_size, dtype=jnp.float32) * (in_size - 1) / (out_size - 1)
    lo = jnp.minimum(jnp.floor(pos).astype(jnp.int32), in_size - 2)
    frac = pos - lo.astype(jnp.float32)
    cols = jnp.arange(in_size)[None, :]
    return (jnp.where(cols == lo[:, None], 1.0 - frac[:, None], 0.0)
            + jnp.where(cols == lo[:, None] + 1, frac[:, None], 0.0))


def upsample_trilinear_x2(x):
    """x: (N,D,H,W,C) bf16 -> (N,2D,2H,2W,C) bf16; static-weight matmuls, no gathers."""
    N, D, H, W, C = x.shape
    md, mh, mw = _interp_matrix(D, 2 * D), _interp_matrix(H, 2 * H), _interp_matrix(W, 2 * W)
    x = jnp.einsum("ed,ndhwc->nehwc", md, x,
                   preferred_element_type=jnp.float32).astype(jnp.bfloat16)
    x = jnp.einsum("fh,ndhwc->ndfwc", mh, x,
                   preferred_element_type=jnp.float32).astype(jnp.bfloat16)
    x = jnp.einsum("gw,ndhwc->ndhgc", mw, x,
                   preferred_element_type=jnp.float32).astype(jnp.bfloat16)
    return x


def _merge_inputs_padded(x1_ncdhw, x2_ncdhw):
    """up(x1) -> pad to x2's size -> concat channels, with the conv halo folded in.

    Returns xp: (N, D+4, H+2, W*Ctot) bf16 (2-deep D halo, 1-deep H halo; the W
    halo is folded into the banded weights) and the spatial dims (D, H, W).
    """
    x1 = jnp.transpose(x1_ncdhw, (0, 2, 3, 4, 1)).astype(jnp.bfloat16)
    x2 = jnp.transpose(x2_ncdhw, (0, 2, 3, 4, 1)).astype(jnp.bfloat16)
    x1 = upsample_trilinear_x2(x1)

    # F.pad(x1, [dx//2, dx-dx//2, dy//2, dy-dy//2, dz//2, dz-dz//2])
    # TODO(synk): negative diffs (cropping) not handled; U-Net keeps diff >= 0.
    off = []
    for ax in (1, 2, 3):
        diff = x2.shape[ax] - x1.shape[ax]
        off.append((diff // 2, diff - diff // 2))

    # Fold the conv halo into the same pad (no separate full-tensor pad pass).
    x2p = jnp.pad(x2, ((0, 0), (2, 2), (1, 1), (0, 0), (0, 0)))
    x1p = jnp.pad(x1, ((0, 0),
                       (off[0][0] + 2, off[0][1] + 2),
                       (off[1][0] + 1, off[1][1] + 1),
                       off[2], (0, 0)))
    x = jnp.concatenate([x2p, x1p], axis=-1)      # torch.cat([x2, x1], dim=1)
    N, Dp, Hp, W, C = x.shape
    return x.reshape(N, Dp, Hp, W * C), (Dp - 4, Hp - 2, W)


# ----------------------------------------------------------------------------
# Parameters (PyTorch-equivalent init, eval-mode BN folded)
# ----------------------------------------------------------------------------
def init_up_params(key, in_channels, n_skip_channels, out_channels):
    # TODO(synk): training-mode BatchNorm (per-batch statistics) is not
    #             reproduced; eval-mode running stats are folded instead.
    c_in1 = in_channels + n_skip_channels
    k1, k2, k3, k4 = jax.random.split(key, 4)

    def conv_init(kw, kb, cin, cout):
        fan_in = cin * 27
        bound = 1.0 / jnp.sqrt(jnp.float32(fan_in))
        w = jax.random.uniform(kw, (3, 3, 3, cin, cout), jnp.float32, -bound, bound)
        b = jax.random.uniform(kb, (cout,), jnp.float32, -bound, bound)
        return w, b

    w1, b1 = conv_init(k1, k2, c_in1, out_channels)
    w2, b2 = conv_init(k3, k4, out_channels, out_channels)

    eps = 1e-5

    def fold_bn(conv_bias, cout):
        gamma = jnp.ones((cout,), jnp.float32)
        beta = jnp.zeros((cout,), jnp.float32)
        mean = jnp.zeros((cout,), jnp.float32)
        var = jnp.ones((cout,), jnp.float32)
        s = gamma / jnp.sqrt(var + eps)
        return s, (conv_bias - mean) * s + beta

    s1, bias1 = fold_bn(b1, out_channels)
    s2, bias2 = fold_bn(b2, out_channels)
    return dict(w1=w1, s1=s1, b1=bias1, w2=w2, s2=s2, b2=bias2)


def up_forward(x1_ncdhw, x2_ncdhw, params):
    """Up.forward(x1, x2) with bilinear(trilinear)=True; NCDHW in/out."""
    xp, (D, H, W) = _merge_inputs_padded(x1_ncdhw, x2_ncdhw)
    y = double_conv(xp, params["w1"], params["s1"], params["b1"],
                    params["w2"], params["s2"], params["b2"],
                    D=D, H=H, W=W, out_dtype=jnp.float32)
    return jnp.transpose(y, (0, 4, 1, 2, 3))


# ----------------------------------------------------------------------------
# Pure-JAX reference (same bf16-operand / f32-accumulate convention)
# ----------------------------------------------------------------------------
def _ref_conv_bn_relu(x, w, scale, bias):
    y = jax.lax.conv_general_dilated(
        x.astype(jnp.bfloat16), w.astype(jnp.bfloat16),
        window_strides=(1, 1, 1), padding=[(1, 1)] * 3,
        dimension_numbers=("NDHWC", "DHWIO", "NDHWC"),
        preferred_element_type=jnp.float32)
    return jnp.maximum(y * scale + bias, 0.0)


def _ref_up_forward(x1_ncdhw, x2_ncdhw, params):
    xp, (D, H, W) = _merge_inputs_padded(x1_ncdhw, x2_ncdhw)
    N = xp.shape[0]
    C = xp.shape[-1] // W
    x = xp.reshape(N, D + 4, H + 2, W, C)[:, 2:D + 2, 1:H + 1]
    y = _ref_conv_bn_relu(x, params["w1"], params["s1"], params["b1"])
    y = _ref_conv_bn_relu(y.astype(jnp.bfloat16),
                          params["w2"], params["s2"], params["b2"])
    return jnp.transpose(y, (0, 4, 1, 2, 3))


if __name__ == "__main__":
    key = jax.random.PRNGKey(0)
    k_x1, k_x2, k_p = jax.random.split(key, 3)

    # Up(in_channels=8, n_skip_channels=4, out_channels=8, bilinear=True)
    in_channels, n_skip_channels, out_channels = 8, 4, 8
    # x1: deep feature (NCDHW), x2: skip connection at 2x spatial resolution.
    x1 = jax.random.normal(k_x1, (2, in_channels, 8, 8, 8), jnp.float32)
    x2 = jax.random.normal(k_x2, (2, n_skip_channels, 16, 16, 16), jnp.float32)

    params = init_up_params(k_p, in_channels, n_skip_channels, out_channels)

    out = jax.block_until_ready(jax.jit(up_forward)(x1, x2, params))
    assert out.shape == (2, out_channels, 16, 16, 16), out.shape

    ref = jax.block_until_ready(jax.jit(_ref_up_forward)(x1, x2, params))
    max_err = float(jnp.max(jnp.abs(out - ref)))
    assert jnp.allclose(out, ref, atol=1e-2, rtol=1e-2), max_err

    print("KERNEL_OK")
</pallas_src>

<mosaic_0001>
module attributes {stable_mosaic.version = 11 : i64} {
  func.func @_double_conv_kernel(%arg0: i32, %arg1: i32, %arg2: memref<1x20x18x192xbf16, #tpu.memory_space<vmem>>, %arg3: memref<3x576x128xbf16, #tpu.memory_space<vmem>>, %arg4: memref<1x128xf32, #tpu.memory_space<vmem>>, %arg5: memref<3x384x128xbf16, #tpu.memory_space<vmem>>, %arg6: memref<1x128xf32, #tpu.memory_space<vmem>>, %arg7: memref<1x1x256x128xf32, #tpu.memory_space<vmem>>, %arg8: memref<288x128xf32, #tpu.memory_space<vmem>>, %arg9: memref<256x128xf32, #tpu.memory_space<vmem>>, %arg10: memref<18x16x128xbf16, #tpu.memory_space<vmem>>) attributes {dimension_semantics = [#tpu.dimension_semantics<parallel>, #tpu.dimension_semantics<parallel>], iteration_bounds = array<i64: 2, 1>, scalar_prefetch = 0 : i64, scratch_operands = 3 : i64, tpu.core_type = #tpu.core_type<tc>, window_params = [{transform_indices = @transform_0, window_bounds = array<i64: 1, 20, 18, 192>}, {pipeline_mode = #tpu.pipeline_mode<synchronous>, transform_indices = @transform_1, window_bounds = array<i64: 3, 576, 128>}, {pipeline_mode = #tpu.pipeline_mode<synchronous>, transform_indices = @transform_2, window_bounds = array<i64: 1, 128>}, {pipeline_mode = #tpu.pipeline_mode<synchronous>, transform_indices = @transform_3, window_bounds = array<i64: 3, 384, 128>}, {pipeline_mode = #tpu.pipeline_mode<synchronous>, transform_indices = @transform_4, window_bounds = array<i64: 1, 128>}, {transform_indices = @transform_5, window_bounds = array<i64: 1, 1, 256, 128>}]} {
    %c16_i32 = arith.constant 16 : i32
    %0 = arith.muli %arg1, %c16_i32 : i32
    %1 = tpu.assume_multiple %0, 16 : i32
    %cst = arith.constant 0.000000e+00 : f32
    %2 = vector.broadcast %cst : f32 to vector<288x128xf32>
    %c0 = arith.constant 0 : index
    %c0_0 = arith.constant 0 : index
    %3 = vector.load %arg8[%c0, %c0_0] : memref<288x128xf32, #tpu.memory_space<vmem>>, vector<288x128xf32>
    tpu.vector_store %arg8[%c0, %c0_0], %2 {strides = array<i32>} : memref<288x128xf32, #tpu.memory_space<vmem>>, vector<288x128xf32>,
    %c0_i32 = arith.constant 0 : i32
    %4 = arith.addi %1, %c0_i32 : i32
    %c0_1 = arith.constant 0 : index
    %5 = arith.index_cast %4 : i32 to index
    %c0_2 = arith.constant 0 : index
    %c0_3 = arith.constant 0 : index
    %6 = vector.load %arg2[%c0_1, %5, %c0_2, %c0_3] : memref<1x20x18x192xbf16, #tpu.memory_space<vmem>>, vector<1x18x18x192xbf16>
    %7 = vector.shape_cast %6 : vector<1x18x18x192xbf16> to vector<18x18x192xbf16>
    %8 = vector.extract_strided_slice %7 {offsets = [0, 0, 0], sizes = [18, 16, 192], strides = [1, 1, 1]} : vector<18x18x192xbf16> to vector<18x16x192xbf16>
    %9 = vector.extract_strided_slice %7 {offsets = [0, 1, 0], sizes = [18, 16, 192], strides = [1, 1, 1]} : vector<18x18x192xbf16> to vector<18x16x192xbf16>
    %10 = vector.extract_strided_slice %7 {offsets = [0, 2, 0], sizes = [18, 16, 192], strides = [1, 1, 1]} : vector<18x18x192xbf16> to vector<18x16x192xbf16>
    %11 = tpu.concatenate %8, %9, %10 in 2 : vector<18x16x192xbf16>, vector<18x16x192xbf16>, vector<18x16x192xbf16> -> vector<18x16x576xbf16>
    %c0_4 = arith.constant 0 : index
    %c0_5 = arith.constant 0 : index
    %12 = vector.load %arg8[%c0_4, %c0_5] : memref<288x128xf32, #tpu.memory_space<vmem>>, vector<288x128xf32>
    %13 = vector.shape_cast %11 : vector<18x16x576xbf16> to vector<288x576xbf16>
    %c0_6 = arith.constant 0 : index
    %c0_7 = arith.constant 0 : index
    %c0_8 = arith.constant 0 : index
    %14 = vector.load %arg3[%c0_6, %c0_7, %c0_8] : memref<3x576x128xbf16, #tpu.memory_space<vmem>>, vector<1x576x128xbf16>
    %15 = vector.shape_cast %14 : vector<1x576x128xbf16> to vector<576x128xbf16>
    %cst_9 = arith.constant dense<0.000000e+00> : vector<288x128xf32>
    %16 = tpu.matmul %13, %15, %cst_9 {dimension_numbers = #tpu.dot_dimension_numbers<[1], [0], [0], [1], [0, 0, 1, 1], [], []>} : vector<288x576xbf16>, vector<576x128xbf16>, vector<288x128xf32> -> vector<288x128xf32>
    %17 = arith.addf %12, %16 : vector<288x128xf32>
    %c0_10 = arith.constant 0 : index
    %c0_11 = arith.constant 0 : index
    %18 = vector.load %arg8[%c0_10, %c0_11] : memref<288x128xf32, #tpu.memory_space<vmem>>, vector<288x128xf32>
    tpu.vector_store %arg8[%c0_10, %c0_11], %17 {strides = array<i32>} : memref<288x128xf32, #tpu.memory_space<vmem>>, vector<288x128xf32>,
    %c1_i32 = arith.constant 1 : i32
    %19 = arith.addi %1, %c1_i32 : i32
    %c0_12 = arith.constant 0 : index
    %20 = arith.index_cast %19 : i32 to index
    %c0_13 = arith.constant 0 : index
    %c0_14 = arith.constant 0 : index
    %21 = vector.load %arg2[%c0_12, %20, %c0_13, %c0_14] : memref<1x20x18x192xbf16, #tpu.memory_space<vmem>>, vector<1x18x18x192xbf16>
    %22 = vector.shape_cast %21 : vector<1x18x18x192xbf16> to vector<18x18x192xbf16>
    %23 = vector.extract_strided_slice %22 {offsets = [0, 0, 0], sizes = [18, 16, 192], strides = [1, 1, 1]} : vector<18x18x192xbf16> to vector<18x16x192xbf16>
    %24 = vector.extract_strided_slice %22 {offsets = [0, 1, 0], sizes = [18, 16, 192], strides = [1, 1, 1]} : vector<18x18x192xbf16> to vector<18x16x192xbf16>
    %25 = vector.extract_strided_slice %22 {offsets = [0, 2, 0], sizes = [18, 16, 192], strides = [1, 1, 1]} : vector<18x18x192xbf16> to vector<18x16x192xbf16>
    %26 = tpu.concatenate %23, %24, %25 in 2 : vector<18x16x192xbf16>, vector<18x16x192xbf16>, vector<18x16x192xbf16> -> vector<18x16x576xbf16>
    %c0_15 = arith.constant 0 : index
    %c0_16 = arith.constant 0 : index
    %27 = vector.load %arg8[%c0_15, %c0_16] : memref<288x128xf32, #tpu.memory_space<vmem>>, vector<288x128xf32>
    %28 = vector.shape_cast %26 : vector<18x16x576xbf16> to vector<288x576xbf16>
    %c1 = arith.constant 1 : index
    %c0_17 = arith.constant 0 : index
    %c0_18 = arith.constant 0 : index
    %29 = vector.load %arg3[%c1, %c0_17, %c0_18] : memref<3x576x128xbf16, #tpu.memory_space<vmem>>, vector<1x576x128xbf16>
    %30 = vector.shape_cast %29 : vector<1x576x128xbf16> to vector<576x128xbf16>
    %cst_19 = arith.constant dense<0.000000e+00> : vector<288x128xf32>
    %31 = tpu.matmul %28, %30, %cst_19 {dimension_numbers = #tpu.dot_dimension_numbers<[1], [0], [0], [1], [0, 0, 1, 1], [], []>} : vector<288x576xbf16>, vector<576x128xbf16>, vector<288x128xf32> -> vector<288x128xf32>
    %32 = arith.addf %27, %31 : vector<288x128xf32>
    %c0_20 = arith.constant 0 : index
    %c0_21 = arith.constant 0 : index
    %33 = vector.load %arg8[%c0_20, %c0_21] : memref<288x128xf32, #tpu.memory_space<vmem>>, vector<288x128xf32>
    tpu.vector_store %arg8[%c0_20, %c0_21], %32 {strides = array<i32>} : memref<288x128xf32, #tpu.memory_space<vmem>>, vector<288x128xf32>,
    %c2_i32 = arith.constant 2 : i32
    %34 = arith.addi %1, %c2_i32 : i32
    %c0_22 = arith.constant 0 : index
    %35 = arith.index_cast %34 : i32 to index
    %c0_23 = arith.constant 0 : index
    %c0_24 = arith.constant 0 : index
    %36 = vector.load %arg2[%c0_22, %35, %c0_23, %c0_24] : memref<1x20x18x192xbf16, #tpu.memory_space<vmem>>, vector<1x18x18x192xbf16>
    %37 = vector.shape_cast %36 : vector<1x18x18x192xbf16> to vector<18x18x192xbf16>
    %38 = vector.extract_strided_slice %37 {offsets = [0, 0, 0], sizes = [18, 16, 192], strides = [1, 1, 1]} : vector<18x18x192xbf16> to vector<18x16x192xbf16>
    %39 = vector.extract_strided_slice %37 {offsets = [0, 1, 0], sizes = [18, 16, 192], strides = [1, 1, 1]} : vector<18x18x192xbf16> to vector<18x16x192xbf16>
    %40 = vector.extract_strided_slice %37 {offsets = [0, 2, 0], sizes = [18, 16, 192], strides = [1, 1, 1]} : vector<18x18x192xbf16> to vector<18x16x192xbf16>
    %41 = tpu.concatenate %38, %39, %40 in 2 : vector<18x16x192xbf16>, vector<18x16x192xbf16>, vector<18x16x192xbf16> -> vector<18x16x576xbf16>
    %c0_25 = arith.constant 0 : index
    %c0_26 = arith.constant 0 : index
    %42 = vector.load %arg8[%c0_25, %c0_26] : memref<288x128xf32, #tpu.memory_space<vmem>>, vector<288x128xf32>
    %43 = vector.shape_cast %41 : vector<18x16x576xbf16> to vector<288x576xbf16>
    %c2 = arith.constant 2 : index
    %c0_27 = arith.constant 0 : index
    %c0_28 = arith.constant 0 : index
    %44 = vector.load %arg3[%c2, %c0_27, %c0_28] : memref<3x576x128xbf16, #tpu.memory_space<vmem>>, vector<1x576x128xbf16>
    %45 = vector.shape_cast %44 : vector<1x576x128xbf16> to vector<576x128xbf16>
    %cst_29 = arith.constant dense<0.000000e+00> : vector<288x128xf32>
    %46 = tpu.matmul %43, %45, %cst_29 {dimension_numbers = #tpu.dot_dimension_numbers<[1], [0], [0], [1], [0, 0, 1, 1], [], []>} : vector<288x576xbf16>, vector<576x128xbf16>, vector<288x128xf32> -> vector<288x128xf32>
    %47 = arith.addf %42, %46 : vector<288x128xf32>
    %c0_30 = arith.constant 0 : index
    %c0_31 = arith.constant 0 : index
    %48 = vector.load %arg8[%c0_30, %c0_31] : memref<288x128xf32, #tpu.memory_space<vmem>>, vector<288x128xf32>
    tpu.vector_store %arg8[%c0_30, %c0_31], %47 {strides = array<i32>} : memref<288x128xf32, #tpu.memory_space<vmem>>, vector<288x128xf32>,
    %c0_32 = arith.constant 0 : index
    %c0_33 = arith.constant 0 : index
    %49 = vector.load %arg8[%c0_32, %c0_33] : memref<288x128xf32, #tpu.memory_space<vmem>>, vector<288x128xf32>
    %c0_34 = arith.constant 0 : index
    %c0_35 = arith.constant 0 : index
    %50 = vector.load %arg4[%c0_34, %c0_35] : memref<1x128xf32, #tpu.memory_space<vmem>>, vector<1x128xf32>
    %51 = vector.broadcast %50 : vector<1x128xf32> to vector<288x128xf32>
    %52 = arith.addf %49, %51 : vector<288x128xf32>
    %cst_36 = arith.constant 0.000000e+00 : f32
    %53 = vector.broadcast %cst_36 : f32 to vector<288x128xf32>
    %54 = arith.maximumf %52, %53 : vector<288x128xf32>
    %55 = vector.shape_cast %54 : vector<288x128xf32> to vector<18x16x128xf32>
    %56 = arith.truncf %55 : vector<18x16x128xf32> to vector<18x16x128xbf16>
    %c0_37 = arith.constant 0 : index
    %c0_38 = arith.constant 0 : index
    %c0_39 = arith.constant 0 : index
    %57 = vector.load %arg10[%c0_37, %c0_38, %c0_39] : memref<18x16x128xbf16, #tpu.memory_space<vmem>>, vector<18x16x128xbf16>
    tpu.vector_store %arg10[%c0_37, %c0_38, %c0_39], %56 {strides = array<i32>} : memref<18x16x128xbf16, #tpu.memory_space<vmem>>, vector<18x16x128xbf16>,
    %c0_i32_40 = arith.constant 0 : i32
    %58 = arith.cmpi eq, %arg1, %c0_i32_40 : i32
    %59 = arith.extui %58 : i1 to i32
    %c0_i32_41 = arith.constant 0 : i32
    %60 = arith.cmpi ne, %59, %c0_i32_41 : i32
    scf.if %60 {
      %cst_90 = arith.constant 0.000000e+00 : bf16
      %115 = vector.broadcast %cst_90 : bf16 to vector<16x128xbf16>
      %c0_91 = arith.constant 0 : index
      %c0_92 = arith.constant 0 : index
      %c0_93 = arith.constant 0 : index
      %116 = vector.load %arg10[%c0_91, %c0_92, %c0_93] : memref<18x16x128xbf16, #tpu.memory_space<vmem>>, vector<1x16x128xbf16>
      %117 = vector.shape_cast %116 : vector<1x16x128xbf16> to vector<16x128xbf16>
      %118 = vector.shape_cast %115 : vector<16x128xbf16> to vector<1x16x128xbf16>
      tpu.vector_store %arg10[%c0_91, %c0_92, %c0_93], %118 {strides = array<i32>} : memref<18x16x128xbf16, #tpu.memory_space<vmem>>, vector<1x16x128xbf16>,
    } else {
    }
    %c0_i32_42 = arith.constant 0 : i32
    %61 = arith.cmpi eq, %arg1, %c0_i32_42 : i32
    %62 = arith.extui %61 : i1 to i32
    %c0_i32_43 = arith.constant 0 : i32
    %63 = arith.cmpi ne, %62, %c0_i32_43 : i32
    scf.if %63 {
      %cst_90 = arith.constant 0.000000e+00 : bf16
      %115 = vector.broadcast %cst_90 : bf16 to vector<16x128xbf16>
      %c17 = arith.constant 17 : index
      %c0_91 = arith.constant 0 : index
      %c0_92 = arith.constant 0 : index
      %116 = vector.load %arg10[%c17, %c0_91, %c0_92] : memref<18x16x128xbf16, #tpu.memory_space<vmem>>, vector<1x16x128xbf16>
      %117 = vector.shape_cast %116 : vector<1x16x128xbf16> to vector<16x128xbf16>
      %118 = vector.shape_cast %115 : vector<16x128xbf16> to vector<1x16x128xbf16>
      tpu.vector_store %arg10[%c17, %c0_91, %c0_92], %118 {strides = array<i32>} : memref<18x16x128xbf16, #tpu.memory_space<vmem>>, vector<1x16x128xbf16>,
    } else {
    }
    %cst_44 = arith.constant 0.000000e+00 : f32
    %64 = vector.broadcast %cst_44 : f32 to vector<256x128xf32>
    %c0_45 = arith.constant 0 : index
    %c0_46 = arith.constant 0 : index
    %65 = vector.load %arg9[%c0_45, %c0_46] : memref<256x128xf32, #tpu.memory_space<vmem>>, vector<256x128xf32>
    tpu.vector_store %arg9[%c0_45, %c0_46], %64 {strides = array<i32>} : memref<256x128xf32, #tpu.memory_space<vmem>>, vector<256x128xf32>,
    %cst_47 = arith.constant 0.000000e+00 : bf16
    %66 = vector.broadcast %cst_47 : bf16 to vector<16x1x128xbf16>
    %c0_48 = arith.constant 0 : index
    %c0_49 = arith.constant 0 : index
    %c0_50 = arith.constant 0 : index
    %67 = vector.load %arg10[%c0_48, %c0_49, %c0_50] : memref<18x16x128xbf16, #tpu.memory_space<vmem>>, vector<16x16x128xbf16>
    %68 = vector.extract_strided_slice %67 {offsets = [0, 0, 0], sizes = [16, 15, 128], strides = [1, 1, 1]} : vector<16x16x128xbf16> to vector<16x15x128xbf16>
    %69 = tpu.concatenate %66, %68 in 1 : vector<16x1x128xbf16>, vector<16x15x128xbf16> -> vector<16x16x128xbf16>
    %70 = vector.extract_strided_slice %67 {offsets = [0, 1, 0], sizes = [16, 15, 128], strides = [1, 1, 1]} : vector<16x16x128xbf16> to vector<16x15x128xbf16>
    %71 = tpu.concatenate %70, %66 in 1 : vector<16x15x128xbf16>, vector<16x1x128xbf16> -> vector<16x16x128xbf16>
    %72 = tpu.concatenate %69, %67, %71 in 2 : vector<16x16x128xbf16>, vector<16x16x128xbf16>, vector<16x16x128xbf16> -> vector<16x16x384xbf16>
    %c0_51 = arith.constant 0 : index
    %c0_52 = arith.constant 0 : index
    %73 = vector.load %arg9[%c0_51, %c0_52] : memref<256x128xf32, #tpu.memory_space<vmem>>, vector<256x128xf32>
    %74 = vector.shape_cast %72 : vector<16x16x384xbf16> to vector<256x384xbf16>
    %c0_53 = arith.constant 0 : index
    %c0_54 = arith.constant 0 : index
    %c0_55 = arith.constant 0 : index
    %75 = vector.load %arg5[%c0_53, %c0_54, %c0_55] : memref<3x384x128xbf16, #tpu.memory_space<vmem>>, vector<1x384x128xbf16>
    %76 = vector.shape_cast %75 : vector<1x384x128xbf16> to vector<384x128xbf16>
    %cst_56 = arith.constant dense<0.000000e+00> : vector<256x128xf32>
    %77 = tpu.matmul %74, %76, %cst_56 {dimension_numbers = #tpu.dot_dimension_numbers<[1], [0], [0], [1], [0, 0, 1, 1], [], []>} : vector<256x384xbf16>, vector<384x128xbf16>, vector<256x128xf32> -> vector<256x128xf32>
    %78 = arith.addf %73, %77 : vector<256x128xf32>
    %c0_57 = arith.constant 0 : index
    %c0_58 = arith.constant 0 : index
    %79 = vector.load %arg9[%c0_57, %c0_58] : memref<256x128xf32, #tpu.memory_space<vmem>>, vector<256x128xf32>
    tpu.vector_store %arg9[%c0_57, %c0_58], %78 {strides = array<i32>} : memref<256x128xf32, #tpu.memory_space<vmem>>, vector<256x128xf32>,
    %c1_59 = arith.constant 1 : index
    %c0_60 = arith.constant 0 : index
    %c0_61 = arith.constant 0 : index
    %80 = vector.load %arg10[%c1_59, %c0_60, %c0_61] : memref<18x16x128xbf16, #tpu.memory_space<vmem>>, vector<16x16x128xbf16>
    %81 = vector.extract_strided_slice %80 {offsets = [0, 0, 0], sizes = [16, 15, 128], strides = [1, 1, 1]} : vector<16x16x128xbf16> to vector<16x15x128xbf16>
    %82 = tpu.concatenate %66, %81 in 1 : vector<16x1x128xbf16>, vector<16x15x128xbf16> -> vector<16x16x128xbf16>
    %83 = vector.extract_strided_slice %80 {offsets = [0, 1, 0], sizes = [16, 15, 128], strides = [1, 1, 1]} : vector<16x16x128xbf16> to vector<16x15x128xbf16>
    %84 = tpu.concatenate %83, %66 in 1 : vector<16x15x128xbf16>, vector<16x1x128xbf16> -> vector<16x16x128xbf16>
    %85 = tpu.concatenate %82, %80, %84 in 2 : vector<16x16x128xbf16>, vector<16x16x128xbf16>, vector<16x16x128xbf16> -> vector<16x16x384xbf16>
    %c0_62 = arith.constant 0 : index
    %c0_63 = arith.constant 0 : index
    %86 = vector.load %arg9[%c0_62, %c0_63] : memref<256x128xf32, #tpu.memory_space<vmem>>, vector<256x128xf32>
    %87 = vector.shape_cast %85 : vector<16x16x384xbf16> to vector<256x384xbf16>
    %c1_64 = arith.constant 1 : index
    %c0_65 = arith.constant 0 : index
    %c0_66 = arith.constant 0 : index
    %88 = vector.load %arg5[%c1_64, %c0_65, %c0_66] : memref<3x384x128xbf16, #tpu.memory_space<vmem>>, vector<1x384x128xbf16>
    %89 = vector.shape_cast %88 : vector<1x384x128xbf16> to vector<384x128xbf16>
    %cst_67 = arith.constant dense<0.000000e+00> : vector<256x128xf32>
    %90 = tpu.matmul %87, %89, %cst_67 {dimension_numbers = #tpu.dot_dimension_numbers<[1], [0], [0], [1], [0, 0, 1, 1], [], []>} : vector<256x384xbf16>, vector<384x128xbf16>, vector<256x128xf32> -> vector<256x128xf32>
    %91 = arith.addf %86, %90 : vector<256x128xf32>
    %c0_68 = arith.constant 0 : index
    %c0_69 = arith.constant 0 : index
    %92 = vector.load %arg9[%c0_68, %c0_69] : memref<256x128xf32, #tpu.memory_space<vmem>>, vector<256x128xf32>
    tpu.vector_store %arg9[%c0_68, %c0_69], %91 {strides = array<i32>} : memref<256x128xf32, #tpu.memory_space<vmem>>, vector<256x128xf32>,
    %c2_70 = arith.constant 2 : index
    %c0_71 = arith.constant 0 : index
    %c0_72 = arith.constant 0 : index
    %93 = vector.load %arg10[%c2_70, %c0_71, %c0_72] : memref<18x16x128xbf16, #tpu.memory_space<vmem>>, vector<16x16x128xbf16>
    %94 = vector.extract_strided_slice %93 {offsets = [0, 0, 0], sizes = [16, 15, 128], strides = [1, 1, 1]} : vector<16x16x128xbf16> to vector<16x15x128xbf16>
    %95 = tpu.concatenate %66, %94 in 1 : vector<16x1x128xbf16>, vector<16x15x128xbf16> -> vector<16x16x128xbf16>
    %96 = vector.extract_strided_slice %93 {offsets = [0, 1, 0], sizes = [16, 15, 128], strides = [1, 1, 1]} : vector<16x16x128xbf16> to vector<16x15x128xbf16>
    %97 = tpu.concatenate %96, %66 in 1 : vector<16x15x128xbf16>, vector<16x1x128xbf16> -> vector<16x16x128xbf16>
    %98 = tpu.concatenate %95, %93, %97 in 2 : vector<16x16x128xbf16>, vector<16x16x128xbf16>, vector<16x16x128xbf16> -> vector<16x16x384xbf16>
    %c0_73 = arith.constant 0 : index
    %c0_74 = arith.constant 0 : index
    %99 = vector.load %arg9[%c0_73, %c0_74] : memref<256x128xf32, #tpu.memory_space<vmem>>, vector<256x128xf32>
    %100 = vector.shape_cast %98 : vector<16x16x384xbf16> to vector<256x384xbf16>
    %c2_75 = arith.constant 2 : index
    %c0_76 = arith.constant 0 : index
    %c0_77 = arith.constant 0 : index
    %101 = vector.load %arg5[%c2_75, %c0_76, %c0_77] : memref<3x384x128xbf16, #tpu.memory_space<vmem>>, vector<1x384x128xbf16>
    %102 = vector.shape_cast %101 : vector<1x384x128xbf16> to vector<384x128xbf16>
    %cst_78 = arith.constant dense<0.000000e+00> : vector<256x128xf32>
    %103 = tpu.matmul %100, %102, %cst_78 {dimension_numbers = #tpu.dot_dimension_numbers<[1], [0], [0], [1], [0, 0, 1, 1], [], []>} : vector<256x384xbf16>, vector<384x128xbf16>, vector<256x128xf32> -> vector<256x128xf32>
    %104 = arith.addf %99, %103 : vector<256x128xf32>
    %c0_79 = arith.constant 0 : index
    %c0_80 = arith.constant 0 : index
    %105 = vector.load %arg9[%c0_79, %c0_80] : memref<256x128xf32, #tpu.memory_space<vmem>>, vector<256x128xf32>
    tpu.vector_store %arg9[%c0_79, %c0_80], %104 {strides = array<i32>} : memref<256x128xf32, #tpu.memory_space<vmem>>, vector<256x128xf32>,
    %c0_81 = arith.constant 0 : index
    %c0_82 = arith.constant 0 : index
    %106 = vector.load %arg9[%c0_81, %c0_82] : memref<256x128xf32, #tpu.memory_space<vmem>>, vector<256x128xf32>
    %c0_83 = arith.constant 0 : index
    %c0_84 = arith.constant 0 : index
    %107 = vector.load %arg6[%c0_83, %c0_84] : memref<1x128xf32, #tpu.memory_space<vmem>>, vector<1x128xf32>
    %108 = vector.broadcast %107 : vector<1x128xf32> to vector<256x128xf32>
    %109 = arith.addf %106, %108 : vector<256x128xf32>
    %cst_85 = arith.constant 0.000000e+00 : f32
    %110 = vector.broadcast %cst_85 : f32 to vector<256x128xf32>
    %111 = arith.maximumf %109, %110 : vector<256x128xf32>
    %c0_86 = arith.constant 0 : index
    %c0_87 = arith.constant 0 : index
    %c0_88 = arith.constant 0 : index
    %c0_89 = arith.constant 0 : index
    %112 = vector.load %arg7[%c0_86, %c0_87, %c0_88, %c0_89] : memref<1x1x256x128xf32, #tpu.memory_space<vmem>>, vector<1x1x256x128xf32>
    %113 = vector.shape_cast %112 : vector<1x1x256x128xf32> to vector<256x128xf32>
    %114 = vector.shape_cast %111 : vector<256x128xf32> to vector<1x1x256x128xf32>
    tpu.vector_store %arg7[%c0_86, %c0_87, %c0_88, %c0_89], %114 {strides = array<i32>} : memref<1x1x256x128xf32, #tpu.memory_space<vmem>>, vector<1x1x256x128xf32>,
    return
  }
  func.func @transform_0(%arg0: i32, %arg1: i32) -> (i32, i32, i32, i32) {
    %c0_i32 = arith.constant 0 : i32
    %c0_i32_0 = arith.constant 0 : i32
    %c0_i32_1 = arith.constant 0 : i32
    %c0_i32_2 = arith.constant 0 : i32
    return %arg0, %c0_i32, %c0_i32_0, %c0_i32_1 : i32, i32, i32, i32
  }
  func.func @transform_1(%arg0: i32, %arg1: i32) -> (i32, i32, i32) {
    %c0_i32 = arith.constant 0 : i32
    %c0_i32_0 = arith.constant 0 : i32
    %c0_i32_1 = arith.constant 0 : i32
    %c0_i32_2 = arith.constant 0 : i32
    return %c0_i32, %c0_i32_0, %c0_i32_1 : i32, i32, i32
  }
  func.func @transform_2(%arg0: i32, %arg1: i32) -> (i32, i32) {
    %c0_i32 = arith.constant 0 : i32
    %c0_i32_0 = arith.constant 0 : i32
    %c0_i32_1 = arith.constant 0 : i32
    return %c0_i32, %c0_i32_0 : i32, i32
  }
  func.func @transform_3(%arg0: i32, %arg1: i32) -> (i32, i32, i32) {
    %c0_i32 = arith.constant 0 : i32
    %c0_i32_0 = arith.constant 0 : i32
    %c0_i32_1 = arith.constant 0 : i32
    %c0_i32_2 = arith.constant 0 : i32
    return %c0_i32, %c0_i32_0, %c0_i32_1 : i32, i32, i32
  }
  func.func @transform_4(%arg0: i32, %arg1: i32) -> (i32, i32) {
    %c0_i32 = arith.constant 0 : i32
    %c0_i32_0 = arith.constant 0 : i32
    %c0_i32_1 = arith.constant 0 : i32
    return %c0_i32, %c0_i32_0 : i32, i32
  }
  func.func @transform_5(%arg0: i32, %arg1: i32) -> (i32, i32, i32, i32) {
    %c0_i32 = arith.constant 0 : i32
    %c0_i32_0 = arith.constant 0 : i32
    %c0_i32_1 = arith.constant 0 : i32
    return %arg0, %arg1, %c0_i32, %c0_i32_0 : i32, i32, i32, i32
  }
}

</mosaic_0001>

<bundles_post_ra>
// kernel: tile.14
= control target key start
LH: loop header
LB: loop body
LE: loop exit
PB: predicated region body
PF: predicated region fallthrough
CT: control target
= control target key end

     0   :  { %s131_s10 = smov 120   ;;  %s132_s11 = smov 104   ;;  %vm3_vm0 = vcmask 64512   ;;  %vm9_vm1 = vcmask 1048512   ;;  %vm15_vm2 = vcmask 982912   ;;  %vm21_vm3 = vcmask 917312   ;;  %s207_s0 = inlined_call_operand.vmem [shape: f32[16,8], index: 0, kind: input, shape index: {}]   ;;  %s208_s1 = inlined_call_operand.vmem [shape: f32[1,128], index: 1, kind: output, shape index: {}]  }
   0x1   :  { %v101_v0 = vld [vmem:[%s207_s0 + $0xf] sm:$0x1]   ;;  %v103_v1 = vld [vmem:[%s207_s0 + $0xd] sm:$0x1]   ;;  %v102_v2 = vld [vmem:[%s207_s0 + $0xe] sm:$0x1]  }
   0x2   :  { %7 = vrot.lane.b32.xlu0 %v101_v0, %s131_s10  ;;  %19 = vrot.lane.b32.xlu1 %v103_v1, %s132_s11  ;;  %v104_v3 = vld [vmem:[%s207_s0 + $0xc] sm:$0x1]   ;;  %s133_s16 = smov 112   ;;  %s134_s17 = smov 96   ;;  %v105_v4 = vld [vmem:[%s207_s0 + $0xb] sm:$0x1]  }
   0x3   :  { %v106_v5 = vld [vmem:[%s207_s0 + $0xa] sm:$0x1]   ;;  %v2_v6 = vld [vmem:[%s207_s0] sm:$0x1]   ;;  %s135_s24 = smov 88   ;;  %s136_s25 = smov 80  }
   0x4   :  { %4 = vst.msk [vmem:[#allocation0] sm:$0x1] %vm3_vm0, %v2_v6   ;;  %v107_v7 = vld [vmem:[%s207_s0 + $0x9] sm:$0x1]   ;;  %v108_v8 = vld [vmem:[%s207_s0 + $0x8] sm:$0x1]  }
   0x5   :  { %s137_s30 = smov 72   ;;  %s138_s2 = smov 64   ;;  %v109_v9 = vld [vmem:[%s207_s0 + $0x7] sm:$0x1]   ;;  %v110_v10 = vld [vmem:[%s207_s0 + $0x6] sm:$0x1]  }
   0x6   :  { %13 = vrot.lane.b32.xlu0 %v102_v2, %s133_s16  ;;  %25 = vrot.lane.b32.xlu1 %v104_v3, %s134_s17  ;;  %s139_s7 = smov 56   ;;  %s140_s8 = smov 48   ;;  %v111_v11 = vld [vmem:[%s207_s0 + $0x5] sm:$0x1]   ;;  %v112_v12 = vld [vmem:[%s207_s0 + $0x4] sm:$0x1]  }
   0x7   :  { %s141_s13 = smov 40   ;;  %s142_s14 = smov 32   ;;  %v113_v13 = vld [vmem:[%s207_s0 + $0x3] sm:$0x1]   ;;  %v114_v14 = vld [vmem:[%s207_s0 + $0x2] sm:$0x1]  }
   0x8   :  { %s143_s19 = smov 24   ;;  %s144_s20 = smov 16   ;;  %v115_v15 = vld [vmem:[%s207_s0 + $0x1] sm:$0x1]   ;;  %vm27_vm4 = vcmask 851712   ;;  %vm33_vm5 = vcmask 786112  }
   0x9   :  { %s145_s0 = smov 8   ;;  %vm39_vm6 = vcmask 720512   ;;  %vm45_vm7 = vcmask 654912   ;;  %vm51_vm8 = vcmask 589312   ;;  %vm57_vm9 = vcmask 523712  }
   0xa   :  { %31 = vrot.lane.b32.xlu0 %v105_v4, %s135_s24  ;;  %37 = vrot.lane.b32.xlu1 %v106_v5, %s136_s25  ;;  %vm63_vm10 = vcmask 458112   ;;  %vm69_vm11 = vcmask 392512   ;;  %vm75_vm12 = vcmask 326912   ;;  %vm81_vm13 = vcmask 261312  }
   0xb   :  { %vm87_vm14 = vcmask 195712   ;;  %vm93_vm15 = vcmask 130112  }
   0xe   :  { %43 = vrot.lane.b32.xlu0 %v107_v7, %s137_s30  ;;  %49 = vrot.lane.b32.xlu1 %v108_v8, %s138_s2 }
  0x12   :  { %55 = vrot.lane.b32.xlu0 %v109_v9, %s139_s7  ;;  %61 = vrot.lane.b32.xlu1 %v110_v10, %s140_s8 }
  0x16   :  { %67 = vrot.lane.b32.xlu0 %v111_v11, %s141_s13  ;;  %73 = vrot.lane.b32.xlu1 %v112_v12, %s142_s14 }
  0x1a   :  { %79 = vrot.lane.b32.xlu0 %v113_v13, %s143_s19  ;;  %85 = vrot.lane.b32.xlu1 %v114_v14, %s144_s20 }
  0x1e   :  { %91 = vrot.lane.b32.xlu0 %v115_v15, %s145_s0 }
  0x74   :  { %v8_v16 = vpop.permute.xlu0 %7   ;;  %v20_v17 = vpop.permute.xlu1 %19  }
  0x75   :  { %10 = vst.msk [vmem:[#allocation0] sm:$0x1] %vm9_vm1, %v8_v16  }
  0x78   :  { %v14_v18 = vpop.permute.xlu0 %13   ;;  %v26_v19 = vpop.permute.xlu1 %25  }
  0x79   :  { %16 = vst.msk [vmem:[#allocation0] sm:$0x1] %vm15_vm2, %v14_v18  }
  0x7a   :  { %22 = vst.msk [vmem:[#allocation0] sm:$0x1] %vm21_vm3, %v20_v17  }
  0x7b   :  { %28 = vst.msk [vmem:[#allocation0] sm:$0x1] %vm27_vm4, %v26_v19  }
  0x7c   :  { %v32_v20 = vpop.permute.xlu0 %31   ;;  %v38_v21 = vpop.permute.xlu1 %37  }
  0x7d   :  { %34 = vst.msk [vmem:[#allocation0] sm:$0x1] %vm33_vm5, %v32_v20  }
  0x7e   :  { %40 = vst.msk [vmem:[#allocation0] sm:$0x1] %vm39_vm6, %v38_v21  }
  0x80   :  { %v44_v22 = vpop.permute.xlu0 %43   ;;  %v50_v23 = vpop.permute.xlu1 %49  }
  0x81   :  { %46 = vst.msk [vmem:[#allocation0] sm:$0x1] %vm45_vm7, %v44_v22  }
  0x82   :  { %52 = vst.msk [vmem:[#allocation0] sm:$0x1] %vm51_vm8, %v50_v23  }
  0x84   :  { %v56_v24 = vpop.permute.xlu0 %55   ;;  %v62_v25 = vpop.permute.xlu1 %61  }
  0x85   :  { %58 = vst.msk [vmem:[#allocation0] sm:$0x1] %vm57_vm9, %v56_v24  }
  0x86   :  { %64 = vst.msk [vmem:[#allocation0] sm:$0x1] %vm63_vm10, %v62_v25  }
  0x88   :  { %v68_v26 = vpop.permute.xlu0 %67   ;;  %v74_v27 = vpop.permute.xlu1 %73  }
  0x89   :  { %70 = vst.msk [vmem:[#allocation0] sm:$0x1] %vm69_vm11, %v68_v26  }
  0x8a   :  { %76 = vst.msk [vmem:[#allocation0] sm:$0x1] %vm75_vm12, %v74_v27  }
  0x8c   :  { %v80_v28 = vpop.permute.xlu0 %79   ;;  %v86_v29 = vpop.permute.xlu1 %85  }
  0x8d   :  { %82 = vst.msk [vmem:[#allocation0] sm:$0x1] %vm81_vm13, %v80_v28  }
  0x8e   :  { %88 = vst.msk [vmem:[#allocation0] sm:$0x1] %vm87_vm14, %v86_v29  }
  0x90   :  { %v92_v30 = vpop.permute.xlu0 %91  }
  0x91   :  { %94 = vst.msk [vmem:[#allocation0] sm:$0x1] %vm93_vm15, %v92_v30  }
  0x98   :  { %v98_v31 = vld [vmem:[#allocation0] sm:$0x1] }
  0x99   :  { %100 = vst [vmem:[%s208_s1] sm:$0x1] %v98_v31 }

// kernel: tile.13
= control target key start
LH: loop header
LB: loop body
LE: loop exit
PB: predicated region body
PF: predicated region fallthrough
CT: control target
= control target key end

     0   :  { %2 = vsyncpa [#allocation1], 0  ;;  %s47_s6 = smov [#allocation0]   ;;  %s76_s0 = inlined_call_operand.hbm [shape: f32[8], index: 0, kind: input, shape index: {}]   ;;  %s77_s1 = inlined_call_operand.vmem [shape: f32[16,8], index: 1, kind: output, shape index: {}]  }
   0x1   :  { %s9_s7 = sshll.u32 %s47_s6, 4  ;;  %s23_s10 = scalar_lea.hbm %s76_s0, 16  ;;  %s10_s7 = int_to_ptr.vmem [resolvable:$true] %s9_s7 }
   0x2   :  { %p24_p0 = scmp.ne.s32.totalorder %s76_s0, %s23_s10  ;;  %p27_p1 = scmp.lt.u32.totalorder %s23_s10, %s76_s0 }
   0x4   :  { %p29_p2 = pnand %p27_p1, %p24_p0 }
   0x6   :  { %32 = shalt.err (!%p29_p2)
}
   0x7   :  { %s33_s15 = scalar_lea.vmem %s10_s7, 16  ;;  %s37_s16 = scalar_lea.vmem %s10_s7, 32 }
   0x8   :  { %p34_p3 = scmp.ne.s32.totalorder %s10_s7, %s33_s15  ;;  %p38_p4 = scmp.lt.s32.totalorder %s10_s7, %s10_s7 }
   0x9   :  { %p39_p5 = scmp.lt.s32.totalorder %s37_s16, %s33_s15 }
   0xb   :  { %p40_p6 = por %p39_p5, %p38_p4 }
   0xd   :  { %p41_p7 = pnand %p40_p6, %p34_p3 }
   0xf   :  { %44 = shalt.err (!%p41_p7)
}
  0x10   :  { %12 = dma.hbm_to_vmem [thread:$0]  %s76_s0, 16, %s10_s7, [#allocation1]  }
  0x11   :  { %45 = dma.done.wait [#allocation1], 16  }
  0x12   :  { %46 = vsyncadd [#allocation1], 4294967280  ;;  %v16_v0 = vld [vmem:[#allocation0] ss:$0 sm:$0xff] }
  0x13   :  { %17 = vst [vmem:[%s77_s1] sm:$0xff] %v16_v0  ;;  %21 = vst [vmem:[%s77_s1 + $0x8] sm:$0xff] %v16_v0 }
  0x14   :  { %20 = vsyncpa [#allocation1], 1 }

// kernel: up_forward.1
= control target key start
LH: loop header
LB: loop body
LE: loop exit
PB: predicated region body
PF: predicated region fallthrough
CT: control target
= control target key end

     0   :  { %s11735_s18 = smov 0   ;;  %s11737_s19 = smov 0   ;;  %s15918_s0 = inlined_call_operand.vmem [shape: bf16[2,20,18,192], index: 0, kind: input, shape index: {}]   ;;  %s15919_s1 = inlined_call_operand.vmem [shape: bf16[3,576,128], index: 1, kind: input, shape index: {}]   ;;  %s15920_s2 = inlined_call_operand.vmem [shape: f32[1,128], index: 2, kind: input, shape index: {}]   ;;  %s15921_s3 = inlined_call_operand.vmem [shape: bf16[3,384,128], index: 3, kind: input, shape index: {}]   ;;  %s15922_s4 = inlined_call_operand.vmem [shape: f32[1,128], index: 4, kind: input, shape index: {}]   ;;  %s15923_s5 = inlined_call_operand.vmem [shape: f32[2,1,256,128], index: 5, kind: output, shape index: {}]  }
   0x1   :  { %s11739_s20 = smov 0  }
   0x2 LB: > { %s27_s21 = sadd.s32 1, %s11697_s19  ;;  %p9256_p0 = scmp.ge.s32.totalorder %s11701_s20, 1  ;;  %s11701_s20 = sphi %s11739_s20, %s15_s20   ;;  %s11697_s19 = sphi %s11737_s19, %s16752_s19   ;;  %s11693_s18 = sphi %s11735_s18, %s16751_s18  }
   0x3   : > { %p29_p1 = scmp.ge.s32.totalorder %s27_s21, 2  ;;  %p201_p2 = scmp.lt.s32.totalorder %s11701_s20, 3 }
   0x5   : > { %s16754_s21 = smov (%p29_p1, %s27_s21), 0  ;;  %p202_p3 = pnand %p9256_p0, %p201_p2 }
   0x7   : > { %205 = sbr.rel (%p202_p3) target bundleno = 1549 (0x60d), region = 40 }
   0xe   : > { %p233_p4 = scmp.lt.s32.totalorder %s11693_s18, 1  ;;  %v11210_v0 = vld [vmem:[%s15919_s1 + $0x100] sm:$0xff]   ;;  %v11215_v1 = vld [vmem:[%s15919_s1 + $0x108] sm:$0xff]   ;;  %v11221_v2 = vld [vmem:[%s15919_s1 + $0x110] sm:$0xff]   ;;  %v15924_v3 = vmov 0   ;;  %s11704_s9 = smov 64  }
   0xf   : > { %10537 = vmatprep.subr.bf16.mxu1 %v11210_v0  ;;  %1696 = vmatprep.subr.bf16.mxu0 %v15924_v3  ;;  %v11226_v7 = vld [vmem:[%s15919_s1 + $0x118] sm:$0xff]   ;;  %vm594_vm0 = vsmask.f32 7424  ;;  %vm1136_vm1 = vcmask 1046528   ;;  %vm1099_vm2 = vcmask 523264   ;;  %vm6657_vm3 = vcmask 1040384  }
  0x10   : > { %s16756_s18 = smov (!%p233_p4, %s11693_s18), 1  ;;  %10538 = vmatpush3.bf16.msra.mxu1 %v11210_v0  ;;  %vm6658_vm4 = vsmask.f32 256  ;;  %vm6724_vm6 = vcmask 1047552  }
  0x11   : > { %s11153_s26 = smul.u32 480, %s16756_s18  ;;  %10539 = vmatprep.subr.bf16.mxu1 %v11215_v1  ;;  %vm14931_vm5 = vmand %vm6657_vm3, %vm6658_vm4  ;;  %s10062_s30 = sshll.u32 %s16756_s18, 8 }
  0x12   : > { %vm15359_vm7 = vmand %vm6724_vm6, %vm594_vm0  ;;  %s15815_s10 = scalar_lea.vmem %s15923_s5, %s10062_s30 }
  0x13   : > { %s11769_s6 = scalar_lea.vmem %s15918_s0, %s11153_s26 }
  0x14   : > { %v9392_v4 = vld [vmem:[%s11769_s6 + $0x48] sm:$0xff]  ;;  %v9393_v5 = vld [vmem:[%s11769_s6 + $0x50] sm:$0xff]  ;;  %v9394_v6 = vld [vmem:[%s11769_s6 + $0x58] sm:$0x11]  ;;  %10540 = vmatpush3.bf16.msra.mxu1 %v11215_v1 }
  0x15   : > { %v11777_v8 = vcombine.low %v9392_v4, %v9393_v5  ;;  %v11779_v9 = vcombine.low %v9394_v6, %v9394_v6  ;;  %v11782_v10 = vld [vmem:[%s11769_s6 + $0x28] sm:$0x11]  ;;  %v11182_v11 = vld [vmem:[%s11769_s6 + $0x18] ss:$8 sps:$4 sm:$0xff]   ;;  %10541 = vmatprep.subr.bf16.mxu1 %v11221_v2  ;;  %v11795_v15 = vcombine.high %v9392_v4, %v9393_v5  ;;  %v11797_v16 = vcombine.high %v9394_v6, %v9394_v6  ;;  %v11803_v20 = vld [vmem:[%s11769_s6 + $0x70] sm:$0x11] }
  0x16   : > { %v11787_v12 = vcombine.low %v11782_v10, %v11782_v10  ;;  %v11790_v13 = vld [vmem:[%s11769_s6 + $0x60] sm:$0xff]  ;;  %v11793_v14 = vld [vmem:[%s11769_s6 + $0x68] sm:$0xff]  ;;  %v2610_v22 = vshrl.u32 %v11182_v11, 16  ;;  %v2612_v23 = vshll.u32 %v11182_v11, 16  ;;  %v11812_v25 = vcombine.low %v11803_v20, %v11803_v20  ;;  %v11187_v31 = vld [vmem:[%s11769_s6 + $0x30] ss:$8 sps:$4 sm:$0xff]  }
  0x17   : > { %16162 = vst [vmem:[#allocation5_spill] sm:$0xff] %v11777_v8  ;;  %16163 = vst [vmem:[#allocation6_spill] sm:$0xff] %v11779_v9  ;;  %v2658_v17 = vshrl.u32 %v11777_v8, 16  ;;  %v2660_v18 = vshll.u32 %v11777_v8, 16  ;;  %v2665_v19 = vshll.u32 %v11779_v9, 16  ;;  %v11807_v21 = vcombine.low %v11790_v13, %v11793_v14  ;;  %v11826_v36 = vld [vmem:[%s11769_s6 + $0x90] sm:$0xff] }
  0x18   : > { %16164 = vst [vmem:[#allocation7_spill] sm:$0xff] %v11787_v12  ;;  %16165 = vst [vmem:[#allocation8_spill] sm:$0xff] %v11795_v15  ;;  %v2617_v24 = vshll.u32 %v11787_v12, 16  ;;  %v11815_v26 = vld [vmem:[%s11769_s6 + $0x40] sm:$0x11]  ;;  %10542 = vmatpush3.bf16.msra.mxu1 %v11221_v2  ;;  %v2614_v32 = vrot.slane %v2612_v23, 1 }
  0x19   : > { %16166 = vst [vmem:[#allocation9_spill] sm:$0xff] %v11797_v16  ;;  %16167 = vst [vmem:[#allocation10_spill] sm:$0xff] %v11807_v21  ;;  %v2662_v27 = vrot.slane %v2660_v18, 1  ;;  %v2667_v28 = vrot.slane %v2665_v19, 1  ;;  %v2682_v29 = vshrl.u32 %v11807_v21, 16  ;;  %v2684_v30 = vshll.u32 %v11807_v21, 16  ;;  %10543 = vmatprep.subr.bf16.mxu1 %v11226_v7 }
  0x1a   : > { %16168 = vst [vmem:[#allocation11_spill] sm:$0xff] %v11812_v25  ;;  %v2619_v33 = vrot.slane %v2617_v24, 1  ;;  %v2689_v34 = vshll.u32 %v11812_v25, 16  ;;  %v11823_v35 = vcombine.low %v11815_v26, %v11815_v26  ;;  %v11829_v37 = vld [vmem:[%s11769_s6 + $0x98] sm:$0xff]  ;;  %v2634_v40 = vshrl.u32 %v11187_v31, 16  ;;  %v11847_v48 = vld [vmem:[%s11769_s6 + $0x80] sm:$0xff] }
  0x1b   : > { %v11831_v38 = vor.u32 %v2662_v27, %v2658_v17  ;;  %v2686_v39 = vrot.slane %v2684_v30, 1  ;;  %v2636_v41 = vshll.u32 %v11187_v31, 16  ;;  %v11834_v42 = vld [vmem:[%s11769_s6 + $0xa0] sm:$0x11]  ;;  %v11836_v43 = vor.u32 %v2614_v32, %v2610_v22  ;;  %v11844_v47 = vld [vmem:[%s11769_s6 + $0x78] sm:$0xff]  ;;  %v11862_v55 = vld [vmem:[%s11769_s6 + $0xc8] sm:$0xff] }
  0x1c   : > { %16169 = vst [vmem:[#allocation12_spill] sm:$0xff] %v11823_v35  ;;  %v2691_v44 = vrot.slane %v2689_v34, 1  ;;  %v2641_v45 = vshll.u32 %v11823_v35, 16  ;;  %v11841_v46 = vcombine.low %v11826_v36, %v11829_v37  ;;  %v11850_v49 = vld [vmem:[%s11769_s6 + $0x88] sm:$0x11]  ;;  %v11856_v53 = vcombine.low %v11834_v42, %v11834_v42  ;;  %v11859_v54 = vld [vmem:[%s11769_s6 + $0xc0] sm:$0xff]  ;;  %10544 = vmatpush3.bf16.msra.mxu1 %v11226_v7 }
  0x1d   : > { %v2668_v50 = vsel %vm594_vm0, %v11831_v38, %v2667_v28  ;;  %v2687_v51 = vor.u32 %v2686_v39, %v2682_v29  ;;  %v2638_v52 = vrot.slane %v2636_v41, 1  ;;  %v11865_v56 = vld [vmem:[%s11769_s6 + $0xd0] sm:$0x11]  ;;  %v2620_v57 = vsel %vm594_vm0, %v11836_v43, %v2619_v33  ;;  %3708 = vmatprep.subr.bf16.mxu1 %v15924_v3  ;;  %v11895_v6 = vld [vmem:[%s11769_s6 + $0xa8] sm:$0xff]  ;;  %v11901_v11 = vld [vmem:[%s11769_s6 + $0xb8] sm:$0x11] }
  0x1e   : > { %16170 = vst [vmem:[#allocation13_spill] sm:$0xff] %v11841_v46  ;;  %16171 = vst [vmem:[#allocation14_spill] sm:$0xff] %v11856_v53  ;;  %3049 = vrot.lane.b32.xlu1 %v2668_v50, %s11704_s9  ;;  %v2643_v58 = vrot.slane %v2641_v45, 1  ;;  %v2730_v59 = vshrl.u32 %v11841_v46, 16  ;;  %v2732_v60 = vshll.u32 %v11841_v46, 16  ;;  %3041 = vrot.lane.b32.xlu0 %v2620_v57, %s11704_s9  ;;  %v2737_v63 = vshll.u32 %v11856_v53, 16 }
  0x1f   : > { %v2692_v61 = vsel %vm594_vm0, %v2687_v51, %v2691_v44  ;;  %v11875_v62 = vor.u32 %v2638_v52, %v2634_v40  ;;  %v11880_v0 = vcombine.low %v11844_v47, %v11847_v48  ;;  %v11884_v2 = vcombine.low %v11850_v49, %v11850_v49  ;;  %v11898_v7 = vld [vmem:[%s11769_s6 + $0xb0] sm:$0xff]  ;;  %v11911_v24 = vld [vmem:[%s11769_s6 + $0xf8] sm:$0xff]  ;;  %v11928_v39 = vld [vmem:[%s11769_s6 + $0x100] sm:$0x11] }
  0x20   : > { %v2734_v1 = vrot.slane %v2732_v60, 1  ;;  %v11888_v4 = vcombine.low %v11859_v54, %v11862_v55  ;;  %v11892_v5 = vcombine.low %v11865_v56, %v11865_v56  ;;  %v2739_v18 = vrot.slane %v2737_v63, 1  ;;  %v11908_v23 = vld [vmem:[%s11769_s6 + $0xf0] sm:$0xff]  ;;  %v11936_v50 = vld [vmem:[%s11769_s6 + $0xd8] sm:$0xff]  ;;  %v11939_v51 = vld [vmem:[%s11769_s6 + $0xe0] sm:$0xff] }
  0x21   : > { %16172 = vst [vmem:[#allocation15_spill] sm:$0xff] %v11880_v0  ;;  %16173 = vst [vmem:[#allocation16_spill] sm:$0xff] %v11884_v2  ;;  %v2644_v17 = vsel %vm594_vm0, %v11875_v62, %v2643_v58  ;;  %v2706_v19 = vshrl.u32 %v11880_v0, 16  ;;  %v2708_v22 = vshll.u32 %v11880_v0, 16  ;;  %v2713_v28 = vshll.u32 %v11884_v2, 16 }
  0x22   : > { %16174 = vst [vmem:[#allocation17_spill] sm:$0xff] %v11888_v4  ;;  %16175 = vst [vmem:[#allocation18_spill] sm:$0xff] %v11892_v5  ;;  %3053 = vrot.lane.b32.xlu1 %v2692_v61, %s11704_s9  ;;  %v2735_v27 = vor.u32 %v2734_v1, %v2730_v59  ;;  %v2778_v29 = vshrl.u32 %v11888_v4, 16  ;;  %v2780_v30 = vshll.u32 %v11888_v4, 16  ;;  %3045 = vrot.lane.b32.xlu0 %v2644_v17, %s11704_s9  ;;  %v2785_v32 = vshll.u32 %v11892_v5, 16 }
  0x23   : > { %v2710_v31 = vrot.slane %v2708_v22, 1  ;;  %v11921_v33 = vcombine.low %v11895_v6, %v11898_v7  ;;  %v11925_v34 = vcombine.low %v11901_v11, %v11901_v11  ;;  %v2715_v41 = vrot.slane %v2713_v28, 1  ;;  %v11944_v60 = vld [vmem:[%s11769_s6 + $0xe8] sm:$0x11]  ;;  %v9427_v53 = vld [vmem:[%s11769_s6 + $0x160] sm:$0x11] }
  0x24   : > { %v2740_v40 = vsel %vm594_vm0, %v2735_v27, %v2739_v18  ;;  %v2782_v44 = vrot.slane %v2780_v30, 1  ;;  %v11933_v45 = vcombine.low %v11908_v23, %v11911_v24  ;;  %v2787_v57 = vrot.slane %v2785_v32, 1  ;;  %v11954_v18 = vld [vmem:[%s11769_s6 + $0x120] sm:$0xff]  ;;  %v11966_v30 = vld [vmem:[%s11769_s6 + $0x130] sm:$0x11] }
  0x25   : > { %16176 = vst [vmem:[#allocation19_spill] sm:$0xff] %v11921_v33  ;;  %16177 = vst [vmem:[#allocation20_spill] sm:$0xff] %v11925_v34  ;;  %v2711_v52 = vor.u32 %v2710_v31, %v2706_v19  ;;  %v2754_v58 = vshrl.u32 %v11921_v33, 16  ;;  %v2756_v59 = vshll.u32 %v11921_v33, 16  ;;  %v2761_v63 = vshll.u32 %v11925_v34, 16  ;;  %v11957_v19 = vld [vmem:[%s11769_s6 + $0x128] sm:$0xff] }
  0x26   : > { %16178 = vst [vmem:[#allocation21_spill] sm:$0xff] %v11933_v45  ;;  %3061 = vrot.lane.b32.xlu1 %v2740_v40, %s11704_s9  ;;  %v2783_v61 = vor.u32 %v2782_v44, %v2778_v29  ;;  %v11950_v1 = vcombine.low %v11928_v39, %v11928_v39  ;;  %v2826_v17 = vshrl.u32 %v11933_v45, 16  ;;  %v2828_v28 = vshll.u32 %v11933_v45, 16  ;;  %v11976_v44 = vld [vmem:[%s11769_s6 + $0x108] sm:$0xff]  ;;  %v12005_v34 = vld [vmem:[%s11769_s6 + $0x158] sm:$0xff] }
  0x27   : > { %v2716_v22 = vsel %vm594_vm0, %v2711_v52, %v2715_v41  ;;  %v2758_v27 = vrot.slane %v2756_v59, 1  ;;  %v11963_v29 = vcombine.low %v11936_v50, %v11939_v51  ;;  %v2763_v32 = vrot.slane %v2761_v63, 1  ;;  %v11979_v52 = vld [vmem:[%s11769_s6 + $0x110] sm:$0xff]  ;;  %16186 = vst [vmem:[#allocation29_spill] sm:$0xff] %v12005_v34 }
  0x28   : > { %16179 = vst [vmem:[#allocation22_spill] sm:$0xff] %v11950_v1  ;;  %3057 = vrot.lane.b32.xlu0 %v2716_v22, %s11704_s9  ;;  %v2788_v31 = vsel %vm594_vm0, %v2783_v61, %v2787_v57  ;;  %v2833_v40 = vshll.u32 %v11950_v1, 16  ;;  %v11973_v41 = vcombine.low %v11944_v60, %v11944_v60  ;;  %v2830_v3 = vrot.slane %v2828_v28, 1  ;;  %v11997_v28 = vld [vmem:[%s11769_s6 + $0x150] sm:$0xff] }
  0x29   : > { %16180 = vst [vmem:[#allocation23_spill] sm:$0xff] %v11963_v29  ;;  %v2759_v59 = vor.u32 %v2758_v27, %v2754_v58  ;;  %v2802_v22 = vshrl.u32 %v11963_v29, 16  ;;  %v2804_v57 = vshll.u32 %v11963_v29, 16  ;;  %v11987_v1 = vcombine.low %v11954_v18, %v11957_v19  ;;  %v11994_v27 = vld [vmem:[%s11769_s6 + $0x118] sm:$0x11]  ;;  %16184 = vst [vmem:[#allocation27_spill] sm:$0xff] %v11997_v28 }
  0x2a   : > { %16181 = vst [vmem:[#allocation24_spill] sm:$0xff] %v11973_v41  ;;  %3069 = vrot.lane.b32.xlu1 %v2788_v31, %s11704_s9  ;;  %v2835_v61 = vrot.slane %v2833_v40, 1  ;;  %v2809_v63 = vshll.u32 %v11973_v41, 16  ;;  %v11991_v58 = vcombine.low %v11966_v30, %v11966_v30  ;;  %v2831_v31 = vor.u32 %v2830_v3, %v2826_v17  ;;  %v12016_v3 = vld [vmem:[%s11769_s6 + $0x140] sm:$0xff] }
  0x2b   : > { %16182 = vst [vmem:[#allocation25_spill] sm:$0xff] %v11987_v1  ;;  %v2764_v5 = vsel %vm594_vm0, %v2759_v59, %v2763_v32  ;;  %v2806_v40 = vrot.slane %v2804_v57, 1  ;;  %v12002_v41 = vcombine.low %v11976_v44, %v11979_v52  ;;  %v2874_v25 = vshrl.u32 %v11987_v1, 16  ;;  %v12013_v32 = vld [vmem:[%s11769_s6 + $0x138] sm:$0xff] }
  0x2c   : > { %16183 = vst [vmem:[#allocation26_spill] sm:$0xff] %v11991_v58  ;;  %3065 = vrot.lane.b32.xlu0 %v2764_v5, %s11704_s9  ;;  %v2811_v2 = vrot.slane %v2809_v63, 1  ;;  %v2876_v9 = vshll.u32 %v11987_v1, 16  ;;  %v2881_v35 = vshll.u32 %v11991_v58, 16  ;;  %v2836_v17 = vsel %vm594_vm0, %v2831_v31, %v2835_v61  ;;  %v12031_v61 = vld [vmem:[%s11769_s6 + $0x148] sm:$0x11] }
  0x2d   : > { %16185 = vst [vmem:[#allocation28_spill] sm:$0xff] %v12002_v41  ;;  %v2807_v59 = vor.u32 %v2806_v40, %v2802_v22  ;;  %v12021_v5 = vcombine.low %v11994_v27, %v11994_v27  ;;  %v2850_v57 = vshrl.u32 %v12002_v41, 16  ;;  %v2852_v12 = vshll.u32 %v12002_v41, 16  ;;  %16189 = vst [vmem:[#allocation32_spill] sm:$0xff] %v12031_v61 }
  0x2e   : > { %3077 = vrot.lane.b32.xlu1 %v2836_v17, %s11704_s9  ;;  %v2878_v63 = vrot.slane %v2876_v9, 1  ;;  %v2883_v58 = vrot.slane %v2881_v35, 1  ;;  %v12028_v1 = vcombine.low %v11997_v28, %v12005_v34  ;;  %v12035_v40 = vcombine.low %v9427_v53, %v9427_v53  ;;  %v9431_v35 = vld [vmem:[%s11769_s6 + $0x180] sm:$0xff]  ;;  %v9432_v17 = vld [vmem:[%s11769_s6 + $0x188] sm:$0xff] }
  0x2f   : > { %16187 = vst [vmem:[#allocation30_spill] sm:$0xff] %v12021_v5  ;;  %v2812_v22 = vsel %vm594_vm0, %v2807_v59, %v2811_v2  ;;  %v2857_v31 = vshll.u32 %v12021_v5, 16  ;;  %v12039_v9 = vcombine.low %v12013_v32, %v12016_v3  ;;  %v2854_v45 = vrot.slane %v2852_v12, 1  ;;  %v9433_v59 = vld [vmem:[%s11769_s6 + $0x190] sm:$0x11]  ;;  %v12048_v5 = vld [vmem:[%s11769_s6 + $0x168] sm:$0xff] }
  0x30   : > { %16188 = vst [vmem:[#allocation31_spill] sm:$0xff] %v12028_v1  ;;  %16190 = vst [vmem:[#allocation33_spill] sm:$0xff] %v12035_v40  ;;  %3073 = vrot.lane.b32.xlu0 %v2812_v22, %s11704_s9  ;;  %v2879_v41 = vor.u32 %v2878_v63, %v2874_v25  ;;  %v2922_v29 = vshrl.u32 %v12028_v1, 16  ;;  %v2924_v2 = vshll.u32 %v12028_v1, 16  ;;  %v2929_v4 = vshll.u32 %v12035_v40, 16  ;;  %v12057_v22 = vld [vmem:[%s11769_s6 + $0x170] sm:$0xff] }
  0x31   : > { %16191 = vst [vmem:[#allocation34_spill] sm:$0xff] %v12039_v9  ;;  %v2859_v53 = vrot.slane %v2857_v31, 1  ;;  %v12053_v33 = vcombine.low %v12031_v61, %v12031_v61  ;;  %v2898_v46 = vshrl.u32 %v12039_v9, 16  ;;  %v9430_v12 = vld [vmem:[%s11769_s6 + $0x178] sm:$0x11]  ;;  %v2855_v63 = vor.u32 %v2854_v45, %v2850_v57 }
  0x32   : > { %v2884_v25 = vsel %vm594_vm0, %v2879_v41, %v2883_v58  ;;  %v2926_v1 = vrot.slane %v2924_v2, 1  ;;  %v2900_v31 = vshll.u32 %v12039_v9, 16  ;;  %v2931_v40 = vrot.slane %v2929_v4, 1  ;;  %v9439_v41 = vld [vmem:[%s11769_s6 + $0x1c0] sm:$0x11]  ;;  %v9434_v57 = vld [vmem:[%s11769_s6 + $0x198] sm:$0xff] }
  0x33   : > { %16192 = vst [vmem:[#allocation35_spill] sm:$0xff] %v12053_v33  ;;  %3085 = vrot.lane.b32.xlu1 %v2884_v25, %s11704_s9  ;;  %v2905_v0 = vshll.u32 %v12053_v33, 16  ;;  %v12064_v21 = vcombine.low %v9431_v35, %v9432_v17  ;;  %v12066_v8 = vcombine.low %v9433_v59, %v9433_v59  ;;  %v2860_v28 = vsel %vm594_vm0, %v2855_v63, %v2859_v53  ;;  %v11216_v58 = vld [vmem:[%s11769_s6 + $0x1b0] ss:$8 sps:$4 sm:$0xff]   ;;  %v9436_v59 = vld [vmem:[%s11769_s6 + $0x1a8] sm:$0x11] }
  0x34   : > { %v2927_v34 = vor.u32 %v2926_v1, %v2922_v29  ;;  %v2902_v61 = vrot.slane %v2900_v31, 1  ;;  %v12071_v45 = vcombine.low %v12048_v5, %v12057_v22  ;;  %3081 = vrot.lane.b32.xlu0 %v2860_v28, %s11704_s9  ;;  %v12082_v53 = vcombine.low %v9430_v12, %v9430_v12  ;;  %v12086_v63 = vld [vmem:[%s11769_s6 + $0x1a0] sm:$0xff] }
  0x35   : > { %16193 = vst [vmem:[#allocation36_spill] sm:$0xff] %v12064_v21  ;;  %16194 = vst [vmem:[#allocation37_spill] sm:$0xff] %v12066_v8  ;;  %v2907_v4 = vrot.slane %v2905_v0, 1  ;;  %v2970_v35 = vshrl.u32 %v12064_v21, 16  ;;  %v2972_v17 = vshll.u32 %v12064_v21, 16  ;;  %v2977_v2 = vshll.u32 %v12066_v8, 16 }
  0x36   : > { %16195 = vst [vmem:[#allocation38_spill] sm:$0xff] %v12071_v45  ;;  %v2932_v1 = vsel %vm594_vm0, %v2927_v34, %v2931_v40  ;;  %v2903_v29 = vor.u32 %v2902_v61, %v2898_v46  ;;  %16196 = vst [vmem:[#allocation39_spill] sm:$0xff] %v12082_v53  ;;  %v2946_v25 = vshrl.u32 %v12071_v45, 16  ;;  %v2948_v31 = vshll.u32 %v12071_v45, 16 }
  0x37   : > { %3093 = vrot.lane.b32.xlu1 %v2932_v1, %s11704_s9  ;;  %v2974_v0 = vrot.slane %v2972_v17, 1  ;;  %v2979_v28 = vrot.slane %v2977_v2, 1  ;;  %v12090_v33 = vcombine.low %v9439_v41, %v9439_v41  ;;  %v2953_v46 = vshll.u32 %v12082_v53, 16  ;;  %v12100_v2 = vld [vmem:[%s11769_s6 + $0x34] ss:$8 sps:$4 sm:$0xff]  }
  0x38   : > { %v2908_v8 = vsel %vm594_vm0, %v2903_v29, %v2907_v4  ;;  %v3018_v34 = vshrl.u32 %v11216_v58, 16  ;;  %v3020_v61 = vshll.u32 %v11216_v58, 16  ;;  %v2950_v12 = vrot.slane %v2948_v31, 1  ;;  %v12109_v58 = vld [vmem:[%s11769_s6 + $0x1c] ss:$8 sps:$4 sm:$0xff]  }
  0x39   : > { %16197 = vst [vmem:[#allocation40_spill] sm:$0xff] %v12090_v33  ;;  %3089 = vrot.lane.b32.xlu0 %v2908_v8, %s11704_s9  ;;  %v2975_v40 = vor.u32 %v2974_v0, %v2970_v35  ;;  %v3025_v21 = vshll.u32 %v12090_v33, 16  ;;  %v12097_v17 = vcombine.low %v9434_v57, %v12086_v63  ;;  %v2955_v1 = vrot.slane %v2953_v46, 1 }
  0x3a   : > { %v3022_v41 = vrot.slane %v3020_v61, 1  ;;  %v12102_v45 = vcombine.low %v9436_v59, %v9436_v59  ;;  %v12106_v4 = vcombine.high %v11815_v26, %v11815_v26  ;;  %v2951_v35 = vor.u32 %v2950_v12, %v2946_v25 }
  0x3b   : > { %16198 = vst [vmem:[#allocation41_spill] sm:$0xff] %v12097_v17  ;;  %v2980_v8 = vsel %vm594_vm0, %v2975_v40, %v2979_v28  ;;  %v3027_v29 = vrot.slane %v3025_v21, 1  ;;  %v12114_v57 = vcombine.high %v11782_v10, %v11782_v10  ;;  %v2994_v59 = vshrl.u32 %v12097_v17, 16 }
  0x3c   : > { %16199 = vst [vmem:[#allocation42_spill] sm:$0xff] %v12102_v45  ;;  %16200 = vst [vmem:[#allocation43_spill] sm:$0xff] %v12106_v4  ;;  %3101 = vrot.lane.b32.xlu1 %v2980_v8, %s11704_s9  ;;  %v3023_v0 = vor.u32 %v3022_v41, %v3018_v34  ;;  %v2996_v31 = vshll.u32 %v12097_v17, 16  ;;  %v3001_v26 = vshll.u32 %v12102_v45, 16  ;;  %v2956_v46 = vsel %vm594_vm0, %v2951_v35, %v2955_v1  ;;  %v12130_v35 = vld [vmem:[%s11769_s6 + $0x10] sm:$0x11] }
  0x3d   : > { %16201 = vst [vmem:[#allocation44_spill] sm:$0xff] %v12114_v57  ;;  %v2646_v25 = vshrl.u32 %v12100_v2, 16  ;;  %v2648_v21 = vshll.u32 %v12100_v2, 16  ;;  %v2653_v10 = vshll.u32 %v12106_v4, 16  ;;  %3097 = vrot.lane.b32.xlu0 %v2956_v46, %s11704_s9  ;;  %v2622_v40 = vshrl.u32 %v12109_v58, 16 }
  0x3e   : > { %v3028_v28 = vsel %vm594_vm0, %v3023_v0, %v3027_v29  ;;  %v2998_v34 = vrot.slane %v2996_v31, 1  ;;  %v3003_v61 = vrot.slane %v3001_v26, 1  ;;  %v2624_v41 = vshll.u32 %v12109_v58, 16  ;;  %v11233_v4 = vld [vmem:[%s11769_s6 + $0x4] ss:$8 sps:$4 sm:$0xff]  }
  0x3f   : > { %v2650_v12 = vrot.slane %v2648_v21, 1  ;;  %v2655_v1 = vrot.slane %v2653_v10, 1  ;;  %v2629_v8 = vshll.u32 %v12114_v57, 16  ;;  %v12136_v29 = vcombine.high %v11790_v13, %v11793_v14  ;;  %v12144_v26 = vld [vmem:[%s11769_s6 + $0x28] sm:$0x11] }
  0x40   : > { %3109 = vrot.lane.b32.xlu1 %v3028_v28, %s11704_s9  ;;  %v2999_v46 = vor.u32 %v2998_v34, %v2994_v59  ;;  %v12140_v0 = vcombine.high %v11803_v20, %v11803_v20  ;;  %v2670_v31 = vshrl.u32 %v11795_v15, 16  ;;  %v2626_v10 = vrot.slane %v2624_v41, 1  ;;  %v11301_v59 = vld [vmem:[%s15919_s1] sm:$0xff]  }
  0x41   : > { %16202 = vst [vmem:[#allocation45_spill] sm:$0xff] %v12136_v29  ;;  %v2651_v21 = vor.u32 %v2650_v12, %v2646_v25  ;;  %v2631_v57 = vrot.slane %v2629_v8, 1  ;;  %v2672_v33 = vshll.u32 %v11795_v15, 16  ;;  %v2694_v14 = vshrl.u32 %v12136_v29, 16  ;;  %1697 = vmatpush1.bf16.msra.mxu0 %v11301_v59 }
  0x42   : > { %16203 = vst [vmem:[#allocation46_spill] sm:$0xff] %v12140_v0  ;;  %v3004_v13 = vsel %vm594_vm0, %v2999_v46, %v3003_v61  ;;  %v2696_v20 = vshll.u32 %v12136_v29, 16  ;;  %v2701_v28 = vshll.u32 %v12140_v0, 16  ;;  %v2627_v34 = vor.u32 %v2626_v10, %v2622_v40  ;;  %v11306_v40 = vld [vmem:[%s15919_s1 + $0x8] sm:$0xff]  }
  0x43   : > { %3105 = vrot.lane.b32.xlu0 %v3004_v13, %s11704_s9  ;;  %v2656_v25 = vsel %vm594_vm0, %v2651_v21, %v2655_v1  ;;  %v2674_v12 = vrot.slane %v2672_v33, 1  ;;  %v2677_v41 = vshll.u32 %v11797_v16, 16  ;;  %v12160_v61 = vcombine.high %v12130_v35, %v12130_v35 }
  0x44   : > { %3047 = vrot.lane.b32.xlu1 %v2656_v25, %s11704_s9  ;;  %v2698_v8 = vrot.slane %v2696_v20, 1  ;;  %v2703_v45 = vrot.slane %v2701_v28, 1  ;;  %v1140_v46 = vrot.slane %v11233_v4, 1  ;;  %v16204_v53 = vmov 0  }
  0x45   : > { %1698 = vmatprep.subr.bf16.mxu0 %v16204_v53  ;;  %v2632_v33 = vsel %vm594_vm0, %v2627_v34, %v2631_v57  ;;  %v12167_v1 = vor.u32 %v2674_v12, %v2670_v31  ;;  %v2679_v21 = vrot.slane %v2677_v41, 1  ;;  %v12171_v10 = vcombine.high %v12144_v26, %v12144_v26 }
  0x46   : > { %v12173_v59 = vor.u32 %v2698_v8, %v2694_v14  ;;  %v1141_v4 = vrot.slane %v12160_v61, 1  ;;  %v1146_v13 = vrot.slane %v12109_v58, 1  ;;  %v12179_v20 = vcombine.high %v11826_v36, %v11829_v37  ;;  %v11240_v36 = vld [vmem:[%s15919_s1 + $0x120] sm:$0xff]   ;;  %1699 = vmatpush1.bf16.msra.mxu0 %v11306_v40  ;;  %v11309_v58 = vld [vmem:[%s15919_s1 + $0x10] sm:$0xff]  }
  0x47   : > { %3043 = vrot.lane.b32.xlu0 %v2632_v33, %s11704_s9  ;;  %v2680_v57 = vsel %vm594_vm0, %v12167_v1, %v2679_v21  ;;  %v1147_v31 = vrot.slane %v12171_v10, 1  ;;  %v12187_v14 = vcombine.high %v11834_v42, %v11834_v42  ;;  %v12191_v28 = vcombine.high %v11844_v47, %v11847_v48  ;;  %v12197_v37 = vld [vmem:[%s11769_s6 + $0x40] sm:$0x11]  ;;  %v12208_v48 = vld [vmem:[%s11769_s6 + $0x58] sm:$0x11]  ;;  %1700 = vmatprep.subr.bf16.mxu0 %v16204_v53 }
  0x48   : > { %16205 = vst [vmem:[#allocation47_spill] sm:$0xff] %v12179_v20  ;;  %v2704_v25 = vsel %vm594_vm0, %v12173_v59, %v2703_v45  ;;  %v1142_v42 = vsel %vm1136_vm1, %v1140_v46, %v1141_v4  ;;  %v2742_v34 = vshrl.u32 %v12179_v20, 16  ;;  %v2744_v47 = vshll.u32 %v12179_v20, 16 }
  0x49   : > { %16206 = vst [vmem:[#allocation48_spill] sm:$0xff] %v12187_v14  ;;  %16207 = vst [vmem:[#allocation49_spill] sm:$0xff] %v12191_v28  ;;  %3055 = vrot.lane.b32.xlu1 %v2704_v25, %s11704_s9  ;;  %10545 = vmatprep.mubr.msk.bf16.mxu1 %vm1099_vm2, %v1142_v42  ;;  %v1148_v12 = vsel %vm1136_vm1, %v1146_v13, %v1147_v31  ;;  %v2749_v41 = vshll.u32 %v12187_v14, 16  ;;  %v12217_v45 = vcombine.high %v11850_v49, %v11850_v49 }
  0x4a   : > { %v2718_v8 = vshrl.u32 %v12191_v28, 16  ;;  %10546 = vmatmul.mubr.msk.bf16.vlgmr.msra.gmra.mrb[0].mxu1 %vm1099_vm2, %v1148_v12  ;;  %v2746_v46 = vrot.slane %v2744_v47, 1  ;;  %v2720_v40 = vshll.u32 %v12191_v28, 16  ;;  %v12224_v33 = vcombine.high %v11895_v6, %v11898_v7  ;;  %v11245_v6 = vld [vmem:[%s15919_s1 + $0x128] sm:$0xff]   ;;  %1701 = vmatpush1.bf16.msra.mxu0 %v11309_v58 }
  0x4b   : > { %16208 = vst [vmem:[#allocation50_spill] sm:$0xff] %v12217_v45  ;;  %v12228_v21 = vcombine.high %v11901_v11, %v11901_v11  ;;  %3051 = vrot.lane.b32.xlu0 %v2680_v57, %s11704_s9  ;;  %v2751_v4 = vrot.slane %v2749_v41, 1  ;;  %v2725_v49 = vshll.u32 %v12217_v45, 16  ;;  %3709 = vmatpush1.bf16.msra.mxu1 %v11240_v36  ;;  %v12234_v13 = vcombine.high %v12197_v37, %v12197_v37  ;;  %v12241_v7 = vld [vmem:[%s11769_s6] ss:$8 sps:$4 sm:$0xff]   ;;  %v11313_v41 = vld [vmem:[%s15919_s1 + $0x18] sm:$0xff]  }
  0x4c   : > { %16209 = vst [vmem:[#allocation51_spill] sm:$0xff] %v12224_v33  ;;  %v1152_v31 = vrot.slane %v12100_v2, 1  ;;  %v12243_v11 = vor.u32 %v2746_v46, %v2742_v34  ;;  %v2722_v25 = vrot.slane %v2720_v40, 1  ;;  %v2766_v57 = vshrl.u32 %v12224_v33, 16  ;;  %3710 = vmatprep.subr.bf16.mxu1 %v16204_v53  ;;  %v11248_v34 = vld [vmem:[%s15919_s1 + $0x130] sm:$0xff]   ;;  %1702 = vmatprep.subr.bf16.mxu0 %v16204_v53 }
  0x4d   : > { %16210 = vst [vmem:[#allocation52_spill] sm:$0xff] %v12228_v21  ;;  %v2768_v42 = vshll.u32 %v12224_v33, 16  ;;  %v2727_v36 = vrot.slane %v2725_v49, 1  ;;  %v2773_v47 = vshll.u32 %v12228_v21, 16  ;;  %v1153_v2 = vrot.slane %v12234_v13, 1 }
  0x4e   : > { %v12252_v12 = vcombine.high %v12208_v48, %v12208_v48  ;;  %v2752_v58 = vsel %vm594_vm0, %v12243_v11, %v2751_v4  ;;  %v12263_v46 = vor.u32 %v2722_v25, %v2718_v8  ;;  %v15979_v49 = vrot.slane %v11795_v15, 1  ;;  %1703 = vmatpush1.bf16.msra.mxu0 %v11313_v41 }
  0x4f   : > { %v2770_v40 = vrot.slane %v2768_v42, 1  ;;  %3063 = vrot.lane.b32.xlu1 %v2752_v58, %s11704_s9  ;;  %v2775_v21 = vrot.slane %v2773_v47, 1  ;;  %v1154_v14 = vsel %vm1136_vm1, %v1152_v31, %v1153_v2  ;;  %3711 = vmatpush1.bf16.msra.mxu1 %v11245_v6  ;;  %v12271_v0 = vcombine.high %v11936_v50, %v11939_v51  ;;  %v12285_v6 = vld [vmem:[%s11769_s6 + $0x70] sm:$0x11]  ;;  %v11316_v50 = vld [vmem:[%s15919_s1 + $0x20] sm:$0xff]  }
  0x50   : > { %v1159_v45 = vrot.slane %v12252_v12, 1  ;;  %v2728_v8 = vsel %vm594_vm0, %v12263_v46, %v2727_v36  ;;  %10549 = vmatprep.mubr.msk.bf16.mxu1 %vm1099_vm2, %v1154_v14  ;;  %v12280_v25 = vcombine.high %v11944_v60, %v11944_v60  ;;  %3712 = vmatprep.subr.bf16.mxu1 %v16204_v53  ;;  %v596_v31 = vshrl.u32 %v12241_v7, 16  ;;  %v12301_v42 = vld [vmem:[%s11769_s6 + $0x88] sm:$0x11] }
  0x51   : > { %16211 = vst [vmem:[#allocation53_spill] sm:$0xff] %v12271_v0  ;;  %v12275_v4 = vor.u32 %v2770_v40, %v2766_v57  ;;  %3059 = vrot.lane.b32.xlu0 %v2728_v8, %s11704_s9  ;;  %v2814_v14 = vshrl.u32 %v12271_v0, 16  ;;  %v2816_v60 = vshll.u32 %v12271_v0, 16  ;;  %v12298_v57 = vcombine.high %v11859_v54, %v11862_v55  ;;  %v11254_v54 = vld [vmem:[%s15919_s1 + $0x138] sm:$0xff]   ;;  %1704 = vmatprep.subr.bf16.mxu0 %v16204_v53 }
  0x52   : > { %16212 = vst [vmem:[#allocation54_spill] sm:$0xff] %v12280_v25  ;;  %v1160_v51 = vsel %vm1136_vm1, %v15979_v49, %v1159_v45  ;;  %v2821_v47 = vshll.u32 %v12280_v25, 16  ;;  %v12309_v45 = vcombine.high %v11865_v56, %v11865_v56  ;;  %v12313_v2 = vcombine.low %v12130_v35, %v12130_v35  ;;  %v12323_v56 = vld [vmem:[%s11769_s6 + $0xa0] sm:$0x11]  ;;  %1705 = vmatpush1.bf16.msra.mxu0 %v11316_v50 }
  0x53   : > { %16213 = vst [vmem:[#allocation55_spill] sm:$0xff] %v12298_v57  ;;  %v2776_v36 = vsel %vm594_vm0, %v12275_v4, %v2775_v21  ;;  %10550 = vmatmul.mubr.msk.bf16.gmra.mrb[4].mxu1 %vm1099_vm2, %v1160_v51  ;;  %v2818_v55 = vrot.slane %v2816_v60, 1  ;;  %v2790_v21 = vshrl.u32 %v12298_v57, 16  ;;  %v2792_v41 = vshll.u32 %v12298_v57, 16  ;;  %1706 = vmatprep.subr.bf16.mxu0 %v16204_v53 }
  0x54   : > { %16214 = vst [vmem:[#allocation56_spill] sm:$0xff] %v12309_v45  ;;  %16215 = vst [vmem:[#allocation57_spill] sm:$0xff] %v12313_v2  ;;  %3713 = vmatpush1.bf16.msra.mxu1 %v11248_v34  ;;  %v598_v58 = vshll.u32 %v12241_v7, 16  ;;  %v2823_v40 = vrot.slane %v2821_v47, 1  ;;  %v2797_v35 = vshll.u32 %v12309_v45, 16  ;;  %v603_v8 = vshll.u32 %v12313_v2, 16 }
  0x55   : > { %v12329_v51 = vcombine.high %v12285_v6, %v12285_v6  ;;  %3714 = vmatprep.subr.bf16.mxu1 %v16204_v53  ;;  %v12333_v34 = vld [vmem:[%s11769_s6 + $0xb8] sm:$0x11]  ;;  %3067 = vrot.lane.b32.xlu0 %v2776_v36, %s11704_s9  ;;  %v12336_v60 = vor.u32 %v2818_v55, %v2814_v14  ;;  %v2794_v7 = vrot.slane %v2792_v41, 1  ;;  %v15984_v47 = vrot.slane %v12136_v29, 1  ;;  %v11320_v14 = vld [vmem:[%s15919_s1 + $0x28] sm:$0xff]  }
  0x56   : > { %v600_v49 = vrot.slane %v598_v58, 1  ;;  %v2799_v25 = vrot.slane %v2797_v35, 1  ;;  %v605_v45 = vrot.slane %v603_v8, 1  ;;  %v12342_v2 = vcombine.high %v12301_v42, %v12301_v42  ;;  %v12354_v58 = vld [vmem:[%s11769_s6 + $0xd0] sm:$0x11]  ;;  %1707 = vmatpush1.bf16.msra.mxu0 %v11320_v14 }
  0x57   : > { %16216 = vst [vmem:[#allocation58_spill] sm:$0xff] %v12336_v60  ;;  %v1165_v16 = vrot.slane %v12329_v51, 1  ;;  %v2824_v36 = vsel %vm594_vm0, %v12336_v60, %v2823_v40  ;;  %v12350_v55 = vor.u32 %v2794_v7, %v2790_v21  ;;  %v15985_v41 = vrot.slane %v12191_v28, 1  ;;  %v11255_v21 = vld [vmem:[%s15919_s1 + $0x140] sm:$0xff]   ;;  %1708 = vmatprep.subr.bf16.mxu0 %v16204_v53 }
  0x58   : > { %v601_v50 = vor.u32 %v600_v49, %v596_v31  ;;  %3715 = vmatpush1.bf16.msra.mxu1 %v11254_v54  ;;  %v1171_v8 = vrot.slane %v12342_v2, 1  ;;  %v12366_v49 = vcombine.low %v12144_v26, %v12144_v26  ;;  %v12370_v31 = vcombine.high %v12323_v56, %v12323_v56  ;;  %v12383_v26 = vld [vmem:[%s11769_s6 + $0xe8] sm:$0x11] }
  0x59   : > { %16217 = vst [vmem:[#allocation59_spill] sm:$0xff] %v12350_v55  ;;  %v1166_v35 = vsel %vm1136_vm1, %v15984_v47, %v1165_v16  ;;  %3716 = vmatprep.subr.bf16.mxu1 %v16204_v53  ;;  %3075 = vrot.lane.b32.xlu0 %v2824_v36, %s11704_s9  ;;  %v2800_v16 = vsel %vm594_vm0, %v12350_v55, %v2799_v25  ;;  %v15986_v40 = vrot.slane %v12179_v20, 1 }
  0x5a   : > { %16218 = vst [vmem:[#allocation60_spill] sm:$0xff] %v12366_v49  ;;  %v606_v54 = vsel %vm594_vm0, %v601_v50, %v605_v45  ;;  %10553 = vmatprep.mubr.msk.bf16.mxu1 %vm1099_vm2, %v1166_v35  ;;  %v12380_v7 = vcombine.high %v12333_v34, %v12333_v34  ;;  %3071 = vrot.lane.b32.xlu1 %v2800_v16, %s11704_s9  ;;  %v627_v25 = vshll.u32 %v12366_v49, 16  ;;  %v1177_v45 = vrot.slane %v12370_v31, 1  ;;  %v11321_v35 = vld [vmem:[%s15919_s1 + $0x30] sm:$0xff]   ;;  %v11259_v16 = vld [vmem:[%s15919_s1 + $0x148] sm:$0xff]  }
  0x5b   : > { %v1172_v36 = vsel %vm1136_vm1, %v15985_v41, %v1171_v8  ;;  %v12402_v8 = vcombine.high %v11908_v23, %v11911_v24  ;;  %v12406_v41 = vcombine.high %v11928_v39, %v11928_v39  ;;  %v12410_v14 = vcombine.low %v12197_v37, %v12197_v37  ;;  %1709 = vmatpush1.bf16.msra.mxu0 %v11321_v35  ;;  %v11262_v49 = vld [vmem:[%s15919_s1 + $0x150] sm:$0xff]  }
  0x5c   : > { %10554 = vmatmul.mubr.msk.bf16.gmra.mrb[8].mxu1 %vm1099_vm2, %v1172_v36  ;;  %v1183_v47 = vrot.slane %v12380_v7, 1  ;;  %v629_v36 = vrot.slane %v627_v25, 1  ;;  %v1178_v50 = vsel %vm1136_vm1, %v15986_v40, %v1177_v45  ;;  %v12418_v23 = vcombine.high %v12354_v58, %v12354_v58  ;;  %v11325_v40 = vld [vmem:[%s15919_s1 + $0x38] sm:$0xff]   ;;  %1710 = vmatprep.subr.bf16.mxu0 %v16204_v53 }
  0x5d   : > { %16219 = vst [vmem:[#allocation61_spill] sm:$0xff] %v12402_v8  ;;  %16220 = vst [vmem:[#allocation62_spill] sm:$0xff] %v12406_v41  ;;  %3717 = vmatpush1.bf16.msra.mxu1 %v11255_v21  ;;  %1027 = vrot.lane.b32.xlu0 %v606_v54, %s11704_s9  ;;  %v16222_v39 = vrot.slane %v12224_v33, 1  ;;  %v2838_v21 = vshrl.u32 %v12402_v8, 16  ;;  %v2840_v25 = vshll.u32 %v12402_v8, 16  ;;  %v2845_v45 = vshll.u32 %v12406_v41, 16 }
  0x5e   : > { %16221 = vst [vmem:[#allocation63_spill] sm:$0xff] %v12410_v14  ;;  %10557 = vmatprep.mubr.msk.bf16.mxu1 %vm1099_vm2, %v1178_v50  ;;  %v630_v54 = vsel %vm594_vm0, %v11836_v43, %v629_v36  ;;  %3718 = vmatprep.subr.bf16.mxu1 %v16204_v53  ;;  %v651_v50 = vshll.u32 %v12410_v14, 16  ;;  %v12447_v43 = vcombine.high %v11976_v44, %v11979_v52  ;;  %v12450_v36 = vld [vmem:[%s11769_s6 + $0x100] sm:$0x11]  ;;  %v12453_v14 = vld [vmem:[%s11769_s6 + $0x118] sm:$0x11] }
  0x5f   : > { %v1184_v37 = vsel %vm1136_vm1, %v16222_v39, %v1183_v47  ;;  %v1189_v47 = vrot.slane %v12418_v23, 1  ;;  %v12439_v39 = vcombine.high %v12383_v26, %v12383_v26  ;;  %v2842_v24 = vrot.slane %v2840_v25, 1  ;;  %v11326_v44 = vld [vmem:[%s15919_s1 + $0x40] sm:$0xff]   ;;  %1711 = vmatpush1.bf16.msra.mxu0 %v11325_v40 }
  0x60   : > { %v2847_v41 = vrot.slane %v2845_v45, 1  ;;  %16223 = vst [vmem:[#allocation64_spill] sm:$0xff] %v12447_v43  ;;  %v653_v35 = vrot.slane %v651_v50, 1  ;;  %v16224_v25 = vrot.slane %v12298_v57, 1  ;;  %v12462_v17 = vcombine.high %v11994_v27, %v11994_v27  ;;  %1712 = vmatprep.subr.bf16.mxu0 %v16204_v53 }
  0x61   : > { %3719 = vmatpush1.bf16.msra.mxu1 %v11259_v16  ;;  %v1195_v9 = vrot.slane %v12439_v39, 1  ;;  %1031 = vrot.lane.b32.xlu0 %v630_v54, %s11704_s9  ;;  %v12469_v52 = vor.u32 %v2842_v24, %v2838_v21  ;;  %v2862_v16 = vshrl.u32 %v12447_v43, 16  ;;  %v2864_v50 = vshll.u32 %v12447_v43, 16 }
  0x62   : > { %v1190_v45 = vsel %vm1136_vm1, %v16224_v25, %v1189_v47  ;;  %16225 = vst [vmem:[#allocation65_spill] sm:$0xff] %v12462_v17  ;;  %3720 = vmatprep.subr.bf16.mxu1 %v16204_v53  ;;  %v12475_v47 = vcombine.low %v12208_v48, %v12208_v48  ;;  %v654_v27 = vsel %vm594_vm0, %v11875_v62, %v653_v35  ;;  %v16228_v25 = vrot.slane %v12271_v0, 1  ;;  %v11266_v48 = vld [vmem:[%s15919_s1 + $0x158] sm:$0xff]  }
  0x63   : > { %16226 = vst [vmem:[#allocation66_spill] sm:$0xff] %v12469_v52  ;;  %v2869_v54 = vshll.u32 %v12462_v17, 16  ;;  %v2848_v24 = vsel %vm594_vm0, %v12469_v52, %v2847_v41  ;;  %v2866_v21 = vrot.slane %v2864_v50, 1  ;;  %v12494_v40 = vcombine.high %v12450_v36, %v12450_v36  ;;  %1713 = vmatpush1.bf16.msra.mxu0 %v11326_v44  ;;  %v11579_v50 = vld [vmem:[%s11769_s6 + $0x60] sm:$0xff]  ;;  %v11580_v41 = vld [vmem:[%s11769_s6 + $0x68] sm:$0xff] }
  0x64   : > { %16227 = vst [vmem:[#allocation67_spill] sm:$0xff] %v12475_v47  ;;  %v1196_v60 = vsel %vm1136_vm1, %v16228_v25, %v1195_v9  ;;  %10558 = vmatmul.mubr.msk.bf16.gmra.mrb[12].mxu1 %vm1099_vm2, %v1184_v37  ;;  %v675_v62 = vshll.u32 %v12475_v47, 16  ;;  %3079 = vrot.lane.b32.xlu1 %v2848_v24, %s11704_s9  ;;  %v12499_v37 = vcombine.high %v12453_v14, %v12453_v14  ;;  %v12507_v25 = vld [vmem:[%s11769_s6 + $0x130] sm:$0x11]  ;;  %v11272_v24 = vld [vmem:[%s15919_s1 + $0x160] sm:$0xff]   ;;  %v16236_v44 = vrot.slane %v12447_v43, 1 }
  0x65   : > { %3721 = vmatpush1.bf16.msra.mxu1 %v11262_v49  ;;  %v2871_v9 = vrot.slane %v2869_v54, 1  ;;  %1035 = vrot.lane.b32.xlu0 %v654_v27, %s11704_s9  ;;  %v12503_v35 = vor.u32 %v2866_v21, %v2862_v16  ;;  %v1201_v54 = vrot.slane %v12494_v40, 1  ;;  %v12521_v16 = vcombine.high %v11966_v30, %v11966_v30  ;;  %v11330_v21 = vld [vmem:[%s15919_s1 + $0x48] sm:$0xff]  }
  0x66   : > { %16229 = vst [vmem:[#allocation68_spill] sm:$0xff] %v12499_v37  ;;  %10561 = vmatprep.mubr.msk.bf16.mxu1 %vm1099_vm2, %v1190_v45  ;;  %v677_v49 = vrot.slane %v675_v62, 1  ;;  %3722 = vmatprep.subr.bf16.mxu1 %v16204_v53  ;;  %v1207_v27 = vrot.slane %v12499_v37, 1  ;;  %v12517_v45 = vcombine.high %v11954_v18, %v11957_v19  ;;  %v12530_v17 = vcombine.low %v11579_v50, %v11580_v41  ;;  %v11293_v52 = vld [vmem:[%s15919_s1 + $0x188] sm:$0xff]  }
  0x67   : > { %16230 = vst [vmem:[#allocation69_spill] sm:$0xff] %v12503_v35  ;;  %16232 = vst [vmem:[#allocation71_spill] sm:$0xff] %v12521_v16  ;;  %v2872_v62 = vsel %vm594_vm0, %v12503_v35, %v2871_v9  ;;  %v12534_v18 = vcombine.low %v12285_v6, %v12285_v6  ;;  %1714 = vmatprep.subr.bf16.mxu0 %v16204_v53  ;;  %v16235_v19 = vrot.slane %v12402_v8, 1  ;;  %v12549_v6 = vld [vmem:[%s11769_s6 + $0x148] sm:$0x11] }
  0x68   : > { %16231 = vst [vmem:[#allocation70_spill] sm:$0xff] %v12517_v45  ;;  %16233 = vst [vmem:[#allocation72_spill] sm:$0xff] %v12530_v17  ;;  %3083 = vrot.lane.b32.xlu1 %v2872_v62, %s11704_s9  ;;  %v12544_v9 = vsel %vm1136_vm1, %v16236_v44, %v1207_v27  ;;  %v2886_v41 = vshrl.u32 %v12517_v45, 16  ;;  %v2888_v50 = vshll.u32 %v12517_v45, 16  ;;  %v2893_v62 = vshll.u32 %v12521_v16, 16  ;;  %v11274_v27 = vld [vmem:[%s15919_s1 + $0x168] sm:$0xff]   ;;  %1715 = vmatpush1.bf16.msra.mxu0 %v11330_v21 }
  0x69   : > { %16234 = vst [vmem:[#allocation73_spill] sm:$0xff] %v12534_v18  ;;  %3723 = vmatpush1.bf16.msra.mxu1 %v11266_v48  ;;  %v1202_v30 = vsel %vm1136_vm1, %v16235_v19, %v1201_v54  ;;  %v678_v48 = vsel %vm594_vm0, %v11831_v38, %v677_v49  ;;  %v692_v54 = vshrl.u32 %v12530_v17, 16  ;;  %v694_v19 = vshll.u32 %v12530_v17, 16  ;;  %v11331_v49 = vld [vmem:[%s15919_s1 + $0x50] sm:$0xff]   ;;  %v12580_v17 = vld [vmem:[%s11769_s6 + $0x160] sm:$0x11]  ;;  %1716 = vmatprep.subr.bf16.mxu0 %v16204_v53 }
  0x6a   : > { %3724 = vmatprep.subr.bf16.mxu1 %v16204_v53  ;;  %1039 = vrot.lane.b32.xlu0 %v678_v48, %s11704_s9  ;;  %v2890_v44 = vrot.slane %v2888_v50, 1  ;;  %v699_v47 = vshll.u32 %v12534_v18, 16  ;;  %v12564_v43 = vcombine.high %v12507_v25, %v12507_v25  ;;  %v2895_v48 = vrot.slane %v2893_v62, 1  ;;  %v11590_v37 = vld [vmem:[%s11769_s6 + $0xa8] sm:$0xff] }
  0x6b   : > { %v696_v16 = vrot.slane %v694_v19, 1  ;;  %v12573_v50 = vcombine.high %v12013_v32, %v12016_v3  ;;  %v12577_v18 = vcombine.high %v12549_v6, %v12549_v6  ;;  %v16241_v19 = vld [vmem:[#allocation32_spill] sm:$0xff] }
  0x6c   : > { %16237 = vst [vmem:[#allocation74_spill] sm:$0xff] %v12564_v43  ;;  %10562 = vmatmul.mubr.msk.bf16.gmra.mrb[16].mxu1 %vm1099_vm2, %v1196_v60  ;;  %v12584_v21 = vor.u32 %v2890_v44, %v2886_v41  ;;  %v701_v60 = vrot.slane %v699_v47, 1  ;;  %v1213_v62 = vrot.slane %v12564_v43, 1  ;;  %v12589_v32 = vcombine.high %v16241_v19, %v16241_v19  ;;  %v11335_v3 = vld [vmem:[%s15919_s1 + $0x58] sm:$0xff]   ;;  %v11282_v43 = vld [vmem:[%s15919_s1 + $0x170] sm:$0xff]   ;;  %1717 = vmatpush1.bf16.msra.mxu0 %v11331_v49 }
  0x6d   : > { %16238 = vst [vmem:[#allocation75_spill] sm:$0xff] %v12573_v50  ;;  %16239 = vst [vmem:[#allocation76_spill] sm:$0xff] %v12577_v18  ;;  %10565 = vmatprep.mubr.msk.bf16.mxu1 %vm1099_vm2, %v1202_v30  ;;  %3725 = vmatpush1.bf16.msra.mxu1 %v11272_v24  ;;  %v697_v38 = vor.u32 %v696_v16, %v692_v54  ;;  %v1219_v30 = vrot.slane %v12577_v18, 1  ;;  %v2910_v47 = vshrl.u32 %v12573_v50, 16  ;;  %v12599_v41 = vld [vmem:[%s11769_s6 + $0x178] sm:$0x11] }
  0x6e   : > { %16240 = vst [vmem:[#allocation77_spill] sm:$0xff] %v12584_v21  ;;  %16242 = vst [vmem:[#allocation32_spill] sm:$0xff] %v12589_v32  ;;  %3726 = vmatprep.subr.bf16.mxu1 %v16204_v53  ;;  %v2896_v44 = vsel %vm594_vm0, %v12584_v21, %v2895_v48  ;;  %v16243_v19 = vrot.slane %v12517_v45, 1  ;;  %v2912_v16 = vshll.u32 %v12573_v50, 16  ;;  %v2917_v54 = vshll.u32 %v12589_v32, 16  ;;  %1718 = vmatprep.subr.bf16.mxu0 %v16204_v53 }
  0x6f   : > { %3087 = vrot.lane.b32.xlu1 %v2896_v44, %s11704_s9  ;;  %v702_v24 = vsel %vm594_vm0, %v697_v38, %v701_v60  ;;  %v16244_v18 = vrot.slane %v12573_v50, 1  ;;  %v12624_v21 = vcombine.low %v12301_v42, %v12301_v42  ;;  %v16247_v38 = vld [vmem:[#allocation29_spill] sm:$0xff]  ;;  %v16248_v60 = vld [vmem:[#allocation27_spill] sm:$0xff] }
  0x70   : > { %v1214_v35 = vsel %vm1136_vm1, %v16243_v19, %v1213_v62  ;;  %v11581_v62 = vld [vmem:[%s11769_s6 + $0x78] sm:$0xff]  ;;  %v11582_v19 = vld [vmem:[%s11769_s6 + $0x80] sm:$0xff]  ;;  %1043 = vrot.lane.b32.xlu0 %v702_v24, %s11704_s9  ;;  %v2914_v49 = vrot.slane %v2912_v16, 1  ;;  %v2919_v44 = vrot.slane %v2917_v54, 1  ;;  %v12629_v32 = vcombine.high %v16248_v60, %v16247_v38  ;;  %v12644_v16 = vld [vmem:[%s11769_s6 + $0x190] sm:$0x11]  ;;  %1719 = vmatpush1.bf16.msra.mxu0 %v11335_v3 }
  0x71   : > { %v12616_v48 = vsel %vm1136_vm1, %v16244_v18, %v1219_v30  ;;  %v12620_v45 = vcombine.low %v11581_v62, %v11582_v19  ;;  %16246 = vst [vmem:[#allocation79_spill] sm:$0xff] %v12624_v21  ;;  %3727 = vmatpush1.bf16.msra.mxu1 %v11274_v27  ;;  %v12633_v18 = vcombine.high %v12580_v17, %v12580_v17  ;;  %v723_v27 = vshll.u32 %v12624_v21, 16  ;;  %v11283_v54 = vld [vmem:[%s15919_s1 + $0x178] sm:$0xff]   ;;  %v11583_v19 = vld [vmem:[%s11769_s6 + $0x160] sm:$0x11] }
  0x72   : > { %16249 = vst [vmem:[#allocation29_spill] sm:$0xff] %v12629_v32  ;;  %3728 = vmatprep.subr.bf16.mxu1 %v16204_v53  ;;  %v12641_v24 = vcombine.high %v12048_v5, %v12057_v22  ;;  %v12650_v62 = vor.u32 %v2914_v49, %v2910_v47  ;;  %v12656_v60 = vcombine.high %v12599_v41, %v12599_v41  ;;  %v11336_v5 = vld [vmem:[%s15919_s1 + $0x60] sm:$0xff]   ;;  %v11585_v49 = vld [vmem:[%s11769_s6 + $0x98] sm:$0xff] }
  0x73   : > { %16245 = vst [vmem:[#allocation78_spill] sm:$0xff] %v12620_v45  ;;  %16250 = vst [vmem:[#allocation27_spill] sm:$0xff] %v12633_v18  ;;  %v716_v30 = vshrl.u32 %v12620_v45, 16  ;;  %v718_v42 = vshll.u32 %v12620_v45, 16  ;;  %v1225_v38 = vrot.slane %v12633_v18, 1  ;;  %v725_v47 = vrot.slane %v723_v27, 1  ;;  %1720 = vmatprep.subr.bf16.mxu0 %v16204_v53 }
  0x74   : > { %16251 = vst [vmem:[#allocation80_spill] sm:$0xff] %v12641_v24  ;;  %16252 = vst [vmem:[#allocation81_spill] sm:$0xff] %v12650_v62  ;;  %10566 = vmatmul.mubr.msk.bf16.gmra.mrb[20].mxu1 %vm1099_vm2, %v12544_v9  ;;  %v12665_v21 = vcombine.high %v11583_v19, %v11583_v19  ;;  %v2920_v3 = vsel %vm594_vm0, %v12650_v62, %v2919_v44  ;;  %v16255_v45 = vrot.slane %v12629_v32, 1  ;;  %v2934_v27 = vshrl.u32 %v12629_v32, 16  ;;  %v12677_v19 = vld [vmem:[%s11769_s6 + $0x1a8] sm:$0x11] }
  0x75   : > { %16253 = vst [vmem:[#allocation82_spill] sm:$0xff] %v12656_v60  ;;  %v720_v22 = vrot.slane %v718_v42, 1  ;;  %10569 = vmatprep.mubr.msk.bf16.mxu1 %vm1099_vm2, %v1214_v35  ;;  %3729 = vmatpush1.bf16.msra.mxu1 %v11282_v43  ;;  %v1231_v42 = vrot.slane %v12656_v60, 1  ;;  %v11339_v35 = vld [vmem:[%s15919_s1 + $0x68] sm:$0xff]   ;;  %v2936_v44 = vshll.u32 %v12629_v32, 16  ;;  %v16257_v60 = vrot.slane %v12641_v24, 1 }
  0x76   : > { %16254 = vst [vmem:[#allocation83_spill] sm:$0xff] %v12665_v21  ;;  %v1226_v9 = vsel %vm1136_vm1, %v16255_v45, %v1225_v38  ;;  %3730 = vmatprep.subr.bf16.mxu1 %v16204_v53  ;;  %3091 = vrot.lane.b32.xlu1 %v2920_v3, %s11704_s9  ;;  %v2941_v45 = vshll.u32 %v12665_v21, 16  ;;  %v11584_v38 = vld [vmem:[%s11769_s6 + $0x90] sm:$0xff]  ;;  %v11291_v62 = vld [vmem:[%s15919_s1 + $0x180] sm:$0xff]   ;;  %v12706_v3 = vld [vmem:[%s11769_s6 + $0x188] sm:$0xff] }
  0x77   : > { %v721_v43 = vor.u32 %v720_v22, %v716_v30  ;;  %v12688_v50 = vcombine.low %v11584_v38, %v11585_v49  ;;  %v12693_v18 = vsel %vm1136_vm1, %v16257_v60, %v1231_v42  ;;  %v12700_v30 = vcombine.low %v12323_v56, %v12323_v56  ;;  %v12703_v22 = vld [vmem:[%s11769_s6 + $0x180] sm:$0xff]  ;;  %1721 = vmatpush1.bf16.msra.mxu0 %v11336_v5 }
  0x78   : > { %v12710_v49 = vcombine.high %v12703_v22, %v12706_v3  ;;  %v12714_v60 = vcombine.high %v12644_v16, %v12644_v16  ;;  %v2938_v38 = vrot.slane %v2936_v44, 1  ;;  %v2943_v56 = vrot.slane %v2941_v45, 1  ;;  %1722 = vmatprep.subr.bf16.mxu0 %v16204_v53  ;;  %v11589_v45 = vld [vmem:[%s11769_s6 + $0x178] sm:$0x11] }
  0x79   : > { %16256 = vst [vmem:[#allocation84_spill] sm:$0xff] %v12688_v50  ;;  %16258 = vst [vmem:[#allocation85_spill] sm:$0xff] %v12700_v30  ;;  %v726_v42 = vsel %vm594_vm0, %v721_v43, %v725_v47  ;;  %v740_v21 = vshrl.u32 %v12688_v50, 16  ;;  %3731 = vmatpush1.bf16.msra.mxu1 %v11283_v54  ;;  %v742_v32 = vshll.u32 %v12688_v50, 16  ;;  %v747_v8 = vshll.u32 %v12700_v30, 16  ;;  %v12728_v43 = vld [vmem:[%s11769_s6 + $0x198] sm:$0xff] }
  0x7a   : > { %16259 = vst [vmem:[#allocation86_spill] sm:$0xff] %v12710_v49  ;;  %16260 = vst [vmem:[#allocation87_spill] sm:$0xff] %v12714_v60  ;;  %1047 = vrot.lane.b32.xlu0 %v726_v42, %s11704_s9  ;;  %v1237_v5 = vrot.slane %v12714_v60, 1  ;;  %3732 = vmatprep.subr.bf16.mxu1 %v16204_v53  ;;  %v12725_v47 = vor.u32 %v2938_v38, %v2934_v27  ;;  %v12732_v44 = vcombine.high %v12728_v43, %v12086_v63 }
  0x7b   : > { %v12736_v54 = vcombine.high %v12677_v19, %v12677_v19  ;;  %v12739_v42 = vcombine.high %v11589_v45, %v11589_v45  ;;  %v744_v30 = vrot.slane %v742_v32, 1  ;;  %v749_v27 = vrot.slane %v747_v8, 1  ;;  %1723 = vmatpush1.bf16.msra.mxu0 %v11339_v35  ;;  %v11341_v45 = vld [vmem:[%s15919_s1 + $0x70] sm:$0xff]   ;;  %v11344_v8 = vld [vmem:[%s15919_s1 + $0x78] sm:$0xff]  }
  0x7c   : > { %16261 = vst [vmem:[#allocation88_spill] sm:$0xff] %v12725_v47  ;;  %16262 = vst [vmem:[#allocation89_spill] sm:$0xff] %v12732_v44  ;;  %v16265_v38 = vrot.slane %v12710_v49, 1  ;;  %v2958_v50 = vshrl.u32 %v12641_v24, 16  ;;  %10570 = vmatmul.mubr.msk.bf16.gmra.mrb[24].mxu1 %vm1099_vm2, %v12616_v48  ;;  %v2944_v32 = vsel %vm594_vm0, %v12725_v47, %v2943_v56  ;;  %1724 = vmatprep.subr.bf16.mxu0 %v16204_v53  ;;  %v11591_v48 = vld [vmem:[%s11769_s6 + $0xb0] sm:$0xff]  ;;  %v11595_v47 = vld [vmem:[%s11769_s6 + $0xc8] sm:$0xff] }
  0x7d   : > { %16263 = vst [vmem:[#allocation90_spill] sm:$0xff] %v12736_v54  ;;  %16264 = vst [vmem:[#allocation91_spill] sm:$0xff] %v12739_v42  ;;  %v1243_v60 = vrot.slane %v12736_v54, 1  ;;  %10573 = vmatprep.mubr.msk.bf16.mxu1 %vm1099_vm2, %v1226_v9  ;;  %3733 = vmatpush1.bf16.msra.mxu1 %v11291_v62  ;;  %v745_v35 = vor.u32 %v744_v30, %v740_v21  ;;  %v12765_v0 = vcombine.low %v11590_v37, %v11591_v48  ;;  %v11592_v9 = vld [vmem:[%s11769_s6 + $0x190] sm:$0x11] }
  0x7e   : > { %v12747_v63 = vsel %vm1136_vm1, %v16265_v38, %v1237_v5  ;;  %v2960_v5 = vshll.u32 %v12641_v24, 16  ;;  %v2965_v38 = vshll.u32 %v12739_v42, 16  ;;  %v12769_v56 = vcombine.low %v12333_v34, %v12333_v34  ;;  %3734 = vmatprep.subr.bf16.mxu1 %v16204_v53  ;;  %3095 = vrot.lane.b32.xlu1 %v2944_v32, %s11704_s9  ;;  %v11300_v42 = vld [vmem:[%s15919_s1 + $0x190] sm:$0xff]   ;;  %v11593_v24 = vld [vmem:[%s11769_s6 + $0x1a8] sm:$0x11] }
  0x7f   : > { %16266 = vst [vmem:[#allocation92_spill] sm:$0xff] %v12765_v0  ;;  %v16268_v21 = vrot.slane %v12732_v44, 1  ;;  %v12782_v30 = vcombine.high %v11592_v9, %v11592_v9  ;;  %v2982_v34 = vshrl.u32 %v12710_v49, 16  ;;  %v750_v48 = vsel %vm594_vm0, %v745_v35, %v749_v27  ;;  %1725 = vmatpush1.bf16.msra.mxu0 %v11341_v45  ;;  %v11314_v35 = vld [vmem:[%s11769_s6 + $0x1b4] ss:$8 sps:$4 sm:$0xff]  }
  0x80   : > { %16267 = vst [vmem:[#allocation93_spill] sm:$0xff] %v12769_v56  ;;  %v2962_v37 = vrot.slane %v2960_v5, 1  ;;  %v2967_v32 = vrot.slane %v2965_v38, 1  ;;  %v764_v54 = vshrl.u32 %v12765_v0, 16  ;;  %1051 = vrot.lane.b32.xlu0 %v750_v48, %s11704_s9  ;;  %v2984_v9 = vshll.u32 %v12710_v49, 16  ;;  %1726 = vmatprep.subr.bf16.mxu0 %v16204_v53 }
  0x81   : > { %v12779_v62 = vsel %vm1136_vm1, %v16268_v21, %v1243_v60  ;;  %16269 = vst [vmem:[#allocation94_spill] sm:$0xff] %v12782_v30  ;;  %v766_v60 = vshll.u32 %v12765_v0, 16  ;;  %v771_v21 = vshll.u32 %v12769_v56, 16  ;;  %v2989_v27 = vshll.u32 %v12782_v30, 16  ;;  %3735 = vmatpush1.bf16.msra.mxu1 %v11293_v52 }
  0x82   : > { %v12792_v5 = vor.u32 %v2962_v37, %v2958_v50  ;;  %v12800_v0 = vcombine.high %v11593_v24, %v11593_v24  ;;  %v3006_v45 = vshrl.u32 %v12732_v44, 16  ;;  %v3008_v50 = vshll.u32 %v12732_v44, 16  ;;  %3736 = vmatprep.subr.bf16.mxu1 %v16204_v53  ;;  %v11305_v24 = vld [vmem:[%s15919_s1 + $0x198] sm:$0xff]   ;;  %v11594_v44 = vld [vmem:[%s11769_s6 + $0xc0] sm:$0xff] }
  0x83   : > { %v768_v38 = vrot.slane %v766_v60, 1  ;;  %v773_v48 = vrot.slane %v771_v21, 1  ;;  %v2986_v30 = vrot.slane %v2984_v9, 1  ;;  %v2991_v56 = vrot.slane %v2989_v27, 1  ;;  %1727 = vmatpush1.bf16.msra.mxu0 %v11344_v8  ;;  %v11596_v21 = vld [vmem:[%s11769_s6 + $0x1c0] sm:$0x11] }
  0x84   : > { %16270 = vst [vmem:[#allocation95_spill] sm:$0xff] %v12800_v0  ;;  %v2968_v37 = vsel %vm594_vm0, %v12792_v5, %v2967_v32  ;;  %v3010_v60 = vrot.slane %v3008_v50, 1  ;;  %v3013_v49 = vshll.u32 %v12800_v0, 16  ;;  %v12814_v55 = vcombine.low %v11594_v44, %v11595_v47  ;;  %10574 = vmatmul.mubr.msk.bf16.gmra.mrb[28].mxu1 %vm1099_vm2, %v12693_v18  ;;  %1873 = vmatprep.subr.bf16.mxu0 %v16204_v53 }
  0x85   : > { %3099 = vrot.lane.b32.xlu1 %v2968_v37, %s11704_s9  ;;  %v769_v52 = vor.u32 %v768_v38, %v764_v54  ;;  %v12818_v32 = vor.u32 %v2986_v30, %v2982_v34  ;;  %v12822_v54 = vcombine.low %v12354_v58, %v12354_v58  ;;  %v12825_v9 = vcombine.high %v11596_v21, %v11596_v21  ;;  %v11597_v38 = vld [vmem:[%s11769_s6 + $0xd8] sm:$0xff] }
  0x86   : > { %v3030_v27 = vshrl.u32 %v11314_v35, 16  ;;  %10577 = vmatprep.mubr.msk.bf16.mxu1 %vm1099_vm2, %v12747_v63  ;;  %3737 = vmatpush1.bf16.msra.mxu1 %v11300_v42  ;;  %v12831_v47 = vor.u32 %v3010_v60, %v3006_v45  ;;  %v3015_v44 = vrot.slane %v3013_v49, 1  ;;  %v788_v58 = vshrl.u32 %v12814_v55, 16  ;;  %v11598_v45 = vld [vmem:[%s11769_s6 + $0xe0] sm:$0xff]  ;;  %v11599_v60 = vld [vmem:[%s11769_s6 + $0xf0] sm:$0xff] }
  0x87   : > { %16271 = vst [vmem:[#allocation96_spill] sm:$0xff] %v12822_v54  ;;  %16272 = vst [vmem:[#allocation97_spill] sm:$0xff] %v12825_v9  ;;  %v774_v18 = vsel %vm594_vm0, %v769_v52, %v773_v48  ;;  %3738 = vmatprep.subr.bf16.mxu1 %v16204_v53  ;;  %v2992_v8 = vsel %vm594_vm0, %v12818_v32, %v2991_v56  ;;  %v790_v63 = vshll.u32 %v12814_v55, 16  ;;  %v795_v42 = vshll.u32 %v12822_v54, 16 }
  0x88   : > { %1055 = vrot.lane.b32.xlu0 %v774_v18, %s11704_s9  ;;  %v3032_v30 = vshll.u32 %v11314_v35, 16  ;;  %v3016_v49 = vsel %vm594_vm0, %v12831_v47, %v3015_v44  ;;  %v3037_v34 = vshll.u32 %v12825_v9, 16  ;;  %v12846_v50 = vcombine.low %v11597_v38, %v11598_v45  ;;  %v11600_v35 = vld [vmem:[%s11769_s6 + $0xf8] sm:$0xff] }
  0x89   : > { %3103 = vrot.lane.b32.xlu1 %v2992_v8, %s11704_s9  ;;  %v12850_v37 = vcombine.low %v12383_v26, %v12383_v26  ;;  %v792_v56 = vrot.slane %v790_v63, 1  ;;  %v797_v48 = vrot.slane %v795_v42, 1  ;;  %v12854_v21 = vcombine.low %v11599_v60, %v11600_v35  ;;  %v11601_v60 = vld [vmem:[%s11769_s6 + $0x108] sm:$0xff]  ;;  %v11602_v35 = vld [vmem:[%s11769_s6 + $0x110] sm:$0xff] }
  0x8a   : > { %v3034_v52 = vrot.slane %v3032_v30, 1  ;;  %3739 = vmatpush1.bf16.msra.mxu1 %v11305_v24  ;;  %v3039_v18 = vrot.slane %v3037_v34, 1  ;;  %v812_v44 = vshrl.u32 %v12846_v50, 16  ;;  %v814_v8 = vshll.u32 %v12846_v50, 16 }
  0x8b   : > { %16273 = vst [vmem:[#allocation98_spill] sm:$0xff] %v12850_v37  ;;  %v819_v38 = vshll.u32 %v12850_v37, 16  ;;  %3885 = vmatprep.subr.bf16.mxu1 %v16204_v53  ;;  %v793_v26 = vor.u32 %v792_v56, %v788_v58  ;;  %v12862_v42 = vcombine.low %v12450_v36, %v12450_v36  ;;  %v836_v30 = vshrl.u32 %v12854_v21, 16  ;;  %v11611_v37 = vld [vmem:[%s11769_s6 + $0x170] sm:$0xff] }
  0x8c   : > { %v3035_v63 = vor.u32 %v3034_v52, %v3030_v27  ;;  %v816_v24 = vrot.slane %v814_v8, 1  ;;  %v838_v45 = vshll.u32 %v12854_v21, 16  ;;  %v12869_v9 = vcombine.low %v11601_v60, %v11602_v35  ;;  %10578 = vmatmul.mubr.msk.bf16.gmra.mrb[32].mxu1 %vm1099_vm2, %v12779_v62  ;;  %v11605_v60 = vld [vmem:[%s11769_s6 + $0x138] sm:$0xff]  ;;  %v11606_v35 = vld [vmem:[%s11769_s6 + $0x140] sm:$0xff] }
  0x8d   : > { %16274 = vst [vmem:[#allocation99_spill] sm:$0xff] %v12862_v42  ;;  %3107 = vrot.lane.b32.xlu1 %v3016_v49, %s11704_s9  ;;  %v821_v34 = vrot.slane %v819_v38, 1  ;;  %v798_v36 = vsel %vm594_vm0, %v793_v26, %v797_v48  ;;  %v843_v58 = vshll.u32 %v12862_v42, 16  ;;  %v12878_v49 = vcombine.low %v12453_v14, %v12453_v14  ;;  %v11604_v26 = vld [vmem:[%s11769_s6 + $0x128] sm:$0xff] }
  0x8e   : > { %v3040_v27 = vsel %vm594_vm0, %v3035_v63, %v3039_v18  ;;  %1059 = vrot.lane.b32.xlu0 %v798_v36, %s11704_s9  ;;  %v817_v56 = vor.u32 %v816_v24, %v812_v44  ;;  %v840_v52 = vrot.slane %v838_v45, 1  ;;  %v860_v8 = vshrl.u32 %v12869_v9, 16  ;;  %v11603_v18 = vld [vmem:[%s11769_s6 + $0x120] sm:$0xff]  ;;  %v11610_v42 = vld [vmem:[%s11769_s6 + $0x168] sm:$0xff] }
  0x8f   : > { %16275 = vst [vmem:[#allocation100_spill] sm:$0xff] %v12878_v49  ;;  %v862_v62 = vshll.u32 %v12869_v9, 16  ;;  %v845_v38 = vrot.slane %v843_v58, 1  ;;  %v867_v48 = vshll.u32 %v12878_v49, 16  ;;  %v12886_v63 = vcombine.low %v11603_v18, %v11604_v26  ;;  %v11308_v58 = vld [vmem:[%s15919_s1 + $0x1a0] sm:$0xff]  }
  0x90   : > { %v12890_v14 = vcombine.low %v12507_v25, %v12507_v25  ;;  %v822_v44 = vsel %vm594_vm0, %v817_v56, %v821_v34  ;;  %v841_v24 = vor.u32 %v840_v52, %v836_v30  ;;  %v12896_v36 = vcombine.low %v11605_v60, %v11606_v35  ;;  %v12904_v34 = vpop.permute.xlu1 %3049 }
  0x91   : > { %3111 = vrot.lane.b32.xlu1 %v3040_v27, %s11704_s9  ;;  %v864_v45 = vrot.slane %v862_v62, 1  ;;  %v869_v18 = vrot.slane %v867_v48, 1  ;;  %v884_v26 = vshrl.u32 %v12886_v63, 16  ;;  %v886_v25 = vshll.u32 %v12886_v63, 16  ;;  %v12912_v48 = vpop.permute.xlu0 %3041 }
  0x92   : > { %16276 = vst [vmem:[#allocation101_spill] sm:$0xff] %v12890_v14  ;;  %16277 = vst [vmem:[#allocation102_spill] sm:$0xff] %v12896_v36  ;;  %v891_v27 = vshll.u32 %v12890_v14, 16  ;;  %v846_v30 = vsel %vm594_vm0, %v841_v24, %v845_v38  ;;  %v12909_v52 = vcombine.low %v12549_v6, %v12549_v6  ;;  %v908_v62 = vshrl.u32 %v12896_v36, 16  ;;  %v12917_v14 = vld [vmem:[%s11769_s6 + $0x1c] ss:$8 sps:$4 sm:$0xff]  }
  0x93   : > { %v865_v56 = vor.u32 %v864_v45, %v860_v8  ;;  %1067 = vrot.lane.b32.xlu0 %v846_v30, %s11704_s9  ;;  %v888_v60 = vrot.slane %v886_v25, 1  ;;  %v910_v0 = vshll.u32 %v12896_v36, 16  ;;  %v3276_v6 = vsel %vm1099_vm2, %v12917_v14, %v12912_v48  ;;  %v11608_v24 = vld [vmem:[%s11769_s6 + $0x150] sm:$0xff]  ;;  %v11609_v45 = vld [vmem:[%s11769_s6 + $0x158] sm:$0xff] }
  0x94   : > { %16278 = vst [vmem:[#allocation103_spill] sm:$0xff] %v12909_v52  ;;  %v893_v35 = vrot.slane %v891_v27, 1  ;;  %v915_v38 = vshll.u32 %v12909_v52, 16  ;;  %v12927_v25 = vcombine.low %v11608_v24, %v11609_v45  ;;  %3740 = vmatprep.mubr.bf16.mxu1 %v3276_v6  ;;  %v12931_v49 = vcombine.low %v12580_v17, %v12580_v17  ;;  %v12957_v24 = vld [vmem:[%s11769_s6 + $0x34] ss:$8 sps:$4 sm:$0xff]  }
  0x95   : > { %1063 = vrot.lane.b32.xlu1 %v822_v44, %s11704_s9  ;;  %v870_v8 = vsel %vm594_vm0, %v865_v56, %v869_v18  ;;  %v889_v27 = vor.u32 %v888_v60, %v884_v26  ;;  %v912_v30 = vrot.slane %v910_v0, 1  ;;  %v12935_v54 = vcombine.low %v11610_v42, %v11611_v37  ;;  %v12938_v44 = vld [vmem:[%s11769_s6 + $0x18] ss:$8 sps:$4 sm:$0xff]   ;;  %v12941_v18 = vpop.permute.xlu1 %3053  ;;  %v12949_v26 = vpop.permute.xlu0 %3045  ;;  %v11317_v37 = vld [vmem:[%s15919_s1 + $0x1a8] sm:$0xff]  }
  0x96   : > { %16279 = vst [vmem:[#allocation104_spill] sm:$0xff] %v12927_v25  ;;  %16280 = vst [vmem:[#allocation105_spill] sm:$0xff] %v12931_v49  ;;  %3741 = vmatmul.mubr.bf16.vlgmr.msra.gmra.mrb[36].mxu1 %v12938_v44  ;;  %v917_v56 = vrot.slane %v915_v38, 1  ;;  %v932_v6 = vshrl.u32 %v12927_v25, 16  ;;  %v934_v0 = vshll.u32 %v12927_v25, 16  ;;  %v12947_v17 = vcombine.low %v12599_v41, %v12599_v41 }
  0x97   : > { %16281 = vst [vmem:[#allocation106_spill] sm:$0xff] %v12935_v54  ;;  %16282 = vst [vmem:[#allocation107_spill] sm:$0xff] %v12941_v18  ;;  %3886 = vmatpush1.bf16.msra.mxu1 %v11308_v58  ;;  %v894_v42 = vsel %vm594_vm0, %v889_v27, %v893_v35  ;;  %v913_v60 = vor.u32 %v912_v30, %v908_v62  ;;  %v939_v38 = vshll.u32 %v12931_v49, 16  ;;  %v956_v45 = vshrl.u32 %v12935_v54, 16 }
  0x98   : > { %16283 = vst [vmem:[#allocation108_spill] sm:$0xff] %v12947_v17  ;;  %v3279_v41 = vsel %vm1099_vm2, %v12957_v24, %v12949_v26  ;;  %3887 = vmatprep.subr.bf16.mxu1 %v16204_v53  ;;  %v936_v58 = vrot.slane %v934_v0, 1  ;;  %v958_v52 = vshll.u32 %v12935_v54, 16  ;;  %1075 = vrot.lane.b32.xlu0 %v894_v42, %s11704_s9  ;;  %v963_v27 = vshll.u32 %v12947_v17, 16  ;;  %v11614_v0 = vld [vmem:[%s11769_s6 + $0x1a0] sm:$0xff] }
  0x99   : > { %1071 = vrot.lane.b32.xlu1 %v870_v8, %s11704_s9  ;;  %3748 = vmatprep.mubr.bf16.mxu1 %v3279_v41  ;;  %v918_v62 = vsel %vm594_vm0, %v913_v60, %v917_v56  ;;  %v941_v35 = vrot.slane %v939_v38, 1  ;;  %v12971_v30 = vcombine.low %v12703_v22, %v12706_v3  ;;  %v12975_v8 = vcombine.low %v12644_v16, %v12644_v16  ;;  %v11322_v22 = vld [vmem:[%s15919_s1 + $0x1b0] sm:$0xff]   ;;  %v13151_v54 = vld [vmem:[%s11769_s6 + $0x58] sm:$0x11] }
  0x9a   : > { %v937_v49 = vor.u32 %v936_v58, %v932_v6  ;;  %v960_v25 = vrot.slane %v958_v52, 1  ;;  %v12979_v41 = vcombine.low %v12728_v43, %v11614_v0  ;;  %v3282_v56 = vsel %vm1099_vm2, %v11795_v15, %v12904_v34  ;;  %v12989_v6 = vpop.permute.xlu1 %3061  ;;  %v12991_v42 = vpop.permute.xlu0 %3057  ;;  %v13005_v17 = vld [vmem:[%s11769_s6 + $0x30] ss:$8 sps:$4 sm:$0xff]  }
  0x9b   : > { %16284 = vst [vmem:[#allocation109_spill] sm:$0xff] %v12971_v30  ;;  %16285 = vst [vmem:[#allocation110_spill] sm:$0xff] %v12975_v8  ;;  %3888 = vmatpush1.bf16.msra.mxu1 %v11317_v37  ;;  %v965_v3 = vrot.slane %v963_v27, 1  ;;  %v980_v52 = vshrl.u32 %v12971_v30, 16  ;;  %v982_v16 = vshll.u32 %v12971_v30, 16  ;;  %v987_v60 = vshll.u32 %v12975_v8, 16 }
  0x9c   : > { %16286 = vst [vmem:[#allocation111_spill] sm:$0xff] %v12979_v41  ;;  %16287 = vst [vmem:[#allocation112_spill] sm:$0xff] %v12989_v6  ;;  %3889 = vmatprep.subr.bf16.mxu1 %v16204_v53  ;;  %v942_v43 = vsel %vm594_vm0, %v937_v49, %v941_v35  ;;  %v961_v37 = vor.u32 %v960_v25, %v956_v45  ;;  %v12999_v38 = vcombine.low %v12677_v19, %v12677_v19  ;;  %v11329_v49 = vld [vmem:[%s15919_s1 + $0x1b8] sm:$0xff]  }
  0x9d   : > { %16288 = vst [vmem:[#allocation113_spill] sm:$0xff] %v12991_v42  ;;  %1079 = vrot.lane.b32.xlu1 %v918_v62, %s11704_s9  ;;  %1083 = vrot.lane.b32.xlu0 %v942_v43, %s11704_s9  ;;  %v984_v58 = vrot.slane %v982_v16, 1  ;;  %v1004_v27 = vshrl.u32 %v12979_v41, 16  ;;  %v1006_v0 = vshll.u32 %v12979_v41, 16  ;;  %v989_v45 = vrot.slane %v987_v60, 1 }
  0x9e   : > { %16289 = vst [vmem:[#allocation114_spill] sm:$0xff] %v12999_v38  ;;  %3749 = vmatmul.mubr.bf16.gmra.mrb[40].mxu1 %v13005_v17  ;;  %v966_v25 = vsel %vm594_vm0, %v961_v37, %v965_v3  ;;  %v1011_v19 = vshll.u32 %v12999_v38, 16  ;;  %v13014_v62 = vld [vmem:[%s11769_s6 + $0x4] ss:$8 sps:$4 sm:$0xff]   ;;  %v13018_v41 = vpop.permute.xlu0 %3065  ;;  %v615_v37 = vshll.u32 %v12160_v61, 16  ;;  %v634_v60 = vshll.u32 %v12917_v14, 16 }
  0x9f   : > { %v608_v35 = vshrl.u32 %v13014_v62, 16  ;;  %3756 = vmatprep.mubr.bf16.mxu1 %v3282_v56  ;;  %3890 = vmatpush1.bf16.msra.mxu1 %v11322_v22  ;;  %v985_v16 = vor.u32 %v984_v58, %v980_v52  ;;  %v1008_v43 = vrot.slane %v1006_v0, 1  ;;  %v610_v8 = vshll.u32 %v13014_v62, 16  ;;  %16290 = vst [vmem:[#allocation115_spill] sm:$0xff] %v13018_v41  ;;  %v13025_v22 = vpop.permute.xlu1 %3069  ;;  %v11334_v52 = vld [vmem:[%s15919_s1 + $0x1c0] sm:$0xff]  }
  0xa0   : > { %3891 = vmatprep.subr.bf16.mxu1 %v16204_v53  ;;  %v1013_v3 = vrot.slane %v1011_v19, 1  ;;  %16291 = vst [vmem:[#allocation116_spill] sm:$0xff] %v13025_v22  ;;  %v632_v58 = vshrl.u32 %v12917_v14, 16  ;;  %v636_v0 = vrot.slane %v634_v60, 1 }
  0xa1   : > { %1087 = vrot.lane.b32.xlu1 %v966_v25, %s11704_s9  ;;  %v990_v38 = vsel %vm594_vm0, %v985_v16, %v989_v45  ;;  %v1009_v30 = vor.u32 %v1008_v43, %v1004_v27  ;;  %v612_v56 = vrot.slane %v610_v8, 1  ;;  %v639_v25 = vshll.u32 %v12171_v10, 16 }
  0xa2   : > { %1091 = vrot.lane.b32.xlu0 %v990_v38, %s11704_s9  ;;  %v617_v45 = vrot.slane %v615_v37, 1  ;;  %v658_v8 = vshll.u32 %v12957_v24, 16  ;;  %v13035_v27 = vpop.permute.xlu0 %3073  ;;  %v3285_v16 = vsel %vm1099_vm2, %v12136_v29, %v12941_v18  ;;  %v16293_v38 = vld [vmem:[#allocation5_spill] sm:$0xff]  ;;  %v637_v10 = vor.u32 %v636_v0, %v632_v58  ;;  %v11345_v0 = vld [vmem:[%s15919_s1 + $0x1d0] sm:$0xff]  }
  0xa3   : > { %3892 = vmatpush1.bf16.msra.mxu1 %v11329_v49  ;;  %v1014_v61 = vsel %vm594_vm0, %v1009_v30, %v1013_v3  ;;  %v613_v19 = vor.u32 %v612_v56, %v608_v35  ;;  %16292 = vst [vmem:[#allocation117_spill] sm:$0xff] %v13035_v27  ;;  %v641_v49 = vrot.slane %v639_v25, 1  ;;  %v656_v30 = vshrl.u32 %v12957_v24, 16  ;;  %v11340_v35 = vld [vmem:[%s15919_s1 + $0x1c8] sm:$0xff]   ;;  %v13049_v60 = vpop.permute.xlu1 %3077  ;;  %v11384_v18 = vld [vmem:[%s11769_s6 + $0x78] ss:$8 sps:$4 sm:$0xff]  }
  0xa4   : > { %3893 = vmatprep.subr.bf16.mxu1 %v16204_v53  ;;  %v660_v3 = vrot.slane %v658_v8, 1  ;;  %v663_v37 = vshll.u32 %v12234_v13, 16  ;;  %16294 = vst [vmem:[#allocation5_spill] sm:$0xff] %v13049_v60  ;;  %v3288_v13 = vsel %vm1099_vm2, %v12191_v28, %v12991_v42  ;;  %v16295_v8 = vld [vmem:[#allocation10_spill] sm:$0xff]  ;;  %v16305_v42 = vld [vmem:[#allocation59_spill] sm:$0xff] }
  0xa5   : > { %v618_v43 = vsel %vm594_vm0, %v613_v19, %v617_v45  ;;  %v642_v58 = vsel %vm594_vm0, %v637_v10, %v641_v49  ;;  %v11348_v10 = vld [vmem:[%s15919_s1 + $0x1d8] sm:$0xff]  }
  0xa6   : > { %3757 = vmatmul.mubr.bf16.gmra.mrb[44].mxu1 %v16293_v38  ;;  %1095 = vrot.lane.b32.xlu0 %v1014_v61, %s11704_s9  ;;  %v13052_v56 = vpop.permute.xlu0 %3081  ;;  %v661_v25 = vor.u32 %v660_v3, %v656_v30  ;;  %v665_v61 = vrot.slane %v663_v37, 1  ;;  %v735_v30 = vshll.u32 %v12342_v2, 16 }
  0xa7   : > { %3764 = vmatprep.mubr.bf16.mxu1 %v3285_v16  ;;  %3894 = vmatpush1.bf16.msra.mxu1 %v11334_v52  ;;  %v687_v52 = vshll.u32 %v12252_v12, 16  ;;  %v13066_v45 = vpop.permute.xlu1 %3085  ;;  %v711_v16 = vshll.u32 %v12329_v51, 16  ;;  %v11351_v51 = vld [vmem:[%s15919_s1 + $0x1e0] sm:$0xff]  }
  0xa8   : > { %3895 = vmatprep.subr.bf16.mxu1 %v16204_v53  ;;  %v666_v49 = vsel %vm594_vm0, %v661_v25, %v665_v61  ;;  %v737_v2 = vrot.slane %v735_v30, 1  ;;  %v783_v25 = vshll.u32 %v12380_v7, 16  ;;  %v16298_v61 = vld [vmem:[#allocation15_spill] sm:$0xff]  ;;  %v11356_v30 = vld [vmem:[%s15919_s1 + $0x1f8] sm:$0xff]  }
  0xa9   : > { %v689_v12 = vrot.slane %v687_v52, 1  ;;  %v759_v52 = vshll.u32 %v12370_v31, 16 }
  0xaa   : > { %1029 = vrot.lane.b32.xlu0 %v618_v43, %s11704_s9  ;;  %v713_v43 = vrot.slane %v711_v16, 1  ;;  %v11355_v16 = vld [vmem:[%s15919_s1 + $0x1f0] sm:$0xff]  }
  0xab   : > { %3896 = vmatpush1.bf16.msra.mxu1 %v11340_v35  ;;  %v13064_v19 = vpop.permute.xlu0 %3089  ;;  %v690_v3 = vsel %vm594_vm0, %v12167_v1, %v689_v12  ;;  %v13085_v37 = vpop.permute.xlu1 %3093  ;;  %v761_v31 = vrot.slane %v759_v52, 1  ;;  %v13130_v52 = vld [vmem:[%s11769_s6 + $0x40] sm:$0x11] }
  0xac   : > { %3897 = vmatprep.subr.bf16.mxu1 %v16204_v53  ;;  %16297 = vst [vmem:[#allocation118_spill] sm:$0xff] %v13085_v37 }
  0xae   : > { %3765 = vmatmul.mubr.bf16.gmra.mrb[48].mxu1 %v16295_v8  ;;  %1033 = vrot.lane.b32.xlu0 %v642_v58, %s11704_s9  ;;  %v3291_v58 = vsel %vm1099_vm2, %v12179_v20, %v12989_v6 }
  0xaf   : > { %3772 = vmatprep.mubr.bf16.mxu1 %v3288_v13  ;;  %3898 = vmatpush1.bf16.msra.mxu1 %v11345_v0  ;;  %v13077_v35 = vpop.permute.xlu0 %3097  ;;  %v11354_v0 = vld [vmem:[%s15919_s1 + $0x1e8] sm:$0xff]   ;;  %v714_v13 = vsel %vm594_vm0, %v12173_v59, %v713_v43  ;;  %v13103_v12 = vpop.permute.xlu1 %3101  ;;  %v3294_v59 = vsel %vm1099_vm2, %v12224_v33, %v13018_v41  ;;  %v807_v43 = vshll.u32 %v12418_v23, 16  ;;  %v13137_v23 = vcombine.low %v13130_v52, %v13130_v52 }
  0xb0   : > { %3899 = vmatprep.subr.bf16.mxu1 %v16204_v53  ;;  %16296 = vst [vmem:[#allocation10_spill] sm:$0xff] %v13077_v35  ;;  %16299 = vst [vmem:[#allocation119_spill] sm:$0xff] %v13103_v12 }
  0xb1   : > { %16301 = vst [vmem:[#allocation120_spill] sm:$0xff] %v13137_v23  ;;  %v809_v41 = vrot.slane %v807_v43, 1 }
  0xb2   : > { %1037 = vrot.lane.b32.xlu0 %v666_v49, %s11704_s9  ;;  %v785_v49 = vrot.slane %v783_v25, 1  ;;  %v3297_v25 = vsel %vm1099_vm2, %v12298_v57, %v13025_v22  ;;  %v11379_v22 = vld [vmem:[%s11769_s6 + $0x60] ss:$8 sps:$4 sm:$0xff]  }
  0xb3   : > { %3900 = vmatpush1.bf16.msra.mxu1 %v11348_v10  ;;  %v738_v10 = vsel %vm594_vm0, %v12263_v46, %v737_v2  ;;  %v11371_v46 = vld [vmem:[%s11769_s6 + $0x30] ss:$8 sps:$4 sm:$0xff]   ;;  %v762_v2 = vsel %vm594_vm0, %v12243_v11, %v761_v31  ;;  %v4629_v31 = vshll.u32 %v13137_v23, 16 }
  0xb4   : > { %3901 = vmatprep.subr.bf16.mxu1 %v16204_v53  ;;  %v16304_v23 = vld [vmem:[#allocation19_spill] sm:$0xff] }
  0xb5   : > { %v13098_v1 = vpop.permute.xlu0 %3105 }
  0xb6   : > { %3773 = vmatmul.mubr.bf16.gmra.mrb[52].mxu1 %v16298_v61  ;;  %1041 = vrot.lane.b32.xlu0 %v690_v3, %s11704_s9  ;;  %v16300_v3 = vld [vmem:[#allocation13_spill] sm:$0xff]  ;;  %v9649_v61 = vld [vmem:[%s11769_s6 + $0x88] sm:$0x11] }
  0xb7   : > { %3780 = vmatprep.mubr.bf16.mxu1 %v3291_v58  ;;  %3902 = vmatpush1.bf16.msra.mxu1 %v11351_v51  ;;  %v831_v51 = vshll.u32 %v12439_v39, 16  ;;  %v4624_v39 = vshll.u32 %v11371_v46, 16 }
  0xb8   : > { %3903 = vmatprep.subr.bf16.mxu1 %v16204_v53 }
  0xb9   : > { %v13106_v7 = vpop.permute.xlu0 %3043  ;;  %v4626_v11 = vrot.slane %v4624_v39, 1  ;;  %v833_v6 = vrot.slane %v831_v51, 1  ;;  %v13156_v39 = vcombine.low %v13151_v54, %v13151_v54 }
  0xba   : > { %1045 = vrot.lane.b32.xlu0 %v714_v13, %s11704_s9  ;;  %v4622_v13 = vshrl.u32 %v11371_v46, 16 }
  0xbb   : > { %3904 = vmatpush1.bf16.msra.mxu1 %v11354_v0  ;;  %v13132_v0 = vpop.permute.xlu1 %3109  ;;  %16302 = vst [vmem:[#allocation121_spill] sm:$0xff] %v13156_v39 }
  0xbc   : > { %3905 = vmatprep.subr.bf16.mxu1 %v16204_v53  ;;  %v4627_v46 = vor.u32 %v4626_v11, %v4622_v13  ;;  %v855_v13 = vshll.u32 %v12494_v40, 16  ;;  %v4672_v40 = vshll.u32 %v11379_v22, 16 }
  0xbd   : > { %v13125_v58 = vpop.permute.xlu0 %3051 }
  0xbe   : > { %3781 = vmatmul.mubr.bf16.gmra.mrb[56].mxu1 %v16300_v3  ;;  %1049 = vrot.lane.b32.xlu0 %v738_v10, %s11704_s9  ;;  %v11357_v10 = vld [vmem:[%s15919_s1 + $0x200] sm:$0xff]   ;;  %v857_v36 = vrot.slane %v855_v13, 1  ;;  %v4694_v13 = vshrl.u32 %v11384_v18, 16 }
  0xbf   : > { %3788 = vmatprep.mubr.bf16.mxu1 %v3294_v59  ;;  %3906 = vmatpush1.bf16.msra.mxu1 %v11355_v16  ;;  %v11375_v16 = vld [vmem:[%s11769_s6 + $0x48] ss:$8 sps:$4 sm:$0xff]   ;;  %v786_v59 = vsel %vm594_vm0, %v12275_v4, %v785_v49  ;;  %v13163_v51 = vpop.permute.xlu1 %3047 }
  0xc0   : > { %3907 = vmatprep.subr.bf16.mxu1 %v16204_v53  ;;  %v11358_v4 = vld [vmem:[%s15919_s1 + $0x208] sm:$0xff]   ;;  %v4646_v49 = vshrl.u32 %v11375_v16, 16  ;;  %v4648_v43 = vshll.u32 %v11375_v16, 16  ;;  %v9646_v16 = vld [vmem:[%s11769_s6 + $0x70] sm:$0x11] }
  0xc2   : > { %1053 = vrot.lane.b32.xlu0 %v762_v2, %s11704_s9  ;;  %v4631_v2 = vrot.slane %v4629_v31, 1  ;;  %v4653_v31 = vshll.u32 %v13156_v39, 16  ;;  %v4650_v3 = vrot.slane %v4648_v43, 1 }
  0xc3   : > { %3908 = vmatpush1.bf16.msra.mxu1 %v11356_v30  ;;  %v13158_v30 = vpop.permute.xlu0 %3059 }
  0xc4   : > { %3909 = vmatprep.subr.bf16.mxu1 %v16204_v53  ;;  %16303 = vst [vmem:[#allocation122_spill] sm:$0xff] %v13158_v30  ;;  %v4632_v11 = vsel %vm594_vm0, %v4627_v46, %v4631_v2  ;;  %v810_v30 = vsel %vm594_vm0, %v16305_v42, %v809_v41  ;;  %v16309_v2 = vld [vmem:[#allocation58_spill] sm:$0xff]  ;;  %v16310_v42 = vld [vmem:[#allocation68_spill] sm:$0xff]  ;;  %v4651_v39 = vor.u32 %v4650_v3, %v4646_v49 }
  0xc5   : > { %5053 = vrot.lane.b32.xlu1 %v4632_v11, %s11704_s9  ;;  %v834_v41 = vsel %vm594_vm0, %v16309_v2, %v833_v6  ;;  %v879_v43 = vshll.u32 %v16310_v42, 16  ;;  %v4670_v11 = vshrl.u32 %v11379_v22, 16  ;;  %v13194_v6 = vpop.permute.xlu1 %3055  ;;  %v11360_v49 = vld [vmem:[%s15919_s1 + $0x218] sm:$0xff]  }
  0xc6   : > { %3789 = vmatmul.mubr.bf16.gmra.mrb[60].mxu1 %v16304_v23  ;;  %1057 = vrot.lane.b32.xlu0 %v786_v59, %s11704_s9  ;;  %v4655_v59 = vrot.slane %v4653_v31, 1  ;;  %v13176_v23 = vcombine.low %v9646_v16, %v9646_v16  ;;  %v4674_v31 = vrot.slane %v4672_v40, 1  ;;  %16311 = vst [vmem:[#allocation58_spill] sm:$0xff] %v13194_v6  ;;  %v16314_v40 = vld [vmem:[#allocation17_spill] sm:$0xff]  ;;  %v11388_v42 = vld [vmem:[%s11769_s6 + $0x90] ss:$8 sps:$4 sm:$0xff]  }
  0xc7   : > { %3796 = vmatprep.mubr.bf16.mxu1 %v3297_v25  ;;  %3910 = vmatpush1.bf16.msra.mxu1 %v11357_v10  ;;  %v13178_v46 = vpop.permute.xlu0 %3067  ;;  %v16308_v25 = vld [vmem:[#allocation53_spill] sm:$0xff]  ;;  %v16321_v6 = vld [vmem:[#allocation76_spill] sm:$0xff] }
  0xc8   : > { %3911 = vmatprep.subr.bf16.mxu1 %v16204_v53  ;;  %16306 = vst [vmem:[#allocation59_spill] sm:$0xff] %v13176_v23  ;;  %16307 = vst [vmem:[#allocation123_spill] sm:$0xff] %v13178_v46  ;;  %v3300_v10 = vsel %vm1099_vm2, %v16308_v25, %v13035_v27  ;;  %v4677_v16 = vshll.u32 %v13176_v23, 16  ;;  %v11359_v46 = vld [vmem:[%s15919_s1 + $0x210] sm:$0xff]   ;;  %v4656_v27 = vsel %vm594_vm0, %v4651_v39, %v4655_v59  ;;  %v881_v39 = vrot.slane %v879_v43, 1  ;;  %v11361_v43 = vld [vmem:[%s15919_s1 + $0x80] sm:$0xff]  }
  0xc9   : > { %5057 = vrot.lane.b32.xlu1 %v4656_v27, %s11704_s9  ;;  %v4675_v22 = vor.u32 %v4674_v31, %v4670_v11  ;;  %v4696_v59 = vshll.u32 %v11384_v18, 16  ;;  %v11363_v27 = vld [vmem:[%s15919_s1 + $0x220] sm:$0xff]   ;;  %v16315_v18 = vld [vmem:[#allocation66_spill] sm:$0xff]  ;;  %v13229_v23 = vpop.permute.xlu1 %3063 }
  0xca   : > { %1061 = vrot.lane.b32.xlu0 %v810_v30, %s11704_s9  ;;  %v4679_v3 = vrot.slane %v4677_v16, 1  ;;  %v13198_v30 = vcombine.low %v9649_v61, %v9649_v61  ;;  %v858_v11 = vsel %vm594_vm0, %v16315_v18, %v857_v36  ;;  %v9652_v16 = vld [vmem:[%s11769_s6 + $0xa0] sm:$0x11]  ;;  %v16319_v36 = vld [vmem:[#allocation74_spill] sm:$0xff] }
  0xcb   : > { %3912 = vmatpush1.bf16.msra.mxu1 %v11358_v4  ;;  %v13200_v4 = vpop.permute.xlu0 %3075  ;;  %v4698_v31 = vrot.slane %v4696_v59, 1  ;;  %v903_v59 = vshll.u32 %v16319_v36, 16  ;;  %16320 = vst [vmem:[#allocation74_spill] sm:$0xff] %v13229_v23  ;;  %v927_v36 = vshll.u32 %v16321_v6, 16  ;;  %v16322_v23 = vld [vmem:[#allocation69_spill] sm:$0xff] }
  0xcc   : > { %3913 = vmatprep.subr.bf16.mxu1 %v16204_v53  ;;  %16312 = vst [vmem:[#allocation68_spill] sm:$0xff] %v13198_v30  ;;  %16313 = vst [vmem:[#allocation124_spill] sm:$0xff] %v13200_v4  ;;  %v4680_v61 = vsel %vm594_vm0, %v4675_v22, %v4679_v3  ;;  %v4701_v2 = vshll.u32 %v13198_v30, 16  ;;  %v13221_v22 = vcombine.low %v9652_v16, %v9652_v16  ;;  %v4720_v3 = vshll.u32 %v11388_v42, 16 }
  0xcd   : > { %5061 = vrot.lane.b32.xlu1 %v4680_v61, %s11704_s9  ;;  %v4699_v18 = vor.u32 %v4698_v31, %v4694_v13  ;;  %v9655_v13 = vld [vmem:[%s11769_s6 + $0xb8] sm:$0x11]  ;;  %v11617_v31 = vld [vmem:[%s11769_s6] ss:$8 sps:$4 sm:$0xff]   ;;  %v905_v6 = vrot.slane %v903_v59, 1 }
  0xce   : > { %3797 = vmatmul.mubr.bf16.gmra.mrb[64].mxu1 %v16314_v40  ;;  %1065 = vrot.lane.b32.xlu0 %v834_v41, %s11704_s9  ;;  %v4703_v41 = vrot.slane %v4701_v2, 1  ;;  %16316 = vst [vmem:[#allocation66_spill] sm:$0xff] %v13221_v22  ;;  %v4718_v2 = vshrl.u32 %v11388_v42, 16  ;;  %v4722_v16 = vrot.slane %v4720_v3, 1  ;;  %v4725_v4 = vshll.u32 %v13221_v22, 16  ;;  %v16330_v22 = vld [vmem:[#allocation81_spill] sm:$0xff] }
  0xcf   : > { %3804 = vmatprep.mubr.bf16.mxu1 %v3300_v10  ;;  %3914 = vmatpush1.bf16.msra.mxu1 %v11359_v46  ;;  %v13223_v46 = vpop.permute.xlu0 %1027  ;;  %v16318_v10 = vld [vmem:[#allocation61_spill] sm:$0xff]  ;;  %v11392_v40 = vld [vmem:[%s11769_s6 + $0xa8] ss:$8 sps:$4 sm:$0xff]  }
  0xd0   : > { %3915 = vmatprep.subr.bf16.mxu1 %v16204_v53  ;;  %16317 = vst [vmem:[#allocation125_spill] sm:$0xff] %v13223_v46  ;;  %v3303_v30 = vsel %vm1099_vm2, %v16318_v10, %v13049_v60  ;;  %v1265_v61 = vsel %vm1099_vm2, %v13014_v62, %v13223_v46  ;;  %v4704_v60 = vsel %vm594_vm0, %v4699_v18, %v4703_v41  ;;  %v4727_v42 = vrot.slane %v4725_v4, 1  ;;  %v13251_v18 = vpop.permute.xlu1 %3071  ;;  %v16325_v4 = vld [vmem:[#allocation23_spill] sm:$0xff] }
  0xd1   : > { %1728 = vmatprep.mubr.bf16.mxu0 %v1265_v61  ;;  %v882_v62 = vsel %vm594_vm0, %v16322_v23, %v881_v39  ;;  %v4723_v46 = vor.u32 %v4722_v16, %v4718_v2  ;;  %5065 = vrot.lane.b32.xlu1 %v4704_v60, %s11704_s9  ;;  %v4744_v41 = vshll.u32 %v11392_v40, 16  ;;  %v11396_v61 = vld [vmem:[%s11769_s6 + $0xc0] ss:$8 sps:$4 sm:$0xff]   ;;  %v929_v60 = vrot.slane %v927_v36, 1 }
  0xd2   : > { %1069 = vrot.lane.b32.xlu0 %v858_v11, %s11704_s9  ;;  %1729 = vmatmul.mubr.bf16.vlgmr.msra.gmra.mrb[0].mxu0 %v11617_v31  ;;  %v13243_v11 = vcombine.low %v9655_v13, %v9655_v13  ;;  %v16328_v31 = vld [vmem:[#allocation64_spill] sm:$0xff]  ;;  %v16329_v36 = vld [vmem:[#allocation77_spill] sm:$0xff] }
  0xd3   : > { %3916 = vmatpush1.bf16.msra.mxu1 %v11360_v49  ;;  %v13245_v3 = vpop.permute.xlu0 %1031  ;;  %1874 = vmatpush1.bf16.msra.mxu0 %v11361_v43  ;;  %v11362_v49 = vld [vmem:[%s15919_s1 + $0x88] sm:$0xff]   ;;  %v4728_v39 = vsel %vm594_vm0, %v4723_v46, %v4727_v42  ;;  %v4746_v59 = vrot.slane %v4744_v41, 1  ;;  %v3306_v46 = vsel %vm1099_vm2, %v16328_v31, %v13052_v56 }
  0xd4   : > { %10581 = vmatprep.subr.bf16.mxu1 %v11363_v27  ;;  %16323 = vst [vmem:[#allocation76_spill] sm:$0xff] %v13243_v11  ;;  %16324 = vst [vmem:[#allocation69_spill] sm:$0xff] %v13245_v3  ;;  %v4742_v27 = vshrl.u32 %v11392_v40, 16  ;;  %v1268_v23 = vsel %vm1099_vm2, %v12917_v14, %v13245_v3  ;;  %1875 = vmatprep.subr.bf16.mxu0 %v16204_v53  ;;  %v4749_v43 = vshll.u32 %v13243_v11, 16  ;;  %v9658_v40 = vld [vmem:[%s11769_s6 + $0xd0] sm:$0x11] }
  0xd5   : > { %1736 = vmatprep.mubr.bf16.mxu0 %v1268_v23  ;;  %v13263_v16 = vcombine.low %v9658_v40, %v9658_v40  ;;  %v4768_v14 = vshll.u32 %v11396_v61, 16  ;;  %5069 = vrot.lane.b32.xlu1 %v4728_v39, %s11704_s9  ;;  %v11400_v11 = vld [vmem:[%s11769_s6 + $0xd8] ss:$8 sps:$4 sm:$0xff]   ;;  %v930_v3 = vsel %vm594_vm0, %v16330_v22, %v929_v60  ;;  %v9661_v39 = vld [vmem:[%s11769_s6 + $0xe8] sm:$0x11] }
  0xd6   : > { %3805 = vmatmul.mubr.bf16.gmra.mrb[68].mxu1 %v16325_v4  ;;  %1073 = vrot.lane.b32.xlu0 %v882_v62, %s11704_s9  ;;  %v4751_v2 = vrot.slane %v4749_v43, 1  ;;  %v906_v62 = vsel %vm594_vm0, %v16329_v36, %v905_v6  ;;  %v4747_v42 = vor.u32 %v4746_v59, %v4742_v27  ;;  %v13276_v41 = vpop.permute.xlu1 %3079  ;;  %v4766_v43 = vshrl.u32 %v11396_v61, 16  ;;  %v16331_v6 = vld [vmem:[#allocation27_spill] sm:$0xff]  ;;  %v11365_v22 = vld [vmem:[%s15919_s1 + $0x98] sm:$0xff]  }
  0xd7   : > { %3812 = vmatprep.mubr.bf16.mxu1 %v3303_v30  ;;  %16326 = vst [vmem:[#allocation23_spill] sm:$0xff] %v13263_v16  ;;  %v13265_v13 = vpop.permute.xlu0 %1035  ;;  %1876 = vmatpush1.bf16.msra.mxu0 %v11362_v49  ;;  %v11364_v30 = vld [vmem:[%s15919_s1 + $0x90] sm:$0xff]   ;;  %v4770_v49 = vrot.slane %v4768_v14, 1  ;;  %v4773_v40 = vshll.u32 %v13263_v16, 16  ;;  %v951_v36 = vshll.u32 %v16331_v6, 16  ;;  %v13291_v61 = vcombine.low %v9661_v39, %v9661_v39 }
  0xd8   : > { %16327 = vst [vmem:[#allocation126_spill] sm:$0xff] %v13265_v13  ;;  %v1271_v23 = vsel %vm1099_vm2, %v12957_v24, %v13265_v13  ;;  %1877 = vmatprep.subr.bf16.mxu0 %v16204_v53  ;;  %v4752_v24 = vsel %vm594_vm0, %v4747_v42, %v4751_v2  ;;  %v4790_v14 = vshrl.u32 %v11400_v11, 16  ;;  %v4792_v6 = vshll.u32 %v11400_v11, 16 }
  0xd9   : > { %v4771_v27 = vor.u32 %v4770_v49, %v4766_v43  ;;  %v4775_v59 = vrot.slane %v4773_v40, 1  ;;  %16332 = vst [vmem:[#allocation77_spill] sm:$0xff] %v13291_v61  ;;  %v953_v60 = vrot.slane %v951_v36, 1  ;;  %v4797_v2 = vshll.u32 %v13291_v61, 16  ;;  %5073 = vrot.lane.b32.xlu1 %v4752_v24, %s11704_s9  ;;  %v9664_v49 = vld [vmem:[%s11769_s6 + $0x100] sm:$0x11] }
  0xda   : > { %1737 = vmatmul.mubr.bf16.gmra.mrb[4].mxu0 %v12938_v44  ;;  %1077 = vrot.lane.b32.xlu0 %v906_v62, %s11704_s9  ;;  %v16333_v44 = vld [vmem:[#allocation21_spill] sm:$0xff]  ;;  %v3084_v16 = vpop.permute.xlu1 %3083  ;;  %v11403_v62 = vld [vmem:[%s11769_s6 + $0xf0] ss:$8 sps:$4 sm:$0xff]   ;;  %v4794_v43 = vrot.slane %v4792_v6, 1  ;;  %v13309_v36 = vcombine.low %v9664_v49, %v9664_v49 }
  0xdb   : > { %1744 = vmatprep.mubr.bf16.mxu0 %v1271_v23  ;;  %1878 = vmatpush1.bf16.msra.mxu0 %v11364_v30  ;;  %v16334_v30 = vld [vmem:[#allocation70_spill] sm:$0xff]  ;;  %v4776_v11 = vsel %vm594_vm0, %v4771_v27, %v4775_v59  ;;  %v4799_v40 = vrot.slane %v4797_v2, 1  ;;  %v4816_v39 = vshll.u32 %v11403_v62, 16  ;;  %v16336_v61 = vld [vmem:[#allocation88_spill] sm:$0xff]  ;;  %v13318_v13 = vsel %vm1099_vm2, %v13052_v56, %v3084_v16 }
  0xdc   : > { %1879 = vmatprep.subr.bf16.mxu0 %v16204_v53  ;;  %v13300_v42 = vpop.permute.xlu0 %1039  ;;  %v3309_v23 = vsel %vm1099_vm2, %v16334_v30, %v13066_v45  ;;  %16335 = vst [vmem:[#allocation81_spill] sm:$0xff] %v13309_v36  ;;  %v954_v24 = vsel %vm594_vm0, %v16336_v61, %v953_v60  ;;  %v4795_v6 = vor.u32 %v4794_v43, %v4790_v14  ;;  %v4814_v27 = vshrl.u32 %v11403_v62, 16  ;;  %v11406_v2 = vld [vmem:[%s11769_s6 + $0x108] ss:$8 sps:$4 sm:$0xff]   ;;  %v9667_v14 = vld [vmem:[%s11769_s6 + $0x118] sm:$0x11] }
  0xdd   : > { %v4818_v59 = vrot.slane %v4816_v39, 1  ;;  %v11367_v61 = vld [vmem:[%s15919_s1 + $0xa8] sm:$0xff]   ;;  %5077 = vrot.lane.b32.xlu1 %v4776_v11, %s11704_s9  ;;  %v13335_v39 = vcombine.low %v9667_v14, %v9667_v14 }
  0xde   : > { %3813 = vmatmul.mubr.bf16.gmra.mrb[72].mxu1 %v16333_v44  ;;  %1081 = vrot.lane.b32.xlu0 %v930_v3, %s11704_s9  ;;  %v1274_v3 = vsel %vm1099_vm2, %v11795_v15, %v13300_v42  ;;  %v4800_v56 = vsel %vm594_vm0, %v4795_v6, %v4799_v40  ;;  %v16337_v16 = vld [vmem:[#allocation82_spill] sm:$0xff]  ;;  %v4840_v15 = vshll.u32 %v11406_v2, 16  ;;  %v16339_v40 = vld [vmem:[#allocation28_spill] sm:$0xff] }
  0xdf   : > { %3820 = vmatprep.mubr.bf16.mxu1 %v3306_v46  ;;  %1880 = vmatpush1.bf16.msra.mxu0 %v11365_v22  ;;  %v11366_v46 = vld [vmem:[%s15919_s1 + $0xa0] sm:$0xff]   ;;  %v4821_v22 = vshll.u32 %v13309_v36, 16  ;;  %v975_v60 = vshll.u32 %v16337_v16, 16  ;;  %v4819_v62 = vor.u32 %v4818_v59, %v4814_v27  ;;  %16338 = vst [vmem:[#allocation27_spill] sm:$0xff] %v13335_v39  ;;  %v4838_v36 = vshrl.u32 %v11406_v2, 16 }
  0xe0   : > { %1881 = vmatprep.subr.bf16.mxu0 %v16204_v53  ;;  %v11409_v16 = vld [vmem:[%s11769_s6 + $0x120] ss:$8 sps:$4 sm:$0xff]   ;;  %v4842_v27 = vrot.slane %v4840_v15, 1 }
  0xe1   : > { %v3088_v43 = vpop.permute.xlu1 %3087  ;;  %v4823_v49 = vrot.slane %v4821_v22, 1  ;;  %v977_v11 = vrot.slane %v975_v60, 1  ;;  %5081 = vrot.lane.b32.xlu1 %v4800_v56, %s11704_s9  ;;  %v4862_v60 = vshrl.u32 %v11409_v16, 16 }
  0xe2   : > { %1745 = vmatmul.mubr.bf16.gmra.mrb[8].mxu0 %v13005_v17  ;;  %1085 = vrot.lane.b32.xlu0 %v954_v24, %s11704_s9  ;;  %v13338_v6 = vpop.permute.xlu0 %1043  ;;  %v4845_v17 = vshll.u32 %v13335_v39, 16  ;;  %v4843_v56 = vor.u32 %v4842_v27, %v4838_v36  ;;  %v9673_v36 = vld [vmem:[%s11769_s6 + $0x148] sm:$0x11] }
  0xe3   : > { %1752 = vmatprep.mubr.bf16.mxu0 %v1274_v3  ;;  %1882 = vmatpush1.bf16.msra.mxu0 %v11366_v46  ;;  %v978_v24 = vsel %vm594_vm0, %v12792_v5, %v977_v11  ;;  %v9670_v3 = vld [vmem:[%s11769_s6 + $0x130] sm:$0x11]  ;;  %v13349_v46 = vsel %vm1099_vm2, %v13066_v45, %v3088_v43  ;;  %v4824_v59 = vsel %vm594_vm0, %v4819_v62, %v4823_v49  ;;  %v11412_v62 = vld [vmem:[%s11769_s6 + $0x138] ss:$8 sps:$4 sm:$0xff]  }
  0xe4   : > { %1883 = vmatprep.subr.bf16.mxu0 %v16204_v53  ;;  %v4847_v22 = vrot.slane %v4845_v17, 1  ;;  %v13353_v2 = vcombine.low %v9670_v3, %v9670_v3  ;;  %v1277_v5 = vsel %vm1099_vm2, %v12136_v29, %v13338_v6  ;;  %v11368_v45 = vld [vmem:[%s15919_s1 + $0xb0] sm:$0xff]   ;;  %v16352_v29 = vld [vmem:[#allocation34_spill] sm:$0xff] }
  0xe5   : > { %v16342_v11 = vld [vmem:[#allocation75_spill] sm:$0xff]  ;;  %5085 = vrot.lane.b32.xlu1 %v4824_v59, %s11704_s9 }
  0xe6   : > { %3821 = vmatmul.mubr.bf16.gmra.mrb[76].mxu1 %v16339_v40  ;;  %1089 = vrot.lane.b32.xlu0 %v978_v24, %s11704_s9  ;;  %16340 = vst [vmem:[#allocation21_spill] sm:$0xff] %v13353_v2  ;;  %v4869_v43 = vshll.u32 %v13353_v2, 16  ;;  %v16343_v17 = vld [vmem:[#allocation87_spill] sm:$0xff]  ;;  %v16345_v2 = vld [vmem:[#allocation25_spill] sm:$0xff] }
  0xe7   : > { %3828 = vmatprep.mubr.bf16.mxu1 %v3309_v23  ;;  %v4864_v23 = vshll.u32 %v11409_v16, 16  ;;  %1884 = vmatpush1.bf16.msra.mxu0 %v11367_v61  ;;  %v3312_v61 = vsel %vm1099_vm2, %v16342_v11, %v13064_v19  ;;  %v999_v24 = vshll.u32 %v16343_v17, 16  ;;  %v4848_v16 = vsel %vm594_vm0, %v4843_v56, %v4847_v22  ;;  %v11416_v56 = vld [vmem:[%s11769_s6 + $0x150] ss:$8 sps:$4 sm:$0xff]  }
  0xe8   : > { %v3092_v15 = vpop.permute.xlu1 %3091  ;;  %1885 = vmatprep.subr.bf16.mxu0 %v16204_v53  ;;  %v4871_v3 = vrot.slane %v4869_v43, 1  ;;  %v4888_v17 = vshll.u32 %v11412_v62, 16  ;;  %v9676_v43 = vld [vmem:[%s11769_s6 + $0x160] sm:$0x11] }
  0xe9   : > { %v4866_v14 = vrot.slane %v4864_v23, 1  ;;  %v13366_v49 = vsel %vm1099_vm2, %v13064_v19, %v3092_v15  ;;  %v13376_v23 = vcombine.low %v9673_v36, %v9673_v36  ;;  %v11369_v19 = vld [vmem:[%s15919_s1 + $0xb8] sm:$0xff]   ;;  %v1001_v59 = vrot.slane %v999_v24, 1  ;;  %5089 = vrot.lane.b32.xlu1 %v4848_v16, %s11704_s9 }
  0xea   : > { %16341 = vst [vmem:[#allocation70_spill] sm:$0xff] %v13366_v49  ;;  %1753 = vmatmul.mubr.bf16.gmra.mrb[12].mxu0 %v16293_v38  ;;  %v4886_v15 = vshrl.u32 %v11412_v62, 16  ;;  %v13396_v36 = vcombine.low %v9676_v43, %v9676_v43 }
  0xeb   : > { %v4867_v27 = vor.u32 %v4866_v14, %v4862_v60  ;;  %16344 = vst [vmem:[#allocation88_spill] sm:$0xff] %v13376_v23  ;;  %1760 = vmatprep.mubr.bf16.mxu0 %v1277_v5  ;;  %1886 = vmatpush1.bf16.msra.mxu0 %v11368_v45  ;;  %v4893_v22 = vshll.u32 %v13376_v23, 16  ;;  %v11370_v5 = vld [vmem:[%s15919_s1 + $0xc0] sm:$0xff]   ;;  %v1002_v45 = vsel %vm594_vm0, %v12818_v32, %v1001_v59  ;;  %v4890_v14 = vrot.slane %v4888_v17, 1 }
  0xec   : > { %1887 = vmatprep.subr.bf16.mxu0 %v16204_v53  ;;  %v13385_v60 = vpop.permute.xlu0 %1047  ;;  %1093 = vrot.lane.b32.xlu0 %v1002_v45, %s11704_s9  ;;  %16347 = vst [vmem:[#allocation28_spill] sm:$0xff] %v13396_v36  ;;  %v4910_v32 = vshrl.u32 %v11416_v56, 16  ;;  %v4917_v17 = vshll.u32 %v13396_v36, 16  ;;  %v11374_v36 = vld [vmem:[%s15919_s1 + $0xc8] sm:$0xff]  }
  0xed   : > { %16346 = vst [vmem:[#allocation82_spill] sm:$0xff] %v13385_v60  ;;  %v4872_v62 = vsel %vm594_vm0, %v4867_v27, %v4871_v3  ;;  %v4895_v24 = vrot.slane %v4893_v22, 1  ;;  %v4891_v23 = vor.u32 %v4890_v14, %v4886_v15  ;;  %v1280_v16 = vsel %vm1099_vm2, %v12191_v28, %v13385_v60  ;;  %v11419_v27 = vld [vmem:[%s11769_s6 + $0x168] ss:$8 sps:$4 sm:$0xff]   ;;  %v16349_v22 = vld [vmem:[#allocation29_spill] sm:$0xff]  ;;  %v16350_v15 = vld [vmem:[#allocation72_spill] sm:$0xff] }
  0xee   : > { %3829 = vmatmul.mubr.bf16.gmra.mrb[80].mxu1 %v16345_v2  ;;  %v3315_v45 = vsel %vm1099_vm2, %v16349_v22, %v13085_v37  ;;  %5093 = vrot.lane.b32.xlu1 %v4872_v62, %s11704_s9  ;;  %v4934_v39 = vshrl.u32 %v11419_v27, 16  ;;  %v4936_v28 = vshll.u32 %v11419_v27, 16  ;;  %v16356_v60 = vld [vmem:[#allocation80_spill] sm:$0xff] }
  0xef   : > { %3836 = vmatprep.mubr.bf16.mxu1 %v3312_v61  ;;  %v4912_v61 = vshll.u32 %v11416_v56, 16  ;;  %1888 = vmatpush1.bf16.msra.mxu0 %v11369_v19  ;;  %v9679_v19 = vld [vmem:[%s11769_s6 + $0x178] sm:$0x11]  ;;  %v4896_v14 = vsel %vm594_vm0, %v4891_v23, %v4895_v24  ;;  %v4919_v56 = vrot.slane %v4917_v17, 1  ;;  %v11422_v23 = vld [vmem:[%s11769_s6 + $0x180] ss:$8 sps:$4 sm:$0xff]  }
  0xf0   : > { %1889 = vmatprep.subr.bf16.mxu0 %v16204_v53  ;;  %v13404_v3 = vpop.permute.xlu1 %3095  ;;  %v4958_v37 = vshrl.u32 %v11422_v23, 16 }
  0xf1   : > { %v4914_v59 = vrot.slane %v4912_v61, 1  ;;  %16348 = vst [vmem:[#allocation75_spill] sm:$0xff] %v13404_v3  ;;  %v13413_v61 = vcombine.low %v9679_v19, %v9679_v19 }
  0xf2   : > { %1761 = vmatmul.mubr.bf16.gmra.mrb[16].mxu0 %v16350_v15  ;;  %v13422_v24 = vpop.permute.xlu0 %1051  ;;  %5097 = vrot.lane.b32.xlu1 %v4896_v14, %s11704_s9  ;;  %v11425_v14 = vld [vmem:[%s11769_s6 + $0x198] ss:$8 sps:$4 sm:$0xff]  }
  0xf3   : > { %v4915_v43 = vor.u32 %v4914_v59, %v4910_v32  ;;  %16351 = vst [vmem:[#allocation87_spill] sm:$0xff] %v13413_v61  ;;  %1768 = vmatprep.mubr.bf16.mxu0 %v1280_v16  ;;  %1890 = vmatpush1.bf16.msra.mxu0 %v11370_v5  ;;  %v4941_v62 = vshll.u32 %v13413_v61, 16  ;;  %16353 = vst [vmem:[#allocation25_spill] sm:$0xff] %v13422_v24  ;;  %v11378_v5 = vld [vmem:[%s15919_s1 + $0xd0] sm:$0xff]   ;;  %v4938_v16 = vrot.slane %v4936_v28, 1  ;;  %v4960_v61 = vshll.u32 %v11422_v23, 16 }
  0xf4   : > { %1891 = vmatprep.subr.bf16.mxu0 %v16204_v53  ;;  %v9682_v59 = vld [vmem:[%s11769_s6 + $0x190] sm:$0x11]  ;;  %v11383_v23 = vld [vmem:[%s15919_s1 + $0xd8] sm:$0xff]  }
  0xf5   : > { %v4920_v17 = vsel %vm594_vm0, %v4915_v43, %v4919_v56  ;;  %v4943_v27 = vrot.slane %v4941_v62, 1  ;;  %v13432_v19 = vcombine.low %v9682_v59, %v9682_v59  ;;  %v4962_v3 = vrot.slane %v4960_v61, 1 }
  0xf6   : > { %3837 = vmatmul.mubr.bf16.gmra.mrb[84].mxu1 %v16352_v29  ;;  %v3318_v43 = vsel %vm1099_vm2, %v16356_v60, %v13077_v35  ;;  %5101 = vrot.lane.b32.xlu1 %v4920_v17, %s11704_s9  ;;  %v4982_v17 = vshrl.u32 %v11425_v14, 16 }
  0xf7   : > { %3844 = vmatprep.mubr.bf16.mxu1 %v3315_v45  ;;  %v13424_v32 = vpop.permute.xlu1 %3099  ;;  %16355 = vst [vmem:[#allocation34_spill] sm:$0xff] %v13432_v19  ;;  %1892 = vmatpush1.bf16.msra.mxu0 %v11374_v36  ;;  %v4939_v45 = vor.u32 %v4938_v16, %v4934_v39  ;;  %v4965_v28 = vshll.u32 %v13432_v19, 16  ;;  %v9685_v36 = vld [vmem:[%s11769_s6 + $0x1a8] sm:$0x11]  ;;  %v4963_v62 = vor.u32 %v4962_v3, %v4958_v37  ;;  %v4984_v19 = vshll.u32 %v11425_v14, 16 }
  0xf8   : > { %16354 = vst [vmem:[#allocation72_spill] sm:$0xff] %v13424_v32  ;;  %v1283_v32 = vsel %vm1099_vm2, %v12179_v20, %v13422_v24  ;;  %1893 = vmatprep.subr.bf16.mxu0 %v16204_v53  ;;  %v16357_v39 = vld [vmem:[#allocation78_spill] sm:$0xff]  ;;  %v13447_v59 = vcombine.low %v9685_v36, %v9685_v36  ;;  %v16360_v20 = vld [vmem:[#allocation31_spill] sm:$0xff] }
  0xf9   : > { %v4944_v56 = vsel %vm594_vm0, %v4939_v45, %v4943_v27  ;;  %v4967_v16 = vrot.slane %v4965_v28, 1  ;;  %v11428_v3 = vld [vmem:[%s11769_s6 + $0x1b0] ss:$8 sps:$4 sm:$0xff]   ;;  %v9688_v45 = vld [vmem:[%s11769_s6 + $0x1c0] sm:$0x11] }
  0xfa   : > { %1769 = vmatmul.mubr.bf16.gmra.mrb[20].mxu0 %v16357_v39  ;;  %16358 = vst [vmem:[#allocation78_spill] sm:$0xff] %v13447_v59  ;;  %v4989_v37 = vshll.u32 %v13447_v59, 16  ;;  %v13458_v27 = vpop.permute.xlu0 %1055  ;;  %5105 = vrot.lane.b32.xlu1 %v4944_v56, %s11704_s9  ;;  %v13466_v36 = vcombine.low %v9688_v45, %v9688_v45  ;;  %v5008_v59 = vshll.u32 %v11428_v3, 16  ;;  %v5006_v35 = vshrl.u32 %v11428_v3, 16  ;;  %v11431_v56 = vld [vmem:[%s11769_s6 + $0x1c8] ss:$8 sps:$4 sm:$0xff]  }
  0xfb   : > { %1776 = vmatprep.mubr.bf16.mxu0 %v1283_v32  ;;  %v13449_v61 = vpop.permute.xlu1 %3103  ;;  %1894 = vmatpush1.bf16.msra.mxu0 %v11378_v5  ;;  %v11387_v32 = vld [vmem:[%s15919_s1 + $0xe0] sm:$0xff]   ;;  %v4986_v5 = vrot.slane %v4984_v19, 1  ;;  %v4968_v28 = vsel %vm594_vm0, %v4963_v62, %v4967_v16  ;;  %v16363_v62 = vld [vmem:[#allocation86_spill] sm:$0xff] }
  0xfc   : > { %16359 = vst [vmem:[#allocation127_spill] sm:$0xff] %v13449_v61  ;;  %1895 = vmatprep.subr.bf16.mxu0 %v16204_v53  ;;  %v4991_v14 = vrot.slane %v4989_v37, 1  ;;  %16361 = vst [vmem:[#allocation31_spill] sm:$0xff] %v13466_v36  ;;  %v5010_v24 = vrot.slane %v5008_v59, 1  ;;  %v5013_v19 = vshll.u32 %v13466_v36, 16  ;;  %v3321_v16 = vsel %vm1099_vm2, %v16363_v62, %v13103_v12  ;;  %v11391_v45 = vld [vmem:[%s15919_s1 + $0xe8] sm:$0xff]  }
  0xfd   : > { %v4987_v61 = vor.u32 %v4986_v5, %v4982_v17  ;;  %v16364_v17 = vld [vmem:[#allocation84_spill] sm:$0xff]  ;;  %v5030_v36 = vshrl.u32 %v11431_v56, 16 }
  0xfe   : > { %3845 = vmatmul.mubr.bf16.gmra.mrb[88].mxu1 %v16360_v20  ;;  %5109 = vrot.lane.b32.xlu1 %v4968_v28, %s11704_s9  ;;  %v5011_v5 = vor.u32 %v5010_v24, %v5006_v35  ;;  %v5015_v3 = vrot.slane %v5013_v19, 1  ;;  %v11434_v12 = vld [vmem:[%s11769_s6 + $0x34] ss:$8 sps:$4 sm:$0xff]  }
  0xff   : > { %3852 = vmatprep.mubr.bf16.mxu1 %v3318_v43  ;;  %1896 = vmatpush1.bf16.msra.mxu0 %v11383_v23  ;;  %v1286_v43 = vsel %vm1099_vm2, %v12224_v33, %v13458_v27  ;;  %v13474_v49 = vpop.permute.xlu1 %3107  ;;  %v9691_v23 = vld [vmem:[%s11769_s6 + $0x1d8] sm:$0x11]  ;;  %v4992_v37 = vsel %vm594_vm0, %v4987_v61, %v4991_v14  ;;  %v5032_v33 = vshll.u32 %v11431_v56, 16  ;;  %v11395_v24 = vld [vmem:[%s15919_s1 + $0xf0] sm:$0xff]  }
 0x100   : > { %1897 = vmatprep.subr.bf16.mxu0 %v16204_v53  ;;  %16362 = vst [vmem:[#allocation128_spill] sm:$0xff] %v13474_v49  ;;  %v13483_v59 = vcombine.low %v9691_v23, %v9691_v23  ;;  %v16366_v49 = vld [vmem:[#allocation38_spill] sm:$0xff]  ;;  %v13492_v61 = vpop.permute.xlu0 %1059 }
 0x101   : > { %v5034_v35 = vrot.slane %v5032_v33, 1  ;;  %v1289_v33 = vsel %vm1099_vm2, %v12298_v57, %v13492_v61  ;;  %v11436_v57 = vld [vmem:[%s11769_s6 + $0x4c] ss:$8 sps:$4 sm:$0xff]  }
 0x102   : > { %1777 = vmatmul.mubr.bf16.gmra.mrb[24].mxu0 %v16364_v17  ;;  %16365 = vst [vmem:[#allocation84_spill] sm:$0xff] %v13483_v59  ;;  %v5037_v28 = vshll.u32 %v13483_v59, 16  ;;  %5113 = vrot.lane.b32.xlu1 %v4992_v37, %s11704_s9  ;;  %v13504_v59 = vcombine.high %v13130_v52, %v13130_v52 }
 0x103   : > { %1784 = vmatprep.mubr.bf16.mxu0 %v1286_v43  ;;  %1898 = vmatpush1.bf16.msra.mxu0 %v11387_v32  ;;  %v5016_v32 = vsel %vm594_vm0, %v5011_v5, %v5015_v3  ;;  %v16367_v43 = vld [vmem:[#allocation90_spill] sm:$0xff]  ;;  %v13500_v56 = vpop.permute.xlu1 %3111  ;;  %v5035_v23 = vor.u32 %v5034_v35, %v5030_v36  ;;  %v4634_v5 = vshrl.u32 %v11434_v12, 16  ;;  %v16370_v36 = vld [vmem:[#allocation89_spill] sm:$0xff] }
 0x104   : > { %1899 = vmatprep.subr.bf16.mxu0 %v16204_v53  ;;  %v5039_v14 = vrot.slane %v5037_v28, 1  ;;  %v1023_v19 = vshll.u32 %v16367_v43, 16  ;;  %16368 = vst [vmem:[#allocation38_spill] sm:$0xff] %v13504_v59  ;;  %v16369_v28 = vld [vmem:[#allocation92_spill] sm:$0xff]  ;;  %v3324_v52 = vsel %vm1099_vm2, %v16370_v36, %v13098_v1  ;;  %v4641_v35 = vshll.u32 %v13504_v59, 16 }
 0x105   : > { %v11399_v43 = vld [vmem:[%s15919_s1 + $0xf8] sm:$0xff]  }
 0x106   : > { %3853 = vmatmul.mubr.bf16.gmra.mrb[92].mxu1 %v16366_v49  ;;  %v1025_v37 = vrot.slane %v1023_v19, 1  ;;  %5117 = vrot.lane.b32.xlu1 %v5016_v32, %s11704_s9  ;;  %v16371_v19 = vld [vmem:[#allocation36_spill] sm:$0xff] }
 0x107   : > { %3860 = vmatprep.mubr.bf16.mxu1 %v3321_v16  ;;  %1900 = vmatpush1.bf16.msra.mxu0 %v11391_v45  ;;  %v4636_v16 = vshll.u32 %v11434_v12, 16  ;;  %v5040_v45 = vsel %vm594_vm0, %v5035_v23, %v5039_v14  ;;  %v13525_v14 = vpop.permute.xlu1 %1063  ;;  %v4660_v23 = vshll.u32 %v11436_v57, 16  ;;  %v13566_v59 = vld [vmem:[%s11769_s6 + $0x30] ss:$8 sps:$4 sm:$0xff]  }
 0x108   : > { %1901 = vmatprep.subr.bf16.mxu0 %v16204_v53  ;;  %v1026_v12 = vsel %vm594_vm0, %v12831_v47, %v1025_v37  ;;  %v13532_v47 = vcombine.high %v13151_v54, %v13151_v54  ;;  %v4658_v37 = vshrl.u32 %v11436_v57, 16  ;;  %v16373_v57 = vld [vmem:[#allocation41_spill] sm:$0xff] }
 0x109   : > { %v4638_v3 = vrot.slane %v4636_v16, 1  ;;  %v4643_v16 = vrot.slane %v4641_v35, 1  ;;  %1097 = vrot.lane.b32.xlu0 %v1026_v12, %s11704_s9 }
 0x10a   : > { %1785 = vmatmul.mubr.bf16.gmra.mrb[28].mxu0 %v16369_v28  ;;  %5121 = vrot.lane.b32.xlu1 %v5040_v45, %s11704_s9  ;;  %16372 = vst [vmem:[#allocation90_spill] sm:$0xff] %v13532_v47 }
 0x10b   : > { %1792 = vmatprep.mubr.bf16.mxu0 %v1289_v33  ;;  %1902 = vmatpush1.bf16.msra.mxu0 %v11395_v24  ;;  %v4639_v32 = vor.u32 %v4638_v3, %v4634_v5  ;;  %v1292_v33 = vsel %vm1099_vm2, %v16308_v25, %v13525_v14  ;;  %v4662_v5 = vrot.slane %v4660_v23, 1  ;;  %v4665_v3 = vshll.u32 %v13532_v47, 16  ;;  %v16375_v23 = vld [vmem:[#allocation7_spill] sm:$0xff] }
 0x10c   : > { %1903 = vmatprep.subr.bf16.mxu0 %v16204_v53  ;;  %v13570_v25 = vld [vmem:[%s11769_s6 + $0x1b0] ss:$8 sps:$4 sm:$0xff]  }
 0x10d   : > { %v4644_v24 = vsel %vm594_vm0, %v4639_v32, %v4643_v16  ;;  %v4663_v45 = vor.u32 %v4662_v5, %v4658_v37  ;;  %v4667_v35 = vrot.slane %v4665_v3, 1  ;;  %v11439_v16 = vld [vmem:[%s11769_s6 + $0x64] ss:$8 sps:$4 sm:$0xff]   ;;  %v3150_v37 = vrot.slane %v16375_v23, 1  ;;  %v11620_v5 = vld [vmem:[%s11769_s6 + $0x70] sm:$0x11] }
 0x10e   : > { %3861 = vmatmul.mubr.bf16.gmra.mrb[96].mxu1 %v16371_v19  ;;  %5055 = vrot.lane.b32.xlu1 %v4644_v24, %s11704_s9  ;;  %v13550_v24 = vpop.permute.xlu0 %1067  ;;  %v4684_v3 = vshll.u32 %v11439_v16, 16 }
 0x10f   : > { %3868 = vmatprep.mubr.bf16.mxu1 %v3324_v52  ;;  %1904 = vmatpush1.bf16.msra.mxu0 %v11399_v43  ;;  %v11618_v52 = vld [vmem:[%s11769_s6 + $0x1b4] ss:$8 sps:$4 sm:$0xff]   ;;  %v13544_v43 = vld [vmem:[%s11769_s6 + $0x18] ss:$8 sps:$4 sm:$0xff]   ;;  %v4668_v32 = vsel %vm594_vm0, %v4663_v45, %v4667_v35  ;;  %16374 = vst [vmem:[#allocation92_spill] sm:$0xff] %v13550_v24  ;;  %v4682_v45 = vshrl.u32 %v11439_v16, 16 }
 0x110   : > { %v3327_v54 = vsel %vm1099_vm2, %v11618_v52, %v13132_v0  ;;  %v1295_v52 = vsel %vm1099_vm2, %v16318_v10, %v13550_v24  ;;  %v4686_v35 = vrot.slane %v4684_v3, 1  ;;  %v11441_v3 = vld [vmem:[%s11769_s6 + $0x7c] ss:$8 sps:$4 sm:$0xff]   ;;  %v13577_v10 = vpop.permute.xlu1 %1071 }
 0x112   : > { %1793 = vmatmul.mubr.bf16.gmra.mrb[32].mxu0 %v12814_v55  ;;  %5059 = vrot.lane.b32.xlu1 %v4668_v32, %s11704_s9  ;;  %v4687_v23 = vor.u32 %v4686_v35, %v4682_v45 }
 0x113   : > { %1800 = vmatprep.mubr.bf16.mxu0 %v1292_v33  ;;  %v13555_v33 = vcombine.high %v11620_v5, %v11620_v5 }
 0x115   : > { %16376 = vst [vmem:[#allocation36_spill] sm:$0xff] %v13555_v33  ;;  %v4689_v12 = vshll.u32 %v13555_v33, 16 }
 0x116   : > { %3869 = vmatmul.mubr.bf16.gmra.mrb[100].mxu1 %v16373_v57 }
 0x117   : > { %3876 = vmatprep.mubr.bf16.mxu1 %v3327_v54  ;;  %v16377_v54 = vrot.slane %v13544_v43, 1  ;;  %v4691_v5 = vrot.slane %v4689_v12, 1 }
 0x119   : > { %v3151_v32 = vsel %vm1136_vm1, %v16377_v54, %v3150_v37  ;;  %v4692_v16 = vsel %vm594_vm0, %v4687_v23, %v4691_v5  ;;  %v16379_v37 = vld [vmem:[#allocation12_spill] sm:$0xff]  ;;  %v4708_v54 = vshll.u32 %v11441_v3, 16  ;;  %v1298_v23 = vsel %vm1099_vm2, %v16328_v31, %v13577_v10 }
 0x11a   : > { %1801 = vmatmul.mubr.bf16.gmra.mrb[36].mxu0 %v12846_v50  ;;  %v3156_v45 = vrot.slane %v16379_v37, 1  ;;  %5063 = vrot.lane.b32.xlu0 %v4692_v16, %s11704_s9  ;;  %v4706_v5 = vshrl.u32 %v11441_v3, 16  ;;  %v16382_v16 = vrot.slane %v13566_v59, 1 }
 0x11b   : > { %1808 = vmatprep.mubr.bf16.mxu0 %v1295_v52  ;;  %v11623_v52 = vld [vmem:[%s11769_s6 + $0x88] sm:$0x11] }
 0x11c   : > { %v13582_v35 = vcombine.high %v11623_v52, %v11623_v52  ;;  %v3157_v37 = vsel %vm1136_vm1, %v16382_v16, %v3156_v45  ;;  %v11443_v45 = vld [vmem:[%s11769_s6 + $0x94] ss:$8 sps:$4 sm:$0xff]  }
 0x11d   : > { %v13575_v33 = vpop.f32.mrb[0].mxu1 }
 0x11e   : > { %3877 = vmatmul.mubr.bf16.gmra.mrb[104].mxu1 %v13570_v25  ;;  %16378 = vst [vmem:[#allocation41_spill] sm:$0xff] %v13575_v33  ;;  %v2084_v12 = vpop.f32.mrb[1].mxu1  ;;  %16380 = vst [vmem:[#allocation7_spill] sm:$0xff] %v13582_v35  ;;  %v4710_v33 = vrot.slane %v4708_v54, 1  ;;  %v16383_v54 = vld [vmem:[#allocation6_spill] sm:$0xff] }
 0x11f   : > { %3917 = vmatprep.mubr.bf16.mxu1 %v3151_v32  ;;  %v13584_v47 = vpop.f32.mrb[2].mxu1  ;;  %v4713_v32 = vshll.u32 %v13582_v35, 16  ;;  %v11382_v12 = vld [vmem:[%s15919_s1 + $0x228] sm:$0xff]   ;;  %v3162_v35 = vrot.slane %v16383_v54, 1  ;;  %v4730_v54 = vshrl.u32 %v11443_v45, 16 }
 0x120   : > { %16381 = vst [vmem:[#allocation12_spill] sm:$0xff] %v13584_v47  ;;  %v2087_v24 = vpop.f32.mrb[3].mxu1  ;;  %v3113_v47 = vsel %vm1099_vm2, %v12912_v48, %v13106_v7  ;;  %v11415_v48 = vld [vmem:[%s15919_s1 + $0x230] sm:$0xff]  }
 0x121   : > { %v4711_v24 = vor.u32 %v4710_v33, %v4706_v5  ;;  %v4715_v52 = vrot.slane %v4713_v32, 1  ;;  %v11624_v33 = vld [vmem:[%s15919_s1 + $0x220] sm:$0xff]   ;;  %v13609_v5 = vpop.permute.xlu0 %1075  ;;  %v4732_v32 = vshll.u32 %v11443_v45, 16  ;;  %v3114_v45 = vsel %vm1099_vm2, %v12949_v26, %v13163_v51 }
 0x122   : > { %1809 = vmatmul.mubr.bf16.gmra.mrb[40].mxu0 %v12854_v21 }
 0x123   : > { %1816 = vmatprep.mubr.bf16.mxu0 %v1298_v23  ;;  %v4716_v31 = vsel %vm594_vm0, %v4711_v24, %v4715_v52 }
 0x124   : > { %5067 = vrot.lane.b32.xlu1 %v4716_v31, %s11704_s9  ;;  %v16389_v31 = vrot.slane %v16293_v38, 1 }
 0x126   : > { %3918 = vmatmul.mubr.bf16.vlgmr.msra.gmra.mrb[108].mxu1 %v3113_v47  ;;  %v13604_v16 = vpop.f32.mrb[4].mxu1  ;;  %v11625_v47 = vld [vmem:[%s11769_s6 + $0xa0] sm:$0x11] }
 0x127   : > { %16384 = vst [vmem:[#allocation6_spill] sm:$0xff] %v13604_v16  ;;  %10582 = vmatpush3.bf16.msra.mxu1 %v11624_v33  ;;  %3925 = vmatprep.mubr.bf16.mxu1 %v3157_v37  ;;  %v13614_v7 = vpop.f32.mrb[5].mxu1  ;;  %v13618_v23 = vcombine.high %v11625_v47, %v11625_v47  ;;  %v1301_v37 = vsel %vm1099_vm2, %v16334_v30, %v13609_v5  ;;  %v4734_v33 = vrot.slane %v4732_v32, 1  ;;  %v11445_v32 = vld [vmem:[%s11769_s6 + $0xac] ss:$8 sps:$4 sm:$0xff]  }
 0x128   : > { %16385 = vst [vmem:[#allocation129_spill] sm:$0xff] %v13614_v7  ;;  %10583 = vmatprep.subr.bf16.mxu1 %v11382_v12  ;;  %v13620_v24 = vpop.f32.mrb[6].mxu1  ;;  %v3163_v47 = vsel %vm1136_vm1, %v16389_v31, %v3162_v35  ;;  %v13640_v7 = vpop.permute.xlu1 %1079  ;;  %v3167_v31 = vrot.slane %v16295_v8, 1  ;;  %v4756_v26 = vshll.u32 %v11445_v32, 16 }
 0x129   : > { %16386 = vst [vmem:[#allocation130_spill] sm:$0xff] %v13618_v23  ;;  %16387 = vst [vmem:[#allocation131_spill] sm:$0xff] %v13620_v24  ;;  %v13622_v52 = vpop.f32.mrb[7].mxu1  ;;  %v4737_v3 = vshll.u32 %v13618_v23, 16  ;;  %v11438_v24 = vld [vmem:[%s15919_s1 + $0x238] sm:$0xff]   ;;  %v4735_v16 = vor.u32 %v4734_v33, %v4730_v54  ;;  %v16391_v23 = vld [vmem:[#allocation11_spill] sm:$0xff] }
 0x12a   : > { %16388 = vst [vmem:[#allocation132_spill] sm:$0xff] %v13622_v52  ;;  %1817 = vmatmul.mubr.bf16.gmra.mrb[44].mxu0 %v12869_v9  ;;  %v3168_v54 = vrot.slane %v16391_v23, 1  ;;  %v4758_v8 = vrot.slane %v4756_v26, 1  ;;  %v11448_v26 = vld [vmem:[%s11769_s6 + $0xc4] ss:$8 sps:$4 sm:$0xff]  }
 0x12b   : > { %10584 = vmatpush3.bf16.msra.mxu1 %v11382_v12  ;;  %v4739_v52 = vrot.slane %v4737_v3, 1  ;;  %1824 = vmatprep.mubr.bf16.mxu0 %v1301_v37  ;;  %v11626_v3 = vld [vmem:[%s11769_s6 + $0xb8] sm:$0x11] }
 0x12c   : > { %10585 = vmatprep.subr.bf16.mxu1 %v11415_v48  ;;  %v13648_v37 = vcombine.high %v11626_v3, %v11626_v3 }
 0x12d   : > { %v4740_v12 = vsel %vm594_vm0, %v4735_v16, %v4739_v52  ;;  %v4754_v52 = vshrl.u32 %v11445_v32, 16  ;;  %v3115_v32 = vsel %vm1099_vm2, %v12904_v34, %v13125_v58 }
 0x12e   : > { %3926 = vmatmul.mubr.bf16.gmra.mrb[112].mxu1 %v3114_v45  ;;  %5071 = vrot.lane.b32.xlu0 %v4740_v12, %s11704_s9  ;;  %16392 = vst [vmem:[#allocation11_spill] sm:$0xff] %v13648_v37  ;;  %v4761_v23 = vshll.u32 %v13648_v37, 16 }
 0x12f   : > { %3933 = vmatprep.mubr.bf16.mxu1 %v3163_v47  ;;  %10586 = vmatpush3.bf16.msra.mxu1 %v11415_v48  ;;  %v13642_v35 = vpop.f32.mrb[8].mxu1  ;;  %v1304_v48 = vsel %vm1099_vm2, %v16342_v11, %v13640_v7  ;;  %v3169_v47 = vsel %vm1136_vm1, %v3167_v31, %v3168_v54  ;;  %v4759_v45 = vor.u32 %v4758_v8, %v4754_v52  ;;  %v16397_v31 = vld [vmem:[#allocation15_spill] sm:$0xff]  ;;  %v16398_v52 = vld [vmem:[#allocation16_spill] sm:$0xff] }
 0x130   : > { %16390 = vst [vmem:[#allocation133_spill] sm:$0xff] %v13642_v35  ;;  %10587 = vmatprep.subr.bf16.mxu1 %v11438_v24  ;;  %v13650_v51 = vpop.f32.mrb[9].mxu1  ;;  %v4763_v12 = vrot.slane %v4761_v23, 1  ;;  %v3173_v54 = vrot.slane %v16397_v31, 1  ;;  %v3174_v8 = vrot.slane %v16398_v52, 1  ;;  %v4780_v35 = vshll.u32 %v11448_v26, 16 }
 0x131   : > { %16393 = vst [vmem:[#allocation134_spill] sm:$0xff] %v13650_v51  ;;  %v13652_v16 = vpop.f32.mrb[10].mxu1  ;;  %v16403_v31 = vld [vmem:[#allocation102_spill] sm:$0xff]  ;;  %v13695_v51 = vpop.permute.xlu1 %1087 }
 0x132   : > { %16394 = vst [vmem:[#allocation135_spill] sm:$0xff] %v13652_v16  ;;  %v13658_v33 = vpop.f32.mrb[11].mxu1  ;;  %1825 = vmatmul.mubr.bf16.gmra.mrb[48].mxu0 %v12886_v63  ;;  %v4764_v3 = vsel %vm594_vm0, %v4759_v45, %v4763_v12  ;;  %v13668_v16 = vpop.permute.xlu0 %1083  ;;  %v4778_v45 = vshrl.u32 %v11448_v26, 16  ;;  %v4782_v12 = vrot.slane %v4780_v35, 1  ;;  %v3175_v52 = vsel %vm1136_vm1, %v3173_v54, %v3174_v8  ;;  %v11452_v35 = vld [vmem:[%s11769_s6 + $0xdc] ss:$8 sps:$4 sm:$0xff]  }
 0x133   : > { %16395 = vst [vmem:[#allocation136_spill] sm:$0xff] %v13658_v33  ;;  %10588 = vmatpush3.bf16.msra.mxu1 %v11438_v24  ;;  %1832 = vmatprep.mubr.bf16.mxu0 %v1304_v48  ;;  %v11627_v48 = vld [vmem:[%s11769_s6 + $0xd0] sm:$0x11]  ;;  %v16408_v8 = vld [vmem:[#allocation14_spill] sm:$0xff] }
 0x134   : > { %5720 = vmatprep.subr.bf16.mxu1 %v16204_v53  ;;  %5075 = vrot.lane.b32.xlu1 %v4764_v3, %s11704_s9  ;;  %v13676_v23 = vcombine.high %v11627_v48, %v11627_v48  ;;  %v4783_v48 = vor.u32 %v4782_v12, %v4778_v45  ;;  %v3180_v45 = vrot.slane %v16408_v8, 1 }
 0x136   : > { %3934 = vmatmul.mubr.bf16.gmra.mrb[44].mxu1 %v3115_v32  ;;  %16399 = vst [vmem:[#allocation15_spill] sm:$0xff] %v13676_v23  ;;  %v4785_v32 = vshll.u32 %v13676_v23, 16  ;;  %v16407_v23 = vld [vmem:[#allocation13_spill] sm:$0xff] }
 0x137   : > { %3941 = vmatprep.mubr.bf16.mxu1 %v3169_v47  ;;  %v13671_v24 = vpop.f32.mrb[12].mxu1  ;;  %v1307_v47 = vsel %vm1099_vm2, %v16349_v22, %v13668_v16  ;;  %v3179_v54 = vrot.slane %v16407_v23, 1 }
 0x138   : > { %16396 = vst [vmem:[#allocation137_spill] sm:$0xff] %v13671_v24  ;;  %v13678_v34 = vpop.f32.mrb[13].mxu1  ;;  %v4787_v24 = vrot.slane %v4785_v32, 1  ;;  %v4804_v32 = vshll.u32 %v11452_v35, 16 }
 0x139   : > { %16400 = vst [vmem:[#allocation16_spill] sm:$0xff] %v13678_v34  ;;  %v13680_v58 = vpop.f32.mrb[14].mxu1  ;;  %v16404_v34 = vld [vmem:[#allocation58_spill] sm:$0xff]  ;;  %v3181_v8 = vsel %vm1136_vm1, %v3179_v54, %v3180_v45  ;;  %v16419_v45 = vld [vmem:[#allocation20_spill] sm:$0xff] }
 0x13a   : > { %16401 = vst [vmem:[#allocation138_spill] sm:$0xff] %v13680_v58  ;;  %v13686_v3 = vpop.f32.mrb[15].mxu1  ;;  %1833 = vmatmul.mubr.bf16.gmra.mrb[52].mxu0 %v16403_v31  ;;  %v16405_v58 = vld [vmem:[#allocation107_spill] sm:$0xff]  ;;  %v4788_v26 = vsel %vm594_vm0, %v4783_v48, %v4787_v24 }
 0x13b   : > { %16402 = vst [vmem:[#allocation139_spill] sm:$0xff] %v13686_v3  ;;  %1840 = vmatprep.mubr.bf16.mxu0 %v1307_v47  ;;  %v3116_v33 = vsel %vm1099_vm2, %v16405_v58, %v16404_v34  ;;  %5079 = vrot.lane.b32.xlu0 %v4788_v26, %s11704_s9  ;;  %v11628_v47 = vld [vmem:[%s11769_s6 + $0xe8] sm:$0x11]  ;;  %v1310_v34 = vsel %vm1099_vm2, %v16356_v60, %v13695_v51  ;;  %v4802_v58 = vshrl.u32 %v11452_v35, 16  ;;  %v16413_v26 = vld [vmem:[#allocation104_spill] sm:$0xff]  ;;  %v13722_v60 = vpop.permute.xlu0 %1091 }
 0x13c   : > { %v13703_v12 = vcombine.high %v11628_v47, %v11628_v47  ;;  %16416 = vst [vmem:[#allocation104_spill] sm:$0xff] %v13722_v60 }
 0x13e   : > { %3942 = vmatmul.mubr.bf16.gmra.mrb[48].mxu1 %v3116_v33  ;;  %16409 = vst [vmem:[#allocation58_spill] sm:$0xff] %v13703_v12  ;;  %v4809_v48 = vshll.u32 %v13703_v12, 16  ;;  %v16418_v12 = vld [vmem:[#allocation19_spill] sm:$0xff] }
 0x13f   : > { %3949 = vmatprep.mubr.bf16.mxu1 %v3175_v52  ;;  %v13698_v3 = vpop.f32.mrb[16].mxu1  ;;  %v4806_v52 = vrot.slane %v4804_v32, 1  ;;  %v11456_v32 = vld [vmem:[%s11769_s6 + $0xf4] ss:$8 sps:$4 sm:$0xff]   ;;  %v3185_v54 = vrot.slane %v16418_v12, 1 }
 0x140   : > { %16406 = vst [vmem:[#allocation102_spill] sm:$0xff] %v13698_v3  ;;  %v13705_v33 = vpop.f32.mrb[17].mxu1  ;;  %v4811_v3 = vrot.slane %v4809_v48, 1  ;;  %v4828_v48 = vshll.u32 %v11456_v32, 16 }
 0x141   : > { %16410 = vst [vmem:[#allocation107_spill] sm:$0xff] %v13705_v33  ;;  %v13707_v24 = vpop.f32.mrb[18].mxu1  ;;  %v4807_v47 = vor.u32 %v4806_v52, %v4802_v58  ;;  %v16414_v33 = vld [vmem:[#allocation122_spill] sm:$0xff]  ;;  %v3186_v58 = vrot.slane %v16419_v45, 1 }
 0x142   : > { %16411 = vst [vmem:[#allocation13_spill] sm:$0xff] %v13707_v24  ;;  %v13713_v23 = vpop.f32.mrb[19].mxu1  ;;  %1841 = vmatmul.mubr.bf16.gmra.mrb[56].mxu0 %v16413_v26  ;;  %v16415_v24 = vld [vmem:[#allocation113_spill] sm:$0xff] }
 0x143   : > { %16412 = vst [vmem:[#allocation14_spill] sm:$0xff] %v13713_v23  ;;  %1848 = vmatprep.mubr.bf16.mxu0 %v1310_v34  ;;  %v3117_v37 = vsel %vm1099_vm2, %v16415_v24, %v16414_v33  ;;  %v4812_v35 = vsel %vm594_vm0, %v4807_v47, %v4811_v3  ;;  %v11629_v34 = vld [vmem:[%s11769_s6 + $0x100] sm:$0x11]  ;;  %v1313_v33 = vsel %vm1099_vm2, %v16363_v62, %v13722_v60  ;;  %v4826_v24 = vshrl.u32 %v11456_v32, 16  ;;  %v13749_v62 = vpop.permute.xlu0 %1095 }
 0x144   : > { %5083 = vrot.lane.b32.xlu1 %v4812_v35, %s11704_s9  ;;  %v13730_v52 = vcombine.high %v11629_v34, %v11629_v34  ;;  %v16424_v35 = vld [vmem:[#allocation106_spill] sm:$0xff]  ;;  %v3187_v45 = vsel %vm1136_vm1, %v3185_v54, %v3186_v58 }
 0x145   : > { %16427 = vst [vmem:[#allocation106_spill] sm:$0xff] %v13749_v62  ;;  %v16430_v58 = vld [vmem:[#allocation18_spill] sm:$0xff] }
 0x146   : > { %3950 = vmatmul.mubr.bf16.gmra.mrb[52].mxu1 %v3117_v37  ;;  %16420 = vst [vmem:[#allocation113_spill] sm:$0xff] %v13730_v52  ;;  %v4833_v47 = vshll.u32 %v13730_v52, 16  ;;  %v16429_v52 = vld [vmem:[#allocation17_spill] sm:$0xff] }
 0x147   : > { %3957 = vmatprep.mubr.bf16.mxu1 %v3181_v8  ;;  %v13725_v23 = vpop.f32.mrb[20].mxu1  ;;  %v4830_v8 = vrot.slane %v4828_v48, 1  ;;  %v11459_v48 = vld [vmem:[%s11769_s6 + $0x10c] ss:$8 sps:$4 sm:$0xff]   ;;  %v3191_v54 = vrot.slane %v16429_v52, 1 }
 0x148   : > { %16417 = vst [vmem:[#allocation122_spill] sm:$0xff] %v13725_v23  ;;  %v13732_v37 = vpop.f32.mrb[21].mxu1  ;;  %v4835_v23 = vrot.slane %v4833_v47, 1  ;;  %v4850_v47 = vshrl.u32 %v11459_v48, 16 }
 0x149   : > { %16421 = vst [vmem:[#allocation19_spill] sm:$0xff] %v13732_v37  ;;  %v13734_v3 = vpop.f32.mrb[22].mxu1  ;;  %v4831_v34 = vor.u32 %v4830_v8, %v4826_v24  ;;  %v16425_v37 = vld [vmem:[#allocation74_spill] sm:$0xff]  ;;  %v3192_v24 = vrot.slane %v16430_v58, 1 }
 0x14a   : > { %16422 = vst [vmem:[#allocation20_spill] sm:$0xff] %v13734_v3  ;;  %v13740_v12 = vpop.f32.mrb[23].mxu1  ;;  %1849 = vmatmul.mubr.bf16.gmra.mrb[60].mxu0 %v16424_v35  ;;  %v16426_v3 = vld [vmem:[#allocation112_spill] sm:$0xff] }
 0x14b   : > { %16423 = vst [vmem:[#allocation140_spill] sm:$0xff] %v13740_v12  ;;  %1856 = vmatprep.mubr.bf16.mxu0 %v1313_v33  ;;  %v3118_v22 = vsel %vm1099_vm2, %v16426_v3, %v16425_v37  ;;  %v4836_v32 = vsel %vm594_vm0, %v4831_v34, %v4835_v23  ;;  %v11630_v33 = vld [vmem:[%s11769_s6 + $0x118] sm:$0x11]  ;;  %v4852_v37 = vshll.u32 %v11459_v48, 16  ;;  %v1316_v3 = vsel %vm1099_vm2, %v16370_v36, %v13749_v62  ;;  %v11631_v36 = vld [vmem:[%s11769_s6] ss:$8 sps:$4 sm:$0xff]  }
 0x14c   : > { %5087 = vrot.lane.b32.xlu0 %v4836_v32, %s11704_s9  ;;  %v13757_v8 = vcombine.high %v11630_v33, %v11630_v33  ;;  %v16435_v32 = vld [vmem:[#allocation109_spill] sm:$0xff]  ;;  %v3193_v58 = vsel %vm1136_vm1, %v3191_v54, %v3192_v24  ;;  %v1137_v48 = vrot.slane %v11631_v36, 1  ;;  %v3197_v24 = vrot.slane %v16325_v4, 1  ;;  %v16445_v4 = vld [vmem:[#allocation111_spill] sm:$0xff] }
 0x14e   : > { %3958 = vmatmul.mubr.bf16.gmra.mrb[56].mxu1 %v3118_v22  ;;  %16431 = vst [vmem:[#allocation112_spill] sm:$0xff] %v13757_v8  ;;  %v4857_v52 = vshll.u32 %v13757_v8, 16 }
 0x14f   : > { %3965 = vmatprep.mubr.bf16.mxu1 %v3187_v45  ;;  %v13752_v12 = vpop.f32.mrb[24].mxu1  ;;  %v4854_v45 = vrot.slane %v4852_v37, 1  ;;  %v16438_v37 = vld [vmem:[#allocation57_spill] sm:$0xff] }
 0x150   : > { %16428 = vst [vmem:[#allocation74_spill] sm:$0xff] %v13752_v12  ;;  %v13759_v22 = vpop.f32.mrb[25].mxu1  ;;  %v4859_v12 = vrot.slane %v4857_v52, 1  ;;  %v1138_v62 = vrot.slane %v16438_v37, 1 }
 0x151   : > { %16432 = vst [vmem:[#allocation17_spill] sm:$0xff] %v13759_v22  ;;  %v13761_v23 = vpop.f32.mrb[26].mxu1  ;;  %v4855_v33 = vor.u32 %v4854_v45, %v4850_v47  ;;  %v16437_v22 = vld [vmem:[#allocation115_spill] sm:$0xff] }
 0x152   : > { %16433 = vst [vmem:[#allocation18_spill] sm:$0xff] %v13761_v23  ;;  %v13767_v34 = vpop.f32.mrb[27].mxu1  ;;  %1857 = vmatmul.mubr.bf16.gmra.mrb[64].mxu0 %v16435_v32  ;;  %v16436_v23 = vld [vmem:[#allocation123_spill] sm:$0xff] }
 0x153   : > { %16434 = vst [vmem:[#allocation141_spill] sm:$0xff] %v13767_v34  ;;  %1864 = vmatprep.mubr.bf16.mxu0 %v1316_v3  ;;  %v3119_v60 = vsel %vm1099_vm2, %v16437_v22, %v16436_v23  ;;  %v4860_v8 = vsel %vm594_vm0, %v4855_v33, %v4859_v12  ;;  %v11463_v34 = vld [vmem:[%s11769_s6 + $0x124] ss:$8 sps:$4 sm:$0xff]   ;;  %v16440_v3 = vld [vmem:[#allocation24_spill] sm:$0xff]  ;;  %v11632_v45 = vld [vmem:[%s11769_s6 + $0x130] sm:$0x11]  ;;  %v1139_v12 = vsel %vm1136_vm1, %v1137_v48, %v1138_v62 }
 0x154   : > { %5091 = vrot.lane.b32.xlu1 %v4860_v8, %s11704_s9  ;;  %v3198_v47 = vrot.slane %v16440_v3, 1  ;;  %v13784_v52 = vcombine.high %v11632_v45, %v11632_v45  ;;  %v4874_v23 = vshrl.u32 %v11463_v34, 16  ;;  %v16447_v62 = vld [vmem:[#allocation60_spill] sm:$0xff] }
 0x156   : > { %3966 = vmatmul.mubr.bf16.gmra.mrb[60].mxu1 %v3119_v60  ;;  %16441 = vst [vmem:[#allocation123_spill] sm:$0xff] %v13784_v52  ;;  %v4876_v60 = vshll.u32 %v11463_v34, 16  ;;  %v4881_v8 = vshll.u32 %v13784_v52, 16  ;;  %v3199_v37 = vsel %vm1136_vm1, %v3197_v24, %v3198_v47  ;;  %v1144_v34 = vrot.slane %v16447_v62, 1  ;;  %v16448_v47 = vld [vmem:[#allocation22_spill] sm:$0xff] }
 0x157   : > { %3973 = vmatprep.mubr.bf16.mxu1 %v3193_v58  ;;  %v13779_v54 = vpop.f32.mrb[28].mxu1  ;;  %v3203_v24 = vrot.slane %v16333_v44, 1 }
 0x158   : > { %16439 = vst [vmem:[#allocation109_spill] sm:$0xff] %v13779_v54  ;;  %v13786_v22 = vpop.f32.mrb[29].mxu1  ;;  %v4878_v58 = vrot.slane %v4876_v60, 1  ;;  %v4883_v45 = vrot.slane %v4881_v8, 1  ;;  %v16446_v54 = vld [vmem:[#allocation116_spill] sm:$0xff] }
 0x159   : > { %16442 = vst [vmem:[#allocation115_spill] sm:$0xff] %v13786_v22  ;;  %v13788_v36 = vpop.f32.mrb[30].mxu1  ;;  %v1030_v22 = vpop.permute.xlu0 %1029  ;;  %v11467_v60 = vld [vmem:[%s11769_s6 + $0x13c] ss:$8 sps:$4 sm:$0xff]  }
 0x15a   : > { %16443 = vst [vmem:[#allocation57_spill] sm:$0xff] %v13788_v36  ;;  %v13792_v33 = vpop.f32.mrb[31].mxu1  ;;  %1865 = vmatmul.mubr.bf16.gmra.mrb[68].mxu0 %v16445_v4  ;;  %v4879_v3 = vor.u32 %v4878_v58, %v4874_v23  ;;  %v3120_v36 = vsel %vm1099_vm2, %v16446_v54, %v13251_v18  ;;  %v3204_v23 = vrot.slane %v16448_v47, 1  ;;  %v4900_v8 = vshll.u32 %v11467_v60, 16  ;;  %v16450_v18 = vld [vmem:[#allocation125_spill] sm:$0xff] }
 0x15b   : > { %16444 = vst [vmem:[#allocation24_spill] sm:$0xff] %v13792_v33  ;;  %1905 = vmatprep.mubr.bf16.mxu0 %v1139_v12  ;;  %v11633_v12 = vld [vmem:[%s11769_s6 + $0x148] sm:$0x11]  ;;  %v1100_v54 = vsel %vm1099_vm2, %v16450_v18, %v1030_v22  ;;  %v16454_v18 = vld [vmem:[#allocation124_spill] sm:$0xff] }
 0x15c   : > { %v4884_v48 = vsel %vm594_vm0, %v4879_v3, %v4883_v45  ;;  %v13806_v58 = vcombine.high %v11633_v12, %v11633_v12  ;;  %v16452_v3 = vrot.slane %v13544_v43, 1  ;;  %v4902_v44 = vrot.slane %v4900_v8, 1  ;;  %v11471_v8 = vld [vmem:[%s11769_s6 + $0x154] ss:$8 sps:$4 sm:$0xff]  }
 0x15d   : > { %5095 = vrot.lane.b32.xlu0 %v4884_v48, %s11704_s9  ;;  %v3205_v47 = vsel %vm1136_vm1, %v3203_v24, %v3204_v23  ;;  %v3209_v24 = vrot.slane %v16339_v40, 1  ;;  %v16457_v23 = vld [vmem:[#allocation30_spill] sm:$0xff] }
 0x15e   : > { %3974 = vmatmul.mubr.bf16.gmra.mrb[64].mxu1 %v3120_v36  ;;  %16449 = vst [vmem:[#allocation111_spill] sm:$0xff] %v13806_v58  ;;  %v4905_v45 = vshll.u32 %v13806_v58, 16  ;;  %v11634_v58 = vld [vmem:[%s11769_s6 + $0x160] sm:$0x11] }
 0x15f   : > { %3981 = vmatprep.mubr.bf16.mxu1 %v3199_v37  ;;  %v10579_v33 = vpop.f32.mrb[32].mxu1  ;;  %v1145_v37 = vsel %vm1136_vm1, %v16452_v3, %v1144_v34  ;;  %v16456_v34 = vld [vmem:[#allocation63_spill] sm:$0xff]  ;;  %v13826_v52 = vcombine.high %v11634_v58, %v11634_v58  ;;  %v16459_v58 = vrot.slane %v13566_v59, 1 }
 0x160   : > { %v13810_v36 = vpop.f32.mrb[33].mxu1  ;;  %v4898_v33 = vshrl.u32 %v11467_v60, 16  ;;  %v4907_v22 = vrot.slane %v4905_v45, 1  ;;  %v1150_v3 = vrot.slane %v16456_v34, 1  ;;  %v16458_v45 = vld [vmem:[#allocation69_spill] sm:$0xff] }
 0x161   : > { %16451 = vst [vmem:[#allocation116_spill] sm:$0xff] %v13810_v36  ;;  %v10580_v62 = vpop.f32.mrb[34].mxu1  ;;  %v1034_v36 = vpop.permute.xlu0 %1033 }
 0x162   : > { %v13816_v48 = vpop.f32.mrb[35].mxu1  ;;  %1906 = vmatmul.mubr.bf16.vlgmr.msra.gmra.mrb[72].mxu0 %v1100_v54  ;;  %v4903_v12 = vor.u32 %v4902_v44, %v4898_v33  ;;  %v16455_v62 = vld [vmem:[#allocation117_spill] sm:$0xff]  ;;  %v3210_v54 = vrot.slane %v16457_v23, 1  ;;  %v4924_v33 = vshll.u32 %v11471_v8, 16  ;;  %v4929_v44 = vshll.u32 %v13826_v52, 16 }
 0x163   : > { %16453 = vst [vmem:[#allocation60_spill] sm:$0xff] %v13816_v48  ;;  %1913 = vmatprep.mubr.bf16.mxu0 %v1145_v37  ;;  %v3121_v43 = vsel %vm1099_vm2, %v16455_v62, %v16454_v18  ;;  %v4922_v37 = vshrl.u32 %v11471_v8, 16  ;;  %v1101_v18 = vsel %vm1099_vm2, %v16458_v45, %v1034_v36  ;;  %v16460_v23 = vld [vmem:[#allocation5_spill] sm:$0xff] }
 0x164   : > { %v4908_v60 = vsel %vm594_vm0, %v4903_v12, %v4907_v22  ;;  %v4926_v40 = vrot.slane %v4924_v33, 1  ;;  %v4931_v22 = vrot.slane %v4929_v44, 1  ;;  %v3122_v36 = vsel %vm1099_vm2, %v16460_v23, %v13276_v41  ;;  %v11635_v33 = vld [vmem:[%s11769_s6 + $0x178] sm:$0x11] }
 0x165   : > { %5099 = vrot.lane.b32.xlu1 %v4908_v60, %s11704_s9  ;;  %v3211_v60 = vsel %vm1136_vm1, %v3209_v24, %v3210_v54  ;;  %v1038_v45 = vpop.permute.xlu0 %1037  ;;  %v13845_v44 = vcombine.high %v11635_v33, %v11635_v33  ;;  %v16462_v24 = vld [vmem:[#allocation26_spill] sm:$0xff]  ;;  %v16465_v33 = vld [vmem:[#allocation73_spill] sm:$0xff] }
 0x166   : > { %3982 = vmatmul.mubr.bf16.gmra.mrb[68].mxu1 %v3121_v43  ;;  %v4927_v8 = vor.u32 %v4926_v40, %v4922_v37  ;;  %v3216_v54 = vrot.slane %v16462_v24, 1  ;;  %v11478_v24 = vld [vmem:[%s11769_s6 + $0x184] ss:$8 sps:$4 sm:$0xff]  }
 0x167   : > { %3989 = vmatprep.mubr.bf16.mxu1 %v3205_v47  ;;  %v1151_v47 = vsel %vm1136_vm1, %v16459_v58, %v1150_v3  ;;  %v11474_v3 = vld [vmem:[%s11769_s6 + $0x16c] ss:$8 sps:$4 sm:$0xff]   ;;  %v4953_v41 = vshll.u32 %v13845_v44, 16 }
 0x168   : > { %v4946_v37 = vshrl.u32 %v11474_v3, 16  ;;  %v4948_v58 = vshll.u32 %v11474_v3, 16  ;;  %v1161_v3 = vrot.slane %v16350_v15, 1  ;;  %v4970_v15 = vshrl.u32 %v11478_v24, 16 }
 0x169   : > { %v3742_v62 = vpop.f32.mrb[36].mxu1 }
 0x16a   : > { %v3744_v12 = vpop.f32.mrb[37].mxu1  ;;  %1914 = vmatmul.mubr.bf16.gmra.mrb[76].mxu0 %v1101_v18  ;;  %v16461_v62 = vld [vmem:[#allocation67_spill] sm:$0xff]  ;;  %v3215_v18 = vrot.slane %v16345_v2, 1  ;;  %v4950_v2 = vrot.slane %v4948_v58, 1  ;;  %v3221_v58 = vrot.slane %v16352_v29, 1 }
 0x16b   : > { %v3745_v43 = vpop.f32.mrb[38].mxu1  ;;  %1921 = vmatprep.mubr.bf16.mxu0 %v1151_v47  ;;  %v1156_v59 = vrot.slane %v16461_v62, 1  ;;  %v4932_v12 = vsel %vm594_vm0, %v4927_v8, %v4931_v22  ;;  %v16463_v47 = vld [vmem:[#allocation126_spill] sm:$0xff]  ;;  %v4955_v8 = vrot.slane %v4953_v41, 1  ;;  %v16466_v41 = vld [vmem:[#allocation35_spill] sm:$0xff] }
 0x16c   : > { %v3747_v34 = vpop.f32.mrb[39].mxu1  ;;  %5103 = vrot.lane.b32.xlu0 %v4932_v12, %s11704_s9  ;;  %v1102_v40 = vsel %vm1099_vm2, %v16463_v47, %v1038_v45  ;;  %v3217_v62 = vsel %vm1136_vm1, %v3215_v18, %v3216_v54  ;;  %v4951_v12 = vor.u32 %v4950_v2, %v4946_v37  ;;  %v1042_v45 = vpop.permute.xlu0 %1041  ;;  %v3222_v47 = vrot.slane %v16466_v41, 1  ;;  %v11636_v18 = vld [vmem:[%s11769_s6 + $0x190] sm:$0x11] }
 0x16d   : > { %v16464_v34 = vrot.slane %v16293_v38, 1  ;;  %v1162_v38 = vrot.slane %v16465_v33, 1  ;;  %v13870_v54 = vcombine.high %v11636_v18, %v11636_v18  ;;  %v4972_v37 = vshll.u32 %v11478_v24, 16 }
 0x16e   : > { %3990 = vmatmul.mubr.bf16.gmra.mrb[72].mxu1 %v3122_v36  ;;  %v3223_v29 = vsel %vm1136_vm1, %v3221_v58, %v3222_v47 }
 0x16f   : > { %3997 = vmatprep.mubr.bf16.mxu1 %v3211_v60  ;;  %v1157_v60 = vsel %vm1136_vm1, %v16464_v34, %v1156_v59  ;;  %v4956_v59 = vsel %vm594_vm0, %v4951_v12, %v4955_v8  ;;  %v4977_v34 = vshll.u32 %v13870_v54, 16 }
 0x170   : > { %5107 = vrot.lane.b32.xlu1 %v4956_v59, %s11704_s9  ;;  %v1046_v8 = vpop.permute.xlu0 %1045  ;;  %v16468_v59 = vld [vmem:[#allocation33_spill] sm:$0xff] }
 0x171   : > { %v13853_v43 = vpop.f32.mrb[40].mxu1  ;;  %v4979_v2 = vrot.slane %v4977_v34, 1  ;;  %v3228_v24 = vrot.slane %v16468_v59, 1  ;;  %v16470_v34 = vld [vmem:[#allocation85_spill] sm:$0xff] }
 0x172   : > { %v3752_v22 = vpop.f32.mrb[41].mxu1  ;;  %1922 = vmatmul.mubr.bf16.gmra.mrb[8].mxu0 %v1102_v40  ;;  %v1163_v40 = vsel %vm1136_vm1, %v1161_v3, %v1162_v38  ;;  %v11637_v3 = vld [vmem:[%s11769_s6 + $0x1a8] sm:$0x11]  ;;  %v3227_v38 = vrot.slane %v16360_v20, 1 }
 0x173   : > { %v13858_v23 = vpop.f32.mrb[42].mxu1  ;;  %1929 = vmatprep.mubr.bf16.mxu0 %v1157_v60  ;;  %v4974_v22 = vrot.slane %v4972_v37, 1  ;;  %v13884_v33 = vcombine.high %v11637_v3, %v11637_v3 }
 0x174   : > { %v3755_v36 = vpop.f32.mrb[43].mxu1  ;;  %v1050_v20 = vpop.permute.xlu0 %1049 }
 0x175   : > { %v4975_v60 = vor.u32 %v4974_v22, %v4970_v15  ;;  %v1167_v36 = vrot.slane %v16357_v39, 1  ;;  %v5001_v39 = vshll.u32 %v13884_v33, 16  ;;  %v1173_v22 = vrot.slane %v16364_v17, 1 }
 0x176   : > { %3998 = vmatmul.mubr.bf16.gmra.mrb[76].mxu1 %v13318_v13  ;;  %v1103_v13 = vsel %vm1099_vm2, %v13300_v42, %v1042_v45  ;;  %v11482_v45 = vld [vmem:[%s11769_s6 + $0x19c] ss:$8 sps:$4 sm:$0xff]  }
 0x177   : > { %4005 = vmatprep.mubr.bf16.mxu1 %v3217_v62  ;;  %v16467_v62 = vld [vmem:[#allocation79_spill] sm:$0xff]  ;;  %v4980_v12 = vsel %vm594_vm0, %v4975_v60, %v4979_v2  ;;  %v4994_v58 = vshrl.u32 %v11482_v45, 16  ;;  %v4996_v41 = vshll.u32 %v11482_v45, 16  ;;  %v5003_v37 = vrot.slane %v5001_v39, 1  ;;  %v11484_v60 = vld [vmem:[%s15919_s1 + $0x340] sm:$0xff]   ;;  %v16472_v45 = vld [vmem:[#allocation82_spill] sm:$0xff] }
 0x178   : > { %v1168_v42 = vrot.slane %v16467_v62, 1  ;;  %5111 = vrot.lane.b32.xlu0 %v4980_v12, %s11704_s9  ;;  %v11486_v2 = vld [vmem:[%s11769_s6 + $0x1b4] ss:$8 sps:$4 sm:$0xff]   ;;  %10625 = vmatprep.subr.bf16.mxu0 %v11484_v60  ;;  %v1105_v3 = vsel %vm1099_vm2, %v16472_v45, %v1050_v20 }
 0x179   : > { %v4998_v18 = vrot.slane %v4996_v41, 1  ;;  %v5020_v17 = vshll.u32 %v11486_v2, 16  ;;  %10626 = vmatpush3.bf16.msra.mxu0 %v11484_v60  ;;  %v16473_v39 = vld [vmem:[#allocation75_spill] sm:$0xff]  ;;  %v16476_v60 = vld [vmem:[#allocation37_spill] sm:$0xff] }
 0x17a   : > { %1930 = vmatmul.mubr.bf16.gmra.mrb[12].mxu0 %v1103_v13  ;;  %v1169_v47 = vsel %vm1136_vm1, %v1167_v36, %v1168_v42  ;;  %v3229_v13 = vsel %vm1136_vm1, %v3227_v38, %v3228_v24  ;;  %v16471_v36 = vld [vmem:[#allocation39_spill] sm:$0xff]  ;;  %v11638_v42 = vld [vmem:[%s11769_s6 + $0x1c0] sm:$0x11]  ;;  %v5018_v38 = vshrl.u32 %v11486_v2, 16  ;;  %v3240_v2 = vrot.slane %v16476_v60, 1 }
 0x17b   : > { %1937 = vmatprep.mubr.bf16.mxu0 %v1163_v40  ;;  %v4999_v15 = vor.u32 %v4998_v18, %v4994_v58  ;;  %v16469_v40 = vld [vmem:[#allocation70_spill] sm:$0xff]  ;;  %v3234_v62 = vrot.slane %v16471_v36, 1  ;;  %v13905_v12 = vcombine.high %v11638_v42, %v11638_v42  ;;  %v5022_v24 = vrot.slane %v5020_v17, 1 }
 0x17c   : > { %v1191_v60 = vrot.slane %v12846_v50, 1 }
 0x17d   : > { %v5025_v58 = vshll.u32 %v13905_v12, 16  ;;  %v5023_v41 = vor.u32 %v5022_v24, %v5018_v38  ;;  %v16479_v24 = vld [vmem:[#allocation10_spill] sm:$0xff] }
 0x17e   : > { %4006 = vmatmul.mubr.bf16.gmra.mrb[80].mxu1 %v13349_v46  ;;  %v1104_v46 = vsel %vm1099_vm2, %v13338_v6, %v1046_v8  ;;  %v5004_v6 = vsel %vm594_vm0, %v4999_v15, %v5003_v37  ;;  %v3233_v8 = vrot.slane %v16366_v49, 1  ;;  %v1054_v37 = vpop.permute.xlu0 %1053  ;;  %v16475_v15 = vld [vmem:[#allocation93_spill] sm:$0xff] }
 0x17f   : > { %4013 = vmatprep.mubr.bf16.mxu1 %v3223_v29  ;;  %v1174_v29 = vrot.slane %v16470_v34, 1  ;;  %5115 = vrot.lane.b32.xlu1 %v5004_v6, %s11704_s9  ;;  %v1180_v20 = vrot.slane %v16475_v15, 1  ;;  %v11639_v34 = vld [vmem:[%s11769_s6 + $0x1d8] sm:$0x11]  ;;  %v3239_v6 = vrot.slane %v16371_v19, 1 }
 0x180   : > { %v3235_v49 = vsel %vm1136_vm1, %v3233_v8, %v3234_v62  ;;  %v16478_v19 = vld [vmem:[#allocation72_spill] sm:$0xff] }
 0x181   : > { %v1175_v59 = vsel %vm1136_vm1, %v1173_v22, %v1174_v29  ;;  %v11489_v22 = vld [vmem:[%s11769_s6 + $0x1cc] ss:$8 sps:$4 sm:$0xff]   ;;  %v13920_v29 = vcombine.high %v11639_v34, %v11639_v34  ;;  %v3241_v38 = vsel %vm1136_vm1, %v3239_v6, %v3240_v2 }
 0x182   : > { %1938 = vmatmul.mubr.bf16.gmra.mrb[16].mxu0 %v1104_v46  ;;  %v5027_v46 = vrot.slane %v5025_v58, 1  ;;  %v5042_v8 = vshrl.u32 %v11489_v22, 16  ;;  %v5044_v36 = vshll.u32 %v11489_v22, 16  ;;  %v3127_v58 = vsel %vm1099_vm2, %v16479_v24, %v16478_v19  ;;  %v16483_v22 = vld [vmem:[#allocation119_spill] sm:$0xff]  ;;  %v11640_v19 = vld [vmem:[%s11769_s6 + $0x1c] ss:$8 sps:$4 sm:$0xff]  }
 0x183   : > { %1945 = vmatprep.mubr.bf16.mxu0 %v1169_v47  ;;  %v16474_v47 = vld [vmem:[#allocation118_spill] sm:$0xff]  ;;  %v5049_v62 = vshll.u32 %v13920_v29, 16  ;;  %v16488_v24 = vld [vmem:[#allocation44_spill] sm:$0xff] }
 0x184   : > { %v3126_v18 = vsel %vm1099_vm2, %v16474_v47, %v16473_v39  ;;  %v5046_v45 = vrot.slane %v5044_v36, 1 }
 0x186   : > { %4014 = vmatmul.mubr.bf16.gmra.mrb[84].mxu1 %v16469_v40  ;;  %v5028_v40 = vsel %vm594_vm0, %v5023_v41, %v5027_v46  ;;  %v1185_v41 = vrot.slane %v12814_v55, 1  ;;  %v16480_v46 = vld [vmem:[#allocation96_spill] sm:$0xff]  ;;  %v16482_v55 = vld [vmem:[#allocation127_spill] sm:$0xff] }
 0x187   : > { %4021 = vmatprep.mubr.bf16.mxu1 %v3229_v13  ;;  %v1179_v13 = vrot.slane %v16369_v28, 1  ;;  %5119 = vrot.lane.b32.xlu0 %v5028_v40, %s11704_s9  ;;  %v16477_v28 = vld [vmem:[#allocation25_spill] sm:$0xff]  ;;  %v1186_v39 = vrot.slane %v16480_v46, 1  ;;  %v3128_v34 = vsel %vm1099_vm2, %v16483_v22, %v16482_v55  ;;  %v11641_v55 = vld [vmem:[%s11769_s6 + $0x34] ss:$8 sps:$4 sm:$0xff]  }
 0x188   : > { %v1106_v42 = vsel %vm1099_vm2, %v16477_v28, %v1054_v37  ;;  %v16481_v37 = vld [vmem:[#allocation42_spill] sm:$0xff]  ;;  %v3158_v22 = vrot.slane %v11641_v55, 1 }
 0x189   : > { %v1181_v17 = vsel %vm1136_vm1, %v1179_v13, %v1180_v20  ;;  %v3246_v13 = vrot.slane %v16481_v37, 1  ;;  %v1187_v20 = vsel %vm1136_vm1, %v1185_v41, %v1186_v39  ;;  %v1203_v37 = vrot.slane %v12869_v9, 1 }
 0x18a   : > { %1946 = vmatmul.mubr.bf16.gmra.mrb[20].mxu0 %v1105_v3  ;;  %v5051_v3 = vrot.slane %v5049_v62, 1 }
 0x18b   : > { %1953 = vmatprep.mubr.bf16.mxu0 %v1175_v59  ;;  %v5047_v59 = vor.u32 %v5046_v45, %v5042_v8  ;;  %v16485_v8 = vld [vmem:[#allocation40_spill] sm:$0xff] }
 0x18c   : > { %v3252_v36 = vrot.slane %v16485_v8, 1 }
 0x18d   : > { %v5052_v47 = vsel %vm594_vm0, %v5047_v59, %v5051_v3  ;;  %v1197_v3 = vrot.slane %v12854_v21, 1  ;;  %v11493_v21 = vld [vmem:[%s15919_s1 + $0x348] sm:$0xff]  }
 0x18e   : > { %4022 = vmatmul.mubr.bf16.gmra.mrb[88].mxu1 %v3126_v18  ;;  %5123 = vrot.lane.b32.xlu1 %v5052_v47, %s11704_s9  ;;  %v3245_v18 = vrot.slane %v16373_v57, 1  ;;  %v16484_v57 = vld [vmem:[#allocation98_spill] sm:$0xff] }
 0x18f   : > { %4029 = vmatprep.mubr.bf16.mxu1 %v3235_v49  ;;  %v1058_v49 = vpop.permute.xlu0 %1057  ;;  %v1192_v2 = vrot.slane %v16484_v57, 1  ;;  %10627 = vmatprep.subr.bf16.mxu0 %v11493_v21 }
 0x190   : > { %v1107_v15 = vsel %vm1099_vm2, %v13458_v27, %v1058_v49  ;;  %v3247_v40 = vsel %vm1136_vm1, %v3245_v18, %v3246_v13  ;;  %v3251_v27 = vrot.slane %v13570_v25, 1  ;;  %v16487_v25 = vld [vmem:[#allocation99_spill] sm:$0xff]  ;;  %v3130_v18 = vsel %vm1099_vm2, %v13132_v0, %v13500_v56  ;;  %10628 = vmatpush3.bf16.msra.mxu0 %v11493_v21  ;;  %v16489_v13 = vld [vmem:[#allocation100_spill] sm:$0xff] }
 0x191   : > { %v1193_v28 = vsel %vm1136_vm1, %v1191_v60, %v1192_v2  ;;  %v16492_v2 = vld [vmem:[#allocation92_spill] sm:$0xff] }
 0x192   : > { %1954 = vmatmul.mubr.bf16.gmra.mrb[24].mxu0 %v1106_v42  ;;  %v3253_v42 = vsel %vm1136_vm1, %v3251_v27, %v3252_v36  ;;  %v11447_v36 = vld [vmem:[%s15919_s1 + $0x240] sm:$0xff]  }
 0x193   : > { %1961 = vmatprep.mubr.bf16.mxu0 %v1181_v17  ;;  %v1062_v6 = vpop.permute.xlu0 %1061  ;;  %v16486_v17 = vld [vmem:[#allocation128_spill] sm:$0xff] }
 0x194   : > { %v1108_v62 = vsel %vm1099_vm2, %v13492_v61, %v1062_v6  ;;  %v3129_v50 = vsel %vm1099_vm2, %v13098_v1, %v16486_v17  ;;  %v3152_v61 = vrot.slane %v11640_v19, 1  ;;  %v16491_v6 = vld [vmem:[#allocation9_spill] sm:$0xff]  ;;  %v16497_v19 = vld [vmem:[#allocation50_spill] sm:$0xff] }
 0x195   : > { %v3165_v60 = vrot.slane %v16491_v6, 1 }
 0x196   : > { %4030 = vmatmul.mubr.bf16.gmra.mrb[92].mxu1 %v3127_v58  ;;  %v3153_v58 = vrot.slane %v16488_v24, 1 }
 0x197   : > { %4037 = vmatprep.mubr.bf16.mxu1 %v3241_v38  ;;  %v1066_v45 = vpop.permute.xlu0 %1065  ;;  %v1198_v38 = vrot.slane %v16487_v25, 1  ;;  %v11450_v25 = vld [vmem:[%s15919_s1 + $0x248] sm:$0xff]  }
 0x198   : > { %v1109_v41 = vsel %vm1099_vm2, %v13525_v14, %v1066_v45  ;;  %v3154_v47 = vsel %vm1136_vm1, %v3152_v61, %v3153_v58  ;;  %v16495_v45 = vld [vmem:[#allocation101_spill] sm:$0xff]  ;;  %v3177_v61 = vrot.slane %v16497_v19, 1 }
 0x199   : > { %v1199_v1 = vsel %vm1136_vm1, %v1197_v3, %v1198_v38  ;;  %v1210_v3 = vrot.slane %v16495_v45, 1  ;;  %v16496_v38 = vld [vmem:[#allocation46_spill] sm:$0xff]  ;;  %v16498_v58 = vld [vmem:[#allocation45_spill] sm:$0xff] }
 0x19a   : > { %1962 = vmatmul.mubr.bf16.gmra.mrb[28].mxu0 %v1107_v15  ;;  %v1204_v15 = vrot.slane %v16489_v13, 1  ;;  %v16503_v13 = vld [vmem:[#allocation48_spill] sm:$0xff]  ;;  %v16514_v19 = vld [vmem:[#allocation53_spill] sm:$0xff] }
 0x19b   : > { %1969 = vmatprep.mubr.bf16.mxu0 %v1187_v20  ;;  %v1070_v14 = vpop.permute.xlu0 %1069  ;;  %v16490_v20 = vld [vmem:[#allocation43_spill] sm:$0xff] }
 0x19c   : > { %v1110_v0 = vsel %vm1099_vm2, %v16492_v2, %v1070_v14  ;;  %v1205_v9 = vsel %vm1136_vm1, %v1203_v37, %v1204_v15  ;;  %v11454_v37 = vld [vmem:[%s15919_s1 + $0x258] sm:$0xff]   ;;  %v3183_v15 = vrot.slane %v16503_v13, 1  ;;  %v16507_v2 = vld [vmem:[#allocation51_spill] sm:$0xff]  ;;  %v11465_v13 = vld [vmem:[%s15919_s1 + $0x280] sm:$0xff]  }
 0x19e   : > { %4038 = vmatmul.mubr.bf16.gmra.mrb[96].mxu1 %v3128_v34 }
 0x19f   : > { %4045 = vmatprep.mubr.bf16.mxu1 %v3247_v40  ;;  %v3159_v40 = vrot.slane %v16490_v20, 1  ;;  %v1074_v17 = vpop.permute.xlu0 %1073  ;;  %v16504_v20 = vld [vmem:[#allocation52_spill] sm:$0xff] }
 0x1a0   : > { %v1111_v24 = vsel %vm1099_vm2, %v13577_v10, %v1074_v17  ;;  %v16511_v17 = vld [vmem:[#allocation54_spill] sm:$0xff] }
 0x1a1   : > { %v3160_v8 = vsel %vm1136_vm1, %v3158_v22, %v3159_v40  ;;  %v3189_v40 = vrot.slane %v16504_v20, 1  ;;  %v16505_v22 = vld [vmem:[#allocation47_spill] sm:$0xff] }
 0x1a2   : > { %1970 = vmatmul.mubr.bf16.gmra.mrb[32].mxu0 %v1108_v62  ;;  %v16493_v62 = vld [vmem:[#allocation8_spill] sm:$0xff]  ;;  %v16506_v6 = vrot.slane %v16505_v22, 1 }
 0x1a3   : > { %1977 = vmatprep.mubr.bf16.mxu0 %v1193_v28  ;;  %v16494_v28 = vrot.slane %v16493_v62, 1  ;;  %v1078_v10 = vpop.permute.xlu0 %1077  ;;  %v11458_v62 = vld [vmem:[%s15919_s1 + $0x268] sm:$0xff]  }
 0x1a4   : > { %v1112_v55 = vsel %vm1099_vm2, %v13609_v5, %v1078_v10 }
 0x1a5   : > { %v1730_v59 = vpop.f32.mrb[0].mxu0 }
 0x1a6   : > { %4046 = vmatmul.mubr.bf16.gmra.mrb[100].mxu1 %v3129_v50  ;;  %v1732_v49 = vpop.f32.mrb[1].mxu0  ;;  %v1209_v50 = vrot.slane %v12886_v63, 1  ;;  %v3171_v59 = vrot.slane %v16496_v38, 1 }
 0x1a7   : > { %4053 = vmatprep.mubr.bf16.mxu1 %v3253_v42  ;;  %v1733_v46 = vpop.f32.mrb[2].mxu0  ;;  %v3166_v42 = vsel %vm1136_vm1, %v16494_v28, %v3165_v60  ;;  %v16499_v49 = vrot.slane %v16498_v58, 1  ;;  %v3184_v60 = vsel %vm1136_vm1, %v16506_v6, %v3183_v15  ;;  %v1082_v5 = vpop.permute.xlu0 %1081  ;;  %v16510_v28 = vld [vmem:[#allocation56_spill] sm:$0xff]  ;;  %v16524_v6 = vld [vmem:[#allocation71_spill] sm:$0xff] }
 0x1a8   : > { %v1735_v39 = vpop.f32.mrb[3].mxu0  ;;  %v1211_v63 = vsel %vm1136_vm1, %v1209_v50, %v1210_v3  ;;  %v11451_v46 = vld [vmem:[%s15919_s1 + $0x250] sm:$0xff]   ;;  %v3201_v50 = vrot.slane %v16511_v17, 1  ;;  %v1113_v45 = vsel %vm1099_vm2, %v13640_v7, %v1082_v5  ;;  %v16516_v58 = vld [vmem:[#allocation108_spill] sm:$0xff]  ;;  %v16526_v5 = vrot.slane %v16334_v30, 1 }
 0x1a9   : > { %v16512_v3 = vld [vmem:[#allocation55_spill] sm:$0xff]  ;;  %v16521_v15 = vld [vmem:[#allocation64_spill] sm:$0xff]  ;;  %v1239_v30 = vrot.slane %v16445_v4, 1 }
 0x1aa   : > { %1978 = vmatmul.mubr.bf16.gmra.mrb[36].mxu0 %v1109_v41  ;;  %v3172_v41 = vsel %vm1136_vm1, %v16499_v49, %v3171_v59  ;;  %v11461_v59 = vld [vmem:[%s15919_s1 + $0x270] sm:$0xff]   ;;  %v1228_v49 = vrot.slane %v16516_v58, 1 }
 0x1ab   : > { %1985 = vmatprep.mubr.bf16.mxu0 %v1199_v1  ;;  %v16500_v1 = vld [vmem:[#allocation49_spill] sm:$0xff]  ;;  %v1086_v7 = vpop.permute.xlu0 %1085  ;;  %v16529_v17 = vld [vmem:[#allocation83_spill] sm:$0xff] }
 0x1ac   : > { %v16501_v21 = vrot.slane %v16500_v1, 1  ;;  %v11462_v1 = vld [vmem:[%s15919_s1 + $0x278] sm:$0xff]   ;;  %v1114_v10 = vsel %vm1099_vm2, %v13668_v16, %v1086_v7  ;;  %v16522_v16 = vrot.slane %v16521_v15, 1 }
 0x1ad   : > { %v13976_v34 = vpop.f32.mrb[4].mxu0 }
 0x1ae   : > { %4054 = vmatmul.mubr.bf16.gmra.mrb[116].mxu1 %v3130_v18  ;;  %v1740_v57 = vpop.f32.mrb[5].mxu0  ;;  %v3178_v39 = vsel %vm1136_vm1, %v16501_v21, %v3177_v61  ;;  %v16502_v18 = vld [vmem:[#allocation103_spill] sm:$0xff]  ;;  %v16515_v61 = vrot.slane %v16514_v19, 1  ;;  %v16518_v21 = vld [vmem:[#allocation65_spill] sm:$0xff] }
 0x1af   : > { %10589 = vmatprep.mubr.msk.bf16.mxu1 %vm1099_vm2, %v3154_v47  ;;  %v13981_v56 = vpop.f32.mrb[6].mxu0  ;;  %v1215_v47 = vrot.slane %v16403_v31, 1  ;;  %v1216_v14 = vrot.slane %v16502_v18, 1  ;;  %v11455_v57 = vld [vmem:[%s15919_s1 + $0x260] sm:$0xff]  }
 0x1b0   : > { %v1743_v27 = vpop.f32.mrb[7].mxu0  ;;  %v16519_v18 = vld [vmem:[#allocation61_spill] sm:$0xff] }
 0x1b1   : > { %v1217_v31 = vsel %vm1136_vm1, %v1215_v47, %v1216_v14  ;;  %v1221_v27 = vrot.slane %v16413_v26, 1  ;;  %v11498_v47 = vld [vmem:[%s15919_s1 + $0x350] sm:$0xff]   ;;  %v16520_v14 = vrot.slane %v16519_v18, 1 }
 0x1b2   : > { %1986 = vmatmul.mubr.bf16.gmra.mrb[40].mxu0 %v1110_v0  ;;  %v16508_v0 = vrot.slane %v16507_v2, 1  ;;  %10629 = vmatprep.subr.bf16.mxu0 %v11498_v47  ;;  %v16525_v2 = vld [vmem:[#allocation32_spill] sm:$0xff] }
 0x1b3   : > { %1993 = vmatprep.mubr.bf16.mxu0 %v1205_v9  ;;  %10630 = vmatpush3.bf16.msra.mxu0 %v11498_v47 }
 0x1b4   : > { %v3190_v9 = vsel %vm1136_vm1, %v16508_v0, %v3189_v40  ;;  %v1090_v40 = vpop.permute.xlu0 %1089  ;;  %v3225_v0 = vrot.slane %v16525_v2, 1 }
 0x1b6   : > { %10590 = vmatmul.mubr.msk.bf16.vlgmr.msra.gmra.mrb[120].mxu1 %vm1099_vm2, %v3160_v8  ;;  %v16509_v8 = vld [vmem:[#allocation105_spill] sm:$0xff] }
 0x1b7   : > { %5721 = vmatpush1.bf16.msra.mxu1 %v11447_v36  ;;  %10593 = vmatprep.mubr.msk.bf16.mxu1 %vm1099_vm2, %v3166_v42  ;;  %v1222_v36 = vrot.slane %v16509_v8, 1  ;;  %v3195_v42 = vrot.slane %v16510_v28, 1  ;;  %v11469_v8 = vld [vmem:[%s15919_s1 + $0x290] sm:$0xff]   ;;  %v16528_v28 = vld [vmem:[#allocation114_spill] sm:$0xff] }
 0x1b8   : > { %5722 = vmatprep.subr.bf16.mxu1 %v16204_v53 }
 0x1b9   : > { %v1223_v26 = vsel %vm1136_vm1, %v1221_v27, %v1222_v36  ;;  %v16527_v36 = vrot.slane %v16342_v11, 1  ;;  %v16530_v11 = vld [vmem:[#allocation91_spill] sm:$0xff] }
 0x1ba   : > { %1994 = vmatmul.mubr.bf16.gmra.mrb[44].mxu0 %v1111_v24  ;;  %v3202_v24 = vsel %vm1136_vm1, %v16515_v61, %v3201_v50  ;;  %v3231_v50 = vrot.slane %v16529_v17, 1  ;;  %v11473_v61 = vld [vmem:[%s15919_s1 + $0x2a0] sm:$0xff]   ;;  %v14186_v17 = vld [vmem:[%s11769_s6 + $0x30] ss:$8 sps:$4 sm:$0xff]  }
 0x1bb   : > { %5723 = vmatpush1.bf16.msra.mxu1 %v11450_v25  ;;  %2001 = vmatprep.mubr.bf16.mxu0 %v1211_v63  ;;  %v16513_v25 = vrot.slane %v16512_v3, 1  ;;  %v1227_v63 = vrot.slane %v16424_v35, 1  ;;  %v16531_v3 = vld [vmem:[#allocation104_spill] sm:$0xff] }
 0x1bc   : > { %5724 = vmatprep.subr.bf16.mxu1 %v16204_v53 }
 0x1bd   : > { %v3196_v38 = vsel %vm1136_vm1, %v16513_v25, %v3195_v42  ;;  %v1229_v35 = vsel %vm1136_vm1, %v1227_v63, %v1228_v49  ;;  %v1240_v42 = vrot.slane %v16528_v28, 1  ;;  %v16536_v49 = vld [vmem:[#allocation94_spill] sm:$0xff] }
 0x1be   : > { %10594 = vmatmul.mubr.msk.bf16.gmra.mrb[124].mxu1 %vm1099_vm2, %v3172_v41  ;;  %v16517_v41 = vld [vmem:[#allocation62_spill] sm:$0xff] }
 0x1bf   : > { %5725 = vmatpush1.bf16.msra.mxu1 %v11451_v46  ;;  %10597 = vmatprep.mubr.msk.bf16.mxu1 %vm1099_vm2, %v3178_v39  ;;  %v3207_v46 = vrot.slane %v16517_v41, 1  ;;  %v3213_v39 = vrot.slane %v16518_v21, 1  ;;  %v1241_v4 = vsel %vm1136_vm1, %v1239_v30, %v1240_v42  ;;  %v3243_v41 = vrot.slane %v16536_v49, 1  ;;  %v14180_v28 = vld [vmem:[%s11769_s6 + $0x4c] ss:$8 sps:$4 sm:$0xff]   ;;  %v11492_v49 = vld [vmem:[%s15919_s1 + $0x2e0] sm:$0xff]  }
 0x1c0   : > { %5726 = vmatprep.subr.bf16.mxu1 %v16204_v53 }
 0x1c1   : > { %v3214_v20 = vsel %vm1136_vm1, %v16522_v16, %v3213_v39  ;;  %v16538_v39 = vld [vmem:[#allocation106_spill] sm:$0xff]  ;;  %v11642_v16 = vld [vmem:[%s11769_s6 + $0x1b4] ss:$8 sps:$4 sm:$0xff]  }
 0x1c2   : > { %2002 = vmatmul.mubr.bf16.gmra.mrb[48].mxu0 %v1112_v55  ;;  %v1233_v55 = vrot.slane %v16435_v32, 1 }
 0x1c3   : > { %5727 = vmatpush1.bf16.msra.mxu1 %v11454_v37  ;;  %2009 = vmatprep.mubr.bf16.mxu0 %v1217_v31  ;;  %v3208_v37 = vsel %vm1136_vm1, %v16520_v14, %v3207_v46  ;;  %v16523_v31 = vld [vmem:[#allocation110_spill] sm:$0xff]  ;;  %v11477_v14 = vld [vmem:[%s15919_s1 + $0x2b0] sm:$0xff]  }
 0x1c4   : > { %5728 = vmatprep.subr.bf16.mxu1 %v16204_v53  ;;  %v1234_v22 = vrot.slane %v16523_v31, 1  ;;  %v11476_v46 = vld [vmem:[%s15919_s1 + $0x2a8] sm:$0xff]   ;;  %v11480_v31 = vld [vmem:[%s15919_s1 + $0x2b8] sm:$0xff]  }
 0x1c6   : > { %10598 = vmatmul.mubr.msk.bf16.gmra.mrb[128].mxu1 %vm1099_vm2, %v3184_v60  ;;  %v3219_v60 = vrot.slane %v16524_v6, 1  ;;  %v1235_v32 = vsel %vm1136_vm1, %v1233_v55, %v1234_v22 }
 0x1c7   : > { %5729 = vmatpush1.bf16.msra.mxu1 %v11455_v57  ;;  %10601 = vmatprep.mubr.msk.bf16.mxu1 %vm1099_vm2, %v3190_v9  ;;  %v11466_v57 = vld [vmem:[%s15919_s1 + $0x288] sm:$0xff]   ;;  %v1115_v9 = vsel %vm1099_vm2, %v13695_v51, %v1090_v40  ;;  %v1094_v51 = vpop.permute.xlu0 %1093  ;;  %v16543_v40 = vld [vmem:[#allocation97_spill] sm:$0xff] }
 0x1c8   : > { %5730 = vmatprep.subr.bf16.mxu1 %v16204_v53  ;;  %v3220_v27 = vsel %vm1136_vm1, %v16526_v5, %v3219_v60  ;;  %v1116_v25 = vsel %vm1099_vm2, %v16531_v3, %v1094_v51  ;;  %v3255_v55 = vrot.slane %v16543_v40, 1  ;;  %v14160_v60 = vpop.permute.xlu1 %5053  ;;  %v11503_v5 = vld [vmem:[%s15919_s1 + $0x358] sm:$0xff]   ;;  %v11481_v51 = vld [vmem:[%s15919_s1 + $0x2c0] sm:$0xff]  }
 0x1c9   : > { %10631 = vmatprep.subr.bf16.mxu0 %v11503_v5  ;;  %v14258_v40 = vld [vmem:[%s11769_s6 + $0x78] ss:$8 sps:$4 sm:$0xff]  }
 0x1ca   : > { %2010 = vmatmul.mubr.bf16.gmra.mrb[52].mxu0 %v1113_v45  ;;  %v11470_v45 = vld [vmem:[%s15919_s1 + $0x298] sm:$0xff]  }
 0x1cb   : > { %5731 = vmatpush1.bf16.msra.mxu1 %v11458_v62  ;;  %2017 = vmatprep.mubr.bf16.mxu0 %v1223_v26  ;;  %v3226_v62 = vsel %vm1136_vm1, %v16527_v36, %v3225_v0  ;;  %v3237_v26 = vrot.slane %v16530_v11, 1  ;;  %v1098_v58 = vpop.permute.xlu0 %1097 }
 0x1cc   : > { %5732 = vmatprep.subr.bf16.mxu1 %v16204_v53  ;;  %v14174_v36 = vpop.permute.xlu1 %5057  ;;  %10632 = vmatpush3.bf16.msra.mxu0 %v11503_v5 }
 0x1cd   : > { %v5291_v42 = vsel %vm1099_vm2, %v14180_v28, %v14174_v36 }
 0x1ce   : > { %10602 = vmatmul.mubr.msk.bf16.gmra.mrb[132].mxu1 %vm1099_vm2, %v3196_v38  ;;  %v16532_v38 = vld [vmem:[#allocation29_spill] sm:$0xff] }
 0x1cf   : > { %5733 = vmatpush1.bf16.msra.mxu1 %v11461_v59  ;;  %10605 = vmatprep.mubr.msk.bf16.mxu1 %vm1099_vm2, %v3202_v24  ;;  %v16533_v59 = vrot.slane %v16532_v38, 1  ;;  %v16534_v24 = vld [vmem:[#allocation80_spill] sm:$0xff] }
 0x1d0   : > { %5734 = vmatprep.subr.bf16.mxu1 %v16204_v53  ;;  %v16535_v7 = vrot.slane %v16534_v24, 1  ;;  %v14196_v3 = vpop.permute.xlu1 %5061 }
 0x1d1   : > { %v3232_v19 = vsel %vm1136_vm1, %v16533_v59, %v3231_v50  ;;  %v11485_v50 = vld [vmem:[%s15919_s1 + $0x2c8] sm:$0xff]  }
 0x1d2   : > { %2018 = vmatmul.mubr.bf16.gmra.mrb[56].mxu0 %v1114_v10  ;;  %v3238_v63 = vsel %vm1136_vm1, %v16535_v7, %v3237_v26  ;;  %v1117_v10 = vsel %vm1099_vm2, %v16538_v39, %v1098_v58  ;;  %v11494_v39 = vld [vmem:[%s15919_s1 + $0x2e8] sm:$0xff]  }
 0x1d3   : > { %5735 = vmatpush1.bf16.msra.mxu1 %v11462_v1  ;;  %2025 = vmatprep.mubr.bf16.mxu0 %v1229_v35  ;;  %v16537_v1 = vld [vmem:[#allocation95_spill] sm:$0xff]  ;;  %v16539_v35 = vld [vmem:[#allocation86_spill] sm:$0xff] }
 0x1d4   : > { %5736 = vmatprep.subr.bf16.mxu1 %v16204_v53  ;;  %v3249_v21 = vrot.slane %v16537_v1, 1  ;;  %v16540_v47 = vrot.slane %v16539_v35, 1 }
 0x1d6   : > { %10606 = vmatmul.mubr.msk.bf16.gmra.mrb[136].mxu1 %vm1099_vm2, %v3208_v37  ;;  %v3244_v18 = vsel %vm1136_vm1, %v16540_v47, %v3243_v41  ;;  %v16541_v37 = vld [vmem:[#allocation89_spill] sm:$0xff] }
 0x1d7   : > { %5737 = vmatpush1.bf16.msra.mxu1 %v11465_v13  ;;  %10609 = vmatprep.mubr.msk.bf16.mxu1 %vm1099_vm2, %v3214_v20  ;;  %v16542_v13 = vrot.slane %v16541_v37, 1  ;;  %v3254_v20 = vrot.slane %v11642_v16, 1  ;;  %v16545_v16 = vld [vmem:[#allocation90_spill] sm:$0xff] }
 0x1d8   : > { %5738 = vmatprep.subr.bf16.mxu1 %v16204_v53 }
 0x1d9   : > { %v3250_v15 = vsel %vm1136_vm1, %v16542_v13, %v3249_v21  ;;  %v3256_v2 = vsel %vm1136_vm1, %v3254_v20, %v3255_v55  ;;  %v14233_v21 = vld [vmem:[%s11769_s6 + $0x60] ss:$8 sps:$4 sm:$0xff]   ;;  %v14250_v13 = vld [vmem:[%s11769_s6 + $0x94] ss:$8 sps:$4 sm:$0xff]   ;;  %v5171_v20 = vrot.slane %v16545_v16, 1 }
 0x1da   : > { %2026 = vmatmul.mubr.bf16.gmra.mrb[60].mxu0 %v1115_v9  ;;  %v14164_v9 = vld [vmem:[%s11769_s6 + $0x34] ss:$8 sps:$4 sm:$0xff]  }
 0x1db   : > { %5739 = vmatpush1.bf16.msra.mxu1 %v11466_v57  ;;  %2033 = vmatprep.mubr.bf16.mxu0 %v1235_v32  ;;  %v5288_v32 = vsel %vm1099_vm2, %v14164_v9, %v14160_v60  ;;  %v5164_v55 = vrot.slane %v14164_v9, 1 }
 0x1dc   : > { %5740 = vmatprep.subr.bf16.mxu1 %v16204_v53 }
 0x1de   : > { %10610 = vmatmul.mubr.msk.bf16.gmra.mrb[140].mxu1 %vm1099_vm2, %v3220_v27 }
 0x1df   : > { %5741 = vmatpush1.bf16.msra.mxu1 %v11469_v8  ;;  %10613 = vmatprep.mubr.msk.bf16.mxu1 %vm1099_vm2, %v3226_v62 }
 0x1e0   : > { %5742 = vmatprep.subr.bf16.mxu1 %v16204_v53 }
 0x1e2   : > { %2034 = vmatmul.mubr.bf16.gmra.mrb[64].mxu0 %v1116_v25 }
 0x1e3   : > { %5743 = vmatpush1.bf16.msra.mxu1 %v11470_v45  ;;  %2041 = vmatprep.mubr.bf16.mxu0 %v1241_v4  ;;  %v11488_v4 = vld [vmem:[%s15919_s1 + $0x2d0] sm:$0xff]  }
 0x1e4   : > { %5744 = vmatprep.subr.bf16.mxu1 %v16204_v53 }
 0x1e6   : > { %10614 = vmatmul.mubr.msk.bf16.gmra.mrb[144].mxu1 %vm1099_vm2, %v3232_v19  ;;  %v14205_v19 = vld [vmem:[%s11769_s6 + $0x64] ss:$8 sps:$4 sm:$0xff]  }
 0x1e7   : > { %5745 = vmatpush1.bf16.msra.mxu1 %v11473_v61  ;;  %10617 = vmatprep.mubr.msk.bf16.mxu1 %vm1099_vm2, %v3238_v63  ;;  %v14212_v61 = vld [vmem:[%s11769_s6 + $0x48] ss:$8 sps:$4 sm:$0xff]   ;;  %v14221_v63 = vpop.permute.xlu1 %5065 }
 0x1e8   : > { %5746 = vmatprep.subr.bf16.mxu1 %v16204_v53 }
 0x1ea   : > { %2042 = vmatmul.mubr.bf16.gmra.mrb[80].mxu0 %v1117_v10 }
 0x1eb   : > { %5747 = vmatpush1.bf16.msra.mxu1 %v11476_v46  ;;  %v11648_v46 = vld [vmem:[%s11769_s6 + $0x7c] ss:$8 sps:$4 sm:$0xff]   ;;  %v14242_v47 = vpop.permute.xlu1 %5069 }
 0x1ec   : > { %5748 = vmatprep.subr.bf16.mxu1 %v16204_v53  ;;  %v5297_v1 = vsel %vm1099_vm2, %v11648_v46, %v14221_v63  ;;  %16544 = vst [vmem:[#allocation22_spill] sm:$0xff] %v14242_v47 }
 0x1ee   : > { %10618 = vmatmul.mubr.msk.bf16.gmra.mrb[148].mxu1 %vm1099_vm2, %v3244_v18 }
 0x1ef   : > { %10621 = vmatprep.mubr.msk.bf16.mxu1 %vm1099_vm2, %v3250_v15  ;;  %5749 = vmatpush1.bf16.msra.mxu1 %v11477_v14  ;;  %v11495_v14 = vld [vmem:[%s15919_s1 + $0x2f0] sm:$0xff]   ;;  %v5300_v15 = vsel %vm1099_vm2, %v14250_v13, %v14242_v47  ;;  %v14274_v5 = vpop.permute.xlu1 %5073 }
 0x1f0   : > { %5750 = vmatprep.subr.bf16.mxu1 %v16204_v53  ;;  %16547 = vst [vmem:[#allocation125_spill] sm:$0xff] %v14274_v5 }
 0x1f1   : > { %v3878_v22 = vpop.f32.mrb[104].mxu1 }
 0x1f2   : > { %v3880_v6 = vpop.f32.mrb[105].mxu1 }
 0x1f3   : > { %v3881_v57 = vpop.f32.mrb[106].mxu1  ;;  %5751 = vmatpush1.bf16.msra.mxu1 %v11480_v31  ;;  %v16546_v31 = vld [vmem:[#allocation38_spill] sm:$0xff]  ;;  %v11496_v6 = vld [vmem:[%s15919_s1 + $0x2f8] sm:$0xff]  }
 0x1f4   : > { %v3883_v0 = vpop.f32.mrb[107].mxu1  ;;  %5897 = vmatprep.subr.bf16.mxu1 %v16204_v53  ;;  %v5165_v22 = vrot.slane %v16546_v31, 1  ;;  %v5170_v57 = vrot.slane %v14180_v28, 1  ;;  %v14286_v28 = vld [vmem:[%s11769_s6 + $0x90] ss:$8 sps:$4 sm:$0xff]   ;;  %v11502_v31 = vld [vmem:[%s15919_s1 + $0x320] sm:$0xff]  }
 0x1f6   : > { %10622 = vmatmul.mubr.msk.bf16.gmra.mrb[152].mxu1 %vm1099_vm2, %v3256_v2  ;;  %v5166_v2 = vsel %vm1136_vm1, %v5164_v55, %v5165_v22  ;;  %v5172_v9 = vsel %vm1136_vm1, %v5170_v57, %v5171_v20 }
 0x1f7   : > { %5752 = vmatprep.mubr.bf16.mxu1 %v5288_v32  ;;  %10633 = vmatprep.mubr.msk.bf16.mxu0 %vm1099_vm2, %v5166_v2  ;;  %v14341_v2 = vld [vmem:[%s11769_s6 + $0xc0] ss:$8 sps:$4 sm:$0xff]  }
 0x1f8   : > { %10634 = vmatmul.mubr.msk.bf16.vlgmr.msra.gmra.mrb[84].mxu0 %vm1099_vm2, %v5172_v9  ;;  %16552 = vst [vmem:[#allocation63_spill] sm:$0xff] %v14341_v2  ;;  %v5188_v9 = vrot.slane %v14250_v13, 1 }
 0x1f9   : > { %v3919_v27 = vpop.f32.mrb[108].mxu1 }
 0x1fa   : > { %v3921_v8 = vpop.f32.mrb[109].mxu1 }
 0x1fb   : > { %v3922_v62 = vpop.f32.mrb[110].mxu1  ;;  %v11497_v8 = vld [vmem:[%s15919_s1 + $0x300] sm:$0xff]  }
 0x1fc   : > { %v3924_v30 = vpop.f32.mrb[111].mxu1 }
 0x1fe   : > { %5753 = vmatmul.mubr.bf16.vlgmr.msra.gmra.mrb[156].mxu1 %v14186_v17 }
 0x1ff   : > { %5898 = vmatpush1.bf16.msra.mxu1 %v11481_v51  ;;  %5760 = vmatprep.mubr.bf16.mxu1 %v5291_v42  ;;  %v11652_v51 = vld [vmem:[%s11769_s6 + $0xac] ss:$8 sps:$4 sm:$0xff]   ;;  %v5176_v42 = vrot.slane %v14205_v19, 1 }
 0x200   : > { %5899 = vmatprep.subr.bf16.mxu1 %v16204_v53  ;;  %v5303_v30 = vsel %vm1099_vm2, %v11652_v51, %v14274_v5 }
 0x201   : > { %v3927_v45 = vpop.f32.mrb[112].mxu1 }
 0x202   : > { %v14194_v11 = vadd.f32 %v3927_v45, %v13853_v43  ;;  %v3929_v26 = vpop.f32.mrb[113].mxu1  ;;  %v5294_v43 = vsel %vm1099_vm2, %v14205_v19, %v14196_v3 }
 0x203   : > { %v3930_v25 = vpop.f32.mrb[114].mxu1  ;;  %5900 = vmatpush1.bf16.msra.mxu1 %v11485_v50  ;;  %v16548_v50 = vld [vmem:[#allocation36_spill] sm:$0xff]  ;;  %v11499_v26 = vld [vmem:[%s15919_s1 + $0x308] sm:$0xff]  }
 0x204   : > { %v14202_v38 = vadd.f32 %v3930_v25, %v13858_v23  ;;  %v3932_v59 = vpop.f32.mrb[115].mxu1  ;;  %5901 = vmatprep.subr.bf16.mxu1 %v16204_v53  ;;  %v11491_v23 = vld [vmem:[%s15919_s1 + $0x2d8] sm:$0xff]   ;;  %v5177_v45 = vrot.slane %v16548_v50, 1  ;;  %v5182_v25 = vrot.slane %v11648_v46, 1  ;;  %v11500_v46 = vld [vmem:[%s15919_s1 + $0x310] sm:$0xff]  }
 0x205   : > { %v16554_v50 = vld [vmem:[#allocation11_spill] sm:$0xff] }
 0x206   : > { %5761 = vmatmul.mubr.bf16.gmra.mrb[160].mxu1 %v14212_v61 }
 0x207   : > { %5768 = vmatprep.mubr.bf16.mxu1 %v5294_v43  ;;  %5902 = vmatpush1.bf16.msra.mxu1 %v11488_v4  ;;  %v16549_v4 = vld [vmem:[#allocation7_spill] sm:$0xff]  ;;  %v5178_v43 = vsel %vm1136_vm1, %v5176_v42, %v5177_v45  ;;  %v5194_v42 = vrot.slane %v11652_v51, 1  ;;  %v5195_v45 = vrot.slane %v16554_v50, 1 }
 0x208   : > { %5903 = vmatprep.subr.bf16.mxu1 %v16204_v53  ;;  %v5183_v59 = vrot.slane %v16549_v4, 1  ;;  %10637 = vmatprep.mubr.msk.bf16.mxu0 %vm1099_vm2, %v5178_v43 }
 0x209   : > { %v14219_v24 = vpop.f32.mrb[44].mxu1 }
 0x20a   : > { %v3937_v7 = vpop.f32.mrb[45].mxu1  ;;  %v5184_v19 = vsel %vm1136_vm1, %v5182_v25, %v5183_v59  ;;  %v5196_v59 = vsel %vm1136_vm1, %v5194_v42, %v5195_v45  ;;  %v11660_v45 = vld [vmem:[%s11769_s6 + $0x10c] ss:$8 sps:$4 sm:$0xff]  }
 0x20b   : > { %v14223_v58 = vpop.f32.mrb[46].mxu1  ;;  %5904 = vmatpush1.bf16.msra.mxu1 %v11491_v23  ;;  %10638 = vmatmul.mubr.msk.bf16.gmra.mrb[88].mxu0 %vm1099_vm2, %v5184_v19 }
 0x20c   : > { %v3940_v41 = vpop.f32.mrb[47].mxu1  ;;  %5905 = vmatprep.subr.bf16.mxu1 %v16204_v53 }
 0x20e   : > { %5769 = vmatmul.mubr.bf16.gmra.mrb[164].mxu1 %v14233_v21 }
 0x20f   : > { %5776 = vmatprep.mubr.bf16.mxu1 %v5297_v1  ;;  %5906 = vmatpush1.bf16.msra.mxu1 %v11492_v49  ;;  %v14302_v49 = vpop.permute.xlu1 %5077 }
 0x210   : > { %5907 = vmatprep.subr.bf16.mxu1 %v16204_v53  ;;  %16550 = vst [vmem:[#allocation124_spill] sm:$0xff] %v14302_v49 }
 0x211   : > { %v14240_v10 = vpop.f32.mrb[48].mxu1 }
 0x212   : > { %v3945_v35 = vpop.f32.mrb[49].mxu1 }
 0x213   : > { %v14244_v18 = vpop.f32.mrb[50].mxu1  ;;  %5908 = vmatpush1.bf16.msra.mxu1 %v11494_v39  ;;  %v14310_v39 = vld [vmem:[%s11769_s6 + $0xc4] ss:$8 sps:$4 sm:$0xff]   ;;  %v14326_v20 = vpop.permute.xlu1 %5081 }
 0x214   : > { %v3948_v37 = vpop.f32.mrb[51].mxu1  ;;  %5909 = vmatprep.subr.bf16.mxu1 %v16204_v53  ;;  %v5306_v35 = vsel %vm1099_vm2, %v14310_v39, %v14302_v49  ;;  %16551 = vst [vmem:[#allocation117_spill] sm:$0xff] %v14326_v20  ;;  %v16576_v49 = vld [vmem:[#allocation131_spill] sm:$0xff] }
 0x215   : > { %v11501_v37 = vld [vmem:[%s15919_s1 + $0x318] sm:$0xff]  }
 0x216   : > { %5777 = vmatmul.mubr.bf16.gmra.mrb[168].mxu1 %v14258_v40 }
 0x217   : > { %5784 = vmatprep.mubr.bf16.mxu1 %v5300_v15  ;;  %5910 = vmatpush1.bf16.msra.mxu1 %v11495_v14  ;;  %v14317_v14 = vld [vmem:[%s11769_s6 + $0xa8] ss:$8 sps:$4 sm:$0xff]   ;;  %v14357_v51 = vpop.permute.xlu1 %5085 }
 0x218   : > { %5911 = vmatprep.subr.bf16.mxu1 %v16204_v53  ;;  %16555 = vst [vmem:[#allocation30_spill] sm:$0xff] %v14357_v51 }
 0x219   : > { %v14269_v0 = vpop.f32.mrb[52].mxu1 }
 0x21a   : > { %v3953_v32 = vpop.f32.mrb[53].mxu1 }
 0x21b   : > { %v14276_v27 = vpop.f32.mrb[54].mxu1  ;;  %5912 = vmatpush1.bf16.msra.mxu1 %v11496_v6  ;;  %v14334_v6 = vld [vmem:[%s11769_s6 + $0xdc] ss:$8 sps:$4 sm:$0xff]   ;;  %v16553_v32 = vld [vmem:[#allocation130_spill] sm:$0xff] }
 0x21c   : > { %v3956_v62 = vpop.f32.mrb[55].mxu1  ;;  %5913 = vmatprep.subr.bf16.mxu1 %v16204_v53  ;;  %v5309_v57 = vsel %vm1099_vm2, %v14334_v6, %v14326_v20  ;;  %v16574_v20 = vld [vmem:[#allocation6_spill] sm:$0xff] }
 0x21e   : > { %5785 = vmatmul.mubr.bf16.gmra.mrb[172].mxu1 %v14286_v28 }
 0x21f   : > { %5792 = vmatprep.mubr.bf16.mxu1 %v5303_v30  ;;  %5914 = vmatpush1.bf16.msra.mxu1 %v11497_v8  ;;  %v5189_v8 = vrot.slane %v16553_v32, 1  ;;  %v11504_v30 = vld [vmem:[%s15919_s1 + $0x328] sm:$0xff]  }
 0x220   : > { %5915 = vmatprep.subr.bf16.mxu1 %v16204_v53 }
 0x221   : > { %v14297_v23 = vpop.f32.mrb[56].mxu1  ;;  %v5190_v25 = vsel %vm1136_vm1, %v5188_v9, %v5189_v8 }
 0x222   : > { %v3961_v7 = vpop.f32.mrb[57].mxu1  ;;  %10641 = vmatprep.mubr.msk.bf16.mxu0 %vm1099_vm2, %v5190_v25  ;;  %v14389_v25 = vld [vmem:[%s11769_s6 + $0xf0] ss:$8 sps:$4 sm:$0xff]  }
 0x223   : > { %v14304_v41 = vpop.f32.mrb[58].mxu1  ;;  %5916 = vmatpush1.bf16.msra.mxu1 %v11499_v26  ;;  %10642 = vmatmul.mubr.msk.bf16.gmra.mrb[92].mxu0 %vm1099_vm2, %v5196_v59  ;;  %16559 = vst [vmem:[#allocation26_spill] sm:$0xff] %v14389_v25  ;;  %v16560_v59 = vld [vmem:[#allocation15_spill] sm:$0xff] }
 0x224   : > { %v3964_v1 = vpop.f32.mrb[59].mxu1  ;;  %5917 = vmatprep.subr.bf16.mxu1 %v16204_v53 }
 0x226   : > { %5793 = vmatmul.mubr.bf16.gmra.mrb[176].mxu1 %v14317_v14 }
 0x227   : > { %5800 = vmatprep.mubr.bf16.mxu1 %v5306_v35  ;;  %5918 = vmatpush1.bf16.msra.mxu1 %v11500_v46  ;;  %v11505_v46 = vld [vmem:[%s15919_s1 + $0x330] sm:$0xff]  }
 0x228   : > { %5919 = vmatprep.subr.bf16.mxu1 %v16204_v53  ;;  %v14365_v35 = vld [vmem:[%s11769_s6 + $0xf4] ss:$8 sps:$4 sm:$0xff]  }
 0x229   : > { %v14324_v15 = vpop.f32.mrb[60].mxu1 }
 0x22a   : > { %v3969_v16 = vpop.f32.mrb[61].mxu1 }
 0x22b   : > { %v14328_v55 = vpop.f32.mrb[62].mxu1  ;;  %5920 = vmatpush1.bf16.msra.mxu1 %v11501_v37  ;;  %v5312_v37 = vsel %vm1099_vm2, %v14365_v35, %v14357_v51  ;;  %v14372_v16 = vld [vmem:[%s11769_s6 + $0xd8] ss:$8 sps:$4 sm:$0xff]   ;;  %v11664_v51 = vld [vmem:[%s11769_s6 + $0x13c] ss:$8 sps:$4 sm:$0xff]  }
 0x22c   : > { %v3972_v22 = vpop.f32.mrb[63].mxu1  ;;  %5921 = vmatprep.subr.bf16.mxu1 %v16204_v53  ;;  %16556 = vst [vmem:[#allocation69_spill] sm:$0xff] %v14372_v16 }
 0x22d   : > { %v1866_v62 = vpop.f32.mrb[68].mxu0  ;;  %v11506_v22 = vld [vmem:[%s15919_s1 + $0x338] sm:$0xff]  }
 0x22e   : > { %5801 = vmatmul.mubr.bf16.gmra.mrb[180].mxu1 %v14341_v2  ;;  %v1868_v26 = vpop.f32.mrb[69].mxu0 }
 0x22f   : > { %5808 = vmatprep.mubr.bf16.mxu1 %v5309_v57  ;;  %5922 = vmatpush1.bf16.msra.mxu1 %v11502_v31  ;;  %v1869_v4 = vpop.f32.mrb[70].mxu0 }
 0x230   : > { %5923 = vmatprep.subr.bf16.mxu1 %v16204_v53  ;;  %v1871_v19 = vpop.f32.mrb[71].mxu0  ;;  %v5200_v4 = vrot.slane %v14310_v39, 1 }
 0x231   : > { %v14352_v13 = vpop.f32.mrb[64].mxu1 }
 0x232   : > { %v3977_v43 = vpop.f32.mrb[65].mxu1 }
 0x233   : > { %v14359_v7 = vpop.f32.mrb[66].mxu1  ;;  %5924 = vmatpush1.bf16.msra.mxu1 %v11504_v30  ;;  %v14381_v30 = vpop.permute.xlu1 %5089  ;;  %v5201_v43 = vrot.slane %v16560_v59, 1 }
 0x234   : > { %v3980_v1 = vpop.f32.mrb[67].mxu1  ;;  %5925 = vmatprep.subr.bf16.mxu1 %v16204_v53  ;;  %16557 = vst [vmem:[#allocation5_spill] sm:$0xff] %v14381_v30  ;;  %v5315_v26 = vsel %vm1099_vm2, %v11660_v45, %v14381_v30 }
 0x235   : > { %v1907_v31 = vpop.f32.mrb[72].mxu0  ;;  %v16561_v1 = vld [vmem:[#allocation58_spill] sm:$0xff] }
 0x236   : > { %5809 = vmatmul.mubr.bf16.gmra.mrb[184].mxu1 %v14372_v16  ;;  %v1909_v57 = vpop.f32.mrb[73].mxu0 }
 0x237   : > { %5816 = vmatprep.mubr.bf16.mxu1 %v5312_v37  ;;  %5926 = vmatpush1.bf16.msra.mxu1 %v11505_v46  ;;  %v1910_v9 = vpop.f32.mrb[74].mxu0  ;;  %v5206_v46 = vrot.slane %v14334_v6, 1  ;;  %v5207_v37 = vrot.slane %v16561_v1, 1  ;;  %v5202_v57 = vsel %vm1136_vm1, %v5200_v4, %v5201_v43  ;;  %v16564_v1 = vld [vmem:[#allocation12_spill] sm:$0xff] }
 0x238   : > { %5927 = vmatprep.subr.bf16.mxu1 %v16204_v53  ;;  %v1912_v8 = vpop.f32.mrb[75].mxu0  ;;  %10645 = vmatprep.mubr.msk.bf16.mxu0 %vm1099_vm2, %v5202_v57 }
 0x239   : > { %v14379_v32 = vpop.f32.mrb[68].mxu1  ;;  %v5208_v39 = vsel %vm1136_vm1, %v5206_v46, %v5207_v37  ;;  %v14421_v37 = vld [vmem:[%s11769_s6 + $0x108] ss:$8 sps:$4 sm:$0xff]  }
 0x23a   : > { %v3985_v62 = vpop.f32.mrb[69].mxu1  ;;  %10646 = vmatmul.mubr.msk.bf16.gmra.mrb[96].mxu0 %vm1099_vm2, %v5208_v39  ;;  %16565 = vst [vmem:[#allocation73_spill] sm:$0xff] %v14421_v37 }
 0x23b   : > { %v14383_v42 = vpop.f32.mrb[70].mxu1  ;;  %5928 = vmatpush1.bf16.msra.mxu1 %v11506_v22 }
 0x23c   : > { %16558 = vst [vmem:[#allocation67_spill] sm:$0xff] %v14383_v42  ;;  %v3988_v50 = vpop.f32.mrb[71].mxu1 }
 0x23d   : > { %v1915_v19 = vpop.f32.mrb[76].mxu0 }
 0x23e   : > { %5817 = vmatmul.mubr.bf16.gmra.mrb[188].mxu1 %v14389_v25  ;;  %v1916_v31 = vadd.f32 %v1915_v19, %v13976_v34  ;;  %v1917_v22 = vpop.f32.mrb[77].mxu0  ;;  %v14407_v34 = vpop.permute.xlu1 %5093  ;;  %v14412_v19 = vld [vmem:[%s11769_s6 + $0x124] ss:$8 sps:$4 sm:$0xff]  }
 0x23f   : > { %5824 = vmatprep.mubr.bf16.mxu1 %v5315_v26  ;;  %v1918_v9 = vpop.f32.mrb[78].mxu0  ;;  %v16562_v26 = vld [vmem:[#allocation41_spill] sm:$0xff]  ;;  %16563 = vst [vmem:[#allocation126_spill] sm:$0xff] %v14407_v34  ;;  %v5318_v46 = vsel %vm1099_vm2, %v14412_v19, %v14407_v34 }
 0x240   : > { %v1919_v62 = vadd.f32 %v1918_v9, %v13981_v56  ;;  %v1920_v50 = vpop.f32.mrb[79].mxu0  ;;  %v14404_v59 = vadd.f32 %v16562_v26, %v1916_v31  ;;  %v16566_v22 = vld [vmem:[#allocation129_spill] sm:$0xff] }
 0x241   : > { %v14398_v8 = vpop.f32.mrb[72].mxu1 }
 0x242   : > { %v3993_v6 = vpop.f32.mrb[73].mxu1  ;;  %v14418_v56 = vadd.f32 %v16564_v1, %v1919_v62  ;;  %v14432_v1 = vpop.permute.xlu1 %5097 }
 0x243   : > { %v14409_v4 = vpop.f32.mrb[74].mxu1  ;;  %v16568_v6 = vld [vmem:[#allocation132_spill] sm:$0xff]  ;;  %16569 = vst [vmem:[#allocation79_spill] sm:$0xff] %v14432_v1 }
 0x244   : > { %v3996_v43 = vpop.f32.mrb[75].mxu1 }
 0x245   : > { %v1923_v31 = vpop.f32.mrb[8].mxu0 }
 0x246   : > { %5825 = vmatmul.mubr.bf16.gmra.mrb[192].mxu1 %v14421_v37  ;;  %v14425_v57 = vadd.f32 %v16566_v22, %v1923_v31  ;;  %v1925_v9 = vpop.f32.mrb[9].mxu0  ;;  %v5212_v31 = vrot.slane %v14365_v35, 1  ;;  %v16571_v22 = vld [vmem:[#allocation113_spill] sm:$0xff] }
 0x247   : > { %5832 = vmatprep.mubr.bf16.mxu1 %v5318_v46  ;;  %v1926_v39 = vpop.f32.mrb[10].mxu0  ;;  %v5321_v46 = vsel %vm1099_vm2, %v11664_v51, %v14432_v1  ;;  %v5213_v9 = vrot.slane %v16571_v22, 1  ;;  %v14442_v37 = vld [vmem:[%s11769_s6 + $0x120] ss:$8 sps:$4 sm:$0xff]  }
 0x248   : > { %v14430_v26 = vadd.f32 %v16568_v6, %v1926_v39  ;;  %v1928_v43 = vpop.f32.mrb[11].mxu0  ;;  %16572 = vst [vmem:[#allocation70_spill] sm:$0xff] %v14442_v37 }
 0x249   : > { %v14427_v50 = vpop.f32.mrb[76].mxu1  ;;  %v5214_v6 = vsel %vm1136_vm1, %v5212_v31, %v5213_v9  ;;  %v5218_v43 = vrot.slane %v11660_v45, 1  ;;  %v14458_v45 = vpop.permute.xlu1 %5101 }
 0x24a   : > { %16567 = vst [vmem:[#allocation35_spill] sm:$0xff] %v14427_v50  ;;  %v4001_v62 = vpop.f32.mrb[77].mxu1  ;;  %10649 = vmatprep.mubr.msk.bf16.mxu0 %vm1099_vm2, %v5214_v6  ;;  %16577 = vst [vmem:[#allocation39_spill] sm:$0xff] %v14458_v45  ;;  %v14466_v6 = vld [vmem:[%s11769_s6 + $0x138] ss:$8 sps:$4 sm:$0xff]  }
 0x24b   : > { %v14434_v34 = vpop.f32.mrb[78].mxu1  ;;  %v16573_v62 = vld [vmem:[#allocation112_spill] sm:$0xff]  ;;  %16579 = vst [vmem:[#allocation75_spill] sm:$0xff] %v14466_v6 }
 0x24c   : > { %16570 = vst [vmem:[#allocation33_spill] sm:$0xff] %v14434_v34  ;;  %v4004_v30 = vpop.f32.mrb[79].mxu1 }
 0x24d   : > { %v1931_v39 = vpop.f32.mrb[12].mxu0  ;;  %v5219_v30 = vrot.slane %v16573_v62, 1  ;;  %v14477_v16 = vpop.permute.xlu1 %5105 }
 0x24e   : > { %5833 = vmatmul.mubr.bf16.gmra.mrb[196].mxu1 %v14442_v37  ;;  %v14448_v25 = vadd.f32 %v16574_v20, %v1931_v39  ;;  %v1933_v1 = vpop.f32.mrb[13].mxu0  ;;  %16583 = vst [vmem:[#allocation93_spill] sm:$0xff] %v14477_v16 }
 0x24f   : > { %5840 = vmatprep.mubr.bf16.mxu1 %v5321_v46  ;;  %v1934_v35 = vpop.f32.mrb[14].mxu0  ;;  %v5220_v37 = vsel %vm1136_vm1, %v5218_v43, %v5219_v30  ;;  %v11666_v1 = vld [vmem:[%s11769_s6 + $0x154] ss:$8 sps:$4 sm:$0xff]   ;;  %v16580_v43 = vld [vmem:[#allocation134_spill] sm:$0xff] }
 0x250   : > { %v14455_v46 = vadd.f32 %v16576_v49, %v1934_v35  ;;  %v1936_v31 = vpop.f32.mrb[15].mxu0  ;;  %10650 = vmatmul.mubr.msk.bf16.gmra.mrb[100].mxu0 %vm1099_vm2, %v5220_v37  ;;  %v5324_v39 = vsel %vm1099_vm2, %v11666_v1, %v14458_v45 }
 0x251   : > { %v14451_v22 = vpop.f32.mrb[80].mxu1 }
 0x252   : > { %16575 = vst [vmem:[#allocation85_spill] sm:$0xff] %v14451_v22  ;;  %v4009_v9 = vpop.f32.mrb[81].mxu1 }
 0x253   : > { %v14460_v62 = vpop.f32.mrb[82].mxu1  ;;  %v16582_v9 = vld [vmem:[#allocation136_spill] sm:$0xff] }
 0x254   : > { %16578 = vst [vmem:[#allocation82_spill] sm:$0xff] %v14460_v62  ;;  %v4012_v20 = vpop.f32.mrb[83].mxu1  ;;  %v5230_v62 = vrot.slane %v11664_v51, 1 }
 0x255   : > { %v1939_v49 = vpop.f32.mrb[16].mxu0 }
 0x256   : > { %5841 = vmatmul.mubr.bf16.gmra.mrb[200].mxu1 %v14466_v6  ;;  %v14470_v30 = vadd.f32 %v16580_v43, %v1939_v49  ;;  %v1941_v37 = vpop.f32.mrb[17].mxu0  ;;  %v5224_v6 = vrot.slane %v14412_v19, 1  ;;  %v11668_v43 = vld [vmem:[%s11769_s6 + $0x16c] ss:$8 sps:$4 sm:$0xff]  }
 0x257   : > { %5848 = vmatprep.mubr.bf16.mxu1 %v5324_v39  ;;  %v1942_v35 = vpop.f32.mrb[18].mxu0  ;;  %v16585_v39 = vld [vmem:[#allocation123_spill] sm:$0xff]  ;;  %v5327_v37 = vsel %vm1099_vm2, %v11668_v43, %v14477_v16 }
 0x258   : > { %v14475_v20 = vadd.f32 %v16582_v9, %v1942_v35  ;;  %v1944_v48 = vpop.f32.mrb[19].mxu0  ;;  %v5225_v34 = vrot.slane %v16585_v39, 1  ;;  %v16588_v9 = vld [vmem:[#allocation133_spill] sm:$0xff] }
 0x259   : > { %v14472_v31 = vpop.f32.mrb[84].mxu1  ;;  %v14489_v48 = vld [vmem:[%s11769_s6 + $0x150] ss:$8 sps:$4 sm:$0xff]  }
 0x25a   : > { %16581 = vst [vmem:[#allocation118_spill] sm:$0xff] %v14472_v31  ;;  %v4017_v45 = vpop.f32.mrb[85].mxu1  ;;  %v16586_v31 = vld [vmem:[#allocation111_spill] sm:$0xff]  ;;  %v5226_v35 = vsel %vm1136_vm1, %v5224_v6, %v5225_v34  ;;  %16587 = vst [vmem:[#allocation25_spill] sm:$0xff] %v14489_v48 }
 0x25b   : > { %v14479_v5 = vpop.f32.mrb[86].mxu1  ;;  %v5231_v50 = vrot.slane %v16586_v31, 1  ;;  %10653 = vmatprep.mubr.msk.bf16.mxu0 %vm1099_vm2, %v5226_v35  ;;  %v16590_v6 = vld [vmem:[#allocation135_spill] sm:$0xff]  ;;  %v14503_v35 = vpop.permute.xlu1 %5109 }
 0x25c   : > { %16584 = vst [vmem:[#allocation37_spill] sm:$0xff] %v14479_v5  ;;  %v4020_v49 = vpop.f32.mrb[87].mxu1  ;;  %16591 = vst [vmem:[#allocation10_spill] sm:$0xff] %v14503_v35 }
 0x25d   : > { %v5232_v19 = vsel %vm1136_vm1, %v5230_v62, %v5231_v50  ;;  %v1947_v45 = vpop.f32.mrb[20].mxu0 }
 0x25e   : > { %5849 = vmatmul.mubr.bf16.gmra.mrb[204].mxu1 %v14489_v48  ;;  %10654 = vmatmul.mubr.msk.bf16.gmra.mrb[104].mxu0 %vm1099_vm2, %v5232_v19  ;;  %v14496_v51 = vadd.f32 %v16588_v9, %v1947_v45  ;;  %v1949_v31 = vpop.f32.mrb[21].mxu0  ;;  %v14511_v45 = vld [vmem:[%s11769_s6 + $0x168] ss:$8 sps:$4 sm:$0xff]   ;;  %v5236_v9 = vrot.slane %v11666_v1, 1 }
 0x25f   : > { %5856 = vmatprep.mubr.bf16.mxu1 %v5327_v37  ;;  %v1950_v39 = vpop.f32.mrb[22].mxu0  ;;  %v11670_v37 = vld [vmem:[%s11769_s6 + $0x184] ss:$8 sps:$4 sm:$0xff]   ;;  %16593 = vst [vmem:[#allocation42_spill] sm:$0xff] %v14511_v45  ;;  %v5237_v31 = vrot.slane %v13826_v52, 1  ;;  %v16596_v52 = vld [vmem:[#allocation139_spill] sm:$0xff] }
 0x260   : > { %v14501_v49 = vadd.f32 %v16590_v6, %v1950_v39  ;;  %v1952_v16 = vpop.f32.mrb[23].mxu0  ;;  %v5330_v19 = vsel %vm1099_vm2, %v11670_v37, %v14503_v35  ;;  %v5242_v39 = vrot.slane %v11668_v43, 1  ;;  %v16594_v6 = vld [vmem:[#allocation16_spill] sm:$0xff] }
 0x261   : > { %v14498_v34 = vpop.f32.mrb[88].mxu1  ;;  %v5243_v16 = vrot.slane %v13845_v44, 1  ;;  %v5238_v35 = vsel %vm1136_vm1, %v5236_v9, %v5237_v31  ;;  %v11672_v9 = vld [vmem:[%s11769_s6 + $0x19c] ss:$8 sps:$4 sm:$0xff]  }
 0x262   : > { %16589 = vst [vmem:[#allocation72_spill] sm:$0xff] %v14498_v34  ;;  %v4025_v48 = vpop.f32.mrb[89].mxu1  ;;  %10657 = vmatprep.mubr.msk.bf16.mxu0 %vm1099_vm2, %v5238_v35  ;;  %v16600_v35 = vld [vmem:[#allocation137_spill] sm:$0xff] }
 0x263   : > { %v14505_v50 = vpop.f32.mrb[90].mxu1 }
 0x264   : > { %16592 = vst [vmem:[#allocation96_spill] sm:$0xff] %v14505_v50  ;;  %v4028_v62 = vpop.f32.mrb[91].mxu1  ;;  %v5244_v50 = vsel %vm1136_vm1, %v5242_v39, %v5243_v16  ;;  %v14536_v39 = vld [vmem:[%s11769_s6 + $0x180] ss:$8 sps:$4 sm:$0xff]  }
 0x265   : > { %v1955_v48 = vpop.f32.mrb[24].mxu0  ;;  %16599 = vst [vmem:[#allocation40_spill] sm:$0xff] %v14536_v39 }
 0x266   : > { %5857 = vmatmul.mubr.bf16.gmra.mrb[208].mxu1 %v14511_v45  ;;  %v14517_v5 = vadd.f32 %v16594_v6, %v1955_v48  ;;  %v1957_v62 = vpop.f32.mrb[25].mxu0  ;;  %10658 = vmatmul.mubr.msk.bf16.gmra.mrb[108].mxu0 %vm1099_vm2, %v5244_v50 }
 0x267   : > { %5864 = vmatprep.mubr.bf16.mxu1 %v5330_v19  ;;  %v1958_v34 = vpop.f32.mrb[26].mxu0  ;;  %v14528_v19 = vpop.permute.xlu1 %5113 }
 0x268   : > { %v14525_v1 = vadd.f32 %v16596_v52, %v1958_v34  ;;  %v1960_v44 = vpop.f32.mrb[27].mxu0  ;;  %16597 = vst [vmem:[#allocation119_spill] sm:$0xff] %v14528_v19  ;;  %v5333_v31 = vsel %vm1099_vm2, %v11672_v9, %v14528_v19 }
 0x269   : > { %v14521_v45 = vpop.f32.mrb[92].mxu1  ;;  %v16602_v44 = vld [vmem:[#allocation138_spill] sm:$0xff] }
 0x26a   : > { %16595 = vst [vmem:[#allocation127_spill] sm:$0xff] %v14521_v45  ;;  %v4033_v43 = vpop.f32.mrb[93].mxu1 }
 0x26b   : > { %v14530_v48 = vpop.f32.mrb[94].mxu1  ;;  %v14547_v19 = vpop.permute.xlu1 %5117 }
 0x26c   : > { %16598 = vst [vmem:[#allocation98_spill] sm:$0xff] %v14530_v48  ;;  %v4036_v6 = vpop.f32.mrb[95].mxu1  ;;  %16603 = vst [vmem:[#allocation99_spill] sm:$0xff] %v14547_v19 }
 0x26d   : > { %v1963_v34 = vpop.f32.mrb[28].mxu0 }
 0x26e   : > { %5865 = vmatmul.mubr.bf16.gmra.mrb[212].mxu1 %v14536_v39  ;;  %v14540_v16 = vadd.f32 %v16600_v35, %v1963_v34  ;;  %v1965_v50 = vpop.f32.mrb[29].mxu0  ;;  %v11674_v39 = vld [vmem:[%s11769_s6 + $0x1b4] ss:$8 sps:$4 sm:$0xff]   ;;  %v14555_v34 = vld [vmem:[%s11769_s6 + $0x198] ss:$8 sps:$4 sm:$0xff]   ;;  %v5248_v35 = vrot.slane %v11670_v37, 1 }
 0x26f   : > { %5872 = vmatprep.mubr.bf16.mxu1 %v5333_v31  ;;  %v1966_v62 = vpop.f32.mrb[30].mxu0  ;;  %v5336_v31 = vsel %vm1099_vm2, %v11674_v39, %v14547_v19  ;;  %16605 = vst [vmem:[#allocation100_spill] sm:$0xff] %v14555_v34  ;;  %v5249_v50 = vrot.slane %v13870_v54, 1  ;;  %v16608_v54 = vld [vmem:[#allocation14_spill] sm:$0xff] }
 0x270   : > { %v14545_v43 = vadd.f32 %v16602_v44, %v1966_v62  ;;  %v1968_v6 = vpop.f32.mrb[31].mxu0  ;;  %v5254_v62 = vrot.slane %v11672_v9, 1  ;;  %v5255_v44 = vrot.slane %v13884_v33, 1 }
 0x271   : > { %v14542_v52 = vpop.f32.mrb[96].mxu1  ;;  %v16606_v6 = vld [vmem:[#allocation107_spill] sm:$0xff]  ;;  %v5250_v19 = vsel %vm1136_vm1, %v5248_v35, %v5249_v50 }
 0x272   : > { %16601 = vst [vmem:[#allocation128_spill] sm:$0xff] %v14542_v52  ;;  %v4041_v48 = vpop.f32.mrb[97].mxu1  ;;  %v5256_v52 = vsel %vm1136_vm1, %v5254_v62, %v5255_v44  ;;  %10661 = vmatprep.mubr.msk.bf16.mxu0 %vm1099_vm2, %v5250_v19  ;;  %v11676_v35 = vld [vmem:[%s11769_s6 + $0x1cc] ss:$8 sps:$4 sm:$0xff]   ;;  %v14580_v62 = vld [vmem:[%s11769_s6 + $0x1b0] ss:$8 sps:$4 sm:$0xff]  }
 0x273   : > { %v14549_v45 = vpop.f32.mrb[98].mxu1  ;;  %10662 = vmatmul.mubr.msk.bf16.gmra.mrb[112].mxu0 %vm1099_vm2, %v5256_v52  ;;  %16612 = vst [vmem:[#allocation101_spill] sm:$0xff] %v14580_v62  ;;  %v16613_v19 = vld [vmem:[#allocation102_spill] sm:$0xff] }
 0x274   : > { %16604 = vst [vmem:[#allocation44_spill] sm:$0xff] %v14549_v45  ;;  %v4044_v22 = vpop.f32.mrb[99].mxu1 }
 0x275   : > { %v1971_v48 = vpop.f32.mrb[32].mxu0 }
 0x276   : > { %5873 = vmatmul.mubr.bf16.gmra.mrb[216].mxu1 %v14555_v34  ;;  %v14561_v45 = vadd.f32 %v16606_v6, %v1971_v48  ;;  %v1973_v22 = vpop.f32.mrb[33].mxu0 }
 0x277   : > { %5880 = vmatprep.mubr.bf16.mxu1 %v5336_v31  ;;  %v1974_v2 = vpop.f32.mrb[34].mxu0  ;;  %v14572_v31 = vpop.permute.xlu1 %5121  ;;  %v5161_v22 = vrot.slane %v14186_v17, 1  ;;  %v5261_v17 = vrot.slane %v13905_v12, 1 }
 0x278   : > { %v14569_v37 = vadd.f32 %v16608_v54, %v1974_v2  ;;  %v1976_v33 = vpop.f32.mrb[35].mxu0  ;;  %16610 = vst [vmem:[#allocation92_spill] sm:$0xff] %v14572_v31  ;;  %v5339_v50 = vsel %vm1099_vm2, %v11676_v35, %v14572_v31  ;;  %v16614_v54 = vld [vmem:[#allocation120_spill] sm:$0xff] }
 0x279   : > { %v14565_v34 = vpop.f32.mrb[100].mxu1  ;;  %v5162_v33 = vrot.slane %v16614_v54, 1  ;;  %v5267_v54 = vrot.slane %v13920_v29, 1 }
 0x27a   : > { %16607 = vst [vmem:[#allocation43_spill] sm:$0xff] %v14565_v34  ;;  %16609 = vst [vmem:[#allocation9_spill] sm:$0xff] %v14569_v37  ;;  %v4049_v9 = vpop.f32.mrb[101].mxu1 }
 0x27b   : > { %v14574_v48 = vpop.f32.mrb[102].mxu1 }
 0x27c   : > { %16611 = vst [vmem:[#allocation8_spill] sm:$0xff] %v14574_v48  ;;  %v4052_v6 = vpop.f32.mrb[103].mxu1  ;;  %v16615_v48 = vld [vmem:[#allocation13_spill] sm:$0xff] }
 0x27d   : > { %v1979_v2 = vpop.f32.mrb[36].mxu0 }
 0x27e   : > { %5881 = vmatmul.mubr.bf16.gmra.mrb[220].mxu1 %v14580_v62  ;;  %v14584_v44 = vadd.f32 %v16613_v19, %v1979_v2  ;;  %v1981_v52 = vpop.f32.mrb[37].mxu0  ;;  %v5163_v62 = vsel %vm1136_vm1, %v5161_v22, %v5162_v33  ;;  %v5260_v2 = vrot.slane %v11674_v39, 1 }
 0x27f   : > { %5888 = vmatprep.mubr.bf16.mxu1 %v5339_v50  ;;  %v1982_v9 = vpop.f32.mrb[38].mxu0  ;;  %v14593_v50 = vld [vmem:[%s11769_s6 + $0x1c8] ss:$8 sps:$4 sm:$0xff]   ;;  %v5266_v52 = vrot.slane %v11676_v35, 1  ;;  %v16618_v35 = vld [vmem:[#allocation140_spill] sm:$0xff] }
 0x280   : > { %v14589_v34 = vadd.f32 %v16615_v48, %v1982_v9  ;;  %v1984_v31 = vpop.f32.mrb[39].mxu0  ;;  %v5056_v48 = vpop.permute.xlu1 %5055  ;;  %v16616_v9 = vld [vmem:[#allocation19_spill] sm:$0xff]  ;;  %v5262_v33 = vsel %vm1136_vm1, %v5260_v2, %v5261_v17 }
 0x281   : > { %v4055_v6 = vpop.f32.mrb[116].mxu1  ;;  %10665 = vmatprep.mubr.msk.bf16.mxu0 %vm1099_vm2, %v5262_v33  ;;  %v5268_v12 = vsel %vm1136_vm1, %v5266_v52, %v5267_v54  ;;  %v5125_v54 = vsel %vm1099_vm2, %v14160_v60, %v5056_v48 }
 0x282   : > { %v4057_v37 = vpop.f32.mrb[117].mxu1  ;;  %10666 = vmatmul.mubr.msk.bf16.gmra.mrb[116].mxu0 %vm1099_vm2, %v5268_v12  ;;  %v5173_v12 = vrot.slane %v14233_v21, 1 }
 0x283   : > { %v4058_v47 = vpop.f32.mrb[118].mxu1  ;;  %v16617_v37 = vld [vmem:[#allocation121_spill] sm:$0xff]  ;;  %6998 = vmatprep.mubr.bf16.mxu0 %v16204_v53 }
 0x284   : > { %v4060_v42 = vpop.f32.mrb[119].mxu1  ;;  %v5168_v22 = vrot.slane %v16617_v37, 1  ;;  %v5060_v33 = vpop.permute.xlu1 %5059 }
 0x285   : > { %v1987_v19 = vpop.f32.mrb[40].mxu0  ;;  %v5167_v42 = vrot.slane %v14212_v61, 1 }
 0x286   : > { %5889 = vmatmul.mubr.bf16.gmra.mrb[224].mxu1 %v14593_v50  ;;  %v14599_v31 = vadd.f32 %v16616_v9, %v1987_v19  ;;  %v1989_v47 = vpop.f32.mrb[41].mxu0 }
 0x287   : > { %5929 = vmatprep.mubr.bf16.mxu1 %v5163_v62  ;;  %v1990_v6 = vpop.f32.mrb[42].mxu0  ;;  %v5169_v52 = vsel %vm1136_vm1, %v5167_v42, %v5168_v22  ;;  %v16621_v22 = vld [vmem:[#allocation20_spill] sm:$0xff] }
 0x288   : > { %v14607_v62 = vadd.f32 %v16618_v35, %v1990_v6  ;;  %v1992_v29 = vpop.f32.mrb[43].mxu0  ;;  %v16619_v6 = vld [vmem:[#allocation122_spill] sm:$0xff] }
 0x289   : > { %v10591_v39 = vpop.f32.mrb[120].mxu1 }
 0x28a   : > { %v4105_v19 = vadd.f32 %v10591_v39, %v14194_v11  ;;  %v4096_v9 = vpop.f32.mrb[121].mxu1 }
 0x28b   : > { %v10592_v61 = vpop.f32.mrb[122].mxu1 }
 0x28c   : > { %v14613_v2 = vadd.f32 %v4105_v19, %v14404_v59  ;;  %v4108_v17 = vadd.f32 %v10592_v61, %v14202_v38  ;;  %v4099_v47 = vpop.f32.mrb[123].mxu1  ;;  %v16620_v38 = vld [vmem:[#allocation59_spill] sm:$0xff] }
 0x28d   : > { %v1995_v11 = vpop.f32.mrb[44].mxu0  ;;  %v5174_v35 = vrot.slane %v16620_v38, 1  ;;  %v16623_v38 = vld [vmem:[#allocation68_spill] sm:$0xff] }
 0x28e   : > { %v14620_v37 = vadd.f32 %v4108_v17, %v14418_v56  ;;  %5930 = vmatmul.mubr.bf16.vlgmr.msra.gmra.mrb[228].mxu1 %v5125_v54  ;;  %v14623_v39 = vadd.f32 %v16619_v6, %v1995_v11  ;;  %v1997_v59 = vpop.f32.mrb[45].mxu0 }
 0x28f   : > { %5937 = vmatprep.mubr.bf16.mxu1 %v5169_v52  ;;  %v1998_v29 = vpop.f32.mrb[46].mxu0  ;;  %v5175_v52 = vsel %vm1136_vm1, %v5173_v12, %v5174_v35  ;;  %v5179_v12 = vrot.slane %v14258_v40, 1  ;;  %v5180_v35 = vrot.slane %v16623_v38, 1  ;;  %v11511_v40 = vld [vmem:[%s15921_s3 + $0x50] sm:$0xff]  }
 0x290   : > { %v14628_v19 = vadd.f32 %v16621_v22, %v1998_v29  ;;  %v2000_v60 = vpop.f32.mrb[47].mxu0  ;;  %v11510_v22 = vld [vmem:[%s15921_s3 + $0x8] sm:$0xff]  }
 0x291   : > { %v10595_v42 = vpop.f32.mrb[124].mxu1 }
 0x292   : > { %v4121_v56 = vadd.f32 %v10595_v42, %v14240_v10  ;;  %v4112_v48 = vpop.f32.mrb[125].mxu1  ;;  %v5126_v10 = vsel %vm1099_vm2, %v14174_v36, %v5060_v33  ;;  %v5064_v36 = vpop.permute.xlu0 %5063 }
 0x293   : > { %v4113_v9 = vadd.f32 %v4112_v48, %v14219_v24  ;;  %v10596_v61 = vpop.f32.mrb[126].mxu1  ;;  %v11507_v24 = vld [vmem:[%s15921_s3 + $0x40] sm:$0xff]  }
 0x294   : > { %v14633_v17 = vadd.f32 %v4121_v56, %v14448_v25  ;;  %v4124_v47 = vadd.f32 %v10596_v61, %v14244_v18  ;;  %v4115_v21 = vpop.f32.mrb[127].mxu1  ;;  %v11508_v18 = vld [vmem:[%s15921_s3] sm:$0xff]   ;;  %v11509_v25 = vld [vmem:[%s15921_s3 + $0x48] sm:$0xff]   ;;  %10129 = vmatprep.subr.bf16.mxu0 %v11507_v24 }
 0x295   : > { %v14638_v54 = vadd.f32 %v4113_v9, %v14425_v57  ;;  %v4116_v11 = vadd.f32 %v4115_v21, %v14223_v58  ;;  %v2003_v58 = vpop.f32.mrb[48].mxu0  ;;  %10130 = vmatpush3.bf16.msra.mxu0 %v11508_v18  ;;  %v5127_v18 = vsel %vm1099_vm2, %v14196_v3, %v5064_v36  ;;  %v5068_v3 = vpop.permute.xlu1 %5067 }
 0x296   : > { %v14644_v6 = vadd.f32 %v4124_v47, %v14455_v46  ;;  %5938 = vmatmul.mubr.bf16.gmra.mrb[232].mxu1 %v5126_v10  ;;  %v16622_v46 = vld [vmem:[#allocation17_spill] sm:$0xff]  ;;  %v2005_v59 = vpop.f32.mrb[49].mxu0  ;;  %10131 = vmatprep.subr.bf16.mxu0 %v11509_v25  ;;  %v5181_v10 = vsel %vm1136_vm1, %v5179_v12, %v5180_v35  ;;  %v16625_v25 = vld [vmem:[#allocation74_spill] sm:$0xff]  ;;  %v11514_v35 = vld [vmem:[%s15921_s3 + $0x18] sm:$0xff]  }
 0x297   : > { %v14656_v57 = vadd.f32 %v4116_v11, %v14430_v26  ;;  %5945 = vmatprep.mubr.bf16.mxu1 %v5175_v52  ;;  %v14659_v33 = vadd.f32 %v16622_v46, %v2003_v58  ;;  %v2006_v29 = vpop.f32.mrb[50].mxu0  ;;  %v16624_v26 = vld [vmem:[#allocation141_spill] sm:$0xff]  ;;  %v5185_v46 = vrot.slane %v14286_v28, 1 }
 0x298   : > { %v14667_v60 = vadd.f32 %v16624_v26, %v2006_v29  ;;  %v2008_v56 = vpop.f32.mrb[51].mxu0  ;;  %v16627_v29 = vld [vmem:[#allocation18_spill] sm:$0xff]  ;;  %v11515_v28 = vld [vmem:[%s15921_s3 + $0x60] sm:$0xff]  }
 0x299   : > { %v10599_v42 = vpop.f32.mrb[128].mxu1  ;;  %10132 = vmatpush3.bf16.msra.mxu0 %v11510_v22 }
 0x29a   : > { %v4137_v48 = vadd.f32 %v10599_v42, %v14297_v23  ;;  %v4128_v9 = vpop.f32.mrb[129].mxu1  ;;  %10133 = vmatprep.subr.bf16.mxu0 %v11511_v40 }
 0x29b   : > { %v4129_v61 = vadd.f32 %v4128_v9, %v14269_v0  ;;  %v10600_v47 = vpop.f32.mrb[130].mxu1  ;;  %v11512_v0 = vld [vmem:[%s15921_s3 + $0x10] sm:$0xff]  }
 0x29c   : > { %v14675_v21 = vadd.f32 %v4137_v48, %v14496_v51  ;;  %v4140_v52 = vadd.f32 %v10600_v47, %v14304_v41  ;;  %v4131_v11 = vpop.f32.mrb[131].mxu1  ;;  %v11513_v41 = vld [vmem:[%s15921_s3 + $0x58] sm:$0xff]  }
 0x29d   : > { %v14680_v24 = vadd.f32 %v4129_v61, %v14470_v30  ;;  %v4132_v23 = vadd.f32 %v4131_v11, %v14276_v27  ;;  %v2011_v30 = vpop.f32.mrb[52].mxu0  ;;  %10134 = vmatpush3.bf16.msra.mxu0 %v11512_v0  ;;  %v5128_v11 = vsel %vm1099_vm2, %v14221_v63, %v5068_v3  ;;  %v16629_v0 = vld [vmem:[#allocation76_spill] sm:$0xff] }
 0x29e   : > { %v14689_v51 = vadd.f32 %v4140_v52, %v14501_v49  ;;  %5946 = vmatmul.mubr.bf16.gmra.mrb[164].mxu1 %v5127_v18  ;;  %v14698_v58 = vadd.f32 %v16625_v25, %v2011_v30  ;;  %v2013_v36 = vpop.f32.mrb[53].mxu0  ;;  %v16626_v49 = vld [vmem:[#allocation66_spill] sm:$0xff]  ;;  %10135 = vmatprep.subr.bf16.mxu0 %v11513_v41  ;;  %v5191_v18 = vrot.slane %v14317_v14, 1  ;;  %v5192_v41 = vrot.slane %v16629_v0, 1 }
 0x29f   : > { %v14695_v27 = vadd.f32 %v4132_v23, %v14475_v20  ;;  %5953 = vmatprep.mubr.bf16.mxu1 %v5181_v10  ;;  %v5186_v59 = vrot.slane %v16626_v49, 1  ;;  %v2014_v12 = vpop.f32.mrb[54].mxu0 }
 0x2a0   : > { %v14706_v20 = vadd.f32 %v16627_v29, %v2014_v12  ;;  %v2016_v42 = vpop.f32.mrb[55].mxu0 }
 0x2a1   : > { %v10603_v38 = vpop.f32.mrb[132].mxu1  ;;  %v5187_v47 = vsel %vm1136_vm1, %v5185_v46, %v5186_v59  ;;  %10136 = vmatpush3.bf16.msra.mxu0 %v11514_v35  ;;  %v5193_v35 = vsel %vm1136_vm1, %v5191_v18, %v5192_v41  ;;  %v16631_v42 = vld [vmem:[#allocation67_spill] sm:$0xff] }
 0x2a2   : > { %v4153_v22 = vadd.f32 %v10603_v38, %v14352_v13  ;;  %v4144_v26 = vpop.f32.mrb[133].mxu1  ;;  %10137 = vmatprep.subr.bf16.mxu0 %v11515_v28  ;;  %v16639_v41 = vld [vmem:[#allocation35_spill] sm:$0xff] }
 0x2a3   : > { %v4145_v56 = vadd.f32 %v4144_v26, %v14324_v15  ;;  %v10604_v48 = vpop.f32.mrb[134].mxu1  ;;  %v11516_v15 = vld [vmem:[%s15921_s3 + $0x20] sm:$0xff]   ;;  %v16632_v26 = vld [vmem:[#allocation22_spill] sm:$0xff] }
 0x2a4   : > { %v14714_v9 = vadd.f32 %v4153_v22, %v14540_v16  ;;  %v4156_v40 = vadd.f32 %v10604_v48, %v14359_v7  ;;  %v4147_v61 = vpop.f32.mrb[135].mxu1  ;;  %v16634_v48 = vld [vmem:[#allocation109_spill] sm:$0xff] }
 0x2a5   : > { %v14719_v52 = vadd.f32 %v4145_v56, %v14517_v5  ;;  %v4148_v13 = vadd.f32 %v4147_v61, %v14328_v55  ;;  %v2019_v7 = vpop.f32.mrb[56].mxu0  ;;  %v5072_v5 = vpop.permute.xlu0 %5071  ;;  %v16628_v55 = vld [vmem:[#allocation115_spill] sm:$0xff]  ;;  %10138 = vmatpush3.bf16.msra.mxu0 %v11516_v15 }
 0x2a6   : > { %v14728_v16 = vadd.f32 %v4156_v40, %v14545_v43  ;;  %5954 = vmatmul.mubr.bf16.gmra.mrb[168].mxu1 %v5128_v11  ;;  %v14734_v23 = vadd.f32 %v16628_v55, %v2019_v7  ;;  %v2021_v63 = vpop.f32.mrb[57].mxu0  ;;  %v16630_v43 = vld [vmem:[#allocation24_spill] sm:$0xff] }
 0x2a7   : > { %v14731_v10 = vadd.f32 %v4148_v13, %v14525_v1  ;;  %5961 = vmatprep.mubr.bf16.mxu1 %v5187_v47  ;;  %v2022_v30 = vpop.f32.mrb[58].mxu0  ;;  %v16636_v13 = vld [vmem:[#allocation23_spill] sm:$0xff]  ;;  %v16638_v63 = vld [vmem:[#allocation85_spill] sm:$0xff] }
 0x2a8   : > { %v14739_v25 = vadd.f32 %v16630_v43, %v2022_v30  ;;  %v2024_v36 = vpop.f32.mrb[59].mxu0  ;;  %v5198_v11 = vrot.slane %v16636_v13, 1 }
 0x2a9   : > { %v10607_v3 = vpop.f32.mrb[136].mxu1  ;;  %v16640_v36 = vld [vmem:[#allocation82_spill] sm:$0xff] }
 0x2aa   : > { %v4169_v1 = vadd.f32 %v10607_v3, %v14398_v8  ;;  %v4160_v46 = vpop.f32.mrb[137].mxu1  ;;  %v5129_v8 = vsel %vm1099_vm2, %v16632_v26, %v5072_v5  ;;  %v16637_v5 = vld [vmem:[#allocation57_spill] sm:$0xff] }
 0x2ab   : > { %v4161_v49 = vadd.f32 %v4160_v46, %v14379_v32  ;;  %v10608_v59 = vpop.f32.mrb[138].mxu1 }
 0x2ac   : > { %v14744_v12 = vadd.f32 %v4169_v1, %v14584_v44  ;;  %v4172_v14 = vadd.f32 %v10608_v59, %v14409_v4  ;;  %v4163_v38 = vpop.f32.mrb[139].mxu1  ;;  %v16633_v44 = vld [vmem:[#allocation9_spill] sm:$0xff]  ;;  %v5076_v4 = vpop.permute.xlu1 %5075 }
 0x2ad   : > { %v14749_v29 = vadd.f32 %v4161_v49, %v14561_v45  ;;  %v4164_v22 = vadd.f32 %v4163_v38, %v16631_v42  ;;  %v2027_v32 = vpop.f32.mrb[60].mxu0  ;;  %v16635_v45 = vld [vmem:[#allocation63_spill] sm:$0xff] }
 0x2ae   : > { %v14755_v28 = vadd.f32 %v4172_v14, %v14589_v34  ;;  %5962 = vmatmul.mubr.bf16.gmra.mrb[172].mxu1 %v5129_v8  ;;  %v2205_v40 = vadd.f32 %v16634_v48, %v2027_v32  ;;  %v2029_v61 = vpop.f32.mrb[61].mxu0  ;;  %v5197_v47 = vrot.slane %v16635_v45, 1  ;;  %v16641_v14 = vld [vmem:[#allocation33_spill] sm:$0xff]  ;;  %v5080_v8 = vpop.permute.xlu0 %5079  ;;  %v16643_v32 = vld [vmem:[#allocation116_spill] sm:$0xff] }
 0x2af   : > { %v14758_v56 = vadd.f32 %v4164_v22, %v16633_v44  ;;  %5969 = vmatprep.mubr.bf16.mxu1 %v5193_v35  ;;  %v2030_v15 = vpop.f32.mrb[62].mxu0  ;;  %v16642_v35 = vld [vmem:[#allocation125_spill] sm:$0xff] }
 0x2b0   : > { %v2208_v55 = vadd.f32 %v16637_v5, %v2030_v15  ;;  %v2032_v34 = vpop.f32.mrb[63].mxu0  ;;  %v5199_v49 = vsel %vm1136_vm1, %v5197_v47, %v5198_v11  ;;  %v5130_v42 = vsel %vm1099_vm2, %v16642_v35, %v5076_v4  ;;  %v16645_v45 = vld [vmem:[#allocation77_spill] sm:$0xff]  ;;  %v16646_v4 = vld [vmem:[#allocation60_spill] sm:$0xff] }
 0x2b1   : > { %v10611_v7 = vpop.f32.mrb[140].mxu1  ;;  %v5204_v47 = vrot.slane %v16645_v45, 1 }
 0x2b2   : > { %v4185_v18 = vadd.f32 %v10611_v7, %v16638_v63  ;;  %v4176_v0 = vpop.f32.mrb[141].mxu1  ;;  %v16648_v63 = vld [vmem:[#allocation118_spill] sm:$0xff] }
 0x2b3   : > { %v4177_v30 = vadd.f32 %v4176_v0, %v16639_v41  ;;  %v10612_v3 = vpop.f32.mrb[142].mxu1  ;;  %v16650_v41 = vld [vmem:[#allocation96_spill] sm:$0xff] }
 0x2b4   : > { %v14767_v43 = vadd.f32 %v4185_v18, %v14623_v39  ;;  %v4188_v1 = vadd.f32 %v10612_v3, %v16640_v36  ;;  %v4179_v46 = vpop.f32.mrb[143].mxu1 }
 0x2b5   : > { %v14772_v59 = vadd.f32 %v4177_v30, %v14599_v31  ;;  %v4180_v38 = vadd.f32 %v4179_v46, %v16641_v14  ;;  %v2035_v26 = vpop.f32.mrb[64].mxu0  ;;  %v16644_v31 = vld [vmem:[#allocation69_spill] sm:$0xff]  ;;  %v16652_v14 = vld [vmem:[#allocation124_spill] sm:$0xff] }
 0x2b6   : > { %v14778_v22 = vadd.f32 %v4188_v1, %v14628_v19  ;;  %5970 = vmatmul.mubr.bf16.gmra.mrb[176].mxu1 %v5130_v42  ;;  %v2213_v44 = vadd.f32 %v16643_v32, %v2035_v26  ;;  %v2037_v48 = vpop.f32.mrb[65].mxu0  ;;  %v5203_v61 = vrot.slane %v16644_v31, 1  ;;  %v16647_v19 = vld [vmem:[#allocation72_spill] sm:$0xff]  ;;  %v16651_v46 = vld [vmem:[#allocation37_spill] sm:$0xff]  ;;  %v5084_v26 = vpop.permute.xlu1 %5083  ;;  %v16655_v32 = vld [vmem:[#allocation26_spill] sm:$0xff] }
 0x2b7   : > { %v14781_v39 = vadd.f32 %v4180_v38, %v14607_v62  ;;  %5977 = vmatprep.mubr.bf16.mxu1 %v5199_v49  ;;  %v2038_v13 = vpop.f32.mrb[66].mxu0  ;;  %v5131_v38 = vsel %vm1099_vm2, %v16652_v14, %v5080_v8  ;;  %v5209_v48 = vrot.slane %v16655_v32, 1  ;;  %v16656_v31 = vld [vmem:[#allocation81_spill] sm:$0xff] }
 0x2b8   : > { %v2216_v15 = vadd.f32 %v16646_v4, %v2038_v13  ;;  %v2040_v34 = vpop.f32.mrb[67].mxu0  ;;  %v5205_v36 = vsel %vm1136_vm1, %v5203_v61, %v5204_v47  ;;  %v16657_v13 = vld [vmem:[#allocation128_spill] sm:$0xff] }
 0x2b9   : > { %v10615_v11 = vpop.f32.mrb[144].mxu1 }
 0x2ba   : > { %v4201_v7 = vadd.f32 %v10615_v11, %v16647_v19  ;;  %v4192_v5 = vpop.f32.mrb[145].mxu1 }
 0x2bb   : > { %v4193_v62 = vadd.f32 %v4192_v5, %v16648_v63  ;;  %v10616_v18 = vpop.f32.mrb[146].mxu1 }
 0x2bc   : > { %v14790_v0 = vadd.f32 %v4201_v7, %v14698_v58  ;;  %v4204_v30 = vadd.f32 %v10616_v18, %v16650_v41  ;;  %v4195_v3 = vpop.f32.mrb[147].mxu1  ;;  %v16662_v41 = vld [vmem:[#allocation98_spill] sm:$0xff] }
 0x2bd   : > { %v14795_v1 = vadd.f32 %v4193_v62, %v14659_v33  ;;  %v4196_v49 = vadd.f32 %v4195_v3, %v16651_v46  ;;  %v2043_v42 = vpop.f32.mrb[80].mxu0  ;;  %v5210_v33 = vrot.slane %v16656_v31, 1  ;;  %v16663_v3 = vld [vmem:[#allocation117_spill] sm:$0xff]  ;;  %v16668_v31 = vld [vmem:[#allocation43_spill] sm:$0xff] }
 0x2be   : > { %16649 = vst [vmem:[#allocation46_spill] sm:$0xff] %v14790_v0  ;;  %v14801_v35 = vadd.f32 %v4204_v30, %v14706_v20  ;;  %5978 = vmatmul.mubr.bf16.gmra.mrb[180].mxu1 %v5131_v38  ;;  %v2045_v61 = vpop.f32.mrb[81].mxu0  ;;  %v16658_v20 = vld [vmem:[#allocation127_spill] sm:$0xff] }
 0x2bf   : > { %v14804_v58 = vadd.f32 %v4196_v49, %v14667_v60  ;;  %5985 = vmatprep.mubr.bf16.mxu1 %v5205_v36  ;;  %v2046_v47 = vpop.f32.mrb[82].mxu0  ;;  %v16660_v60 = vld [vmem:[#allocation44_spill] sm:$0xff]  ;;  %v5211_v62 = vsel %vm1136_vm1, %v5209_v48, %v5210_v33  ;;  %v5132_v36 = vsel %vm1099_vm2, %v16663_v3, %v5084_v26  ;;  %v16667_v38 = vld [vmem:[#allocation27_spill] sm:$0xff]  ;;  %v5088_v48 = vpop.permute.xlu0 %5087 }
 0x2c0   : > { %16653 = vst [vmem:[#allocation50_spill] sm:$0xff] %v14801_v35  ;;  %v2048_v4 = vpop.f32.mrb[83].mxu0  ;;  %v5216_v42 = vrot.slane %v16667_v38, 1  ;;  %v16670_v47 = vld [vmem:[#allocation8_spill] sm:$0xff]  ;;  %v11545_v35 = vld [vmem:[%s15921_s3 + $0xb0] sm:$0xff]  }
 0x2c1   : > { %16654 = vst [vmem:[#allocation45_spill] sm:$0xff] %v14804_v58  ;;  %v10619_v45 = vpop.f32.mrb[148].mxu1  ;;  %v16673_v4 = vld [vmem:[#allocation70_spill] sm:$0xff] }
 0x2c2   : > { %v4217_v11 = vadd.f32 %v10619_v45, %v16657_v13  ;;  %v4208_v8 = vpop.f32.mrb[149].mxu1 }
 0x2c3   : > { %v4209_v19 = vadd.f32 %v4208_v8, %v16658_v20  ;;  %v10620_v7 = vpop.f32.mrb[150].mxu1  ;;  %v5221_v20 = vrot.slane %v16673_v4, 1  ;;  %v16680_v4 = vld [vmem:[#allocation28_spill] sm:$0xff] }
 0x2c4   : > { %v14810_v5 = vadd.f32 %v4217_v11, %v2205_v40  ;;  %v4220_v34 = vadd.f32 %v10620_v7, %v16660_v60  ;;  %v4211_v63 = vpop.f32.mrb[151].mxu1  ;;  %v16666_v40 = vld [vmem:[#allocation73_spill] sm:$0xff] }
 0x2c5   : > { %v14815_v18 = vadd.f32 %v4209_v19, %v14734_v23  ;;  %v4212_v30 = vadd.f32 %v4211_v63, %v16662_v41  ;;  %v5215_v14 = vrot.slane %v16666_v40, 1  ;;  %v16674_v19 = vld [vmem:[#allocation21_spill] sm:$0xff]  ;;  %v16677_v40 = vld [vmem:[#allocation88_spill] sm:$0xff] }
 0x2c6   : > { %16659 = vst [vmem:[#allocation49_spill] sm:$0xff] %v14810_v5  ;;  %v14820_v46 = vadd.f32 %v4220_v34, %v2208_v55  ;;  %5986 = vmatmul.mubr.bf16.gmra.mrb[184].mxu1 %v5132_v36  ;;  %v5222_v7 = vrot.slane %v16674_v19, 1  ;;  %v5092_v34 = vpop.permute.xlu1 %5091  ;;  %v16676_v36 = vld [vmem:[#allocation75_spill] sm:$0xff] }
 0x2c7   : > { %16661 = vst [vmem:[#allocation103_spill] sm:$0xff] %v14815_v18  ;;  %v14823_v49 = vadd.f32 %v4212_v30, %v14739_v25  ;;  %5993 = vmatprep.mubr.bf16.mxu1 %v5211_v62  ;;  %v5217_v26 = vsel %vm1136_vm1, %v5215_v14, %v5216_v42  ;;  %v16671_v25 = vld [vmem:[#allocation30_spill] sm:$0xff]  ;;  %v16675_v30 = vld [vmem:[#allocation5_spill] sm:$0xff]  ;;  %v5228_v14 = vrot.slane %v16677_v40, 1  ;;  %v5096_v42 = vpop.permute.xlu0 %5095  ;;  %v16683_v40 = vld [vmem:[#allocation87_spill] sm:$0xff] }
 0x2c8   : > { %16664 = vst [vmem:[#allocation48_spill] sm:$0xff] %v14820_v46  ;;  %v5133_v11 = vsel %vm1099_vm2, %v16671_v25, %v5088_v48  ;;  %v5134_v3 = vsel %vm1099_vm2, %v16675_v30, %v5092_v34  ;;  %v16679_v25 = vld [vmem:[#allocation25_spill] sm:$0xff]  ;;  %v11522_v34 = vld [vmem:[%s15921_s3 + $0x70] sm:$0xff]  }
 0x2c9   : > { %16665 = vst [vmem:[#allocation52_spill] sm:$0xff] %v14823_v49  ;;  %v10623_v32 = vpop.f32.mrb[152].mxu1  ;;  %v11525_v30 = vld [vmem:[%s15921_s3 + $0x110] sm:$0xff]  }
 0x2ca   : > { %v4224_v23 = vpop.f32.mrb[153].mxu1  ;;  %v5100_v19 = vpop.permute.xlu1 %5099 }
 0x2cb   : > { %v4225_v33 = vadd.f32 %v4224_v23, %v16668_v31  ;;  %v10624_v61 = vpop.f32.mrb[154].mxu1  ;;  %v11517_v23 = vld [vmem:[%s15921_s3 + $0x68] sm:$0xff]  }
 0x2cc   : > { %v4227_v45 = vpop.f32.mrb[155].mxu1  ;;  %v11518_v61 = vld [vmem:[%s15921_s3 + $0x28] sm:$0xff]   ;;  %10139 = vmatprep.subr.bf16.mxu0 %v11517_v23  ;;  %v16684_v23 = vld [vmem:[#allocation39_spill] sm:$0xff] }
 0x2cd   : > { %v14829_v55 = vadd.f32 %v4225_v33, %v2213_v44  ;;  %v4228_v13 = vadd.f32 %v4227_v45, %v16670_v47  ;;  %v5223_v44 = vsel %vm1136_vm1, %v5221_v20, %v5222_v7  ;;  %v11519_v45 = vld [vmem:[%s15921_s3 + $0x100] sm:$0xff]   ;;  %v16678_v47 = vld [vmem:[#allocation126_spill] sm:$0xff]  ;;  %10140 = vmatpush3.bf16.msra.mxu0 %v11518_v61  ;;  %v5234_v20 = vrot.slane %v16680_v4, 1 }
 0x2ce   : > { %5994 = vmatmul.mubr.bf16.gmra.mrb[188].mxu1 %v5133_v11  ;;  %10265 = vmatprep.subr.bf16.mxu1 %v11519_v45  ;;  %v5233_v11 = vrot.slane %v16679_v25, 1  ;;  %v11521_v7 = vld [vmem:[%s15921_s3 + $0x108] sm:$0xff]  }
 0x2cf   : > { %16669 = vst [vmem:[#allocation47_spill] sm:$0xff] %v14829_v55  ;;  %v14834_v8 = vadd.f32 %v4228_v13, %v2216_v15  ;;  %6001 = vmatprep.mubr.bf16.mxu1 %v5217_v26  ;;  %v5227_v15 = vrot.slane %v16676_v36, 1  ;;  %v11520_v26 = vld [vmem:[%s15921_s3 + $0xc0] sm:$0xff]   ;;  %v5135_v13 = vsel %vm1099_vm2, %v16678_v47, %v5096_v42  ;;  %10141 = vmatprep.subr.bf16.mxu0 %v11522_v34  ;;  %v16682_v36 = vld [vmem:[#allocation42_spill] sm:$0xff]  ;;  %v5104_v42 = vpop.permute.xlu0 %5103  ;;  %v16685_v47 = vld [vmem:[#allocation40_spill] sm:$0xff] }
 0x2d0   : > { %10266 = vmatpush3.bf16.msra.mxu1 %v11520_v26  ;;  %v11527_v26 = vld [vmem:[%s15921_s3 + $0x118] sm:$0xff]   ;;  %v16686_v25 = vld [vmem:[#allocation34_spill] sm:$0xff] }
 0x2d1   : > { %16672 = vst [vmem:[#allocation51_spill] sm:$0xff] %v14834_v8  ;;  %v5754_v60 = vpop.f32.mrb[156].mxu1  ;;  %v5229_v33 = vsel %vm1136_vm1, %v5227_v15, %v5228_v14  ;;  %10267 = vmatprep.subr.bf16.mxu1 %v11521_v7  ;;  %v5239_v15 = vrot.slane %v16682_v36, 1  ;;  %v5240_v14 = vrot.slane %v16683_v40, 1  ;;  %v11531_v7 = vld [vmem:[%s15921_s3 + $0x120] sm:$0xff]   ;;  %v11529_v34 = vld [vmem:[%s15921_s3 + $0x78] sm:$0xff]  }
 0x2d2   : > { %v5756_v63 = vpop.f32.mrb[157].mxu1  ;;  %v5235_v60 = vsel %vm1136_vm1, %v5233_v11, %v5234_v20  ;;  %v5246_v11 = vrot.slane %v16686_v25, 1  ;;  %v11528_v20 = vld [vmem:[%s15921_s3 + $0xd8] sm:$0xff]   ;;  %v6532_v40 = vrot.slane %v16204_v53, 7  ;;  %v11536_v25 = vld [vmem:[%s15921_s3 + $0x130] sm:$0xff]  }
 0x2d3   : > { %v5757_v62 = vpop.f32.mrb[158].mxu1  ;;  %v11523_v63 = vld [vmem:[%s15921_s3 + $0xc8] sm:$0xff]  }
 0x2d4   : > { %v5759_v41 = vpop.f32.mrb[159].mxu1  ;;  %v11524_v62 = vld [vmem:[%s15921_s3 + $0x30] sm:$0xff]   ;;  %10268 = vmatpush3.bf16.msra.mxu1 %v11523_v63  ;;  %v11530_v63 = vld [vmem:[%s15921_s3 + $0x38] sm:$0xff]  }
 0x2d5   : > { %v16681_v41 = vld [vmem:[#allocation79_spill] sm:$0xff]  ;;  %10142 = vmatpush3.bf16.msra.mxu0 %v11524_v62  ;;  %10269 = vmatprep.subr.bf16.mxu1 %v11525_v30  ;;  %v11532_v62 = vld [vmem:[%s15921_s3 + $0xe0] sm:$0xff]  }
 0x2d6   : > { %6002 = vmatmul.mubr.bf16.gmra.mrb[192].mxu1 %v5134_v3  ;;  %v11526_v3 = vld [vmem:[%s15921_s3 + $0xd0] sm:$0xff]   ;;  %10143 = vmatprep.subr.bf16.mxu0 %v11529_v34  ;;  %v16694_v34 = vld [vmem:[#allocation101_spill] sm:$0xff] }
 0x2d7   : > { %6009 = vmatprep.mubr.bf16.mxu1 %v5223_v44  ;;  %v5136_v44 = vsel %vm1099_vm2, %v16681_v41, %v5100_v19  ;;  %v5108_v19 = vpop.permute.xlu1 %5107  ;;  %v16687_v41 = vld [vmem:[#allocation93_spill] sm:$0xff] }
 0x2d8   : > { %10270 = vmatpush3.bf16.msra.mxu1 %v11526_v3 }
 0x2d9   : > { %v14843_v38 = vpop.f32.mrb[160].mxu1  ;;  %10271 = vmatprep.subr.bf16.mxu1 %v11527_v26  ;;  %10144 = vmatpush3.bf16.msra.mxu0 %v11530_v63  ;;  %v11534_v26 = vld [vmem:[%s15921_s3 + $0xe8] sm:$0xff]   ;;  %v5257_v63 = vrot.slane %v16694_v34, 1 }
 0x2da   : > { %v5764_v32 = vpop.f32.mrb[161].mxu1 }
 0x2db   : > { %v14845_v48 = vpop.f32.mrb[162].mxu1  ;;  %v5241_v32 = vsel %vm1136_vm1, %v5239_v15, %v5240_v14  ;;  %v11533_v15 = vld [vmem:[%s15921_s3 + $0x128] sm:$0xff]   ;;  %v16688_v14 = vld [vmem:[#allocation100_spill] sm:$0xff] }
 0x2dc   : > { %v5767_v31 = vpop.f32.mrb[163].mxu1  ;;  %10272 = vmatpush3.bf16.msra.mxu1 %v11528_v20  ;;  %v11537_v20 = vld [vmem:[%s15921_s3 + $0xf0] sm:$0xff]  }
 0x2dd   : > { %v5137_v31 = vsel %vm1099_vm2, %v16684_v23, %v5104_v42  ;;  %10273 = vmatprep.subr.bf16.mxu1 %v11531_v7  ;;  %v5251_v42 = vrot.slane %v16688_v14, 1  ;;  %v16696_v14 = vld [vmem:[#allocation119_spill] sm:$0xff] }
 0x2de   : > { %6010 = vmatmul.mubr.bf16.gmra.mrb[196].mxu1 %v5135_v13  ;;  %v5245_v13 = vrot.slane %v16685_v47, 1  ;;  %v14940_v47 = vsel %vm14931_vm5, 0, %v6532_v40 }
 0x2df   : > { %6017 = vmatprep.mubr.bf16.mxu1 %v5229_v33  ;;  %v14890_v33 = vpop.f32.mrb[84].mxu0  ;;  %16692 = vst [vmem:[#allocation105_spill] sm:$0xff] %v14940_v47  ;;  %6999 = vmatmul.mubr.bf16.vlgmr.msra.gmra.mrb[120].mxu0 %v14940_v47  ;;  %v11544_v47 = vld [vmem:[%s15921_s3 + $0xa8] sm:$0xff]  }
 0x2e0   : > { %v6108_v61 = vpop.f32.mrb[85].mxu0  ;;  %10274 = vmatpush3.bf16.msra.mxu1 %v11532_v62  ;;  %v16695_v62 = vld [vmem:[#allocation31_spill] sm:$0xff] }
 0x2e1   : > { %v14892_v45 = vpop.f32.mrb[86].mxu0  ;;  %10275 = vmatprep.subr.bf16.mxu1 %v11533_v15  ;;  %v5116_v15 = vpop.permute.xlu1 %5115  ;;  %v11550_v61 = vld [vmem:[%s15921_s3 + $0x158] sm:$0xff]  }
 0x2e2   : > { %v6111_v4 = vpop.f32.mrb[87].mxu0 }
 0x2e3   : > { %v14917_v30 = vpop.f32.mrb[88].mxu0  ;;  %v11535_v4 = vld [vmem:[%s15921_s3 + $0x80] sm:$0xff]  }
 0x2e4   : > { %v14919_v3 = vpop.f32.mrb[89].mxu0  ;;  %10276 = vmatpush3.bf16.msra.mxu1 %v11534_v26  ;;  %10669 = vmatprep.subr.bf16.mxu0 %v11535_v4 }
 0x2e5   : > { %v14921_v36 = vpop.f32.mrb[90].mxu0  ;;  %10277 = vmatprep.subr.bf16.mxu1 %v11536_v25  ;;  %10670 = vmatpush3.bf16.msra.mxu0 %v11535_v4  ;;  %v16697_v25 = vld [vmem:[#allocation84_spill] sm:$0xff] }
 0x2e6   : > { %6018 = vmatmul.mubr.bf16.gmra.mrb[200].mxu1 %v5136_v44  ;;  %v5138_v44 = vsel %vm1099_vm2, %v16687_v41, %v5108_v19  ;;  %v16693_v19 = vld [vmem:[#allocation10_spill] sm:$0xff]  ;;  %v5258_v41 = vrot.slane %v16695_v62, 1 }
 0x2e7   : > { %6025 = vmatprep.mubr.bf16.mxu1 %v5235_v60  ;;  %v5247_v60 = vsel %vm1136_vm1, %v5245_v13, %v5246_v11  ;;  %v5112_v13 = vpop.permute.xlu0 %5111 }
 0x2e8   : > { %v5139_v7 = vsel %vm1099_vm2, %v16693_v19, %v5112_v13  ;;  %10278 = vmatpush3.bf16.msra.mxu1 %v11537_v20  ;;  %v5259_v40 = vsel %vm1136_vm1, %v5257_v63, %v5258_v41  ;;  %v5263_v13 = vrot.slane %v14593_v50, 1  ;;  %v5124_v63 = vpop.permute.xlu1 %5123  ;;  %v16699_v50 = vld [vmem:[#allocation92_spill] sm:$0xff] }
 0x2e9   : > { %v5142_v62 = vsel %vm1099_vm2, %v16699_v50, %v5124_v63  ;;  %v11543_v63 = vld [vmem:[%s15921_s3 + $0xa0] sm:$0xff]  }
 0x2eb   : > { %v5120_v20 = vpop.permute.xlu0 %5119 }
 0x2ee   : > { %6026 = vmatmul.mubr.bf16.gmra.mrb[204].mxu1 %v5137_v31  ;;  %v14929_v31 = vpop.f32.mrb[91].mxu0 }
 0x2ef   : > { %6033 = vmatprep.mubr.bf16.mxu1 %v5241_v32  ;;  %v16689_v32 = vld [vmem:[#allocation78_spill] sm:$0xff] }
 0x2f0   : > { %v5252_v23 = vrot.slane %v16689_v32, 1 }
 0x2f2   : > { %v5253_v11 = vsel %vm1136_vm1, %v5251_v42, %v5252_v23  ;;  %v5140_v42 = vsel %vm1099_vm2, %v16696_v14, %v5116_v15  ;;  %v11541_v14 = vld [vmem:[%s15921_s3 + $0x90] sm:$0xff]  }
 0x2f6   : > { %6034 = vmatmul.mubr.bf16.gmra.mrb[208].mxu1 %v5138_v44  ;;  %v11539_v44 = vld [vmem:[%s15921_s3 + $0xf8] sm:$0xff]   ;;  %v14966_v32 = vpop.f32.mrb[92].mxu0 }
 0x2f7   : > { %6041 = vmatprep.mubr.bf16.mxu1 %v5247_v60  ;;  %v11538_v60 = vld [vmem:[%s15921_s3 + $0x138] sm:$0xff]   ;;  %v14968_v23 = vpop.f32.mrb[93].mxu0 }
 0x2f8   : > { %10279 = vmatprep.subr.bf16.mxu1 %v11538_v60  ;;  %v14970_v26 = vpop.f32.mrb[94].mxu0  ;;  %v16698_v60 = vld [vmem:[#allocation99_spill] sm:$0xff] }
 0x2f9   : > { %10280 = vmatpush3.bf16.msra.mxu1 %v11539_v44  ;;  %v14974_v4 = vpop.f32.mrb[95].mxu0  ;;  %v5141_v34 = vsel %vm1099_vm2, %v16698_v60, %v5120_v20  ;;  %v11542_v20 = vld [vmem:[%s15921_s3 + $0x98] sm:$0xff]  }
 0x2fe   : > { %6042 = vmatmul.mubr.bf16.gmra.mrb[212].mxu1 %v5139_v7  ;;  %v11540_v7 = vld [vmem:[%s15921_s3 + $0x88] sm:$0xff]  }
 0x2ff   : > { %6049 = vmatprep.mubr.bf16.mxu1 %v5253_v11  ;;  %v5264_v11 = vrot.slane %v16697_v25, 1  ;;  %10671 = vmatprep.subr.bf16.mxu0 %v11540_v7 }
 0x300   : > { %10672 = vmatpush3.bf16.msra.mxu0 %v11540_v7 }
 0x301   : > { %v5265_v19 = vsel %vm1136_vm1, %v5263_v13, %v5264_v11  ;;  %10673 = vmatprep.subr.bf16.mxu0 %v11541_v14 }
 0x304   : > { %10674 = vmatpush3.bf16.msra.mxu0 %v11541_v14 }
 0x305   : > { %10675 = vmatprep.subr.bf16.mxu0 %v11542_v20 }
 0x306   : > { %6050 = vmatmul.mubr.bf16.gmra.mrb[216].mxu1 %v5140_v42 }
 0x307   : > { %6057 = vmatprep.mubr.bf16.mxu1 %v5259_v40 }
 0x308   : > { %10676 = vmatpush3.bf16.msra.mxu0 %v11542_v20 }
 0x309   : > { %10677 = vmatprep.subr.bf16.mxu0 %v11543_v63 }
 0x30c   : > { %10678 = vmatpush3.bf16.msra.mxu0 %v11543_v63 }
 0x30d   : > { %v14984_v41 = vpop.f32.mrb[96].mxu0  ;;  %10679 = vmatprep.subr.bf16.mxu0 %v11544_v47 }
 0x30e   : > { %6058 = vmatmul.mubr.bf16.gmra.mrb[220].mxu1 %v5141_v34  ;;  %v14986_v44 = vpop.f32.mrb[97].mxu0 }
 0x30f   : > { %6065 = vmatprep.mubr.bf16.mxu1 %v5265_v19  ;;  %v14988_v15 = vpop.f32.mrb[98].mxu0 }
 0x310   : > { %v14990_v40 = vpop.f32.mrb[99].mxu0  ;;  %10680 = vmatpush3.bf16.msra.mxu0 %v11544_v47 }
 0x311   : > { %10681 = vmatprep.subr.bf16.mxu0 %v11545_v35 }
 0x314   : > { %10682 = vmatpush3.bf16.msra.mxu0 %v11545_v35 }
 0x316   : > { %6066 = vmatmul.mubr.bf16.gmra.mrb[236].mxu1 %v5142_v62 }
 0x323   : > { %v14995_v42 = vpop.f32.mrb[100].mxu0 }
 0x324   : > { %v14997_v13 = vpop.f32.mrb[101].mxu0 }
 0x325   : > { %v14999_v25 = vpop.f32.mrb[102].mxu0 }
 0x326   : > { %v15001_v11 = vpop.f32.mrb[103].mxu0 }
 0x331   : > { %v15006_v19 = vpop.f32.mrb[104].mxu0 }
 0x332   : > { %v15008_v7 = vpop.f32.mrb[105].mxu0 }
 0x333   : > { %v15010_v60 = vpop.f32.mrb[106].mxu0 }
 0x334   : > { %v15012_v34 = vpop.f32.mrb[107].mxu0 }
 0x339   : > { %v15017_v50 = vpop.f32.mrb[108].mxu0 }
 0x33a   : > { %16700 = vst [vmem:[#allocation56_spill] sm:$0xff] %v15017_v50  ;;  %v15019_v62 = vpop.f32.mrb[109].mxu0 }
 0x33b   : > { %v15021_v14 = vpop.f32.mrb[110].mxu0 }
 0x33c   : > { %16701 = vst [vmem:[#allocation54_spill] sm:$0xff] %v15021_v14  ;;  %v15023_v20 = vpop.f32.mrb[111].mxu0 }
 0x33d   : > { %16702 = vst [vmem:[#allocation55_spill] sm:$0xff] %v15023_v20 }
 0x346   : > { %v15028_v53 = vpop.f32.mrb[112].mxu0 }
 0x347   : > { %16703 = vst [vmem:[#allocation53_spill] sm:$0xff] %v15028_v53  ;;  %v15030_v8 = vpop.f32.mrb[113].mxu0 }
 0x348   : > { %16704 = vst [vmem:[#allocation108_spill] sm:$0xff] %v15030_v8  ;;  %v15032_v55 = vpop.f32.mrb[114].mxu0 }
 0x349   : > { %16705 = vst [vmem:[#allocation62_spill] sm:$0xff] %v15032_v55  ;;  %v15034_v63 = vpop.f32.mrb[115].mxu0 }
 0x34a   : > { %16706 = vst [vmem:[#allocation65_spill] sm:$0xff] %v15034_v63 }
 0x355   : > { %v10667_v14 = vpop.f32.mrb[116].mxu0 }
 0x356   : > { %v15039_v8 = vpop.f32.mrb[117].mxu0 }
 0x357   : > { %v10668_v55 = vpop.f32.mrb[118].mxu0 }
 0x358   : > { %v15041_v58 = vpop.f32.mrb[119].mxu0  ;;  %v11546_v55 = vld [vmem:[%s15921_s3 + $0xb8] sm:$0xff]  }
 0x359   : > { %v5890_v46 = vpop.f32.mrb[224].mxu1  ;;  %10683 = vmatprep.subr.bf16.mxu0 %v11546_v55 }
 0x35a   : > { %v5892_v5 = vpop.f32.mrb[225].mxu1  ;;  %10684 = vmatpush3.bf16.msra.mxu0 %v11546_v55 }
 0x35b   : > { %v5893_v49 = vpop.f32.mrb[226].mxu1 }
 0x35c   : > { %v5895_v18 = vpop.f32.mrb[227].mxu1 }
 0x361   : > { %v5931_v47 = vpop.f32.mrb[228].mxu1 }
 0x362   : > { %v5933_v0 = vpop.f32.mrb[229].mxu1 }
 0x363   : > { %v5934_v53 = vpop.f32.mrb[230].mxu1 }
 0x364   : > { %v5936_v50 = vpop.f32.mrb[231].mxu1  ;;  %v15049_v53 = vld [vmem:[%s15920_s2] ss:$0 sm:$0xff] }
 0x369   : > { %v5939_v46 = vpop.f32.mrb[232].mxu1 }
 0x36a   : > { %v5940_v5 = vadd.f32 %v5939_v46, %v14843_v38  ;;  %v5941_v18 = vpop.f32.mrb[233].mxu1 }
 0x36b   : > { %v5942_v49 = vpop.f32.mrb[234].mxu1 }
 0x36c   : > { %v6117_v63 = vadd.f32 %v14890_v33, %v5940_v5  ;;  %v5943_v14 = vadd.f32 %v5942_v49, %v14845_v48  ;;  %v5944_v20 = vpop.f32.mrb[235].mxu1  ;;  %v15061_v48 = vld [vmem:[%s15921_s3 + $0x140] sm:$0xff]  }
 0x36d   : > { %10717 = vmatprep.subr.bf16.mxu0 %v15061_v48 }
 0x36e   : > { %v6253_v0 = vadd.f32 %v6117_v63, %v14613_v2  ;;  %v6120_v35 = vadd.f32 %v14892_v45, %v5943_v14 }
 0x370   : > { %v6368_v38 = vadd.f32 %v15049_v53, %v6253_v0  ;;  %v6254_v33 = vadd.f32 %v6120_v35, %v14620_v37 }
 0x371   : > { %v5947_v50 = vpop.f32.mrb[164].mxu1 }
 0x372   : > { %v6369_v2 = vadd.f32 %v15049_v53, %v6254_v33  ;;  %v6125_v45 = vadd.f32 %v14919_v3, %v5947_v50  ;;  %v5949_v20 = vpop.f32.mrb[165].mxu1  ;;  %v6404_v47 = vmax.f32 %v6368_v38, 0.0 }
 0x373   : > { %v5950_v63 = vpop.f32.mrb[166].mxu1 }
 0x374   : > { %v6405_v46 = vmax.f32 %v6369_v2, 0.0  ;;  %v6255_v37 = vadd.f32 %v6125_v45, %v14638_v54  ;;  %v6128_v5 = vadd.f32 %v14929_v31, %v5950_v63  ;;  %v5952_v18 = vpop.f32.mrb[167].mxu1 }
 0x376   : > { %v6370_v49 = vadd.f32 %v15049_v53, %v6255_v37  ;;  %v6256_v14 = vadd.f32 %v6128_v5, %v14656_v57  ;;  %v6439_v0 = vpack.c.bf16 %v6405_v46, %v6404_v47 }
 0x378   : > { %v6371_v35 = vadd.f32 %v15049_v53, %v6256_v14  ;;  %7006 = vmatprep.mubr.bf16.mxu0 %v6439_v0  ;;  %7834 = vmatprep.mubr.bf16.mxu1 %v6439_v0  ;;  %v6537_v3 = vshrl.u32 %v6439_v0, 16  ;;  %v6540_v55 = vshll.u32 %v6439_v0, 16  ;;  %v6406_v33 = vmax.f32 %v6370_v49, 0.0 }
 0x379   : > { %v5955_v50 = vpop.f32.mrb[168].mxu1 }
 0x37a   : > { %v6407_v38 = vmax.f32 %v6371_v35, 0.0  ;;  %v6133_v2 = vadd.f32 %v14917_v30, %v5955_v50  ;;  %v5957_v54 = vpop.f32.mrb[169].mxu1  ;;  %v6539_v45 = vrot.slane %v6537_v3, 7  ;;  %v6678_v31 = vrot.slane %v6540_v55, 1 }
 0x37b   : > { %v5958_v20 = vpop.f32.mrb[170].mxu1 }
 0x37c   : > { %v15072_v63 = vpack.c.bf16 %v6407_v38, %v6406_v33  ;;  %v6257_v57 = vadd.f32 %v6133_v2, %v14633_v17  ;;  %v6136_v47 = vadd.f32 %v14921_v36, %v5958_v20  ;;  %v5960_v46 = vpop.f32.mrb[171].mxu1  ;;  %v6542_v37 = vor.u32 %v6540_v55, %v6539_v45 }
 0x37d   : > { %v15076_v5 = vor.u32 %v6678_v31, %v6537_v3 }
 0x37e   : > { %v6372_v18 = vadd.f32 %v15049_v53, %v6257_v57  ;;  %v6258_v49 = vadd.f32 %v6136_v47, %v14644_v6  ;;  %v6661_v30 = vsel %vm14931_vm5, 0, %v6542_v37  ;;  %v6544_v14 = vshrl.u32 %v15072_v63, 16 }
 0x37f   : > { %7007 = vmatmul.mubr.bf16.gmra.mrb[124].mxu0 %v6661_v30  ;;  %7835 = vmatmul.mubr.bf16.vlgmr.msra.gmra.mrb[240].mxu1 %v6661_v30  ;;  %v6547_v0 = vshll.u32 %v15072_v63, 16 }
 0x380   : > { %v6373_v17 = vadd.f32 %v15049_v53, %v6258_v49  ;;  %7014 = vmatprep.mubr.bf16.mxu0 %v15072_v63  ;;  %7842 = vmatprep.mubr.bf16.mxu1 %v15072_v63  ;;  %v6546_v36 = vrot.slane %v6544_v14, 7  ;;  %v6408_v55 = vmax.f32 %v6372_v18, 0.0 }
 0x381   : > { %v5963_v35 = vpop.f32.mrb[172].mxu1  ;;  %v6680_v3 = vrot.slane %v6547_v0, 1 }
 0x382   : > { %v6409_v6 = vmax.f32 %v6373_v17, 0.0  ;;  %v6141_v33 = vadd.f32 %v14968_v23, %v5963_v35  ;;  %v5965_v50 = vpop.f32.mrb[173].mxu1  ;;  %v6549_v38 = vor.u32 %v6547_v0, %v6546_v36 }
 0x383   : > { %v5966_v2 = vpop.f32.mrb[174].mxu1  ;;  %v15088_v54 = vor.u32 %v6680_v3, %v6544_v14 }
 0x384   : > { %v15090_v45 = vpack.c.bf16 %v6409_v6, %v6408_v55  ;;  %v6259_v31 = vadd.f32 %v6141_v33, %v14680_v24  ;;  %v6144_v20 = vadd.f32 %v14974_v4, %v5966_v2  ;;  %v5968_v57 = vpop.f32.mrb[175].mxu1  ;;  %v15096_v47 = vsel %vm14931_vm5, 0, %v6549_v38 }
 0x386   : > { %v6374_v46 = vadd.f32 %v15049_v53, %v6259_v31  ;;  %v6260_v23 = vadd.f32 %v6144_v20, %v14695_v27  ;;  %v6551_v37 = vshrl.u32 %v15090_v45, 16  ;;  %v6554_v18 = vshll.u32 %v15090_v45, 16 }
 0x387   : > { %7015 = vmatmul.mubr.bf16.gmra.mrb[128].mxu0 %v15096_v47  ;;  %7843 = vmatmul.mubr.bf16.gmra.mrb[244].mxu1 %v15096_v47 }
 0x388   : > { %v6375_v24 = vadd.f32 %v15049_v53, %v6260_v23  ;;  %7022 = vmatprep.mubr.bf16.mxu0 %v15090_v45  ;;  %7850 = vmatprep.mubr.bf16.mxu1 %v15090_v45  ;;  %v6553_v4 = vrot.slane %v6551_v37, 7  ;;  %v6682_v49 = vrot.slane %v6554_v18, 1  ;;  %v6410_v30 = vmax.f32 %v6374_v46, 0.0 }
 0x389   : > { %v5971_v14 = vpop.f32.mrb[176].mxu1 }
 0x38a   : > { %v6411_v0 = vmax.f32 %v6375_v24, 0.0  ;;  %v6149_v27 = vadd.f32 %v14966_v32, %v5971_v14  ;;  %v5973_v17 = vpop.f32.mrb[177].mxu1  ;;  %v6556_v36 = vor.u32 %v6554_v18, %v6553_v4  ;;  %v15108_v35 = vor.u32 %v6682_v49, %v6551_v37 }
 0x38b   : > { %v5974_v3 = vpop.f32.mrb[178].mxu1 }
 0x38c   : > { %v15110_v55 = vpack.c.bf16 %v6411_v0, %v6410_v30  ;;  %v6261_v6 = vadd.f32 %v6149_v27, %v14675_v21  ;;  %v6152_v33 = vadd.f32 %v14970_v26, %v5974_v3  ;;  %v5976_v50 = vpop.f32.mrb[179].mxu1  ;;  %v15116_v38 = vsel %vm14931_vm5, 0, %v6556_v36 }
 0x38e   : > { %v6376_v2 = vadd.f32 %v15049_v53, %v6261_v6  ;;  %v6262_v32 = vadd.f32 %v6152_v33, %v14689_v51  ;;  %v6558_v31 = vshrl.u32 %v15110_v55, 16  ;;  %v6561_v20 = vshll.u32 %v15110_v55, 16 }
 0x38f   : > { %7023 = vmatmul.mubr.bf16.gmra.mrb[132].mxu0 %v15116_v38  ;;  %7851 = vmatmul.mubr.bf16.gmra.mrb[248].mxu1 %v15116_v38 }
 0x390   : > { %v6377_v21 = vadd.f32 %v15049_v53, %v6262_v32  ;;  %7030 = vmatprep.mubr.bf16.mxu0 %v15110_v55  ;;  %7858 = vmatprep.mubr.bf16.mxu1 %v15110_v55  ;;  %v6560_v26 = vrot.slane %v6558_v31, 7  ;;  %v6684_v57 = vrot.slane %v6561_v20, 1  ;;  %v6412_v46 = vmax.f32 %v6376_v2, 0.0 }
 0x391   : > { %v5979_v23 = vpop.f32.mrb[180].mxu1 }
 0x392   : > { %v6413_v37 = vmax.f32 %v6377_v21, 0.0  ;;  %v6157_v51 = vadd.f32 %v14986_v44, %v5979_v23  ;;  %v5981_v18 = vpop.f32.mrb[181].mxu1  ;;  %v6563_v24 = vor.u32 %v6561_v20, %v6560_v26  ;;  %v15128_v4 = vor.u32 %v6684_v57, %v6558_v31 }
 0x393   : > { %v5982_v49 = vpop.f32.mrb[182].mxu1 }
 0x394   : > { %v15130_v30 = vpack.c.bf16 %v6413_v37, %v6412_v46  ;;  %v6263_v14 = vadd.f32 %v6157_v51, %v14719_v52  ;;  %v6160_v0 = vadd.f32 %v14990_v40, %v5982_v49  ;;  %v5984_v27 = vpop.f32.mrb[183].mxu1  ;;  %v15136_v17 = vsel %vm14931_vm5, 0, %v6563_v24 }
 0x396   : > { %v6378_v36 = vadd.f32 %v15049_v53, %v6263_v14  ;;  %v6264_v44 = vadd.f32 %v6160_v0, %v14731_v10  ;;  %v6565_v3 = vshrl.u32 %v15130_v30, 16  ;;  %v6568_v6 = vshll.u32 %v15130_v30, 16 }
 0x397   : > { %7031 = vmatmul.mubr.bf16.gmra.mrb[136].mxu0 %v15136_v17  ;;  %7859 = vmatmul.mubr.bf16.gmra.mrb[252].mxu1 %v15136_v17 }
 0x398   : > { %v6379_v52 = vadd.f32 %v15049_v53, %v6264_v44  ;;  %7038 = vmatprep.mubr.bf16.mxu0 %v15130_v30  ;;  %7866 = vmatprep.mubr.bf16.mxu1 %v15130_v30  ;;  %v6567_v40 = vrot.slane %v6565_v3, 7  ;;  %v6686_v33 = vrot.slane %v6568_v6, 1  ;;  %v6414_v50 = vmax.f32 %v6378_v36, 0.0 }
 0x399   : > { %v5987_v2 = vpop.f32.mrb[184].mxu1 }
 0x39a   : > { %v6415_v32 = vmax.f32 %v6379_v52, 0.0  ;;  %v6165_v10 = vadd.f32 %v14984_v41, %v5987_v2  ;;  %v5989_v31 = vpop.f32.mrb[185].mxu1  ;;  %v6570_v20 = vor.u32 %v6568_v6, %v6567_v40  ;;  %v15148_v21 = vor.u32 %v6686_v33, %v6565_v3 }
 0x39b   : > { %v5990_v26 = vpop.f32.mrb[186].mxu1 }
 0x39c   : > { %v15150_v57 = vpack.c.bf16 %v6415_v32, %v6414_v50  ;;  %v6265_v46 = vadd.f32 %v6165_v10, %v14714_v9  ;;  %v6168_v23 = vadd.f32 %v14988_v15, %v5990_v26  ;;  %v5992_v37 = vpop.f32.mrb[187].mxu1  ;;  %v15156_v51 = vsel %vm14931_vm5, 0, %v6570_v20 }
 0x39e   : > { %v6380_v18 = vadd.f32 %v15049_v53, %v6265_v46  ;;  %v6266_v41 = vadd.f32 %v6168_v23, %v14728_v16  ;;  %v6572_v24 = vshrl.u32 %v15150_v57, 16  ;;  %v6575_v49 = vshll.u32 %v15150_v57, 16 }
 0x39f   : > { %7039 = vmatmul.mubr.bf16.gmra.mrb[140].mxu0 %v15156_v51  ;;  %7867 = vmatmul.mubr.bf16.gmra.mrb[0].mxu1 %v15156_v51 }
 0x3a0   : > { %v6381_v9 = vadd.f32 %v15049_v53, %v6266_v41  ;;  %7046 = vmatprep.mubr.bf16.mxu0 %v15150_v57  ;;  %7874 = vmatprep.mubr.bf16.mxu1 %v15150_v57  ;;  %v6574_v15 = vrot.slane %v6572_v24, 7  ;;  %v6688_v14 = vrot.slane %v6575_v49, 1  ;;  %v6416_v0 = vmax.f32 %v6380_v18, 0.0 }
 0x3a1   : > { %v5995_v27 = vpop.f32.mrb[188].mxu1 }
 0x3a2   : > { %v6417_v36 = vmax.f32 %v6381_v9, 0.0  ;;  %v6173_v16 = vadd.f32 %v14997_v13, %v5995_v27  ;;  %v5997_v44 = vpop.f32.mrb[189].mxu1  ;;  %v6577_v3 = vor.u32 %v6575_v49, %v6574_v15  ;;  %v15168_v6 = vor.u32 %v6688_v14, %v6572_v24 }
 0x3a3   : > { %v5998_v52 = vpop.f32.mrb[190].mxu1 }
 0x3a4   : > { %v15170_v40 = vpack.c.bf16 %v6417_v36, %v6416_v0  ;;  %v6267_v33 = vadd.f32 %v6173_v16, %v14749_v29  ;;  %v6176_v50 = vadd.f32 %v15001_v11, %v5998_v52  ;;  %v6000_v2 = vpop.f32.mrb[191].mxu1  ;;  %v15176_v32 = vsel %vm14931_vm5, 0, %v6577_v3 }
 0x3a6   : > { %v6382_v10 = vadd.f32 %v15049_v53, %v6267_v33  ;;  %v6268_v13 = vadd.f32 %v6176_v50, %v14758_v56  ;;  %v6579_v31 = vshrl.u32 %v15170_v40, 16  ;;  %v6582_v20 = vshll.u32 %v15170_v40, 16 }
 0x3a7   : > { %7047 = vmatmul.mubr.bf16.gmra.mrb[144].mxu0 %v15176_v32  ;;  %7875 = vmatmul.mubr.bf16.gmra.mrb[4].mxu1 %v15176_v32 }
 0x3a8   : > { %v6383_v29 = vadd.f32 %v15049_v53, %v6268_v13  ;;  %7054 = vmatprep.mubr.bf16.mxu0 %v15170_v40  ;;  %7882 = vmatprep.mubr.bf16.mxu1 %v15170_v40  ;;  %v6581_v11 = vrot.slane %v6579_v31, 7  ;;  %v6690_v26 = vrot.slane %v6582_v20, 1  ;;  %v6418_v46 = vmax.f32 %v6382_v10, 0.0 }
 0x3a9   : > { %v6003_v23 = vpop.f32.mrb[192].mxu1 }
 0x3aa   : > { %v6419_v37 = vmax.f32 %v6383_v29, 0.0  ;;  %v6181_v56 = vadd.f32 %v14995_v42, %v6003_v23  ;;  %v6005_v18 = vpop.f32.mrb[193].mxu1  ;;  %v6584_v41 = vor.u32 %v6582_v20, %v6581_v11  ;;  %v15188_v24 = vor.u32 %v6690_v26, %v6579_v31 }
 0x3ab   : > { %v6006_v49 = vpop.f32.mrb[194].mxu1 }
 0x3ac   : > { %v15190_v9 = vpack.c.bf16 %v6419_v37, %v6418_v46  ;;  %v6269_v15 = vadd.f32 %v6181_v56, %v14744_v12  ;;  %v6184_v14 = vadd.f32 %v14999_v25, %v6006_v49  ;;  %v6008_v0 = vpop.f32.mrb[195].mxu1  ;;  %v15196_v27 = vsel %vm14931_vm5, 0, %v6584_v41 }
 0x3ae   : > { %v6384_v36 = vadd.f32 %v15049_v53, %v6269_v15  ;;  %v6270_v42 = vadd.f32 %v6184_v14, %v14755_v28  ;;  %v6586_v16 = vshrl.u32 %v15190_v9, 16  ;;  %v6589_v44 = vshll.u32 %v15190_v9, 16 }
 0x3af   : > { %7055 = vmatmul.mubr.bf16.gmra.mrb[148].mxu0 %v15196_v27  ;;  %7883 = vmatmul.mubr.bf16.gmra.mrb[8].mxu1 %v15196_v27 }
 0x3b0   : > { %v6385_v12 = vadd.f32 %v15049_v53, %v6270_v42  ;;  %7062 = vmatprep.mubr.bf16.mxu0 %v15190_v9  ;;  %7890 = vmatprep.mubr.bf16.mxu1 %v15190_v9  ;;  %v6588_v25 = vrot.slane %v6586_v16, 7  ;;  %v6692_v3 = vrot.slane %v6589_v44, 1  ;;  %v6420_v52 = vmax.f32 %v6384_v36, 0.0 }
 0x3b1   : > { %v6011_v33 = vpop.f32.mrb[196].mxu1 }
 0x3b2   : > { %v6421_v50 = vmax.f32 %v6385_v12, 0.0  ;;  %v6189_v28 = vadd.f32 %v15008_v7, %v6011_v33  ;;  %v6013_v2 = vpop.f32.mrb[197].mxu1  ;;  %v6591_v10 = vor.u32 %v6589_v44, %v6588_v25  ;;  %v15208_v13 = vor.u32 %v6692_v3, %v6586_v16 }
 0x3b3   : > { %v6014_v31 = vpop.f32.mrb[198].mxu1 }
 0x3b4   : > { %v15210_v20 = vpack.c.bf16 %v6421_v50, %v6420_v52  ;;  %v6271_v29 = vadd.f32 %v6189_v28, %v14772_v59  ;;  %v6192_v11 = vadd.f32 %v15012_v34, %v6014_v31  ;;  %v6016_v26 = vpop.f32.mrb[199].mxu1  ;;  %v15216_v46 = vsel %vm14931_vm5, 0, %v6591_v10 }
 0x3b6   : > { %v6386_v23 = vadd.f32 %v15049_v53, %v6271_v29  ;;  %v6272_v7 = vadd.f32 %v6192_v11, %v14781_v39  ;;  %v6593_v37 = vshrl.u32 %v15210_v20, 16  ;;  %v6596_v56 = vshll.u32 %v15210_v20, 16 }
 0x3b7   : > { %7063 = vmatmul.mubr.bf16.gmra.mrb[152].mxu0 %v15216_v46  ;;  %7891 = vmatmul.mubr.bf16.gmra.mrb[12].mxu1 %v15216_v46 }
 0x3b8   : > { %v6387_v59 = vadd.f32 %v15049_v53, %v6272_v7  ;;  %7070 = vmatprep.mubr.bf16.mxu0 %v15210_v20  ;;  %7898 = vmatprep.mubr.bf16.mxu1 %v15210_v20  ;;  %v6595_v34 = vrot.slane %v6593_v37, 7  ;;  %v6694_v18 = vrot.slane %v6596_v56, 1  ;;  %v6422_v41 = vmax.f32 %v6386_v23, 0.0 }
 0x3b9   : > { %v6019_v49 = vpop.f32.mrb[200].mxu1 }
 0x3ba   : > { %v6423_v15 = vmax.f32 %v6387_v59, 0.0  ;;  %v6197_v39 = vadd.f32 %v15006_v19, %v6019_v49  ;;  %v6021_v14 = vpop.f32.mrb[201].mxu1  ;;  %v6598_v0 = vor.u32 %v6596_v56, %v6595_v34  ;;  %v15228_v36 = vor.u32 %v6694_v18, %v6593_v37  ;;  %v16707_v56 = vld [vmem:[#allocation55_spill] sm:$0xff]  ;;  %v16708_v49 = vld [vmem:[#allocation45_spill] sm:$0xff] }
 0x3bb   : > { %v6022_v42 = vpop.f32.mrb[202].mxu1 }
 0x3bc   : > { %v15230_v16 = vpack.c.bf16 %v6423_v15, %v6422_v41  ;;  %v6273_v44 = vadd.f32 %v6197_v39, %v14767_v43  ;;  %v6200_v12 = vadd.f32 %v15010_v60, %v6022_v42  ;;  %v6024_v25 = vpop.f32.mrb[203].mxu1  ;;  %v15236_v3 = vsel %vm14931_vm5, 0, %v6598_v0 }
 0x3bd   : > { %v16709_v25 = vld [vmem:[#allocation56_spill] sm:$0xff] }
 0x3be   : > { %v6388_v52 = vadd.f32 %v15049_v53, %v6273_v44  ;;  %v6274_v19 = vadd.f32 %v6200_v12, %v14778_v22  ;;  %v6600_v33 = vshrl.u32 %v15230_v16, 16  ;;  %v6603_v50 = vshll.u32 %v15230_v16, 16 }
 0x3bf   : > { %7071 = vmatmul.mubr.bf16.gmra.mrb[156].mxu0 %v15236_v3  ;;  %7899 = vmatmul.mubr.bf16.gmra.mrb[16].mxu1 %v15236_v3 }
 0x3c0   : > { %v6389_v43 = vadd.f32 %v15049_v53, %v6274_v19  ;;  %7078 = vmatprep.mubr.bf16.mxu0 %v15230_v16  ;;  %7906 = vmatprep.mubr.bf16.mxu1 %v15230_v16  ;;  %v6602_v60 = vrot.slane %v6600_v33, 7  ;;  %v6696_v28 = vrot.slane %v6603_v50, 1  ;;  %v6424_v2 = vmax.f32 %v6388_v52, 0.0 }
 0x3c1   : > { %v6027_v10 = vpop.f32.mrb[204].mxu1 }
 0x3c2   : > { %v6425_v31 = vmax.f32 %v6389_v43, 0.0  ;;  %v6205_v22 = vadd.f32 %v15019_v62, %v6027_v10  ;;  %v6029_v29 = vpop.f32.mrb[205].mxu1  ;;  %v6605_v11 = vor.u32 %v6603_v50, %v6602_v60  ;;  %v15248_v26 = vor.u32 %v6696_v28, %v6600_v33  ;;  %v16710_v28 = vld [vmem:[#allocation46_spill] sm:$0xff] }
 0x3c3   : > { %v6030_v23 = vpop.f32.mrb[206].mxu1  ;;  %v16711_v10 = vld [vmem:[#allocation54_spill] sm:$0xff] }
 0x3c4   : > { %v15250_v7 = vpack.c.bf16 %v6425_v31, %v6424_v2  ;;  %v6275_v37 = vadd.f32 %v6205_v22, %v14795_v1  ;;  %v6208_v59 = vadd.f32 %v16707_v56, %v6030_v23  ;;  %v6032_v34 = vpop.f32.mrb[207].mxu1  ;;  %v15256_v18 = vsel %vm14931_vm5, 0, %v6605_v11  ;;  %v10145_v11 = vpop.f32.mrb[120].mxu0 }
 0x3c6   : > { %v6390_v41 = vadd.f32 %v15049_v53, %v6275_v37  ;;  %v6276_v62 = vadd.f32 %v6208_v59, %v16708_v49  ;;  %v6607_v15 = vshrl.u32 %v15250_v7, 16  ;;  %v6610_v39 = vshll.u32 %v15250_v7, 16  ;;  %v16712_v37 = vld [vmem:[#allocation50_spill] sm:$0xff] }
 0x3c7   : > { %7079 = vmatmul.mubr.bf16.gmra.mrb[160].mxu0 %v15256_v18  ;;  %7907 = vmatmul.mubr.bf16.gmra.mrb[20].mxu1 %v15256_v18 }
 0x3c8   : > { %v6391_v1 = vadd.f32 %v15049_v53, %v6276_v62  ;;  %7086 = vmatprep.mubr.bf16.mxu0 %v15250_v7  ;;  %7914 = vmatprep.mubr.bf16.mxu1 %v15250_v7  ;;  %v6609_v14 = vrot.slane %v6607_v15, 7  ;;  %v6698_v0 = vrot.slane %v6610_v39, 1  ;;  %v6426_v42 = vmax.f32 %v6390_v41, 0.0  ;;  %v10146_v41 = vpop.f32.mrb[121].mxu0 }
 0x3c9   : > { %v6035_v44 = vpop.f32.mrb[208].mxu1  ;;  %v15284_v49 = vadd.f32 %v10146_v41, %v10145_v11  ;;  %v10148_v62 = vpop.f32.mrb[122].mxu0  ;;  %v16716_v41 = vld [vmem:[#allocation52_spill] sm:$0xff] }
 0x3ca   : > { %v6427_v12 = vmax.f32 %v6391_v1, 0.0  ;;  %v6213_v52 = vadd.f32 %v16709_v25, %v6035_v44  ;;  %v6037_v19 = vpop.f32.mrb[209].mxu1  ;;  %v6612_v33 = vor.u32 %v6610_v39, %v6609_v14  ;;  %v15268_v50 = vor.u32 %v6698_v0, %v6607_v15  ;;  %v10149_v14 = vpop.f32.mrb[123].mxu0  ;;  %v16713_v25 = vld [vmem:[#allocation108_spill] sm:$0xff] }
 0x3cb   : > { %v6038_v43 = vpop.f32.mrb[210].mxu1  ;;  %v15289_v44 = vadd.f32 %v10149_v14, %v10148_v62 }
 0x3cc   : > { %v15270_v60 = vpack.c.bf16 %v6427_v12, %v6426_v42  ;;  %v6277_v2 = vadd.f32 %v6213_v52, %v16710_v28  ;;  %v6216_v31 = vadd.f32 %v16711_v10, %v6038_v43  ;;  %v6040_v22 = vpop.f32.mrb[211].mxu1  ;;  %v15276_v29 = vsel %vm14931_vm5, 0, %v6612_v33  ;;  %v16714_v10 = vld [vmem:[#allocation103_spill] sm:$0xff] }
 0x3cd   : > { %v16715_v22 = vld [vmem:[#allocation65_spill] sm:$0xff] }
 0x3ce   : > { %v6392_v23 = vadd.f32 %v15049_v53, %v6277_v2  ;;  %v6278_v56 = vadd.f32 %v6216_v31, %v16712_v37  ;;  %v6614_v59 = vshrl.u32 %v15270_v60, 16  ;;  %v6617_v34 = vshll.u32 %v15270_v60, 16 }
 0x3cf   : > { %7087 = vmatmul.mubr.bf16.gmra.mrb[164].mxu0 %v15276_v29  ;;  %7915 = vmatmul.mubr.bf16.gmra.mrb[24].mxu1 %v15276_v29 }
 0x3d0   : > { %v6393_v15 = vadd.f32 %v15049_v53, %v6278_v56  ;;  %7094 = vmatprep.mubr.bf16.mxu0 %v15270_v60  ;;  %7922 = vmatprep.mubr.bf16.mxu1 %v15270_v60  ;;  %v6616_v39 = vrot.slane %v6614_v59, 7  ;;  %v6700_v1 = vrot.slane %v6617_v34, 1  ;;  %v6428_v0 = vmax.f32 %v6392_v23, 0.0 }
 0x3d1   : > { %v6043_v42 = vpop.f32.mrb[212].mxu1 }
 0x3d2   : > { %v6429_v12 = vmax.f32 %v6393_v15, 0.0  ;;  %v6221_v52 = vadd.f32 %v16713_v25, %v6043_v42  ;;  %v6045_v19 = vpop.f32.mrb[213].mxu1  ;;  %v6619_v33 = vor.u32 %v6617_v34, %v6616_v39  ;;  %v15292_v43 = vor.u32 %v6700_v1, %v6614_v59 }
 0x3d3   : > { %v6046_v28 = vpop.f32.mrb[214].mxu1 }
 0x3d4   : > { %v15294_v2 = vpack.c.bf16 %v6429_v12, %v6428_v0  ;;  %v6279_v31 = vadd.f32 %v6221_v52, %v16714_v10  ;;  %v6224_v11 = vadd.f32 %v16715_v22, %v6046_v28  ;;  %v6048_v37 = vpop.f32.mrb[215].mxu1  ;;  %v15300_v23 = vsel %vm14931_vm5, 0, %v6619_v33  ;;  %v16717_v12 = vld [vmem:[#allocation53_spill] sm:$0xff] }
 0x3d6   : > { %v6394_v56 = vadd.f32 %v15049_v53, %v6279_v31  ;;  %v6280_v62 = vadd.f32 %v6224_v11, %v16716_v41  ;;  %v6621_v34 = vshrl.u32 %v15294_v2, 16  ;;  %v6624_v59 = vshll.u32 %v15294_v2, 16  ;;  %v16719_v31 = vld [vmem:[#allocation49_spill] sm:$0xff]  ;;  %v16720_v11 = vld [vmem:[#allocation62_spill] sm:$0xff] }
 0x3d7   : > { %7095 = vmatmul.mubr.bf16.gmra.mrb[168].mxu0 %v15300_v23  ;;  %7923 = vmatmul.mubr.bf16.gmra.mrb[28].mxu1 %v15300_v23 }
 0x3d8   : > { %v6395_v15 = vadd.f32 %v15049_v53, %v6280_v62  ;;  %7102 = vmatprep.mubr.bf16.mxu0 %v15294_v2  ;;  %7930 = vmatprep.mubr.bf16.mxu1 %v15294_v2  ;;  %v6623_v39 = vrot.slane %v6621_v34, 7  ;;  %v6702_v1 = vrot.slane %v6624_v59, 1  ;;  %v6430_v14 = vmax.f32 %v6394_v56, 0.0 }
 0x3d9   : > { %v6051_v0 = vpop.f32.mrb[216].mxu1 }
 0x3da   : > { %v6431_v42 = vmax.f32 %v6395_v15, 0.0  ;;  %v6229_v25 = vadd.f32 %v16717_v12, %v6051_v0  ;;  %v6053_v52 = vpop.f32.mrb[217].mxu1  ;;  %v6626_v19 = vor.u32 %v6624_v59, %v6623_v39  ;;  %v15312_v33 = vor.u32 %v6702_v1, %v6621_v34  ;;  %v16722_v15 = vld [vmem:[#allocation48_spill] sm:$0xff] }
 0x3db   : > { %v6054_v28 = vpop.f32.mrb[218].mxu1 }
 0x3dc   : > { %v15314_v10 = vpack.c.bf16 %v6431_v42, %v6430_v14  ;;  %v6281_v22 = vadd.f32 %v6229_v25, %v16719_v31  ;;  %v6232_v37 = vadd.f32 %v16720_v11, %v6054_v28  ;;  %v6056_v41 = vpop.f32.mrb[219].mxu1  ;;  %v15320_v62 = vsel %vm14931_vm5, 0, %v6626_v19 }
 0x3dd   : > { %16721 = vst [vmem:[#allocation64_spill] sm:$0xff] %v15320_v62 }
 0x3de   : > { %16718 = vst [vmem:[#allocation61_spill] sm:$0xff] %v15314_v10  ;;  %v6396_v56 = vadd.f32 %v15049_v53, %v6281_v22  ;;  %v6282_v0 = vadd.f32 %v6232_v37, %v16722_v15  ;;  %v6628_v59 = vshrl.u32 %v15314_v10, 16  ;;  %v6631_v34 = vshll.u32 %v15314_v10, 16  ;;  %v16723_v37 = vld [vmem:[#allocation47_spill] sm:$0xff] }
 0x3df   : > { %7103 = vmatmul.mubr.bf16.gmra.mrb[172].mxu0 %v15320_v62  ;;  %7931 = vmatmul.mubr.bf16.gmra.mrb[32].mxu1 %v15320_v62  ;;  %v16724_v62 = vld [vmem:[#allocation51_spill] sm:$0xff] }
 0x3e0   : > { %v6397_v39 = vadd.f32 %v15049_v53, %v6282_v0  ;;  %7110 = vmatprep.mubr.bf16.mxu0 %v15314_v10  ;;  %7938 = vmatprep.mubr.bf16.mxu1 %v15314_v10  ;;  %v6630_v1 = vrot.slane %v6628_v59, 7  ;;  %v6704_v14 = vrot.slane %v6631_v34, 1  ;;  %v6432_v42 = vmax.f32 %v6396_v56, 0.0 }
 0x3e1   : > { %v6059_v12 = vpop.f32.mrb[220].mxu1 }
 0x3e2   : > { %v6433_v25 = vmax.f32 %v6397_v39, 0.0  ;;  %v6237_v52 = vadd.f32 %v15039_v8, %v6059_v12  ;;  %v6061_v19 = vpop.f32.mrb[221].mxu1  ;;  %v6633_v28 = vor.u32 %v6631_v34, %v6630_v1  ;;  %v15332_v31 = vor.u32 %v6704_v14, %v6628_v59 }
 0x3e3   : > { %v6062_v22 = vpop.f32.mrb[222].mxu1  ;;  %v16725_v1 = vmov 0  }
 0x3e4   : > { %v15334_v11 = vpack.c.bf16 %v6433_v25, %v6432_v42  ;;  %v6283_v41 = vadd.f32 %v6237_v52, %v16723_v37  ;;  %v6240_v15 = vadd.f32 %v15041_v58, %v6062_v22  ;;  %v6064_v0 = vpop.f32.mrb[223].mxu1  ;;  %v15342_v39 = vsel %vm14931_vm5, 0, %v6633_v28  ;;  %v11572_v22 = vld [vmem:[%s15921_s3 + $0x208] sm:$0xff]  }
 0x3e5   : > { %v6676_v14 = vrot.slane %v16725_v1, 1 }
 0x3e6   : > { %v6398_v10 = vadd.f32 %v15049_v53, %v6283_v41  ;;  %v6284_v56 = vadd.f32 %v6240_v15, %v16724_v62  ;;  %v6635_v8 = vshrl.u32 %v15334_v11, 16  ;;  %v6638_v62 = vshll.u32 %v15334_v11, 16 }
 0x3e7   : > { %7111 = vmatmul.mubr.bf16.gmra.mrb[176].mxu0 %v15342_v39  ;;  %7939 = vmatmul.mubr.bf16.gmra.mrb[36].mxu1 %v15342_v39  ;;  %v15365_v37 = vsel %vm15359_vm7, %v6676_v14, 0  ;;  %v6727_v14 = vsel %vm15359_vm7, %v15076_v5, 0  ;;  %v11549_v5 = vld [vmem:[%s15921_s3 + $0x150] sm:$0xff]  }
 0x3e8   : > { %v6399_v59 = vadd.f32 %v15049_v53, %v6284_v56  ;;  %7118 = vmatprep.mubr.bf16.mxu0 %v15334_v11  ;;  %7946 = vmatprep.mubr.bf16.mxu1 %v15334_v11  ;;  %v6637_v58 = vrot.slane %v6635_v8, 7  ;;  %v6434_v42 = vmax.f32 %v6398_v10, 0.0  ;;  %16728 = vst [vmem:[#allocation110_spill] sm:$0xff] %v15365_v37 }
 0x3e9   : > { %v6067_v34 = vpop.f32.mrb[236].mxu1 }
 0x3ea   : > { %v6435_v12 = vmax.f32 %v6399_v59, 0.0  ;;  %v6069_v25 = vpop.f32.mrb[237].mxu1  ;;  %v6640_v52 = vor.u32 %v6638_v62, %v6637_v58  ;;  %v11548_v34 = vld [vmem:[%s15921_s3 + $0x148] sm:$0xff]  }
 0x3eb   : > { %v6070_v53 = vpop.f32.mrb[238].mxu1  ;;  %v11551_v25 = vld [vmem:[%s15921_s3 + $0x160] sm:$0xff]  }
 0x3ec   : > { %v15356_v19 = vpack.c.bf16 %v6435_v12, %v6434_v42  ;;  %v6072_v28 = vpop.f32.mrb[239].mxu1  ;;  %v15371_v15 = vsel %vm14931_vm5, 0, %v6640_v52  ;;  %v15393_v12 = vsel %vm15359_vm7, %v15088_v54, 0  ;;  %v15406_v54 = vsel %vm15359_vm7, %v15108_v35, 0  ;;  %v11552_v35 = vld [vmem:[%s15921_s3 + $0x168] sm:$0xff]   ;;  %v11553_v53 = vld [vmem:[%s15921_s3 + $0x170] sm:$0xff]  }
 0x3ed   : > { %v15424_v52 = vsel %vm15359_vm7, %v15148_v21, 0  ;;  %v11554_v21 = vld [vmem:[%s15921_s3 + $0x178] sm:$0xff]   ;;  %v15442_v28 = vsel %vm15359_vm7, %v15188_v24, 0  ;;  %v15457_v24 = vsel %vm15359_vm7, %v15228_v36, 0  ;;  %v15475_v36 = vsel %vm15359_vm7, %v15292_v43, 0 }
 0x3ee   : > { %v7475_v10 = vshrl.u32 %v15356_v19, 16  ;;  %v7478_v41 = vshll.u32 %v15356_v19, 16  ;;  %16729 = vst [vmem:[#allocation71_spill] sm:$0xff] %v15442_v28  ;;  %16731 = vst [vmem:[#allocation114_spill] sm:$0xff] %v15457_v24 }
 0x3ef   : > { %7119 = vmatmul.mubr.bf16.gmra.mrb[180].mxu0 %v15371_v15  ;;  %7947 = vmatmul.mubr.bf16.gmra.mrb[40].mxu1 %v15371_v15 }
 0x3f0   : > { %7954 = vmatprep.mubr.bf16.mxu1 %v15356_v19  ;;  %10685 = vmatprep.mubr.bf16.mxu0 %v15365_v37  ;;  %v7477_v0 = vrot.slane %v7475_v10, 7  ;;  %v7543_v56 = vrot.slane %v7478_v41, 1 }
 0x3f2   : > { %v7480_v59 = vor.u32 %v7478_v41, %v7477_v0  ;;  %v15377_v58 = vor.u32 %v7543_v56, %v7475_v10  ;;  %v11555_v10 = vld [vmem:[%s15921_s3 + $0x1c0] sm:$0xff]   ;;  %v15469_v41 = vsel %vm15359_vm7, %v15268_v50, 0  ;;  %v6706_v0 = vrot.slane %v6638_v62, 1  ;;  %v11559_v62 = vld [vmem:[%s15921_s3 + $0x1d0] sm:$0xff]  }
 0x3f3   : > { %16732 = vst [vmem:[#allocation83_spill] sm:$0xff] %v15469_v41  ;;  %v15489_v50 = vsel %vm15359_vm7, %v15332_v31, 0  ;;  %v11557_v31 = vld [vmem:[%s15921_s3 + $0x1c8] sm:$0xff]  }
 0x3f4   : > { %v15387_v42 = vsel %vm14931_vm5, 0, %v7480_v59  ;;  %v6707_v43 = vor.u32 %v6706_v0, %v6635_v8  ;;  %v11558_v8 = vld [vmem:[%s15921_s3 + $0x188] sm:$0xff]   ;;  %v11560_v59 = vld [vmem:[%s15921_s3 + $0x190] sm:$0xff]   ;;  %v11570_v0 = vld [vmem:[%s15921_s3 + $0x1b8] sm:$0xff]  }
 0x3f6   : > { %v15496_v56 = vsel %vm15359_vm7, %v6707_v43, 0  ;;  %v15555_v43 = vld [vmem:[%s15921_s3 + $0x200] sm:$0xff]  }
 0x3f7   : > { %10686 = vmatmul.mubr.bf16.vlgmr.msra.gmra.mrb[184].mxu0 %v6727_v14  ;;  %7955 = vmatmul.mubr.bf16.gmra.mrb[104].mxu1 %v15387_v42 }
 0x3f8   : > { %10718 = vmatpush3.bf16.msra.mxu0 %v15061_v48  ;;  %10689 = vmatprep.mubr.bf16.mxu0 %v15393_v12  ;;  %v15412_v48 = vsel %vm15359_vm7, %v15128_v4, 0  ;;  %v15430_v4 = vsel %vm15359_vm7, %v15168_v6, 0  ;;  %v15448_v6 = vsel %vm15359_vm7, %v15208_v13, 0  ;;  %v15463_v13 = vsel %vm15359_vm7, %v15248_v26, 0 }
 0x3f9   : > { %10719 = vmatprep.subr.bf16.mxu0 %v11548_v34  ;;  %16730 = vst [vmem:[#allocation32_spill] sm:$0xff] %v15448_v6  ;;  %v15481_v26 = vsel %vm15359_vm7, %v15312_v33, 0  ;;  %v11556_v33 = vld [vmem:[%s15921_s3 + $0x180] sm:$0xff]  }
 0x3fc   : > { %10720 = vmatpush3.bf16.msra.mxu0 %v11548_v34  ;;  %v11561_v34 = vld [vmem:[%s15921_s3 + $0x1d8] sm:$0xff]  }
 0x3fd   : > { %10721 = vmatprep.subr.bf16.mxu0 %v11549_v5 }
 0x3ff   : > { %10690 = vmatmul.mubr.bf16.gmra.mrb[188].mxu0 %v15406_v54 }
 0x400   : > { %10693 = vmatprep.mubr.bf16.mxu0 %v15412_v48  ;;  %10722 = vmatpush3.bf16.msra.mxu0 %v11549_v5  ;;  %v11563_v5 = vld [vmem:[%s15921_s3 + $0x1e0] sm:$0xff]  }
 0x401   : > { %10723 = vmatprep.subr.bf16.mxu0 %v11550_v61 }
 0x404   : > { %10724 = vmatpush3.bf16.msra.mxu0 %v11550_v61  ;;  %v11564_v61 = vld [vmem:[%s15921_s3 + $0x1a0] sm:$0xff]  }
 0x405   : > { %10725 = vmatprep.subr.bf16.mxu0 %v11551_v25 }
 0x407   : > { %10694 = vmatmul.mubr.bf16.gmra.mrb[192].mxu0 %v15424_v52 }
 0x408   : > { %10697 = vmatprep.mubr.bf16.mxu0 %v15430_v4  ;;  %10726 = vmatpush3.bf16.msra.mxu0 %v11551_v25  ;;  %v11565_v25 = vld [vmem:[%s15921_s3 + $0x1e8] sm:$0xff]  }
 0x409   : > { %10727 = vmatprep.subr.bf16.mxu0 %v11552_v35 }
 0x40c   : > { %10728 = vmatpush3.bf16.msra.mxu0 %v11552_v35  ;;  %v11566_v35 = vld [vmem:[%s15921_s3 + $0x1a8] sm:$0xff]  }
 0x40d   : > { %10729 = vmatprep.subr.bf16.mxu0 %v11553_v53 }
 0x40f   : > { %10698 = vmatmul.mubr.bf16.gmra.mrb[196].mxu0 %v15442_v28 }
 0x410   : > { %10701 = vmatprep.mubr.bf16.mxu0 %v15448_v6  ;;  %10730 = vmatpush3.bf16.msra.mxu0 %v11553_v53  ;;  %v11567_v53 = vld [vmem:[%s15921_s3 + $0x1f0] sm:$0xff]  }
 0x411   : > { %10731 = vmatprep.subr.bf16.mxu0 %v11554_v21 }
 0x414   : > { %10732 = vmatpush3.bf16.msra.mxu0 %v11554_v21  ;;  %v11568_v21 = vld [vmem:[%s15921_s3 + $0x1b0] sm:$0xff]  }
 0x415   : > { %10401 = vmatprep.subr.bf16.mxu0 %v11555_v10  ;;  %v11569_v10 = vld [vmem:[%s15921_s3 + $0x1f8] sm:$0xff]  }
 0x417   : > { %10702 = vmatmul.mubr.bf16.gmra.mrb[200].mxu0 %v15457_v24 }
 0x418   : > { %10705 = vmatprep.mubr.bf16.mxu0 %v15463_v13 }
 0x41f   : > { %10706 = vmatmul.mubr.bf16.gmra.mrb[204].mxu0 %v15469_v41 }
 0x420   : > { %10709 = vmatprep.mubr.bf16.mxu0 %v15475_v36 }
 0x427   : > { %10710 = vmatmul.mubr.bf16.gmra.mrb[208].mxu0 %v15481_v26 }
 0x428   : > { %10713 = vmatprep.mubr.bf16.mxu0 %v15489_v50 }
 0x42f   : > { %10714 = vmatmul.mubr.bf16.gmra.mrb[212].mxu0 %v15496_v56 }
 0x430   : > { %10733 = vmatprep.mubr.bf16.mxu0 %v6727_v14  ;;  %v11562_v14 = vld [vmem:[%s15921_s3 + $0x198] sm:$0xff]  }
 0x437   : > { %10734 = vmatmul.mubr.bf16.vlgmr.msra.gmra.mrb[184].mxu0 %v15393_v12 }
 0x438   : > { %10402 = vmatpush3.bf16.msra.mxu0 %v11556_v33  ;;  %10737 = vmatprep.mubr.bf16.mxu0 %v15406_v54 }
 0x439   : > { %10403 = vmatprep.subr.bf16.mxu0 %v11557_v31 }
 0x43c   : > { %10404 = vmatpush3.bf16.msra.mxu0 %v11558_v8 }
 0x43d   : > { %10405 = vmatprep.subr.bf16.mxu0 %v11559_v62 }
 0x43f   : > { %10738 = vmatmul.mubr.bf16.gmra.mrb[188].mxu0 %v15412_v48 }
 0x440   : > { %10741 = vmatprep.mubr.bf16.mxu0 %v15424_v52  ;;  %10406 = vmatpush3.bf16.msra.mxu0 %v11560_v59 }
 0x441   : > { %10407 = vmatprep.subr.bf16.mxu0 %v11561_v34 }
 0x444   : > { %10408 = vmatpush3.bf16.msra.mxu0 %v11562_v14 }
 0x445   : > { %10409 = vmatprep.subr.bf16.mxu0 %v11563_v5 }
 0x447   : > { %10742 = vmatmul.mubr.bf16.gmra.mrb[192].mxu0 %v15430_v4 }
 0x448   : > { %10745 = vmatprep.mubr.bf16.mxu0 %v15442_v28  ;;  %10410 = vmatpush3.bf16.msra.mxu0 %v11564_v61 }
 0x449   : > { %10411 = vmatprep.subr.bf16.mxu0 %v11565_v25 }
 0x44c   : > { %10412 = vmatpush3.bf16.msra.mxu0 %v11566_v35 }
 0x44d   : > { %10413 = vmatprep.subr.bf16.mxu0 %v11567_v53 }
 0x44f   : > { %10746 = vmatmul.mubr.bf16.gmra.mrb[196].mxu0 %v15448_v6 }
 0x450   : > { %10749 = vmatprep.mubr.bf16.mxu0 %v15457_v24  ;;  %10414 = vmatpush3.bf16.msra.mxu0 %v11568_v21 }
 0x451   : > { %10415 = vmatprep.subr.bf16.mxu0 %v11569_v10 }
 0x452   : > { %v10151_v33 = vpop.f32.mrb[124].mxu0  ;;  %v10281_v31 = vpop.f32.mrb[240].mxu1 }
 0x453   : > { %v10152_v8 = vpop.f32.mrb[125].mxu0  ;;  %v10282_v62 = vpop.f32.mrb[241].mxu1 }
 0x454   : > { %v10153_v59 = vadd.f32 %v10152_v8, %v10151_v33  ;;  %v10283_v34 = vadd.f32 %v10282_v62, %v10281_v31  ;;  %v10154_v14 = vpop.f32.mrb[126].mxu0  ;;  %v10284_v5 = vpop.f32.mrb[242].mxu1  ;;  %10416 = vmatpush3.bf16.msra.mxu0 %v11570_v0 }
 0x455   : > { %v10155_v61 = vpop.f32.mrb[127].mxu0  ;;  %v10285_v25 = vpop.f32.mrb[243].mxu1  ;;  %10765 = vmatprep.subr.bf16.mxu0 %v15555_v43 }
 0x456   : > { %v15559_v35 = vadd.f32 %v10283_v34, %v15284_v49  ;;  %v10156_v53 = vadd.f32 %v10155_v61, %v10154_v14  ;;  %v10286_v21 = vadd.f32 %v10285_v25, %v10284_v5 }
 0x457   : > { %10750 = vmatmul.mubr.bf16.gmra.mrb[200].mxu0 %v15463_v13 }
 0x458   : > { %16733 = vst [vmem:[#allocation91_spill] sm:$0xff] %v15559_v35  ;;  %v15563_v10 = vadd.f32 %v10286_v21, %v15289_v44  ;;  %10753 = vmatprep.mubr.bf16.mxu0 %v15469_v41 }
 0x45a   : > { %16734 = vst [vmem:[#allocation104_spill] sm:$0xff] %v15563_v10  ;;  %v10157_v33 = vpop.f32.mrb[128].mxu0  ;;  %v10287_v31 = vpop.f32.mrb[244].mxu1 }
 0x45b   : > { %v10158_v8 = vpop.f32.mrb[129].mxu0  ;;  %v10288_v0 = vpop.f32.mrb[245].mxu1 }
 0x45c   : > { %v10159_v62 = vadd.f32 %v10158_v8, %v10157_v33  ;;  %v10289_v37 = vadd.f32 %v10288_v0, %v10287_v31  ;;  %v10160_v24 = vpop.f32.mrb[130].mxu0  ;;  %v10290_v6 = vpop.f32.mrb[246].mxu1 }
 0x45d   : > { %v10161_v28 = vpop.f32.mrb[131].mxu0  ;;  %v10291_v49 = vpop.f32.mrb[247].mxu1 }
 0x45e   : > { %v15566_v34 = vadd.f32 %v10289_v37, %v10153_v59  ;;  %v10162_v14 = vadd.f32 %v10161_v28, %v10160_v24  ;;  %v10292_v5 = vadd.f32 %v10291_v49, %v10290_v6 }
 0x45f   : > { %10754 = vmatmul.mubr.bf16.gmra.mrb[204].mxu0 %v15475_v36 }
 0x460   : > { %16735 = vst [vmem:[#allocation29_spill] sm:$0xff] %v15566_v34  ;;  %v15569_v44 = vadd.f32 %v10292_v5, %v10156_v53  ;;  %10757 = vmatprep.mubr.bf16.mxu0 %v15481_v26 }
 0x462   : > { %16736 = vst [vmem:[#allocation80_spill] sm:$0xff] %v15569_v44  ;;  %v10163_v61 = vpop.f32.mrb[132].mxu0  ;;  %v10293_v25 = vpop.f32.mrb[248].mxu1 }
 0x463   : > { %v10164_v21 = vpop.f32.mrb[133].mxu0  ;;  %v10294_v10 = vpop.f32.mrb[249].mxu1 }
 0x464   : > { %v10165_v33 = vadd.f32 %v10164_v21, %v10163_v61  ;;  %v10295_v31 = vadd.f32 %v10294_v10, %v10293_v25  ;;  %v10166_v8 = vpop.f32.mrb[134].mxu0  ;;  %v10296_v0 = vpop.f32.mrb[250].mxu1 }
 0x465   : > { %v10167_v35 = vpop.f32.mrb[135].mxu0  ;;  %v10297_v41 = vpop.f32.mrb[251].mxu1 }
 0x466   : > { %v15572_v37 = vadd.f32 %v10295_v31, %v10159_v62  ;;  %v10168_v28 = vadd.f32 %v10167_v35, %v10166_v8  ;;  %v10298_v6 = vadd.f32 %v10297_v41, %v10296_v0 }
 0x467   : > { %10758 = vmatmul.mubr.bf16.gmra.mrb[208].mxu0 %v15489_v50 }
 0x468   : > { %v15575_v24 = vadd.f32 %v10298_v6, %v10162_v14  ;;  %10761 = vmatprep.mubr.bf16.mxu0 %v15496_v56  ;;  %v15583_v14 = vsel %vm15359_vm7, %v15377_v58, 0 }
 0x46a   : > { %v10169_v59 = vpop.f32.mrb[136].mxu0  ;;  %v10299_v53 = vpop.f32.mrb[252].mxu1 }
 0x46b   : > { %v10170_v49 = vpop.f32.mrb[137].mxu0  ;;  %v10300_v5 = vpop.f32.mrb[253].mxu1 }
 0x46c   : > { %v10171_v61 = vadd.f32 %v10170_v49, %v10169_v59  ;;  %v10301_v10 = vadd.f32 %v10300_v5, %v10299_v53  ;;  %v10172_v25 = vpop.f32.mrb[138].mxu0  ;;  %v10302_v21 = vpop.f32.mrb[254].mxu1 }
 0x46d   : > { %v10173_v44 = vpop.f32.mrb[139].mxu0  ;;  %v10303_v34 = vpop.f32.mrb[255].mxu1 }
 0x46e   : > { %v15578_v62 = vadd.f32 %v10301_v10, %v10165_v33  ;;  %v10174_v35 = vadd.f32 %v10173_v44, %v10172_v25  ;;  %v10304_v41 = vadd.f32 %v10303_v34, %v10302_v21  ;;  %v11573_v25 = vld [vmem:[%s15921_s3 + $0x210] sm:$0xff]  }
 0x46f   : > { %10762 = vmatmul.mubr.bf16.gmra.mrb[212].mxu0 %v15583_v14 }
 0x470   : > { %v15586_v31 = vadd.f32 %v10304_v41, %v10168_v28  ;;  %8670 = vmatprep.mubr.bf16.mxu0 %v15072_v63 }
 0x472   : > { %v10175_v8 = vpop.f32.mrb[140].mxu0  ;;  %v10305_v0 = vpop.f32.mrb[0].mxu1 }
 0x473   : > { %v10176_v6 = vpop.f32.mrb[141].mxu0  ;;  %v10306_v59 = vpop.f32.mrb[1].mxu1 }
 0x474   : > { %v10177_v53 = vadd.f32 %v10176_v6, %v10175_v8  ;;  %v10307_v33 = vadd.f32 %v10306_v59, %v10305_v0  ;;  %v10178_v49 = vpop.f32.mrb[142].mxu0  ;;  %v10308_v44 = vpop.f32.mrb[2].mxu1 }
 0x475   : > { %v10179_v34 = vpop.f32.mrb[143].mxu0  ;;  %v10309_v5 = vpop.f32.mrb[3].mxu1 }
 0x476   : > { %v15592_v58 = vadd.f32 %v10307_v33, %v10171_v61  ;;  %v10180_v28 = vadd.f32 %v10179_v34, %v10178_v49  ;;  %v10310_v10 = vadd.f32 %v10309_v5, %v10308_v44  ;;  %v11575_v5 = vld [vmem:[%s15921_s3 + $0x220] sm:$0xff]  }
 0x477   : > { %8671 = vmatmul.mubr.bf16.vlgmr.msra.gmra.mrb[216].mxu0 %v15096_v47 }
 0x478   : > { %v15595_v63 = vadd.f32 %v10310_v10, %v10174_v35  ;;  %10766 = vmatpush3.bf16.msra.mxu0 %v15555_v43  ;;  %8678 = vmatprep.mubr.bf16.mxu0 %v15090_v45  ;;  %v11574_v45 = vld [vmem:[%s15921_s3 + $0x218] sm:$0xff]  }
 0x479   : > { %10767 = vmatprep.subr.bf16.mxu0 %v11572_v22 }
 0x47a   : > { %v10181_v21 = vpop.f32.mrb[144].mxu0  ;;  %v10311_v41 = vpop.f32.mrb[4].mxu1 }
 0x47b   : > { %v10182_v8 = vpop.f32.mrb[145].mxu0  ;;  %v10312_v61 = vpop.f32.mrb[5].mxu1 }
 0x47c   : > { %v10183_v0 = vadd.f32 %v10182_v8, %v10181_v21  ;;  %v10313_v6 = vadd.f32 %v10312_v61, %v10311_v41  ;;  %v10184_v59 = vpop.f32.mrb[146].mxu0  ;;  %v10314_v33 = vpop.f32.mrb[6].mxu1  ;;  %10768 = vmatpush3.bf16.msra.mxu0 %v11572_v22 }
 0x47d   : > { %v10185_v47 = vpop.f32.mrb[147].mxu0  ;;  %v10315_v35 = vpop.f32.mrb[7].mxu1  ;;  %10769 = vmatprep.subr.bf16.mxu0 %v11573_v25 }
 0x47e   : > { %v15605_v43 = vadd.f32 %v10313_v6, %v10177_v53  ;;  %v10186_v49 = vadd.f32 %v10185_v47, %v10184_v59  ;;  %v10316_v44 = vadd.f32 %v10315_v35, %v10314_v33  ;;  %v11577_v35 = vld [vmem:[%s15921_s3 + $0x230] sm:$0xff]  }
 0x47f   : > { %8679 = vmatmul.mubr.bf16.gmra.mrb[220].mxu0 %v15116_v38 }
 0x480   : > { %v15608_v34 = vadd.f32 %v10316_v44, %v10180_v28  ;;  %8686 = vmatprep.mubr.bf16.mxu0 %v15110_v55  ;;  %10770 = vmatpush3.bf16.msra.mxu0 %v11573_v25  ;;  %v11576_v55 = vld [vmem:[%s15921_s3 + $0x228] sm:$0xff]  }
 0x481   : > { %10771 = vmatprep.subr.bf16.mxu0 %v11574_v45 }
 0x482   : > { %v10187_v22 = vpop.f32.mrb[148].mxu0  ;;  %v10317_v10 = vpop.f32.mrb[8].mxu1 }
 0x483   : > { %v10188_v21 = vpop.f32.mrb[149].mxu0  ;;  %v10318_v41 = vpop.f32.mrb[9].mxu1 }
 0x484   : > { %v10189_v53 = vadd.f32 %v10188_v21, %v10187_v22  ;;  %v10319_v8 = vadd.f32 %v10318_v41, %v10317_v10  ;;  %v10190_v61 = vpop.f32.mrb[150].mxu0  ;;  %v10320_v6 = vpop.f32.mrb[10].mxu1  ;;  %10772 = vmatpush3.bf16.msra.mxu0 %v11574_v45 }
 0x485   : > { %v10191_v38 = vpop.f32.mrb[151].mxu0  ;;  %v10321_v28 = vpop.f32.mrb[11].mxu1  ;;  %10773 = vmatprep.subr.bf16.mxu0 %v11575_v5 }
 0x486   : > { %v15617_v25 = vadd.f32 %v10319_v8, %v10183_v0  ;;  %v10192_v59 = vadd.f32 %v10191_v38, %v10190_v61  ;;  %v10322_v33 = vadd.f32 %v10321_v28, %v10320_v6 }
 0x487   : > { %8687 = vmatmul.mubr.bf16.gmra.mrb[224].mxu0 %v15136_v17 }
 0x488   : > { %v15620_v47 = vadd.f32 %v10322_v33, %v10186_v49  ;;  %8694 = vmatprep.mubr.bf16.mxu0 %v15130_v30  ;;  %10774 = vmatpush3.bf16.msra.mxu0 %v11575_v5  ;;  %v11578_v30 = vld [vmem:[%s15921_s3 + $0x238] sm:$0xff]  }
 0x489   : > { %10775 = vmatprep.subr.bf16.mxu0 %v11576_v55 }
 0x48a   : > { %16737 = vst [vmem:[#allocation94_spill] sm:$0xff] %v15620_v47  ;;  %v10193_v45 = vpop.f32.mrb[152].mxu0  ;;  %v10323_v44 = vpop.f32.mrb[12].mxu1 }
 0x48b   : > { %v10194_v22 = vpop.f32.mrb[153].mxu0  ;;  %v10324_v10 = vpop.f32.mrb[13].mxu1 }
 0x48c   : > { %v10195_v0 = vadd.f32 %v10194_v22, %v10193_v45  ;;  %v10325_v21 = vadd.f32 %v10324_v10, %v10323_v44  ;;  %v10196_v41 = vpop.f32.mrb[154].mxu0  ;;  %v10326_v8 = vpop.f32.mrb[14].mxu1  ;;  %10776 = vmatpush3.bf16.msra.mxu0 %v11576_v55 }
 0x48d   : > { %v10197_v17 = vpop.f32.mrb[155].mxu0  ;;  %v10327_v49 = vpop.f32.mrb[15].mxu1  ;;  %10777 = vmatprep.subr.bf16.mxu0 %v11577_v35 }
 0x48e   : > { %v15629_v5 = vadd.f32 %v10325_v21, %v10189_v53  ;;  %v10198_v61 = vadd.f32 %v10197_v17, %v10196_v41  ;;  %v10328_v6 = vadd.f32 %v10327_v49, %v10326_v8 }
 0x48f   : > { %8695 = vmatmul.mubr.bf16.gmra.mrb[228].mxu0 %v15156_v51 }
 0x490   : > { %v15632_v38 = vadd.f32 %v10328_v6, %v10192_v59  ;;  %8702 = vmatprep.mubr.bf16.mxu0 %v15150_v57  ;;  %10778 = vmatpush3.bf16.msra.mxu0 %v11577_v35 }
 0x491   : > { %10779 = vmatprep.subr.bf16.mxu0 %v11578_v30 }
 0x492   : > { %v10199_v28 = vpop.f32.mrb[156].mxu0  ;;  %v10329_v55 = vpop.f32.mrb[16].mxu1 }
 0x493   : > { %v10200_v33 = vpop.f32.mrb[157].mxu0  ;;  %v10330_v45 = vpop.f32.mrb[17].mxu1 }
 0x494   : > { %v10201_v44 = vadd.f32 %v10200_v33, %v10199_v28  ;;  %v10331_v22 = vadd.f32 %v10330_v45, %v10329_v55  ;;  %v10202_v10 = vpop.f32.mrb[158].mxu0  ;;  %v10332_v47 = vpop.f32.mrb[18].mxu1  ;;  %10780 = vmatpush3.bf16.msra.mxu0 %v11578_v30 }
 0x495   : > { %v10203_v53 = vpop.f32.mrb[159].mxu0  ;;  %v10333_v21 = vpop.f32.mrb[19].mxu1 }
 0x496   : > { %v15635_v41 = vadd.f32 %v10331_v22, %v10195_v0  ;;  %v10204_v51 = vadd.f32 %v10203_v53, %v10202_v10  ;;  %v10334_v59 = vadd.f32 %v10333_v21, %v10332_v47 }
 0x497   : > { %8703 = vmatmul.mubr.bf16.gmra.mrb[232].mxu0 %v15176_v32 }
 0x498   : > { %v15638_v57 = vadd.f32 %v10334_v59, %v10198_v61  ;;  %8710 = vmatprep.mubr.bf16.mxu0 %v15170_v40 }
 0x49a   : > { %v10205_v35 = vpop.f32.mrb[160].mxu0  ;;  %v10335_v8 = vpop.f32.mrb[20].mxu1 }
 0x49b   : > { %v10206_v17 = vpop.f32.mrb[161].mxu0  ;;  %v10336_v49 = vpop.f32.mrb[21].mxu1 }
 0x49c   : > { %v10207_v6 = vadd.f32 %v10206_v17, %v10205_v35  ;;  %v10337_v28 = vadd.f32 %v10336_v49, %v10335_v8  ;;  %v10208_v55 = vpop.f32.mrb[162].mxu0  ;;  %v10338_v30 = vpop.f32.mrb[22].mxu1 }
 0x49d   : > { %v10209_v33 = vpop.f32.mrb[163].mxu0  ;;  %v10339_v45 = vpop.f32.mrb[23].mxu1 }
 0x49e   : > { %v15641_v0 = vadd.f32 %v10337_v28, %v10201_v44  ;;  %v10210_v22 = vadd.f32 %v10209_v33, %v10208_v55  ;;  %v10340_v47 = vadd.f32 %v10339_v45, %v10338_v30 }
 0x49f   : > { %8711 = vmatmul.mubr.bf16.gmra.mrb[236].mxu0 %v15196_v27 }
 0x4a0   : > { %v15644_v32 = vadd.f32 %v10340_v47, %v10204_v51  ;;  %8718 = vmatprep.mubr.bf16.mxu0 %v15190_v9 }
 0x4a2   : > { %v10211_v40 = vpop.f32.mrb[164].mxu0  ;;  %v10341_v61 = vpop.f32.mrb[24].mxu1 }
 0x4a3   : > { %v10212_v10 = vpop.f32.mrb[165].mxu0  ;;  %v10342_v53 = vpop.f32.mrb[25].mxu1 }
 0x4a4   : > { %v10213_v21 = vadd.f32 %v10212_v10, %v10211_v40  ;;  %v10343_v59 = vadd.f32 %v10342_v53, %v10341_v61  ;;  %v10214_v35 = vpop.f32.mrb[166].mxu0  ;;  %v10344_v8 = vpop.f32.mrb[26].mxu1 }
 0x4a5   : > { %v10215_v17 = vpop.f32.mrb[167].mxu0  ;;  %v10345_v49 = vpop.f32.mrb[27].mxu1 }
 0x4a6   : > { %v15647_v44 = vadd.f32 %v10343_v59, %v10207_v6  ;;  %v10216_v28 = vadd.f32 %v10215_v17, %v10214_v35  ;;  %v10346_v55 = vadd.f32 %v10345_v49, %v10344_v8 }
 0x4a7   : > { %8719 = vmatmul.mubr.bf16.gmra.mrb[240].mxu0 %v15216_v46 }
 0x4a8   : > { %v15650_v27 = vadd.f32 %v10346_v55, %v10210_v22  ;;  %8726 = vmatprep.mubr.bf16.mxu0 %v15210_v20 }
 0x4aa   : > { %v10217_v9 = vpop.f32.mrb[168].mxu0  ;;  %v10347_v51 = vpop.f32.mrb[28].mxu1 }
 0x4ab   : > { %v10218_v30 = vpop.f32.mrb[169].mxu0  ;;  %v10348_v33 = vpop.f32.mrb[29].mxu1 }
 0x4ac   : > { %v10219_v45 = vadd.f32 %v10218_v30, %v10217_v9  ;;  %v10349_v47 = vadd.f32 %v10348_v33, %v10347_v51  ;;  %v10220_v40 = vpop.f32.mrb[170].mxu0  ;;  %v10350_v61 = vpop.f32.mrb[30].mxu1 }
 0x4ad   : > { %v10221_v10 = vpop.f32.mrb[171].mxu0  ;;  %v10351_v53 = vpop.f32.mrb[31].mxu1 }
 0x4ae   : > { %v15653_v6 = vadd.f32 %v10349_v47, %v10213_v21  ;;  %v10222_v59 = vadd.f32 %v10221_v10, %v10220_v40  ;;  %v10352_v35 = vadd.f32 %v10351_v53, %v10350_v61 }
 0x4af   : > { %8727 = vmatmul.mubr.bf16.gmra.mrb[244].mxu0 %v15236_v3 }
 0x4b0   : > { %v15656_v46 = vadd.f32 %v10352_v35, %v10216_v28  ;;  %8734 = vmatprep.mubr.bf16.mxu0 %v15230_v16 }
 0x4b2   : > { %v10223_v20 = vpop.f32.mrb[172].mxu0  ;;  %v10353_v22 = vpop.f32.mrb[32].mxu1 }
 0x4b3   : > { %v10224_v8 = vpop.f32.mrb[173].mxu0  ;;  %v10354_v17 = vpop.f32.mrb[33].mxu1 }
 0x4b4   : > { %v10225_v49 = vadd.f32 %v10224_v8, %v10223_v20  ;;  %v10355_v55 = vadd.f32 %v10354_v17, %v10353_v22  ;;  %v10226_v9 = vpop.f32.mrb[174].mxu0  ;;  %v10356_v51 = vpop.f32.mrb[34].mxu1 }
 0x4b5   : > { %v10227_v30 = vpop.f32.mrb[175].mxu0  ;;  %v10357_v33 = vpop.f32.mrb[35].mxu1 }
 0x4b6   : > { %v15659_v21 = vadd.f32 %v10355_v55, %v10219_v45  ;;  %v10228_v47 = vadd.f32 %v10227_v30, %v10226_v9  ;;  %v10358_v40 = vadd.f32 %v10357_v33, %v10356_v51 }
 0x4b7   : > { %8735 = vmatmul.mubr.bf16.gmra.mrb[248].mxu0 %v15256_v18 }
 0x4b8   : > { %v15662_v3 = vadd.f32 %v10358_v40, %v10222_v59  ;;  %8742 = vmatprep.mubr.bf16.mxu0 %v15250_v7 }
 0x4ba   : > { %v10229_v16 = vpop.f32.mrb[176].mxu0  ;;  %v10359_v28 = vpop.f32.mrb[36].mxu1 }
 0x4bb   : > { %v10230_v61 = vpop.f32.mrb[177].mxu0  ;;  %v10360_v10 = vpop.f32.mrb[37].mxu1 }
 0x4bc   : > { %v10231_v53 = vadd.f32 %v10230_v61, %v10229_v16  ;;  %v10361_v35 = vadd.f32 %v10360_v10, %v10359_v28  ;;  %v10232_v20 = vpop.f32.mrb[178].mxu0  ;;  %v10362_v22 = vpop.f32.mrb[38].mxu1 }
 0x4bd   : > { %v10233_v8 = vpop.f32.mrb[179].mxu0  ;;  %v10363_v17 = vpop.f32.mrb[39].mxu1 }
 0x4be   : > { %v15665_v45 = vadd.f32 %v10361_v35, %v10225_v49  ;;  %v10234_v55 = vadd.f32 %v10233_v8, %v10232_v20  ;;  %v10364_v9 = vadd.f32 %v10363_v17, %v10362_v22 }
 0x4bf   : > { %8743 = vmatmul.mubr.bf16.gmra.mrb[252].mxu0 %v15276_v29 }
 0x4c0   : > { %v15668_v18 = vadd.f32 %v10364_v9, %v10228_v47  ;;  %8750 = vmatprep.mubr.bf16.mxu0 %v15270_v60 }
 0x4c2   : > { %v10235_v7 = vpop.f32.mrb[180].mxu0  ;;  %v10365_v59 = vpop.f32.mrb[40].mxu1 }
 0x4c3   : > { %v10236_v51 = vpop.f32.mrb[181].mxu0  ;;  %v10366_v30 = vpop.f32.mrb[41].mxu1 }
 0x4c4   : > { %v10237_v33 = vadd.f32 %v10236_v51, %v10235_v7  ;;  %v10367_v40 = vadd.f32 %v10366_v30, %v10365_v59  ;;  %v10238_v16 = vpop.f32.mrb[182].mxu0  ;;  %v10368_v28 = vpop.f32.mrb[42].mxu1  ;;  %v16738_v59 = vld [vmem:[#allocation64_spill] sm:$0xff]  ;;  %v16739_v51 = vld [vmem:[#allocation61_spill] sm:$0xff] }
 0x4c5   : > { %v10239_v61 = vpop.f32.mrb[183].mxu0  ;;  %v10369_v10 = vpop.f32.mrb[43].mxu1 }
 0x4c6   : > { %v15671_v49 = vadd.f32 %v10367_v40, %v10231_v53  ;;  %v10240_v35 = vadd.f32 %v10239_v61, %v10238_v16  ;;  %v10370_v20 = vadd.f32 %v10369_v10, %v10368_v28  ;;  %v16748_v40 = vld [vmem:[#allocation29_spill] sm:$0xff]  ;;  %v16749_v28 = vld [vmem:[#allocation80_spill] sm:$0xff] }
 0x4c7   : > { %8751 = vmatmul.mubr.bf16.gmra.mrb[0].mxu0 %v15300_v23  ;;  %v16741_v23 = vld [vmem:[#allocation71_spill] sm:$0xff] }
 0x4c8   : > { %v15674_v29 = vadd.f32 %v10370_v20, %v10234_v55  ;;  %8758 = vmatprep.mubr.bf16.mxu0 %v15294_v2  ;;  %v16740_v2 = vld [vmem:[#allocation105_spill] sm:$0xff] }
 0x4ca   : > { %v10371_v60 = vpop.f32.mrb[104].mxu1 }
 0x4cb   : > { %v10372_v47 = vpop.f32.mrb[105].mxu1 }
 0x4cc   : > { %v10373_v22 = vadd.f32 %v10372_v47, %v10371_v60  ;;  %v10374_v8 = vpop.f32.mrb[106].mxu1 }
 0x4cd   : > { %v10375_v17 = vpop.f32.mrb[107].mxu1 }
 0x4ce   : > { %v15677_v9 = vadd.f32 %v10373_v22, %v10237_v33  ;;  %v10376_v7 = vadd.f32 %v10375_v17, %v10374_v8 }
 0x4cf   : > { %8759 = vmatmul.mubr.bf16.gmra.mrb[4].mxu0 %v16738_v59 }
 0x4d0   : > { %v15680_v53 = vadd.f32 %v10376_v7, %v10240_v35  ;;  %8766 = vmatprep.mubr.bf16.mxu0 %v16739_v51 }
 0x4d7   : > { %8767 = vmatmul.mubr.bf16.gmra.mrb[68].mxu0 %v15342_v39  ;;  %v16743_v39 = vld [vmem:[#allocation114_spill] sm:$0xff] }
 0x4d8   : > { %8774 = vmatprep.mubr.bf16.mxu0 %v15334_v11  ;;  %v16742_v11 = vld [vmem:[#allocation32_spill] sm:$0xff] }
 0x4df   : > { %8775 = vmatmul.mubr.bf16.gmra.mrb[72].mxu0 %v15371_v15 }
 0x4e0   : > { %8782 = vmatprep.mubr.bf16.mxu0 %v15356_v19  ;;  %v16745_v19 = vld [vmem:[#allocation110_spill] sm:$0xff] }
 0x4e7   : > { %8783 = vmatmul.mubr.bf16.gmra.mrb[76].mxu0 %v15387_v42 }
 0x4e8   : > { %8790 = vmatprep.mubr.bf16.mxu0 %v16725_v1  ;;  %v16744_v1 = vld [vmem:[#allocation83_spill] sm:$0xff] }
 0x4ef   : > { %8791 = vmatmul.mubr.bf16.gmra.mrb[8].mxu0 %v16740_v2 }
 0x4f0   : > { %10781 = vmatprep.mubr.bf16.mxu0 %v15393_v12 }
 0x4f7   : > { %10782 = vmatmul.mubr.bf16.vlgmr.msra.gmra.mrb[184].mxu0 %v15406_v54 }
 0x4f8   : > { %10785 = vmatprep.mubr.bf16.mxu0 %v15412_v48 }
 0x4ff   : > { %10786 = vmatmul.mubr.bf16.gmra.mrb[188].mxu0 %v15424_v52 }
 0x500   : > { %10789 = vmatprep.mubr.bf16.mxu0 %v15430_v4  ;;  %v16746_v4 = vld [vmem:[#allocation91_spill] sm:$0xff] }
 0x507   : > { %10790 = vmatmul.mubr.bf16.gmra.mrb[192].mxu0 %v16741_v23 }
 0x508   : > { %10793 = vmatprep.mubr.bf16.mxu0 %v16742_v11 }
 0x50f   : > { %10794 = vmatmul.mubr.bf16.gmra.mrb[196].mxu0 %v16743_v39 }
 0x510   : > { %10797 = vmatprep.mubr.bf16.mxu0 %v15463_v13 }
 0x517   : > { %10798 = vmatmul.mubr.bf16.gmra.mrb[200].mxu0 %v16744_v1 }
 0x518   : > { %10801 = vmatprep.mubr.bf16.mxu0 %v15475_v36  ;;  %v16747_v36 = vld [vmem:[#allocation104_spill] sm:$0xff] }
 0x51f   : > { %10802 = vmatmul.mubr.bf16.gmra.mrb[204].mxu0 %v15481_v26 }
 0x520   : > { %10805 = vmatprep.mubr.bf16.mxu0 %v15489_v50 }
 0x527   : > { %10806 = vmatmul.mubr.bf16.gmra.mrb[208].mxu0 %v15496_v56 }
 0x528   : > { %10809 = vmatprep.mubr.bf16.mxu0 %v15583_v14 }
 0x52f   : > { %10810 = vmatmul.mubr.bf16.gmra.mrb[212].mxu0 %v16745_v19 }
 0x54a   : > { %v10417_v15 = vpop.f32.mrb[216].mxu0 }
 0x54b   : > { %v10418_v42 = vpop.f32.mrb[217].mxu0 }
 0x54c   : > { %v10419_v12 = vadd.f32 %v10418_v42, %v10417_v15  ;;  %v10420_v54 = vpop.f32.mrb[218].mxu0 }
 0x54d   : > { %v10421_v48 = vpop.f32.mrb[219].mxu0 }
 0x54e   : > { %v10422_v52 = vadd.f32 %v10421_v48, %v10420_v54  ;;  %v15707_v13 = vadd.f32 %v16746_v4, %v10419_v12 }
 0x550   : > { %v15710_v55 = vadd.f32 %v16747_v36, %v10422_v52 }
 0x552   : > { %v10423_v26 = vpop.f32.mrb[220].mxu0 }
 0x553   : > { %v10424_v50 = vpop.f32.mrb[221].mxu0 }
 0x554   : > { %v10425_v30 = vadd.f32 %v10424_v50, %v10423_v26  ;;  %v10426_v56 = vpop.f32.mrb[222].mxu0 }
 0x555   : > { %v10427_v33 = vpop.f32.mrb[223].mxu0 }
 0x556   : > { %v10428_v14 = vadd.f32 %v10427_v33, %v10426_v56  ;;  %v15713_v16 = vadd.f32 %v16748_v40, %v10425_v30 }
 0x558   : > { %v15716_v61 = vadd.f32 %v16749_v28, %v10428_v14 }
 0x55a   : > { %v10429_v10 = vpop.f32.mrb[224].mxu0 }
 0x55b   : > { %v10430_v35 = vpop.f32.mrb[225].mxu0 }
 0x55c   : > { %v10431_v20 = vadd.f32 %v10430_v35, %v10429_v10  ;;  %v10432_v60 = vpop.f32.mrb[226].mxu0  ;;  %v16750_v10 = vld [vmem:[#allocation94_spill] sm:$0xff] }
 0x55d   : > { %v10433_v47 = vpop.f32.mrb[227].mxu0 }
 0x55e   : > { %v10434_v22 = vadd.f32 %v10433_v47, %v10432_v60  ;;  %v15719_v8 = vadd.f32 %v15572_v37, %v10431_v20 }
 0x560   : > { %v15722_v17 = vadd.f32 %v15575_v24, %v10434_v22 }
 0x562   : > { %v10435_v7 = vpop.f32.mrb[228].mxu0 }
 0x563   : > { %v10436_v59 = vpop.f32.mrb[229].mxu0 }
 0x564   : > { %v10437_v51 = vadd.f32 %v10436_v59, %v10435_v7  ;;  %v10438_v2 = vpop.f32.mrb[230].mxu0 }
 0x565   : > { %v10439_v23 = vpop.f32.mrb[231].mxu0 }
 0x566   : > { %v10440_v11 = vadd.f32 %v10439_v23, %v10438_v2  ;;  %v15725_v39 = vadd.f32 %v15578_v62, %v10437_v51 }
 0x568   : > { %v15728_v1 = vadd.f32 %v15586_v31, %v10440_v11 }
 0x56a   : > { %v10441_v19 = vpop.f32.mrb[232].mxu0 }
 0x56b   : > { %v10442_v15 = vpop.f32.mrb[233].mxu0 }
 0x56c   : > { %v10443_v42 = vadd.f32 %v10442_v15, %v10441_v19  ;;  %v10444_v37 = vpop.f32.mrb[234].mxu0 }
 0x56d   : > { %v10445_v12 = vpop.f32.mrb[235].mxu0 }
 0x56e   : > { %v10446_v54 = vadd.f32 %v10445_v12, %v10444_v37  ;;  %v15731_v24 = vadd.f32 %v15592_v58, %v10443_v42 }
 0x570   : > { %v15734_v48 = vadd.f32 %v15595_v63, %v10446_v54 }
 0x572   : > { %v10447_v52 = vpop.f32.mrb[236].mxu0 }
 0x573   : > { %v10448_v4 = vpop.f32.mrb[237].mxu0 }
 0x574   : > { %v10449_v36 = vadd.f32 %v10448_v4, %v10447_v52  ;;  %v10450_v62 = vpop.f32.mrb[238].mxu0 }
 0x575   : > { %v10451_v26 = vpop.f32.mrb[239].mxu0 }
 0x576   : > { %v10452_v50 = vadd.f32 %v10451_v26, %v10450_v62  ;;  %v15737_v31 = vadd.f32 %v15605_v43, %v10449_v36 }
 0x578   : > { %v15740_v30 = vadd.f32 %v15608_v34, %v10452_v50 }
 0x57a   : > { %v10453_v56 = vpop.f32.mrb[240].mxu0 }
 0x57b   : > { %v10454_v33 = vpop.f32.mrb[241].mxu0 }
 0x57c   : > { %v10455_v14 = vadd.f32 %v10454_v33, %v10453_v56  ;;  %v10456_v58 = vpop.f32.mrb[242].mxu0 }
 0x57d   : > { %v10457_v40 = vpop.f32.mrb[243].mxu0 }
 0x57e   : > { %v10458_v28 = vadd.f32 %v10457_v40, %v10456_v58  ;;  %v15743_v63 = vadd.f32 %v15617_v25, %v10455_v14 }
 0x580   : > { %v15746_v35 = vadd.f32 %v16750_v10, %v10458_v28 }
 0x582   : > { %v10459_v20 = vpop.f32.mrb[244].mxu0 }
 0x583   : > { %v10460_v60 = vpop.f32.mrb[245].mxu0 }
 0x584   : > { %v10461_v47 = vadd.f32 %v10460_v60, %v10459_v20  ;;  %v10462_v43 = vpop.f32.mrb[246].mxu0 }
 0x585   : > { %v10463_v22 = vpop.f32.mrb[247].mxu0 }
 0x586   : > { %v10464_v7 = vadd.f32 %v10463_v22, %v10462_v43  ;;  %v15749_v34 = vadd.f32 %v15629_v5, %v10461_v47 }
 0x588   : > { %v15752_v59 = vadd.f32 %v15632_v38, %v10464_v7 }
 0x58a   : > { %v10465_v51 = vpop.f32.mrb[248].mxu0 }
 0x58b   : > { %v10466_v2 = vpop.f32.mrb[249].mxu0 }
 0x58c   : > { %v10467_v23 = vadd.f32 %v10466_v2, %v10465_v51  ;;  %v10468_v25 = vpop.f32.mrb[250].mxu0 }
 0x58d   : > { %v10469_v11 = vpop.f32.mrb[251].mxu0 }
 0x58e   : > { %v10470_v19 = vadd.f32 %v10469_v11, %v10468_v25  ;;  %v15755_v15 = vadd.f32 %v15635_v41, %v10467_v23 }
 0x590   : > { %v15758_v42 = vadd.f32 %v15638_v57, %v10470_v19 }
 0x592   : > { %v10471_v37 = vpop.f32.mrb[252].mxu0 }
 0x593   : > { %v10472_v12 = vpop.f32.mrb[253].mxu0 }
 0x594   : > { %v10473_v54 = vadd.f32 %v10472_v12, %v10471_v37  ;;  %v10474_v5 = vpop.f32.mrb[254].mxu0 }
 0x595   : > { %v10475_v52 = vpop.f32.mrb[255].mxu0 }
 0x596   : > { %v10476_v4 = vadd.f32 %v10475_v52, %v10474_v5  ;;  %v15761_v38 = vadd.f32 %v15641_v0, %v10473_v54 }
 0x598   : > { %v15764_v36 = vadd.f32 %v15644_v32, %v10476_v4 }
 0x59a   : > { %v10477_v62 = vpop.f32.mrb[0].mxu0 }
 0x59b   : > { %v10478_v26 = vpop.f32.mrb[1].mxu0 }
 0x59c   : > { %v10479_v50 = vadd.f32 %v10478_v26, %v10477_v62  ;;  %v10480_v41 = vpop.f32.mrb[2].mxu0 }
 0x59d   : > { %v10481_v56 = vpop.f32.mrb[3].mxu0 }
 0x59e   : > { %v10482_v33 = vadd.f32 %v10481_v56, %v10480_v41  ;;  %v15767_v57 = vadd.f32 %v15647_v44, %v10479_v50 }
 0x5a0   : > { %v15770_v14 = vadd.f32 %v15650_v27, %v10482_v33 }
 0x5a2   : > { %v10483_v58 = vpop.f32.mrb[4].mxu0 }
 0x5a3   : > { %v10484_v40 = vpop.f32.mrb[5].mxu0 }
 0x5a4   : > { %v10485_v28 = vadd.f32 %v10484_v40, %v10483_v58  ;;  %v10486_v0 = vpop.f32.mrb[6].mxu0 }
 0x5a5   : > { %v10487_v10 = vpop.f32.mrb[7].mxu0 }
 0x5a6   : > { %v10488_v20 = vadd.f32 %v10487_v10, %v10486_v0  ;;  %v15773_v32 = vadd.f32 %v15653_v6, %v10485_v28 }
 0x5a8   : > { %v15776_v60 = vadd.f32 %v15656_v46, %v10488_v20 }
 0x5aa   : > { %v10489_v47 = vpop.f32.mrb[68].mxu0 }
 0x5ab   : > { %v10490_v43 = vpop.f32.mrb[69].mxu0 }
 0x5ac   : > { %v10491_v22 = vadd.f32 %v10490_v43, %v10489_v47  ;;  %v10492_v44 = vpop.f32.mrb[70].mxu0 }
 0x5ad   : > { %v10493_v7 = vpop.f32.mrb[71].mxu0 }
 0x5ae   : > { %v10494_v51 = vadd.f32 %v10493_v7, %v10492_v44  ;;  %v15779_v27 = vadd.f32 %v15659_v21, %v10491_v22 }
 0x5b0   : > { %v15782_v2 = vadd.f32 %v15662_v3, %v10494_v51 }
 0x5b2   : > { %v10495_v23 = vpop.f32.mrb[72].mxu0 }
 0x5b3   : > { %v10496_v25 = vpop.f32.mrb[73].mxu0 }
 0x5b4   : > { %v10497_v11 = vadd.f32 %v10496_v25, %v10495_v23  ;;  %v10498_v6 = vpop.f32.mrb[74].mxu0 }
 0x5b5   : > { %v10499_v19 = vpop.f32.mrb[75].mxu0 }
 0x5b6   : > { %v10500_v37 = vadd.f32 %v10499_v19, %v10498_v6  ;;  %v15785_v46 = vadd.f32 %v15665_v45, %v10497_v11 }
 0x5b8   : > { %v15788_v12 = vadd.f32 %v15668_v18, %v10500_v37 }
 0x5ba   : > { %v10501_v54 = vpop.f32.mrb[76].mxu0 }
 0x5bb   : > { %v10502_v5 = vpop.f32.mrb[77].mxu0 }
 0x5bc   : > { %v10503_v52 = vadd.f32 %v10502_v5, %v10501_v54  ;;  %v10504_v21 = vpop.f32.mrb[78].mxu0 }
 0x5bd   : > { %v10505_v4 = vpop.f32.mrb[79].mxu0 }
 0x5be   : > { %v10506_v3 = vadd.f32 %v10505_v4, %v10504_v21  ;;  %v15791_v62 = vadd.f32 %v15671_v49, %v10503_v52  ;;  %v15805_v49 = vld [vmem:[%s15922_s4] ss:$0 sm:$0xff] }
 0x5c0   : > { %v15794_v26 = vadd.f32 %v15674_v29, %v10506_v3 }
 0x5c2   : > { %v10507_v50 = vpop.f32.mrb[8].mxu0 }
 0x5c3   : > { %v10508_v41 = vpop.f32.mrb[9].mxu0 }
 0x5c4   : > { %v10509_v45 = vadd.f32 %v10508_v41, %v10507_v50  ;;  %v10510_v56 = vpop.f32.mrb[10].mxu0 }
 0x5c5   : > { %v10511_v33 = vpop.f32.mrb[11].mxu0 }
 0x5c6   : > { %v10512_v18 = vadd.f32 %v10511_v33, %v10510_v56  ;;  %v15797_v58 = vadd.f32 %v15677_v9, %v10509_v45 }
 0x5c8   : > { %v15800_v40 = vadd.f32 %v15680_v53, %v10512_v18 }
 0x5ca   : > { %v10783_v28 = vpop.f32.mrb[184].mxu0 }
 0x5cb   : > { %v10815_v29 = vadd.f32 %v15713_v16, %v10783_v28  ;;  %v8833_v0 = vpop.f32.mrb[185].mxu0 }
 0x5cc   : > { %v10818_v10 = vadd.f32 %v15707_v13, %v8833_v0  ;;  %v10784_v20 = vpop.f32.mrb[186].mxu0 }
 0x5cd   : > { %v9065_v47 = vadd.f32 %v10815_v29, %v15805_v49  ;;  %v10821_v9 = vadd.f32 %v15716_v61, %v10784_v20  ;;  %v8836_v43 = vpop.f32.mrb[187].mxu0 }
 0x5ce   : > { %v9063_v53 = vadd.f32 %v10818_v10, %v15805_v49  ;;  %v10824_v16 = vadd.f32 %v15710_v55, %v8836_v43 }
 0x5cf   : > { %v9097_v13 = vmax.f32 %v9065_v47, 0.0  ;;  %v9066_v22 = vadd.f32 %v10821_v9, %v15805_v49 }
 0x5d0   : > { %v9095_v44 = vmax.f32 %v9063_v53, 0.0  ;;  %v9064_v61 = vadd.f32 %v10824_v16, %v15805_v49 }
 0x5d1   : > { %9129 = vst [vmem:[%s15815_s10 + $0x10] sm:$0xff] %v9097_v13  ;;  %v9098_v7 = vmax.f32 %v9066_v22, 0.0 }
 0x5d2   : > { %9127 = vst [vmem:[%s15815_s10] sm:$0xff] %v9095_v44  ;;  %v9096_v51 = vmax.f32 %v9064_v61, 0.0  ;;  %v10787_v23 = vpop.f32.mrb[188].mxu0 }
 0x5d3   : > { %9130 = vst [vmem:[%s15815_s10 + $0x18] sm:$0xff] %v9098_v7  ;;  %v10827_v25 = vadd.f32 %v15725_v39, %v10787_v23  ;;  %v8849_v11 = vpop.f32.mrb[189].mxu0 }
 0x5d4   : > { %9128 = vst [vmem:[%s15815_s10 + $0x8] sm:$0xff] %v9096_v51  ;;  %v10830_v55 = vadd.f32 %v15719_v8, %v8849_v11  ;;  %v10788_v6 = vpop.f32.mrb[190].mxu0 }
 0x5d5   : > { %v9069_v19 = vadd.f32 %v10827_v25, %v15805_v49  ;;  %v10833_v37 = vadd.f32 %v15728_v1, %v10788_v6  ;;  %v8852_v54 = vpop.f32.mrb[191].mxu0 }
 0x5d6   : > { %v9067_v5 = vadd.f32 %v10830_v55, %v15805_v49  ;;  %v10836_v52 = vadd.f32 %v15722_v17, %v8852_v54 }
 0x5d7   : > { %v9101_v21 = vmax.f32 %v9069_v19, 0.0  ;;  %v9070_v39 = vadd.f32 %v10833_v37, %v15805_v49 }
 0x5d8   : > { %v9099_v4 = vmax.f32 %v9067_v5, 0.0  ;;  %v9068_v3 = vadd.f32 %v10836_v52, %v15805_v49 }
 0x5d9   : > { %9133 = vst [vmem:[%s15815_s10 + $0x30] sm:$0xff] %v9101_v21  ;;  %v9102_v8 = vmax.f32 %v9070_v39, 0.0 }
 0x5da   : > { %9131 = vst [vmem:[%s15815_s10 + $0x20] sm:$0xff] %v9099_v4  ;;  %v9100_v50 = vmax.f32 %v9068_v3, 0.0  ;;  %v10791_v41 = vpop.f32.mrb[192].mxu0 }
 0x5db   : > { %9134 = vst [vmem:[%s15815_s10 + $0x38] sm:$0xff] %v9102_v8  ;;  %v10839_v1 = vadd.f32 %v15737_v31, %v10791_v41  ;;  %v8865_v45 = vpop.f32.mrb[193].mxu0 }
 0x5dc   : > { %9132 = vst [vmem:[%s15815_s10 + $0x28] sm:$0xff] %v9100_v50  ;;  %v10842_v17 = vadd.f32 %v15731_v24, %v8865_v45  ;;  %v10792_v56 = vpop.f32.mrb[194].mxu0 }
 0x5dd   : > { %v9073_v33 = vadd.f32 %v10839_v1, %v15805_v49  ;;  %v10845_v18 = vadd.f32 %v15740_v30, %v10792_v56  ;;  %v8868_v28 = vpop.f32.mrb[195].mxu0 }
 0x5de   : > { %v9071_v29 = vadd.f32 %v10842_v17, %v15805_v49  ;;  %v10848_v0 = vadd.f32 %v15734_v48, %v8868_v28 }
 0x5df   : > { %v9105_v10 = vmax.f32 %v9073_v33, 0.0  ;;  %v9074_v31 = vadd.f32 %v10845_v18, %v15805_v49 }
 0x5e0   : > { %v9103_v20 = vmax.f32 %v9071_v29, 0.0  ;;  %v9072_v47 = vadd.f32 %v10848_v0, %v15805_v49 }
 0x5e1   : > { %9137 = vst [vmem:[%s15815_s10 + $0x50] sm:$0xff] %v9105_v10  ;;  %v9106_v24 = vmax.f32 %v9074_v31, 0.0 }
 0x5e2   : > { %9135 = vst [vmem:[%s15815_s10 + $0x40] sm:$0xff] %v9103_v20  ;;  %v9104_v9 = vmax.f32 %v9072_v47, 0.0  ;;  %v10795_v43 = vpop.f32.mrb[196].mxu0 }
 0x5e3   : > { %9138 = vst [vmem:[%s15815_s10 + $0x58] sm:$0xff] %v9106_v24  ;;  %v10851_v30 = vadd.f32 %v15749_v34, %v10795_v43  ;;  %v8881_v53 = vpop.f32.mrb[197].mxu0 }
 0x5e4   : > { %9136 = vst [vmem:[%s15815_s10 + $0x48] sm:$0xff] %v9104_v9  ;;  %v10854_v48 = vadd.f32 %v15743_v63, %v8881_v53  ;;  %v10796_v16 = vpop.f32.mrb[198].mxu0 }
 0x5e5   : > { %v9077_v13 = vadd.f32 %v10851_v30, %v15805_v49  ;;  %v10857_v22 = vadd.f32 %v15752_v59, %v10796_v16  ;;  %v8884_v44 = vpop.f32.mrb[199].mxu0 }
 0x5e6   : > { %v9075_v61 = vadd.f32 %v10854_v48, %v15805_v49  ;;  %v10860_v7 = vadd.f32 %v15746_v35, %v8884_v44 }
 0x5e7   : > { %v9109_v51 = vmax.f32 %v9077_v13, 0.0  ;;  %v9078_v34 = vadd.f32 %v10857_v22, %v15805_v49 }
 0x5e8   : > { %v9107_v23 = vmax.f32 %v9075_v61, 0.0  ;;  %v9076_v25 = vadd.f32 %v10860_v7, %v15805_v49 }
 0x5e9   : > { %9141 = vst [vmem:[%s15815_s10 + $0x70] sm:$0xff] %v9109_v51  ;;  %v9110_v63 = vmax.f32 %v9078_v34, 0.0 }
 0x5ea   : > { %9139 = vst [vmem:[%s15815_s10 + $0x60] sm:$0xff] %v9107_v23  ;;  %v9108_v11 = vmax.f32 %v9076_v25, 0.0  ;;  %v10799_v55 = vpop.f32.mrb[200].mxu0 }
 0x5eb   : > { %9142 = vst [vmem:[%s15815_s10 + $0x78] sm:$0xff] %v9110_v63  ;;  %v10863_v59 = vadd.f32 %v15761_v38, %v10799_v55  ;;  %v8897_v6 = vpop.f32.mrb[201].mxu0 }
 0x5ec   : > { %9140 = vst [vmem:[%s15815_s10 + $0x68] sm:$0xff] %v9108_v11  ;;  %v10866_v35 = vadd.f32 %v15755_v15, %v8897_v6  ;;  %v10800_v19 = vpop.f32.mrb[202].mxu0 }
 0x5ed   : > { %v9081_v37 = vadd.f32 %v10863_v59, %v15805_v49  ;;  %v10869_v54 = vadd.f32 %v15764_v36, %v10800_v19  ;;  %v8900_v5 = vpop.f32.mrb[203].mxu0 }
 0x5ee   : > { %v9079_v52 = vadd.f32 %v10866_v35, %v15805_v49  ;;  %v10872_v21 = vadd.f32 %v15758_v42, %v8900_v5 }
 0x5ef   : > { %v9113_v39 = vmax.f32 %v9081_v37, 0.0  ;;  %v9082_v38 = vadd.f32 %v10869_v54, %v15805_v49 }
 0x5f0   : > { %v9111_v4 = vmax.f32 %v9079_v52, 0.0  ;;  %v9080_v3 = vadd.f32 %v10872_v21, %v15805_v49 }
 0x5f1   : > { %9145 = vst [vmem:[%s15815_s10 + $0x90] sm:$0xff] %v9113_v39  ;;  %v9114_v15 = vmax.f32 %v9082_v38, 0.0 }
 0x5f2   : > { %9143 = vst [vmem:[%s15815_s10 + $0x80] sm:$0xff] %v9111_v4  ;;  %v9112_v8 = vmax.f32 %v9080_v3, 0.0  ;;  %v10803_v50 = vpop.f32.mrb[204].mxu0 }
 0x5f3   : > { %9146 = vst [vmem:[%s15815_s10 + $0x98] sm:$0xff] %v9114_v15  ;;  %v10875_v36 = vadd.f32 %v15773_v32, %v10803_v50  ;;  %v8913_v41 = vpop.f32.mrb[205].mxu0 }
 0x5f4   : > { %9144 = vst [vmem:[%s15815_s10 + $0x88] sm:$0xff] %v9112_v8  ;;  %v10878_v42 = vadd.f32 %v15767_v57, %v8913_v41  ;;  %v10804_v1 = vpop.f32.mrb[206].mxu0 }
 0x5f5   : > { %v9085_v45 = vadd.f32 %v10875_v36, %v15805_v49  ;;  %v10881_v17 = vadd.f32 %v15776_v60, %v10804_v1  ;;  %v8916_v56 = vpop.f32.mrb[207].mxu0 }
 0x5f6   : > { %v9083_v33 = vadd.f32 %v10878_v42, %v15805_v49  ;;  %v10884_v18 = vadd.f32 %v15770_v14, %v8916_v56 }
 0x5f7   : > { %v9117_v28 = vmax.f32 %v9085_v45, 0.0  ;;  %v9086_v32 = vadd.f32 %v10881_v17, %v15805_v49 }
 0x5f8   : > { %v9115_v29 = vmax.f32 %v9083_v33, 0.0  ;;  %v9084_v0 = vadd.f32 %v10884_v18, %v15805_v49 }
 0x5f9   : > { %9149 = vst [vmem:[%s15815_s10 + $0xb0] sm:$0xff] %v9117_v28  ;;  %v9118_v57 = vmax.f32 %v9086_v32, 0.0 }
 0x5fa   : > { %9147 = vst [vmem:[%s15815_s10 + $0xa0] sm:$0xff] %v9115_v29  ;;  %v9116_v10 = vmax.f32 %v9084_v0, 0.0  ;;  %v10807_v31 = vpop.f32.mrb[208].mxu0 }
 0x5fb   : > { %9150 = vst [vmem:[%s15815_s10 + $0xb8] sm:$0xff] %v9118_v57  ;;  %v10887_v60 = vadd.f32 %v15785_v46, %v10807_v31  ;;  %v8929_v20 = vpop.f32.mrb[209].mxu0 }
 0x5fc   : > { %9148 = vst [vmem:[%s15815_s10 + $0xa8] sm:$0xff] %v9116_v10  ;;  %v10890_v14 = vadd.f32 %v15779_v27, %v8929_v20  ;;  %v10808_v47 = vpop.f32.mrb[210].mxu0 }
 0x5fd   : > { %v9089_v24 = vadd.f32 %v10887_v60, %v15805_v49  ;;  %v10893_v9 = vadd.f32 %v15788_v12, %v10808_v47  ;;  %v8932_v43 = vpop.f32.mrb[211].mxu0 }
 0x5fe   : > { %v9087_v30 = vadd.f32 %v10890_v14, %v15805_v49  ;;  %v10896_v53 = vadd.f32 %v15782_v2, %v8932_v43 }
 0x5ff   : > { %v9121_v48 = vmax.f32 %v9089_v24, 0.0  ;;  %v9090_v46 = vadd.f32 %v10893_v9, %v15805_v49 }
 0x600   : > { %v9119_v16 = vmax.f32 %v9087_v30, 0.0  ;;  %v9088_v13 = vadd.f32 %v10896_v53, %v15805_v49 }
 0x601   : > { %9153 = vst [vmem:[%s15815_s10 + $0xd0] sm:$0xff] %v9121_v48  ;;  %v9122_v27 = vmax.f32 %v9090_v46, 0.0 }
 0x602   : > { %9151 = vst [vmem:[%s15815_s10 + $0xc0] sm:$0xff] %v9119_v16  ;;  %v9120_v22 = vmax.f32 %v9088_v13, 0.0  ;;  %v10811_v44 = vpop.f32.mrb[212].mxu0 }
 0x603   : > { %9154 = vst [vmem:[%s15815_s10 + $0xd8] sm:$0xff] %v9122_v27  ;;  %v10899_v12 = vadd.f32 %v15797_v58, %v10811_v44  ;;  %v8945_v61 = vpop.f32.mrb[213].mxu0 }
 0x604   : > { %9152 = vst [vmem:[%s15815_s10 + $0xc8] sm:$0xff] %v9120_v22  ;;  %v10902_v2 = vadd.f32 %v15791_v62, %v8945_v61  ;;  %v10812_v7 = vpop.f32.mrb[214].mxu0 }
 0x605   : > { %v9093_v51 = vadd.f32 %v10899_v12, %v15805_v49  ;;  %v10905_v34 = vadd.f32 %v15800_v40, %v10812_v7  ;;  %v8948_v23 = vpop.f32.mrb[215].mxu0 }
 0x606   : > { %v9091_v25 = vadd.f32 %v10902_v2, %v15805_v49  ;;  %v10908_v63 = vadd.f32 %v15794_v26, %v8948_v23 }
 0x607   : > { %v9125_v11 = vmax.f32 %v9093_v51, 0.0  ;;  %v9094_v58 = vadd.f32 %v10905_v34, %v15805_v49 }
 0x608   : > { %v9123_v55 = vmax.f32 %v9091_v25, 0.0  ;;  %v9092_v59 = vadd.f32 %v10908_v63, %v15805_v49 }
 0x609   : > { %9157 = vst [vmem:[%s15815_s10 + $0xf0] sm:$0xff] %v9125_v11  ;;  %v9126_v6 = vmax.f32 %v9094_v58, 0.0 }
 0x60a   : > { %9155 = vst [vmem:[%s15815_s10 + $0xe0] sm:$0xff] %v9123_v55  ;;  %v9124_v62 = vmax.f32 %v9092_v59, 0.0 }
 0x60b   : > { %9158 = vst [vmem:[%s15815_s10 + $0xf8] sm:$0xff] %v9126_v6 }
 0x60c   : > { %9156 = vst [vmem:[%s15815_s10 + $0xe8] sm:$0xff] %v9124_v62 }
 0x60d PF: > { %s15_s20 = sadd.s32 1, %s11701_s20   ;;  %s16751_s18 = smov %s11697_s19 }
 0x60e   : > { %p12_p5 = scmp.ge.s32.totalorder %s15_s20, 4   ;;  %s16752_s19 = smov %s16754_s21 }
 0x610   :  { %14 = sbr.rel (!%p12_p5) target bundleno = 2 (0x2), region = 84 }

</bundles_post_ra>
